<compile_context>
chip_gen: v7x
topology: tpu7x:2x2x1
jax: 0.10.0
libtpu: 0.0.40
codegen_flags: <defaults>
</compile_context>

<pallas_src>
import functools

import jax
import jax.numpy as jnp
from jax.experimental import pallas as pl
from jax.experimental.pallas import tpu as pltpu


def _round_up(x, m):
    return (x + m - 1) // m * m


def _fused_regression_kernel(x_ref, w1_ref, b1_ref, w2_ref, b2_ref,
                             wo_ref, bo_ref, o_ref, buf0, buf1, buf2,
                             *, H, W, data_start, m_tile, n_tile):
    """One batch element: conv1 -> ReLU -> conv2 -> ReLU -> output conv.

    x_ref : (1, H*W, Cin)        NHWC input, spatially flattened (compute dtype)
    w*_ref: (9, Cin_l, Cout_l)   per-tap 3x3 weights (compute dtype)
    b*_ref: (1, Cout_l) f32      biases
    o_ref : (1, H*W, cout)       output block, cout = 2 * num_anchor_points (un-padded)
    buf0/1/2: (rows, C) VMEM scratch holding zero-padded flattened activations.
    """
    HW = H * W
    rows = buf1.shape[0]

    # Left/right boundary masks for the flattened-row tap trick: dx==0 / dx==2 taps wrap
    # across image rows and the wrapped entries are the conv's zero padding.
    col = jax.lax.broadcasted_iota(jnp.int32, (HW, 1), 0) % W
    mask_l = col != 0          # valid source rows for dx == 0 taps
    mask_r = col != (W - 1)    # valid source rows for dx == 2 taps

    # Zero ONLY the padding rows (head/tail); the data region is fully overwritten every
    # grid step.  Done every step on purpose: scratch is per-core and the "parallel" grid
    # axis may be sharded across TensorCores, so a program_id==0 gate would be wrong.
    for buf in (buf0, buf1, buf2):
        c = buf.shape[1]
        buf[0:data_start, :] = jnp.zeros((data_start, c), buf.dtype)
        buf[data_start + HW:rows, :] = jnp.zeros((rows - data_start - HW, c), buf.dtype)

    # Stage the input rows into the padded layer-0 buffer (layer-1 taps read from here).
    buf0[data_start:data_start + HW, :] = x_ref[0]

    def conv3x3(src, w_r, b_r, relu, emit):
        """3x3 'same' conv reading a padded, flattened VMEM buffer.

        For output position r = h*W + w and tap (dy, dx), the source element lives at
        buffer row  data_start - (W+1) + dy*W + dx + r,  i.e. every tap is one contiguous
        row-slice.  Taps are the outer loop inside each spatial (M) tile so each masked
        patch is built once and reused by every output-channel (N) tile.
        """
        cout = w_r.shape[-1]
        base = data_start - (W + 1)
        n_tiles = [(n0, min(n_tile, cout - n0)) for n0 in range(0, cout, n_tile)]
        for m0 in range(0, HW, m_tile):                     # static spatial tiling
            mt = min(m_tile, HW - m0)
            ml = mask_l[m0:m0 + mt]
            mr = mask_r[m0:m0 + mt]
            accs = [jnp.zeros((mt, nt), jnp.float32) for _, nt in n_tiles]
            for t in range(9):                              # taps outer: patch built once
                dy, dx = divmod(t, 3)
                start = base + dy * W + dx + m0
                patch = src[start:start + mt, :]
                if dx == 0:
                    patch = jnp.where(ml, patch, jnp.zeros_like(patch))
                elif dx == 2:
                    patch = jnp.where(mr, patch, jnp.zeros_like(patch))
                for j, (n0, nt) in enumerate(n_tiles):      # reuse patch per N tile
                    accs[j] = accs[j] + jnp.dot(
                        patch, w_r[t, :, n0:n0 + nt],       # ref-level weight slice
                        preferred_element_type=jnp.float32)
            for j, (n0, nt) in enumerate(n_tiles):
                a = accs[j] + b_r[:, n0:n0 + nt]
                if relu:
                    a = jnp.maximum(a, 0.0)
                emit(m0, mt, n0, nt, a)

    # ---------------- layer 1: Cin -> F, ReLU (VMEM resident) ----------------
    def emit_buf1(m0, mt, n0, nt, v):
        buf1[data_start + m0:data_start + m0 + mt, n0:n0 + nt] = v.astype(buf1.dtype)
    conv3x3(buf0, w1_ref, b1_ref, True, emit_buf1)

    # ---------------- layer 2: F -> F, ReLU (VMEM resident) ------------------
    def emit_buf2(m0, mt, n0, nt, v):
        buf2[data_start + m0:data_start + m0 + mt, n0:n0 + nt] = v.astype(buf2.dtype)
    conv3x3(buf1, w2_ref, b2_ref, True, emit_buf2)

    # -------- output conv: F -> cout, store exactly the valid channels --------
    def emit_out(m0, mt, n0, nt, v):
        o_ref[0, m0:m0 + mt, n0:n0 + nt] = v.astype(o_ref.dtype)
    conv3x3(buf2, wo_ref, bo_ref, False, emit_out)


def _hw_config():
    """Per-generation N-tile width and VMEM cap (perf-only; safe fallback)."""
    try:
        kind = jax.devices()[0].device_kind.lower()
    except Exception:
        kind = ""
    wide_mxu = ("v6" in kind) or ("v7" in kind)
    n_tile = 256 if wide_mxu else 128                    # v6e/v7x MXU is 256 lanes wide
    vmem_cap = (48 << 20) if "v7" in kind else (100 << 20)  # v7x only has 64 MiB VMEM
    return n_tile, vmem_cap


@functools.partial(jax.jit, static_argnames=("compute_dtype",))
def regression_model_forward(params, x_nchw, *, compute_dtype=jnp.bfloat16):
    """Matches RegressionModel.forward: input NCHW, output (B, H*W*num_anchor_points, 2)."""
    x = jnp.transpose(x_nchw, (0, 2, 3, 1))              # NCHW -> NHWC
    B, H, W, Cin = x.shape
    w1, b1 = params["w1"], params["b1"]
    w2, b2 = params["w2"], params["b2"]
    wo, bo = params["wo"], params["bo"]
    F = w1.shape[-1]
    cout = wo.shape[-1]                                  # = 2 * num_anchor_points
    HW = H * W
    # (If H*W % 8 != 0 the buffer slices are merely sublane-misaligned — perf, not correctness.)

    x_flat = x.reshape(B, HW, Cin).astype(compute_dtype)

    # Per-tap weight layout (kh, kw, Cin, Cout) -> (9, Cin, Cout), compute dtype for the MXU.
    w1_f = w1.reshape(9, Cin, F).astype(compute_dtype)
    w2_f = w2.reshape(9, F, F).astype(compute_dtype)
    wo_f = wo.reshape(9, F, cout).astype(compute_dtype)
    b1_f = b1.reshape(1, F).astype(jnp.float32)
    b2_f = b2.reshape(1, F).astype(jnp.float32)
    bo_f = bo.reshape(1, cout).astype(jnp.float32)

    # Padded flattened-activation buffer geometry: data starts at an 8-aligned row >= W+1,
    # with >= W+1 zero rows before and after so every tap slice stays in bounds.
    data_start = _round_up(W + 1, 8)
    rows = data_start + HW + data_start

    n_tile, vmem_cap = _hw_config()
    m_tile = min(HW, 256)                                # bounds the live f32 accumulators
    # NOTE: buf1/buf2 still scale with H*W; for very large feature maps the next step is a
    # second "parallel" grid axis over row-tiles of H (2-row recompute halo), which also gives
    # v7x's two TensorCores work at small batch.

    # VMEM budget: (8,128)-tile-padded working set + accumulator/patch headroom.
    def tile_bytes(r, c, itemsize):
        return _round_up(max(r, 1), 8) * _round_up(max(c, 1), 128) * itemsize

    cb = jnp.dtype(compute_dtype).itemsize
    est = (2 * tile_bytes(HW, Cin, cb)                   # input block (double-buffered)
           + 2 * tile_bytes(HW, cout, 4)                 # output block (double-buffered)
           + 9 * tile_bytes(Cin, F, cb)                  # w1 (single-buffered)
           + 9 * tile_bytes(F, F, cb)                    # w2 (single-buffered)
           + 9 * tile_bytes(F, cout, cb)                 # wo (single-buffered)
           + 3 * tile_bytes(1, max(F, cout), 4)          # biases
           + tile_bytes(rows, Cin, cb)                   # buf0
           + 2 * tile_bytes(rows, F, cb)                 # buf1 / buf2
           + 4 * m_tile * _round_up(n_tile, 128) * 4)    # live accumulators / patches
    vmem_limit = int(min(vmem_cap, max(32 << 20, int(est * 1.5))))

    kernel = functools.partial(_fused_regression_kernel, H=H, W=W,
                               data_start=data_start, m_tile=m_tile, n_tile=n_tile)

    def const_spec(shape):
        # Loop-invariant weights/biases: constant index map + single buffering.
        idx = lambda b: (0,) * len(shape)
        return pl.BlockSpec(shape, idx, pipeline_mode=pl.Buffered(1))

    out = pl.pallas_call(
        kernel,
        out_shape=jax.ShapeDtypeStruct((B, HW, cout), x_nchw.dtype),
        grid_spec=pltpu.PrefetchScalarGridSpec(
            num_scalar_prefetch=0,
            grid=(B,),
            in_specs=[
                pl.BlockSpec((1, HW, Cin), lambda b: (b, 0, 0)),
                const_spec((9, Cin, F)),
                const_spec((1, F)),
                const_spec((9, F, F)),
                const_spec((1, F)),
                const_spec((9, F, cout)),
                const_spec((1, cout)),
            ],
            out_specs=pl.BlockSpec((1, HW, cout), lambda b: (b, 0, 0)),
            scratch_shapes=[
                pltpu.VMEM((rows, Cin), compute_dtype),   # padded input rows
                pltpu.VMEM((rows, F), compute_dtype),     # layer-1 activation (padded)
                pltpu.VMEM((rows, F), compute_dtype),     # layer-2 activation (padded)
            ],
        ),
        compiler_params=pltpu.CompilerParams(
            dimension_semantics=("parallel",),
            vmem_limit_bytes=vmem_limit),
    )(x_flat, w1_f, b1_f, w2_f, b2_f, wo_f, bo_f)

    # Output is already NHWC-flattened (row-major over (h, w, anchor, xy)), so this reshape is
    # a free view == PyTorch's permute(0, 2, 3, 1).contiguous().view(B, -1, 2).
    return out.reshape(B, HW * (cout // 2), 2)


def init_params(key, num_features_in, num_anchor_points=4, feature_size=256):
    """Deterministic synthetic parameters. Weight layout: (kh, kw, Cin, Cout)."""
    ks = jax.random.split(key, 3)

    def wb(kw_, cin, cout):
        scale = 1.0 / jnp.sqrt(cin * 9.0)
        w = jax.random.uniform(kw_, (3, 3, cin, cout), jnp.float32,
                               minval=-scale, maxval=scale)
        bia = jax.random.uniform(jax.random.fold_in(kw_, 1), (cout,),
                                 jnp.float32, minval=-scale, maxval=scale)
        return w, bia

    w1, b1 = wb(ks[0], num_features_in, feature_size)
    w2, b2 = wb(ks[1], feature_size, feature_size)
    wo, bo = wb(ks[2], feature_size, num_anchor_points * 2)
    return {"w1": w1, "b1": b1, "w2": w2, "b2": b2, "wo": wo, "bo": bo}


def _ref_forward(params, x_nchw):
    """Pure-JAX reference (XLA convs), for correctness checking only."""
    def conv(x, w, b):
        y = jax.lax.conv_general_dilated(
            x, w, window_strides=(1, 1), padding="SAME",
            dimension_numbers=("NHWC", "HWIO", "NHWC"),
            precision=jax.lax.Precision.HIGHEST)
        return y + b
    x = jnp.transpose(x_nchw, (0, 2, 3, 1))
    h = jax.nn.relu(conv(x, params["w1"], params["b1"]))
    h = jax.nn.relu(conv(h, params["w2"], params["b2"]))
    o = conv(h, params["wo"], params["bo"])
    return o.reshape(o.shape[0], -1, 2)


if __name__ == "__main__":
    key = jax.random.PRNGKey(0)
    k_x, k_p = jax.random.split(key)

    B, Cin, H, W = 2, 4, 16, 16
    feature_size = 32
    num_anchor_points = 4

    x = jax.random.normal(k_x, (B, Cin, H, W), jnp.float32)
    params = init_params(k_p, Cin, num_anchor_points, feature_size)

    ref = _ref_forward(params, x)

    # Correctness: fused kernel in f32 vs pure-JAX reference.
    out_f32 = regression_model_forward(params, x, compute_dtype=jnp.float32)
    out_f32, ref = jax.block_until_ready((out_f32, ref))
    assert out_f32.shape == ref.shape, (out_f32.shape, ref.shape)
    assert bool(jnp.allclose(out_f32, ref, rtol=5e-3, atol=5e-3)), \
        float(jnp.max(jnp.abs(out_f32 - ref)))

    # Performance path: bf16 MXU dots with f32 accumulation and bf16 inter-layer activations.
    # Expected tolerance vs. f32 reference is ~1e-2 (two bf16 activation stores compound).
    out = regression_model_forward(params, x, compute_dtype=jnp.bfloat16)
    out = jax.block_until_ready(out)
    assert bool(jnp.allclose(out, ref, rtol=2e-2, atol=2e-2)), \
        float(jnp.max(jnp.abs(out - ref)))

    expected_shape = (B, H * W * num_anchor_points, 2)
    assert out.shape == expected_shape, (out.shape, expected_shape)
    print("KERNEL_OK")
</pallas_src>

<mosaic_0001>
module attributes {stable_mosaic.version = 11 : i64} {
  func.func @_fused_regression_kernel(%arg0: i32, %arg1: memref<1x256x4xf32, #tpu.memory_space<vmem>>, %arg2: memref<9x4x32xf32, #tpu.memory_space<vmem>>, %arg3: memref<1x32xf32, #tpu.memory_space<vmem>>, %arg4: memref<9x32x32xf32, #tpu.memory_space<vmem>>, %arg5: memref<1x32xf32, #tpu.memory_space<vmem>>, %arg6: memref<9x32x8xf32, #tpu.memory_space<vmem>>, %arg7: memref<1x8xf32, #tpu.memory_space<vmem>>, %arg8: memref<1x256x8xf32, #tpu.memory_space<vmem>>, %arg9: memref<304x4xf32, #tpu.memory_space<vmem>>, %arg10: memref<304x32xf32, #tpu.memory_space<vmem>>, %arg11: memref<304x32xf32, #tpu.memory_space<vmem>>) attributes {dimension_semantics = [#tpu.dimension_semantics<parallel>], iteration_bounds = array<i64: 2>, scalar_prefetch = 0 : i64, scratch_operands = 3 : i64, tpu.core_type = #tpu.core_type<tc>, window_params = [{transform_indices = @transform_0, window_bounds = array<i64: 1, 256, 4>}, {pipeline_mode = #tpu.pipeline_mode<synchronous>, transform_indices = @transform_1, window_bounds = array<i64: 9, 4, 32>}, {pipeline_mode = #tpu.pipeline_mode<synchronous>, transform_indices = @transform_2, window_bounds = array<i64: 1, 32>}, {pipeline_mode = #tpu.pipeline_mode<synchronous>, transform_indices = @transform_3, window_bounds = array<i64: 9, 32, 32>}, {pipeline_mode = #tpu.pipeline_mode<synchronous>, transform_indices = @transform_4, window_bounds = array<i64: 1, 32>}, {pipeline_mode = #tpu.pipeline_mode<synchronous>, transform_indices = @transform_5, window_bounds = array<i64: 9, 32, 8>}, {pipeline_mode = #tpu.pipeline_mode<synchronous>, transform_indices = @transform_6, window_bounds = array<i64: 1, 8>}, {transform_indices = @transform_7, window_bounds = array<i64: 1, 256, 8>}]} {
    %0 = tpu.iota {dimensions = array<i32: 0>} : vector<256x1xi32>
    %c16_i32 = arith.constant 16 : i32
    %c0_i32 = arith.constant 0 : i32
    %1 = arith.cmpi eq, %c16_i32, %c0_i32 : i32
    %c1_i32 = arith.constant 1 : i32
    %2 = arith.select %1, %c1_i32, %c16_i32 : i32
    %3 = vector.broadcast %2 : i32 to vector<256x1xi32>
    %4 = arith.remsi %0, %3 : vector<256x1xi32>
    %c0_i32_0 = arith.constant 0 : i32
    %5 = vector.broadcast %c0_i32_0 : i32 to vector<256x1xi32>
    %6 = arith.cmpi ne, %4, %5 : vector<256x1xi32>
    %c0_i32_1 = arith.constant 0 : i32
    %7 = vector.broadcast %c0_i32_1 : i32 to vector<256x1xi32>
    %8 = arith.cmpi slt, %4, %7 : vector<256x1xi32>
    %c0_i32_2 = arith.constant 0 : i32
    %9 = arith.cmpi slt, %2, %c0_i32_2 : i32
    %10 = vector.broadcast %9 : i1 to vector<256x1xi1>
    %11 = vector.broadcast %10 : vector<256x1xi1> to vector<256x1xi1>
    %12 = arith.xori %8, %11 : vector<256x1xi1>
    %13 = arith.andi %12, %6 : vector<256x1xi1>
    %14 = vector.broadcast %2 : i32 to vector<256x1xi32>
    %15 = arith.addi %4, %14 : vector<256x1xi32>
    %16 = arith.select %13, %15, %4 : vector<256x1xi1>, vector<256x1xi32>
    %c0_i32_3 = arith.constant 0 : i32
    %17 = vector.broadcast %c0_i32_3 : i32 to vector<256x1xi32>
    %18 = arith.cmpi ne, %16, %17 : vector<256x1xi32>
    %c15_i32 = arith.constant 15 : i32
    %19 = vector.broadcast %c15_i32 : i32 to vector<256x1xi32>
    %20 = arith.cmpi ne, %16, %19 : vector<256x1xi32>
    %cst = arith.constant 0.000000e+00 : f32
    %21 = vector.broadcast %cst : f32 to vector<24x4xf32>
    %c0 = arith.constant 0 : index
    %c0_4 = arith.constant 0 : index
    %22 = vector.load %arg9[%c0, %c0_4] : memref<304x4xf32, #tpu.memory_space<vmem>>, vector<24x4xf32>
    tpu.vector_store %arg9[%c0, %c0_4], %21 {strides = array<i32>} : memref<304x4xf32, #tpu.memory_space<vmem>>, vector<24x4xf32>,
    %cst_5 = arith.constant 0.000000e+00 : f32
    %23 = vector.broadcast %cst_5 : f32 to vector<24x4xf32>
    %c280 = arith.constant 280 : index
    %c0_6 = arith.constant 0 : index
    %24 = vector.load %arg9[%c280, %c0_6] : memref<304x4xf32, #tpu.memory_space<vmem>>, vector<24x4xf32>
    tpu.vector_store %arg9[%c280, %c0_6], %23 {strides = array<i32>} : memref<304x4xf32, #tpu.memory_space<vmem>>, vector<24x4xf32>,
    %cst_7 = arith.constant 0.000000e+00 : f32
    %25 = vector.broadcast %cst_7 : f32 to vector<24x32xf32>
    %c0_8 = arith.constant 0 : index
    %c0_9 = arith.constant 0 : index
    %26 = vector.load %arg10[%c0_8, %c0_9] : memref<304x32xf32, #tpu.memory_space<vmem>>, vector<24x32xf32>
    tpu.vector_store %arg10[%c0_8, %c0_9], %25 {strides = array<i32>} : memref<304x32xf32, #tpu.memory_space<vmem>>, vector<24x32xf32>,
    %cst_10 = arith.constant 0.000000e+00 : f32
    %27 = vector.broadcast %cst_10 : f32 to vector<24x32xf32>
    %c280_11 = arith.constant 280 : index
    %c0_12 = arith.constant 0 : index
    %28 = vector.load %arg10[%c280_11, %c0_12] : memref<304x32xf32, #tpu.memory_space<vmem>>, vector<24x32xf32>
    tpu.vector_store %arg10[%c280_11, %c0_12], %27 {strides = array<i32>} : memref<304x32xf32, #tpu.memory_space<vmem>>, vector<24x32xf32>,
    %cst_13 = arith.constant 0.000000e+00 : f32
    %29 = vector.broadcast %cst_13 : f32 to vector<24x32xf32>
    %c0_14 = arith.constant 0 : index
    %c0_15 = arith.constant 0 : index
    %30 = vector.load %arg11[%c0_14, %c0_15] : memref<304x32xf32, #tpu.memory_space<vmem>>, vector<24x32xf32>
    tpu.vector_store %arg11[%c0_14, %c0_15], %29 {strides = array<i32>} : memref<304x32xf32, #tpu.memory_space<vmem>>, vector<24x32xf32>,
    %cst_16 = arith.constant 0.000000e+00 : f32
    %31 = vector.broadcast %cst_16 : f32 to vector<24x32xf32>
    %c280_17 = arith.constant 280 : index
    %c0_18 = arith.constant 0 : index
    %32 = vector.load %arg11[%c280_17, %c0_18] : memref<304x32xf32, #tpu.memory_space<vmem>>, vector<24x32xf32>
    tpu.vector_store %arg11[%c280_17, %c0_18], %31 {strides = array<i32>} : memref<304x32xf32, #tpu.memory_space<vmem>>, vector<24x32xf32>,
    %c0_19 = arith.constant 0 : index
    %c0_20 = arith.constant 0 : index
    %c0_21 = arith.constant 0 : index
    %33 = vector.load %arg1[%c0_19, %c0_20, %c0_21] : memref<1x256x4xf32, #tpu.memory_space<vmem>>, vector<1x256x4xf32>
    %34 = vector.shape_cast %33 : vector<1x256x4xf32> to vector<256x4xf32>
    %c24 = arith.constant 24 : index
    %c0_22 = arith.constant 0 : index
    %35 = vector.load %arg9[%c24, %c0_22] : memref<304x4xf32, #tpu.memory_space<vmem>>, vector<256x4xf32>
    tpu.vector_store %arg9[%c24, %c0_22], %34 {strides = array<i32>} : memref<304x4xf32, #tpu.memory_space<vmem>>, vector<256x4xf32>,
    %cst_23 = arith.constant 0.000000e+00 : f32
    %36 = vector.broadcast %cst_23 : f32 to vector<256x32xf32>
    %c7 = arith.constant 7 : index
    %c0_24 = arith.constant 0 : index
    %37 = vector.load %arg9[%c7, %c0_24] : memref<304x4xf32, #tpu.memory_space<vmem>>, vector<256x4xf32>
    %cst_25 = arith.constant 0.000000e+00 : f32
    %38 = vector.broadcast %cst_25 : f32 to vector<256x4xf32>
    %39 = vector.shape_cast %18 : vector<256x1xi1> to vector<256x1xi1>
    %40 = vector.broadcast %39 : vector<256x1xi1> to vector<256x4xi1>
    %41 = arith.select %40, %37, %38 : vector<256x4xi1>, vector<256x4xf32>
    %c0_26 = arith.constant 0 : index
    %c0_27 = arith.constant 0 : index
    %c0_28 = arith.constant 0 : index
    %42 = vector.load %arg2[%c0_26, %c0_27, %c0_28] : memref<9x4x32xf32, #tpu.memory_space<vmem>>, vector<1x4x32xf32>
    %43 = vector.shape_cast %42 : vector<1x4x32xf32> to vector<4x32xf32>
    %cst_29 = arith.constant dense<0.000000e+00> : vector<256x32xf32>
    %44 = tpu.matmul %41, %43, %cst_29 {dimension_numbers = #tpu.dot_dimension_numbers<[1], [0], [0], [1], [0, 0, 1, 1], [], []>} : vector<256x4xf32>, vector<4x32xf32>, vector<256x32xf32> -> vector<256x32xf32>
    %45 = arith.addf %36, %44 : vector<256x32xf32>
    %c8 = arith.constant 8 : index
    %c0_30 = arith.constant 0 : index
    %46 = vector.load %arg9[%c8, %c0_30] : memref<304x4xf32, #tpu.memory_space<vmem>>, vector<256x4xf32>
    %c1 = arith.constant 1 : index
    %c0_31 = arith.constant 0 : index
    %c0_32 = arith.constant 0 : index
    %47 = vector.load %arg2[%c1, %c0_31, %c0_32] : memref<9x4x32xf32, #tpu.memory_space<vmem>>, vector<1x4x32xf32>
    %48 = vector.shape_cast %47 : vector<1x4x32xf32> to vector<4x32xf32>
    %cst_33 = arith.constant dense<0.000000e+00> : vector<256x32xf32>
    %49 = tpu.matmul %46, %48, %cst_33 {dimension_numbers = #tpu.dot_dimension_numbers<[1], [0], [0], [1], [0, 0, 1, 1], [], []>} : vector<256x4xf32>, vector<4x32xf32>, vector<256x32xf32> -> vector<256x32xf32>
    %50 = arith.addf %45, %49 : vector<256x32xf32>
    %c9 = arith.constant 9 : index
    %c0_34 = arith.constant 0 : index
    %51 = vector.load %arg9[%c9, %c0_34] : memref<304x4xf32, #tpu.memory_space<vmem>>, vector<256x4xf32>
    %cst_35 = arith.constant 0.000000e+00 : f32
    %52 = vector.broadcast %cst_35 : f32 to vector<256x4xf32>
    %53 = vector.shape_cast %20 : vector<256x1xi1> to vector<256x1xi1>
    %54 = vector.broadcast %53 : vector<256x1xi1> to vector<256x4xi1>
    %55 = arith.select %54, %51, %52 : vector<256x4xi1>, vector<256x4xf32>
    %c2 = arith.constant 2 : index
    %c0_36 = arith.constant 0 : index
    %c0_37 = arith.constant 0 : index
    %56 = vector.load %arg2[%c2, %c0_36, %c0_37] : memref<9x4x32xf32, #tpu.memory_space<vmem>>, vector<1x4x32xf32>
    %57 = vector.shape_cast %56 : vector<1x4x32xf32> to vector<4x32xf32>
    %cst_38 = arith.constant dense<0.000000e+00> : vector<256x32xf32>
    %58 = tpu.matmul %55, %57, %cst_38 {dimension_numbers = #tpu.dot_dimension_numbers<[1], [0], [0], [1], [0, 0, 1, 1], [], []>} : vector<256x4xf32>, vector<4x32xf32>, vector<256x32xf32> -> vector<256x32xf32>
    %59 = arith.addf %50, %58 : vector<256x32xf32>
    %c23 = arith.constant 23 : index
    %c0_39 = arith.constant 0 : index
    %60 = vector.load %arg9[%c23, %c0_39] : memref<304x4xf32, #tpu.memory_space<vmem>>, vector<256x4xf32>
    %cst_40 = arith.constant 0.000000e+00 : f32
    %61 = vector.broadcast %cst_40 : f32 to vector<256x4xf32>
    %62 = vector.shape_cast %18 : vector<256x1xi1> to vector<256x1xi1>
    %63 = vector.broadcast %62 : vector<256x1xi1> to vector<256x4xi1>
    %64 = arith.select %63, %60, %61 : vector<256x4xi1>, vector<256x4xf32>
    %c3 = arith.constant 3 : index
    %c0_41 = arith.constant 0 : index
    %c0_42 = arith.constant 0 : index
    %65 = vector.load %arg2[%c3, %c0_41, %c0_42] : memref<9x4x32xf32, #tpu.memory_space<vmem>>, vector<1x4x32xf32>
    %66 = vector.shape_cast %65 : vector<1x4x32xf32> to vector<4x32xf32>
    %cst_43 = arith.constant dense<0.000000e+00> : vector<256x32xf32>
    %67 = tpu.matmul %64, %66, %cst_43 {dimension_numbers = #tpu.dot_dimension_numbers<[1], [0], [0], [1], [0, 0, 1, 1], [], []>} : vector<256x4xf32>, vector<4x32xf32>, vector<256x32xf32> -> vector<256x32xf32>
    %68 = arith.addf %59, %67 : vector<256x32xf32>
    %c24_44 = arith.constant 24 : index
    %c0_45 = arith.constant 0 : index
    %69 = vector.load %arg9[%c24_44, %c0_45] : memref<304x4xf32, #tpu.memory_space<vmem>>, vector<256x4xf32>
    %c4 = arith.constant 4 : index
    %c0_46 = arith.constant 0 : index
    %c0_47 = arith.constant 0 : index
    %70 = vector.load %arg2[%c4, %c0_46, %c0_47] : memref<9x4x32xf32, #tpu.memory_space<vmem>>, vector<1x4x32xf32>
    %71 = vector.shape_cast %70 : vector<1x4x32xf32> to vector<4x32xf32>
    %cst_48 = arith.constant dense<0.000000e+00> : vector<256x32xf32>
    %72 = tpu.matmul %69, %71, %cst_48 {dimension_numbers = #tpu.dot_dimension_numbers<[1], [0], [0], [1], [0, 0, 1, 1], [], []>} : vector<256x4xf32>, vector<4x32xf32>, vector<256x32xf32> -> vector<256x32xf32>
    %73 = arith.addf %68, %72 : vector<256x32xf32>
    %c25 = arith.constant 25 : index
    %c0_49 = arith.constant 0 : index
    %74 = vector.load %arg9[%c25, %c0_49] : memref<304x4xf32, #tpu.memory_space<vmem>>, vector<256x4xf32>
    %cst_50 = arith.constant 0.000000e+00 : f32
    %75 = vector.broadcast %cst_50 : f32 to vector<256x4xf32>
    %76 = vector.shape_cast %20 : vector<256x1xi1> to vector<256x1xi1>
    %77 = vector.broadcast %76 : vector<256x1xi1> to vector<256x4xi1>
    %78 = arith.select %77, %74, %75 : vector<256x4xi1>, vector<256x4xf32>
    %c5 = arith.constant 5 : index
    %c0_51 = arith.constant 0 : index
    %c0_52 = arith.constant 0 : index
    %79 = vector.load %arg2[%c5, %c0_51, %c0_52] : memref<9x4x32xf32, #tpu.memory_space<vmem>>, vector<1x4x32xf32>
    %80 = vector.shape_cast %79 : vector<1x4x32xf32> to vector<4x32xf32>
    %cst_53 = arith.constant dense<0.000000e+00> : vector<256x32xf32>
    %81 = tpu.matmul %78, %80, %cst_53 {dimension_numbers = #tpu.dot_dimension_numbers<[1], [0], [0], [1], [0, 0, 1, 1], [], []>} : vector<256x4xf32>, vector<4x32xf32>, vector<256x32xf32> -> vector<256x32xf32>
    %82 = arith.addf %73, %81 : vector<256x32xf32>
    %c39 = arith.constant 39 : index
    %c0_54 = arith.constant 0 : index
    %83 = vector.load %arg9[%c39, %c0_54] : memref<304x4xf32, #tpu.memory_space<vmem>>, vector<256x4xf32>
    %cst_55 = arith.constant 0.000000e+00 : f32
    %84 = vector.broadcast %cst_55 : f32 to vector<256x4xf32>
    %85 = vector.shape_cast %18 : vector<256x1xi1> to vector<256x1xi1>
    %86 = vector.broadcast %85 : vector<256x1xi1> to vector<256x4xi1>
    %87 = arith.select %86, %83, %84 : vector<256x4xi1>, vector<256x4xf32>
    %c6 = arith.constant 6 : index
    %c0_56 = arith.constant 0 : index
    %c0_57 = arith.constant 0 : index
    %88 = vector.load %arg2[%c6, %c0_56, %c0_57] : memref<9x4x32xf32, #tpu.memory_space<vmem>>, vector<1x4x32xf32>
    %89 = vector.shape_cast %88 : vector<1x4x32xf32> to vector<4x32xf32>
    %cst_58 = arith.constant dense<0.000000e+00> : vector<256x32xf32>
    %90 = tpu.matmul %87, %89, %cst_58 {dimension_numbers = #tpu.dot_dimension_numbers<[1], [0], [0], [1], [0, 0, 1, 1], [], []>} : vector<256x4xf32>, vector<4x32xf32>, vector<256x32xf32> -> vector<256x32xf32>
    %91 = arith.addf %82, %90 : vector<256x32xf32>
    %c40 = arith.constant 40 : index
    %c0_59 = arith.constant 0 : index
    %92 = vector.load %arg9[%c40, %c0_59] : memref<304x4xf32, #tpu.memory_space<vmem>>, vector<256x4xf32>
    %c7_60 = arith.constant 7 : index
    %c0_61 = arith.constant 0 : index
    %c0_62 = arith.constant 0 : index
    %93 = vector.load %arg2[%c7_60, %c0_61, %c0_62] : memref<9x4x32xf32, #tpu.memory_space<vmem>>, vector<1x4x32xf32>
    %94 = vector.shape_cast %93 : vector<1x4x32xf32> to vector<4x32xf32>
    %cst_63 = arith.constant dense<0.000000e+00> : vector<256x32xf32>
    %95 = tpu.matmul %92, %94, %cst_63 {dimension_numbers = #tpu.dot_dimension_numbers<[1], [0], [0], [1], [0, 0, 1, 1], [], []>} : vector<256x4xf32>, vector<4x32xf32>, vector<256x32xf32> -> vector<256x32xf32>
    %96 = arith.addf %91, %95 : vector<256x32xf32>
    %c41 = arith.constant 41 : index
    %c0_64 = arith.constant 0 : index
    %97 = vector.load %arg9[%c41, %c0_64] : memref<304x4xf32, #tpu.memory_space<vmem>>, vector<256x4xf32>
    %cst_65 = arith.constant 0.000000e+00 : f32
    %98 = vector.broadcast %cst_65 : f32 to vector<256x4xf32>
    %99 = vector.shape_cast %20 : vector<256x1xi1> to vector<256x1xi1>
    %100 = vector.broadcast %99 : vector<256x1xi1> to vector<256x4xi1>
    %101 = arith.select %100, %97, %98 : vector<256x4xi1>, vector<256x4xf32>
    %c8_66 = arith.constant 8 : index
    %c0_67 = arith.constant 0 : index
    %c0_68 = arith.constant 0 : index
    %102 = vector.load %arg2[%c8_66, %c0_67, %c0_68] : memref<9x4x32xf32, #tpu.memory_space<vmem>>, vector<1x4x32xf32>
    %103 = vector.shape_cast %102 : vector<1x4x32xf32> to vector<4x32xf32>
    %cst_69 = arith.constant dense<0.000000e+00> : vector<256x32xf32>
    %104 = tpu.matmul %101, %103, %cst_69 {dimension_numbers = #tpu.dot_dimension_numbers<[1], [0], [0], [1], [0, 0, 1, 1], [], []>} : vector<256x4xf32>, vector<4x32xf32>, vector<256x32xf32> -> vector<256x32xf32>
    %105 = arith.addf %96, %104 : vector<256x32xf32>
    %c0_70 = arith.constant 0 : index
    %c0_71 = arith.constant 0 : index
    %106 = vector.load %arg3[%c0_70, %c0_71] : memref<1x32xf32, #tpu.memory_space<vmem>>, vector<1x32xf32>
    %107 = vector.broadcast %106 : vector<1x32xf32> to vector<256x32xf32>
    %108 = arith.addf %105, %107 : vector<256x32xf32>
    %cst_72 = arith.constant 0.000000e+00 : f32
    %109 = vector.broadcast %cst_72 : f32 to vector<256x32xf32>
    %110 = arith.maximumf %108, %109 : vector<256x32xf32>
    %c24_73 = arith.constant 24 : index
    %c0_74 = arith.constant 0 : index
    %111 = vector.load %arg10[%c24_73, %c0_74] : memref<304x32xf32, #tpu.memory_space<vmem>>, vector<256x32xf32>
    tpu.vector_store %arg10[%c24_73, %c0_74], %110 {strides = array<i32>} : memref<304x32xf32, #tpu.memory_space<vmem>>, vector<256x32xf32>,
    %cst_75 = arith.constant 0.000000e+00 : f32
    %112 = vector.broadcast %cst_75 : f32 to vector<256x32xf32>
    %c7_76 = arith.constant 7 : index
    %c0_77 = arith.constant 0 : index
    %113 = vector.load %arg10[%c7_76, %c0_77] : memref<304x32xf32, #tpu.memory_space<vmem>>, vector<256x32xf32>
    %cst_78 = arith.constant 0.000000e+00 : f32
    %114 = vector.broadcast %cst_78 : f32 to vector<256x32xf32>
    %115 = vector.shape_cast %18 : vector<256x1xi1> to vector<256x1xi1>
    %116 = vector.broadcast %115 : vector<256x1xi1> to vector<256x32xi1>
    %117 = arith.select %116, %113, %114 : vector<256x32xi1>, vector<256x32xf32>
    %c0_79 = arith.constant 0 : index
    %c0_80 = arith.constant 0 : index
    %c0_81 = arith.constant 0 : index
    %118 = vector.load %arg4[%c0_79, %c0_80, %c0_81] : memref<9x32x32xf32, #tpu.memory_space<vmem>>, vector<1x32x32xf32>
    %119 = vector.shape_cast %118 : vector<1x32x32xf32> to vector<32x32xf32>
    %cst_82 = arith.constant dense<0.000000e+00> : vector<256x32xf32>
    %120 = tpu.matmul %117, %119, %cst_82 {dimension_numbers = #tpu.dot_dimension_numbers<[1], [0], [0], [1], [0, 0, 1, 1], [], []>} : vector<256x32xf32>, vector<32x32xf32>, vector<256x32xf32> -> vector<256x32xf32>
    %121 = arith.addf %112, %120 : vector<256x32xf32>
    %c8_83 = arith.constant 8 : index
    %c0_84 = arith.constant 0 : index
    %122 = vector.load %arg10[%c8_83, %c0_84] : memref<304x32xf32, #tpu.memory_space<vmem>>, vector<256x32xf32>
    %c1_85 = arith.constant 1 : index
    %c0_86 = arith.constant 0 : index
    %c0_87 = arith.constant 0 : index
    %123 = vector.load %arg4[%c1_85, %c0_86, %c0_87] : memref<9x32x32xf32, #tpu.memory_space<vmem>>, vector<1x32x32xf32>
    %124 = vector.shape_cast %123 : vector<1x32x32xf32> to vector<32x32xf32>
    %cst_88 = arith.constant dense<0.000000e+00> : vector<256x32xf32>
    %125 = tpu.matmul %122, %124, %cst_88 {dimension_numbers = #tpu.dot_dimension_numbers<[1], [0], [0], [1], [0, 0, 1, 1], [], []>} : vector<256x32xf32>, vector<32x32xf32>, vector<256x32xf32> -> vector<256x32xf32>
    %126 = arith.addf %121, %125 : vector<256x32xf32>
    %c9_89 = arith.constant 9 : index
    %c0_90 = arith.constant 0 : index
    %127 = vector.load %arg10[%c9_89, %c0_90] : memref<304x32xf32, #tpu.memory_space<vmem>>, vector<256x32xf32>
    %cst_91 = arith.constant 0.000000e+00 : f32
    %128 = vector.broadcast %cst_91 : f32 to vector<256x32xf32>
    %129 = vector.shape_cast %20 : vector<256x1xi1> to vector<256x1xi1>
    %130 = vector.broadcast %129 : vector<256x1xi1> to vector<256x32xi1>
    %131 = arith.select %130, %127, %128 : vector<256x32xi1>, vector<256x32xf32>
    %c2_92 = arith.constant 2 : index
    %c0_93 = arith.constant 0 : index
    %c0_94 = arith.constant 0 : index
    %132 = vector.load %arg4[%c2_92, %c0_93, %c0_94] : memref<9x32x32xf32, #tpu.memory_space<vmem>>, vector<1x32x32xf32>
    %133 = vector.shape_cast %132 : vector<1x32x32xf32> to vector<32x32xf32>
    %cst_95 = arith.constant dense<0.000000e+00> : vector<256x32xf32>
    %134 = tpu.matmul %131, %133, %cst_95 {dimension_numbers = #tpu.dot_dimension_numbers<[1], [0], [0], [1], [0, 0, 1, 1], [], []>} : vector<256x32xf32>, vector<32x32xf32>, vector<256x32xf32> -> vector<256x32xf32>
    %135 = arith.addf %126, %134 : vector<256x32xf32>
    %c23_96 = arith.constant 23 : index
    %c0_97 = arith.constant 0 : index
    %136 = vector.load %arg10[%c23_96, %c0_97] : memref<304x32xf32, #tpu.memory_space<vmem>>, vector<256x32xf32>
    %cst_98 = arith.constant 0.000000e+00 : f32
    %137 = vector.broadcast %cst_98 : f32 to vector<256x32xf32>
    %138 = vector.shape_cast %18 : vector<256x1xi1> to vector<256x1xi1>
    %139 = vector.broadcast %138 : vector<256x1xi1> to vector<256x32xi1>
    %140 = arith.select %139, %136, %137 : vector<256x32xi1>, vector<256x32xf32>
    %c3_99 = arith.constant 3 : index
    %c0_100 = arith.constant 0 : index
    %c0_101 = arith.constant 0 : index
    %141 = vector.load %arg4[%c3_99, %c0_100, %c0_101] : memref<9x32x32xf32, #tpu.memory_space<vmem>>, vector<1x32x32xf32>
    %142 = vector.shape_cast %141 : vector<1x32x32xf32> to vector<32x32xf32>
    %cst_102 = arith.constant dense<0.000000e+00> : vector<256x32xf32>
    %143 = tpu.matmul %140, %142, %cst_102 {dimension_numbers = #tpu.dot_dimension_numbers<[1], [0], [0], [1], [0, 0, 1, 1], [], []>} : vector<256x32xf32>, vector<32x32xf32>, vector<256x32xf32> -> vector<256x32xf32>
    %144 = arith.addf %135, %143 : vector<256x32xf32>
    %c24_103 = arith.constant 24 : index
    %c0_104 = arith.constant 0 : index
    %145 = vector.load %arg10[%c24_103, %c0_104] : memref<304x32xf32, #tpu.memory_space<vmem>>, vector<256x32xf32>
    %c4_105 = arith.constant 4 : index
    %c0_106 = arith.constant 0 : index
    %c0_107 = arith.constant 0 : index
    %146 = vector.load %arg4[%c4_105, %c0_106, %c0_107] : memref<9x32x32xf32, #tpu.memory_space<vmem>>, vector<1x32x32xf32>
    %147 = vector.shape_cast %146 : vector<1x32x32xf32> to vector<32x32xf32>
    %cst_108 = arith.constant dense<0.000000e+00> : vector<256x32xf32>
    %148 = tpu.matmul %145, %147, %cst_108 {dimension_numbers = #tpu.dot_dimension_numbers<[1], [0], [0], [1], [0, 0, 1, 1], [], []>} : vector<256x32xf32>, vector<32x32xf32>, vector<256x32xf32> -> vector<256x32xf32>
    %149 = arith.addf %144, %148 : vector<256x32xf32>
    %c25_109 = arith.constant 25 : index
    %c0_110 = arith.constant 0 : index
    %150 = vector.load %arg10[%c25_109, %c0_110] : memref<304x32xf32, #tpu.memory_space<vmem>>, vector<256x32xf32>
    %cst_111 = arith.constant 0.000000e+00 : f32
    %151 = vector.broadcast %cst_111 : f32 to vector<256x32xf32>
    %152 = vector.shape_cast %20 : vector<256x1xi1> to vector<256x1xi1>
    %153 = vector.broadcast %152 : vector<256x1xi1> to vector<256x32xi1>
    %154 = arith.select %153, %150, %151 : vector<256x32xi1>, vector<256x32xf32>
    %c5_112 = arith.constant 5 : index
    %c0_113 = arith.constant 0 : index
    %c0_114 = arith.constant 0 : index
    %155 = vector.load %arg4[%c5_112, %c0_113, %c0_114] : memref<9x32x32xf32, #tpu.memory_space<vmem>>, vector<1x32x32xf32>
    %156 = vector.shape_cast %155 : vector<1x32x32xf32> to vector<32x32xf32>
    %cst_115 = arith.constant dense<0.000000e+00> : vector<256x32xf32>
    %157 = tpu.matmul %154, %156, %cst_115 {dimension_numbers = #tpu.dot_dimension_numbers<[1], [0], [0], [1], [0, 0, 1, 1], [], []>} : vector<256x32xf32>, vector<32x32xf32>, vector<256x32xf32> -> vector<256x32xf32>
    %158 = arith.addf %149, %157 : vector<256x32xf32>
    %c39_116 = arith.constant 39 : index
    %c0_117 = arith.constant 0 : index
    %159 = vector.load %arg10[%c39_116, %c0_117] : memref<304x32xf32, #tpu.memory_space<vmem>>, vector<256x32xf32>
    %cst_118 = arith.constant 0.000000e+00 : f32
    %160 = vector.broadcast %cst_118 : f32 to vector<256x32xf32>
    %161 = vector.shape_cast %18 : vector<256x1xi1> to vector<256x1xi1>
    %162 = vector.broadcast %161 : vector<256x1xi1> to vector<256x32xi1>
    %163 = arith.select %162, %159, %160 : vector<256x32xi1>, vector<256x32xf32>
    %c6_119 = arith.constant 6 : index
    %c0_120 = arith.constant 0 : index
    %c0_121 = arith.constant 0 : index
    %164 = vector.load %arg4[%c6_119, %c0_120, %c0_121] : memref<9x32x32xf32, #tpu.memory_space<vmem>>, vector<1x32x32xf32>
    %165 = vector.shape_cast %164 : vector<1x32x32xf32> to vector<32x32xf32>
    %cst_122 = arith.constant dense<0.000000e+00> : vector<256x32xf32>
    %166 = tpu.matmul %163, %165, %cst_122 {dimension_numbers = #tpu.dot_dimension_numbers<[1], [0], [0], [1], [0, 0, 1, 1], [], []>} : vector<256x32xf32>, vector<32x32xf32>, vector<256x32xf32> -> vector<256x32xf32>
    %167 = arith.addf %158, %166 : vector<256x32xf32>
    %c40_123 = arith.constant 40 : index
    %c0_124 = arith.constant 0 : index
    %168 = vector.load %arg10[%c40_123, %c0_124] : memref<304x32xf32, #tpu.memory_space<vmem>>, vector<256x32xf32>
    %c7_125 = arith.constant 7 : index
    %c0_126 = arith.constant 0 : index
    %c0_127 = arith.constant 0 : index
    %169 = vector.load %arg4[%c7_125, %c0_126, %c0_127] : memref<9x32x32xf32, #tpu.memory_space<vmem>>, vector<1x32x32xf32>
    %170 = vector.shape_cast %169 : vector<1x32x32xf32> to vector<32x32xf32>
    %cst_128 = arith.constant dense<0.000000e+00> : vector<256x32xf32>
    %171 = tpu.matmul %168, %170, %cst_128 {dimension_numbers = #tpu.dot_dimension_numbers<[1], [0], [0], [1], [0, 0, 1, 1], [], []>} : vector<256x32xf32>, vector<32x32xf32>, vector<256x32xf32> -> vector<256x32xf32>
    %172 = arith.addf %167, %171 : vector<256x32xf32>
    %c41_129 = arith.constant 41 : index
    %c0_130 = arith.constant 0 : index
    %173 = vector.load %arg10[%c41_129, %c0_130] : memref<304x32xf32, #tpu.memory_space<vmem>>, vector<256x32xf32>
    %cst_131 = arith.constant 0.000000e+00 : f32
    %174 = vector.broadcast %cst_131 : f32 to vector<256x32xf32>
    %175 = vector.shape_cast %20 : vector<256x1xi1> to vector<256x1xi1>
    %176 = vector.broadcast %175 : vector<256x1xi1> to vector<256x32xi1>
    %177 = arith.select %176, %173, %174 : vector<256x32xi1>, vector<256x32xf32>
    %c8_132 = arith.constant 8 : index
    %c0_133 = arith.constant 0 : index
    %c0_134 = arith.constant 0 : index
    %178 = vector.load %arg4[%c8_132, %c0_133, %c0_134] : memref<9x32x32xf32, #tpu.memory_space<vmem>>, vector<1x32x32xf32>
    %179 = vector.shape_cast %178 : vector<1x32x32xf32> to vector<32x32xf32>
    %cst_135 = arith.constant dense<0.000000e+00> : vector<256x32xf32>
    %180 = tpu.matmul %177, %179, %cst_135 {dimension_numbers = #tpu.dot_dimension_numbers<[1], [0], [0], [1], [0, 0, 1, 1], [], []>} : vector<256x32xf32>, vector<32x32xf32>, vector<256x32xf32> -> vector<256x32xf32>
    %181 = arith.addf %172, %180 : vector<256x32xf32>
    %c0_136 = arith.constant 0 : index
    %c0_137 = arith.constant 0 : index
    %182 = vector.load %arg5[%c0_136, %c0_137] : memref<1x32xf32, #tpu.memory_space<vmem>>, vector<1x32xf32>
    %183 = vector.broadcast %182 : vector<1x32xf32> to vector<256x32xf32>
    %184 = arith.addf %181, %183 : vector<256x32xf32>
    %cst_138 = arith.constant 0.000000e+00 : f32
    %185 = vector.broadcast %cst_138 : f32 to vector<256x32xf32>
    %186 = arith.maximumf %184, %185 : vector<256x32xf32>
    %c24_139 = arith.constant 24 : index
    %c0_140 = arith.constant 0 : index
    %187 = vector.load %arg11[%c24_139, %c0_140] : memref<304x32xf32, #tpu.memory_space<vmem>>, vector<256x32xf32>
    tpu.vector_store %arg11[%c24_139, %c0_140], %186 {strides = array<i32>} : memref<304x32xf32, #tpu.memory_space<vmem>>, vector<256x32xf32>,
    %cst_141 = arith.constant 0.000000e+00 : f32
    %188 = vector.broadcast %cst_141 : f32 to vector<256x8xf32>
    %c7_142 = arith.constant 7 : index
    %c0_143 = arith.constant 0 : index
    %189 = vector.load %arg11[%c7_142, %c0_143] : memref<304x32xf32, #tpu.memory_space<vmem>>, vector<256x32xf32>
    %cst_144 = arith.constant 0.000000e+00 : f32
    %190 = vector.broadcast %cst_144 : f32 to vector<256x32xf32>
    %191 = vector.shape_cast %18 : vector<256x1xi1> to vector<256x1xi1>
    %192 = vector.broadcast %191 : vector<256x1xi1> to vector<256x32xi1>
    %193 = arith.select %192, %189, %190 : vector<256x32xi1>, vector<256x32xf32>
    %c0_145 = arith.constant 0 : index
    %c0_146 = arith.constant 0 : index
    %c0_147 = arith.constant 0 : index
    %194 = vector.load %arg6[%c0_145, %c0_146, %c0_147] : memref<9x32x8xf32, #tpu.memory_space<vmem>>, vector<1x32x8xf32>
    %195 = vector.shape_cast %194 : vector<1x32x8xf32> to vector<32x8xf32>
    %cst_148 = arith.constant dense<0.000000e+00> : vector<256x8xf32>
    %196 = tpu.matmul %193, %195, %cst_148 {dimension_numbers = #tpu.dot_dimension_numbers<[1], [0], [0], [1], [0, 0, 1, 1], [], []>} : vector<256x32xf32>, vector<32x8xf32>, vector<256x8xf32> -> vector<256x8xf32>
    %197 = arith.addf %188, %196 : vector<256x8xf32>
    %c8_149 = arith.constant 8 : index
    %c0_150 = arith.constant 0 : index
    %198 = vector.load %arg11[%c8_149, %c0_150] : memref<304x32xf32, #tpu.memory_space<vmem>>, vector<256x32xf32>
    %c1_151 = arith.constant 1 : index
    %c0_152 = arith.constant 0 : index
    %c0_153 = arith.constant 0 : index
    %199 = vector.load %arg6[%c1_151, %c0_152, %c0_153] : memref<9x32x8xf32, #tpu.memory_space<vmem>>, vector<1x32x8xf32>
    %200 = vector.shape_cast %199 : vector<1x32x8xf32> to vector<32x8xf32>
    %cst_154 = arith.constant dense<0.000000e+00> : vector<256x8xf32>
    %201 = tpu.matmul %198, %200, %cst_154 {dimension_numbers = #tpu.dot_dimension_numbers<[1], [0], [0], [1], [0, 0, 1, 1], [], []>} : vector<256x32xf32>, vector<32x8xf32>, vector<256x8xf32> -> vector<256x8xf32>
    %202 = arith.addf %197, %201 : vector<256x8xf32>
    %c9_155 = arith.constant 9 : index
    %c0_156 = arith.constant 0 : index
    %203 = vector.load %arg11[%c9_155, %c0_156] : memref<304x32xf32, #tpu.memory_space<vmem>>, vector<256x32xf32>
    %cst_157 = arith.constant 0.000000e+00 : f32
    %204 = vector.broadcast %cst_157 : f32 to vector<256x32xf32>
    %205 = vector.shape_cast %20 : vector<256x1xi1> to vector<256x1xi1>
    %206 = vector.broadcast %205 : vector<256x1xi1> to vector<256x32xi1>
    %207 = arith.select %206, %203, %204 : vector<256x32xi1>, vector<256x32xf32>
    %c2_158 = arith.constant 2 : index
    %c0_159 = arith.constant 0 : index
    %c0_160 = arith.constant 0 : index
    %208 = vector.load %arg6[%c2_158, %c0_159, %c0_160] : memref<9x32x8xf32, #tpu.memory_space<vmem>>, vector<1x32x8xf32>
    %209 = vector.shape_cast %208 : vector<1x32x8xf32> to vector<32x8xf32>
    %cst_161 = arith.constant dense<0.000000e+00> : vector<256x8xf32>
    %210 = tpu.matmul %207, %209, %cst_161 {dimension_numbers = #tpu.dot_dimension_numbers<[1], [0], [0], [1], [0, 0, 1, 1], [], []>} : vector<256x32xf32>, vector<32x8xf32>, vector<256x8xf32> -> vector<256x8xf32>
    %211 = arith.addf %202, %210 : vector<256x8xf32>
    %c23_162 = arith.constant 23 : index
    %c0_163 = arith.constant 0 : index
    %212 = vector.load %arg11[%c23_162, %c0_163] : memref<304x32xf32, #tpu.memory_space<vmem>>, vector<256x32xf32>
    %cst_164 = arith.constant 0.000000e+00 : f32
    %213 = vector.broadcast %cst_164 : f32 to vector<256x32xf32>
    %214 = vector.shape_cast %18 : vector<256x1xi1> to vector<256x1xi1>
    %215 = vector.broadcast %214 : vector<256x1xi1> to vector<256x32xi1>
    %216 = arith.select %215, %212, %213 : vector<256x32xi1>, vector<256x32xf32>
    %c3_165 = arith.constant 3 : index
    %c0_166 = arith.constant 0 : index
    %c0_167 = arith.constant 0 : index
    %217 = vector.load %arg6[%c3_165, %c0_166, %c0_167] : memref<9x32x8xf32, #tpu.memory_space<vmem>>, vector<1x32x8xf32>
    %218 = vector.shape_cast %217 : vector<1x32x8xf32> to vector<32x8xf32>
    %cst_168 = arith.constant dense<0.000000e+00> : vector<256x8xf32>
    %219 = tpu.matmul %216, %218, %cst_168 {dimension_numbers = #tpu.dot_dimension_numbers<[1], [0], [0], [1], [0, 0, 1, 1], [], []>} : vector<256x32xf32>, vector<32x8xf32>, vector<256x8xf32> -> vector<256x8xf32>
    %220 = arith.addf %211, %219 : vector<256x8xf32>
    %c24_169 = arith.constant 24 : index
    %c0_170 = arith.constant 0 : index
    %221 = vector.load %arg11[%c24_169, %c0_170] : memref<304x32xf32, #tpu.memory_space<vmem>>, vector<256x32xf32>
    %c4_171 = arith.constant 4 : index
    %c0_172 = arith.constant 0 : index
    %c0_173 = arith.constant 0 : index
    %222 = vector.load %arg6[%c4_171, %c0_172, %c0_173] : memref<9x32x8xf32, #tpu.memory_space<vmem>>, vector<1x32x8xf32>
    %223 = vector.shape_cast %222 : vector<1x32x8xf32> to vector<32x8xf32>
    %cst_174 = arith.constant dense<0.000000e+00> : vector<256x8xf32>
    %224 = tpu.matmul %221, %223, %cst_174 {dimension_numbers = #tpu.dot_dimension_numbers<[1], [0], [0], [1], [0, 0, 1, 1], [], []>} : vector<256x32xf32>, vector<32x8xf32>, vector<256x8xf32> -> vector<256x8xf32>
    %225 = arith.addf %220, %224 : vector<256x8xf32>
    %c25_175 = arith.constant 25 : index
    %c0_176 = arith.constant 0 : index
    %226 = vector.load %arg11[%c25_175, %c0_176] : memref<304x32xf32, #tpu.memory_space<vmem>>, vector<256x32xf32>
    %cst_177 = arith.constant 0.000000e+00 : f32
    %227 = vector.broadcast %cst_177 : f32 to vector<256x32xf32>
    %228 = vector.shape_cast %20 : vector<256x1xi1> to vector<256x1xi1>
    %229 = vector.broadcast %228 : vector<256x1xi1> to vector<256x32xi1>
    %230 = arith.select %229, %226, %227 : vector<256x32xi1>, vector<256x32xf32>
    %c5_178 = arith.constant 5 : index
    %c0_179 = arith.constant 0 : index
    %c0_180 = arith.constant 0 : index
    %231 = vector.load %arg6[%c5_178, %c0_179, %c0_180] : memref<9x32x8xf32, #tpu.memory_space<vmem>>, vector<1x32x8xf32>
    %232 = vector.shape_cast %231 : vector<1x32x8xf32> to vector<32x8xf32>
    %cst_181 = arith.constant dense<0.000000e+00> : vector<256x8xf32>
    %233 = tpu.matmul %230, %232, %cst_181 {dimension_numbers = #tpu.dot_dimension_numbers<[1], [0], [0], [1], [0, 0, 1, 1], [], []>} : vector<256x32xf32>, vector<32x8xf32>, vector<256x8xf32> -> vector<256x8xf32>
    %234 = arith.addf %225, %233 : vector<256x8xf32>
    %c39_182 = arith.constant 39 : index
    %c0_183 = arith.constant 0 : index
    %235 = vector.load %arg11[%c39_182, %c0_183] : memref<304x32xf32, #tpu.memory_space<vmem>>, vector<256x32xf32>
    %cst_184 = arith.constant 0.000000e+00 : f32
    %236 = vector.broadcast %cst_184 : f32 to vector<256x32xf32>
    %237 = vector.shape_cast %18 : vector<256x1xi1> to vector<256x1xi1>
    %238 = vector.broadcast %237 : vector<256x1xi1> to vector<256x32xi1>
    %239 = arith.select %238, %235, %236 : vector<256x32xi1>, vector<256x32xf32>
    %c6_185 = arith.constant 6 : index
    %c0_186 = arith.constant 0 : index
    %c0_187 = arith.constant 0 : index
    %240 = vector.load %arg6[%c6_185, %c0_186, %c0_187] : memref<9x32x8xf32, #tpu.memory_space<vmem>>, vector<1x32x8xf32>
    %241 = vector.shape_cast %240 : vector<1x32x8xf32> to vector<32x8xf32>
    %cst_188 = arith.constant dense<0.000000e+00> : vector<256x8xf32>
    %242 = tpu.matmul %239, %241, %cst_188 {dimension_numbers = #tpu.dot_dimension_numbers<[1], [0], [0], [1], [0, 0, 1, 1], [], []>} : vector<256x32xf32>, vector<32x8xf32>, vector<256x8xf32> -> vector<256x8xf32>
    %243 = arith.addf %234, %242 : vector<256x8xf32>
    %c40_189 = arith.constant 40 : index
    %c0_190 = arith.constant 0 : index
    %244 = vector.load %arg11[%c40_189, %c0_190] : memref<304x32xf32, #tpu.memory_space<vmem>>, vector<256x32xf32>
    %c7_191 = arith.constant 7 : index
    %c0_192 = arith.constant 0 : index
    %c0_193 = arith.constant 0 : index
    %245 = vector.load %arg6[%c7_191, %c0_192, %c0_193] : memref<9x32x8xf32, #tpu.memory_space<vmem>>, vector<1x32x8xf32>
    %246 = vector.shape_cast %245 : vector<1x32x8xf32> to vector<32x8xf32>
    %cst_194 = arith.constant dense<0.000000e+00> : vector<256x8xf32>
    %247 = tpu.matmul %244, %246, %cst_194 {dimension_numbers = #tpu.dot_dimension_numbers<[1], [0], [0], [1], [0, 0, 1, 1], [], []>} : vector<256x32xf32>, vector<32x8xf32>, vector<256x8xf32> -> vector<256x8xf32>
    %248 = arith.addf %243, %247 : vector<256x8xf32>
    %c41_195 = arith.constant 41 : index
    %c0_196 = arith.constant 0 : index
    %249 = vector.load %arg11[%c41_195, %c0_196] : memref<304x32xf32, #tpu.memory_space<vmem>>, vector<256x32xf32>
    %cst_197 = arith.constant 0.000000e+00 : f32
    %250 = vector.broadcast %cst_197 : f32 to vector<256x32xf32>
    %251 = vector.shape_cast %20 : vector<256x1xi1> to vector<256x1xi1>
    %252 = vector.broadcast %251 : vector<256x1xi1> to vector<256x32xi1>
    %253 = arith.select %252, %249, %250 : vector<256x32xi1>, vector<256x32xf32>
    %c8_198 = arith.constant 8 : index
    %c0_199 = arith.constant 0 : index
    %c0_200 = arith.constant 0 : index
    %254 = vector.load %arg6[%c8_198, %c0_199, %c0_200] : memref<9x32x8xf32, #tpu.memory_space<vmem>>, vector<1x32x8xf32>
    %255 = vector.shape_cast %254 : vector<1x32x8xf32> to vector<32x8xf32>
    %cst_201 = arith.constant dense<0.000000e+00> : vector<256x8xf32>
    %256 = tpu.matmul %253, %255, %cst_201 {dimension_numbers = #tpu.dot_dimension_numbers<[1], [0], [0], [1], [0, 0, 1, 1], [], []>} : vector<256x32xf32>, vector<32x8xf32>, vector<256x8xf32> -> vector<256x8xf32>
    %257 = arith.addf %248, %256 : vector<256x8xf32>
    %c0_202 = arith.constant 0 : index
    %c0_203 = arith.constant 0 : index
    %258 = vector.load %arg7[%c0_202, %c0_203] : memref<1x8xf32, #tpu.memory_space<vmem>>, vector<1x8xf32>
    %259 = vector.broadcast %258 : vector<1x8xf32> to vector<256x8xf32>
    %260 = arith.addf %257, %259 : vector<256x8xf32>
    %c0_204 = arith.constant 0 : index
    %c0_205 = arith.constant 0 : index
    %c0_206 = arith.constant 0 : index
    %261 = vector.load %arg8[%c0_204, %c0_205, %c0_206] : memref<1x256x8xf32, #tpu.memory_space<vmem>>, vector<1x256x8xf32>
    %262 = vector.shape_cast %261 : vector<1x256x8xf32> to vector<256x8xf32>
    %263 = vector.shape_cast %260 : vector<256x8xf32> to vector<1x256x8xf32>
    tpu.vector_store %arg8[%c0_204, %c0_205, %c0_206], %263 {strides = array<i32>} : memref<1x256x8xf32, #tpu.memory_space<vmem>>, vector<1x256x8xf32>,
    return
  }
  func.func @transform_0(%arg0: i32) -> (i32, i32, i32) {
    %c0_i32 = arith.constant 0 : i32
    %c0_i32_0 = arith.constant 0 : i32
    %c0_i32_1 = arith.constant 0 : i32
    return %arg0, %c0_i32, %c0_i32_0 : i32, i32, i32
  }
  func.func @transform_1(%arg0: i32) -> (i32, i32, i32) {
    %c0_i32 = arith.constant 0 : i32
    %c0_i32_0 = arith.constant 0 : i32
    %c0_i32_1 = arith.constant 0 : i32
    %c0_i32_2 = arith.constant 0 : i32
    return %c0_i32, %c0_i32_0, %c0_i32_1 : i32, i32, i32
  }
  func.func @transform_2(%arg0: i32) -> (i32, i32) {
    %c0_i32 = arith.constant 0 : i32
    %c0_i32_0 = arith.constant 0 : i32
    %c0_i32_1 = arith.constant 0 : i32
    return %c0_i32, %c0_i32_0 : i32, i32
  }
  func.func @transform_3(%arg0: i32) -> (i32, i32, i32) {
    %c0_i32 = arith.constant 0 : i32
    %c0_i32_0 = arith.constant 0 : i32
    %c0_i32_1 = arith.constant 0 : i32
    %c0_i32_2 = arith.constant 0 : i32
    return %c0_i32, %c0_i32_0, %c0_i32_1 : i32, i32, i32
  }
  func.func @transform_4(%arg0: i32) -> (i32, i32) {
    %c0_i32 = arith.constant 0 : i32
    %c0_i32_0 = arith.constant 0 : i32
    %c0_i32_1 = arith.constant 0 : i32
    return %c0_i32, %c0_i32_0 : i32, i32
  }
  func.func @transform_5(%arg0: i32) -> (i32, i32, i32) {
    %c0_i32 = arith.constant 0 : i32
    %c0_i32_0 = arith.constant 0 : i32
    %c0_i32_1 = arith.constant 0 : i32
    %c0_i32_2 = arith.constant 0 : i32
    return %c0_i32, %c0_i32_0, %c0_i32_1 : i32, i32, i32
  }
  func.func @transform_6(%arg0: i32) -> (i32, i32) {
    %c0_i32 = arith.constant 0 : i32
    %c0_i32_0 = arith.constant 0 : i32
    %c0_i32_1 = arith.constant 0 : i32
    return %c0_i32, %c0_i32_0 : i32, i32
  }
  func.func @transform_7(%arg0: i32) -> (i32, i32, i32) {
    %c0_i32 = arith.constant 0 : i32
    %c0_i32_0 = arith.constant 0 : i32
    %c0_i32_1 = arith.constant 0 : i32
    return %arg0, %c0_i32, %c0_i32_0 : i32, i32, i32
  }
}

</mosaic_0001>

<bundles_post_ra>
// kernel: regression_model_forward.1
= control target key start
LH: loop header
LB: loop body
LE: loop exit
PB: predicated region body
PF: predicated region fallthrough
CT: control target
= control target key end

     0   :  { %s16554_s24 = smov 0   ;;  %s20102_s0 = inlined_call_operand.vmem [shape: f32[2,256,4], index: 0, kind: input, shape index: {}]   ;;  %s20103_s1 = inlined_call_operand.vmem [shape: f32[9,4,32], index: 1, kind: input, shape index: {}]   ;;  %s20104_s2 = inlined_call_operand.vmem [shape: f32[1,32], index: 2, kind: input, shape index: {}]   ;;  %s20105_s3 = inlined_call_operand.vmem [shape: f32[9,32,32], index: 3, kind: input, shape index: {}]   ;;  %s20106_s4 = inlined_call_operand.vmem [shape: f32[1,32], index: 4, kind: input, shape index: {}]   ;;  %s20107_s5 = inlined_call_operand.vmem [shape: f32[9,32,8], index: 5, kind: input, shape index: {}]   ;;  %s20108_s6 = inlined_call_operand.vmem [shape: f32[1,8], index: 6, kind: input, shape index: {}]   ;;  %s20109_s7 = inlined_call_operand.vmem [shape: f32[2,256,8], index: 7, kind: output, shape index: {}]  }
   0x1 LB: > { %s12217_s25 = sadd.s32 4294967295, %s16511_s24   ;;  %p12221_p0 = scmp.ge.s32.totalorder %s16511_s24, 1  ;;  %s16511_s24 = sphi %s16554_s24, %s17_s24  }
   0x2   : > { %p237_p1 = scmp.lt.s32.totalorder %s16511_s24, 3 }
   0x4   : > { %p238_p2 = pnand %p12221_p0, %p237_p1 }
   0x6   : > { %241 = sbr.rel (%p238_p2) target bundleno = 2001 (0x7d1), region = 48 }
   0xd   : > { %v12226_v0 = vld [vmem:[%s20103_s1 + $0x4] sm:$0xf]  ;;  %vm20112_vm0 = vcmask 1043456   ;;  %vm20115_vm1 = vcmask 31744   ;;  %p16565_p3 = scmp.lt.s32.totalorder %s12217_s25, 1  ;;  %v20110_v1 = vmov 0.0   ;;  %v279_v44 = vlaneseq }
   0xe   : > { %14123 = vmatprep.subr.msk.mxu1 %vm20112_vm0, %v12226_v0  ;;  %762 = vst.msk [vmem:[#allocation2 + $0x8] sm:$0xff] %vm20115_vm1, %v20110_v1  ;;  %761 = vst.msk [vmem:[#allocation2] sm:$0xff] %vm20115_vm1, %v20110_v1  ;;  %v16585_v2 = vld [vmem:[%s20103_s1 + $0x10] sm:$0xf]  ;;  %v972_v3 = vld [vmem:[%s20103_s1] sm:$0xf] }
   0xf   : > { %763 = vst.msk [vmem:[#allocation2 + $0x10] sm:$0xff] %vm20115_vm1, %v20110_v1  ;;  %764 = vst.msk [vmem:[#allocation2 + $0x118] sm:$0xff] %vm20115_vm1, %v20110_v1  ;;  %v16593_v4 = vld [vmem:[%s20103_s1 + $0x14] sm:$0xf]  ;;  %14124 = vmatpush3.msk.msra.mxu1 %vm20112_vm0, %v12226_v0  ;;  %14323 = vmatprep.subr.msk.mxu0 %vm20112_vm0, %v16585_v2  ;;  %s21303_s25 = smov (!%p16565_p3, %s12217_s25), 1  ;;  %v16712_v51 = vshrl.u32 %v279_v44, 7 }
  0x10   : > { %765 = vst.msk [vmem:[#allocation2 + $0x120] sm:$0xff] %vm20115_vm1, %v20110_v1  ;;  %766 = vst.msk [vmem:[#allocation2 + $0x128] sm:$0xff] %vm20115_vm1, %v20110_v1  ;;  %14324 = vmatpush3.msk.msra.mxu0 %vm20112_vm0, %v16585_v2  ;;  %14173 = vmatprep.subr.msk.mxu1 %vm20112_vm0, %v972_v3  ;;  %s13176_s12 = sshll.u32 %s21303_s25, 8  ;;  %v16627_v11 = vld [vmem:[%s20103_s1 + $0x8] sm:$0xf]  ;;  %v20465_v63 = vmov 0 }
  0x11   : > { %14373 = vmatprep.subr.msk.mxu0 %vm20112_vm0, %v16593_v4  ;;  %s16613_s15 = scalar_lea.vmem %s20102_s0, %s13176_s12  ;;  %v16674_v33 = vld [vmem:[%s20103_s1 + $0x18] sm:$0xf]  ;;  %v281_v54 = vadd.s32 8, %v16712_v51  ;;  %v283_v58 = vadd.s32 24, %v16712_v51  ;;  %v20487_v44 = vmov 0  ;;  %v290_v1 = vadd.s32 80, %v16712_v51  ;;  %s20001_s20 = scalar_lea.vmem %s20109_s7, %s13176_s12 }
  0x12   : > { %v780_v5 = vld [vmem:[%s16613_s15] sm:$0xff]  ;;  %v781_v6 = vld [vmem:[%s16613_s15 + $0x8] sm:$0xff]  ;;  %v782_v7 = vld [vmem:[%s16613_s15 + $0x10] sm:$0xff] }
  0x13   : > { %812 = vst.msk [vmem:[#allocation2 + $0x18] sm:$0xff] %vm20115_vm1, %v780_v5  ;;  %813 = vst.msk [vmem:[#allocation2 + $0x20] sm:$0xff] %vm20115_vm1, %v781_v6  ;;  %v783_v8 = vld [vmem:[%s16613_s15 + $0x18] sm:$0xff]  ;;  %v784_v9 = vld [vmem:[%s16613_s15 + $0x20] sm:$0xff]  ;;  %v323_v57 = vand.u32 15, %v281_v54 }
  0x14   : > { %814 = vst.msk [vmem:[#allocation2 + $0x28] sm:$0xff] %vm20115_vm1, %v782_v7  ;;  %v785_v10 = vld [vmem:[%s16613_s15 + $0x28] sm:$0xff]  ;;  %815 = vst.msk [vmem:[#allocation2 + $0x30] sm:$0xff] %vm20115_vm1, %v783_v8  ;;  %v786_v14 = vld [vmem:[%s16613_s15 + $0x30] sm:$0xff] }
  0x15   : > { %v973_v12 = vld [vmem:[#allocation2 + $0x8] sm:$0xff]  ;;  %816 = vst.msk [vmem:[#allocation2 + $0x38] sm:$0xff] %vm20115_vm1, %v784_v9  ;;  %817 = vst.msk [vmem:[#allocation2 + $0x40] sm:$0xff] %vm20115_vm1, %v785_v10  ;;  %v787_v15 = vld [vmem:[%s16613_s15 + $0x38] sm:$0xff]  ;;  %vm16731_vm2 = vcmp.ne.s32.totalorder %v323_v57, 15  ;;  %v20468_v9 = vmov 0 }
  0x16   : > { %v974_v13 = vld [vmem:[#allocation2 + $0x10] sm:$0xff]  ;;  %14125 = vmatprep.mubr.msk.f32.mxu1 %vm20115_vm1, %v973_v12  ;;  %818 = vst.msk [vmem:[#allocation2 + $0x48] sm:$0xff] %vm20115_vm1, %v786_v14  ;;  %v788_v16 = vld [vmem:[%s16613_s15 + $0x40] sm:$0xff]  ;;  %v789_v17 = vld [vmem:[%s16613_s15 + $0x48] sm:$0xff]  ;;  %v20466_v63 = vsel %vm16731_vm2, 4294967295, %v20465_v63 }
  0x17   : > { %14126 = vmatmul.mubr.msk.f32.vlgmr.msra.gmra.mrb[0].mxu1 %vm20115_vm1, %v974_v13  ;;  %819 = vst.msk [vmem:[#allocation2 + $0x50] sm:$0xff] %vm20115_vm1, %v787_v15  ;;  %820 = vst.msk [vmem:[#allocation2 + $0x58] sm:$0xff] %vm20115_vm1, %v788_v16  ;;  %v790_v18 = vld [vmem:[%s16613_s15 + $0x50] sm:$0xff]  ;;  %v791_v19 = vld [vmem:[%s16613_s15 + $0x58] sm:$0xff]  ;;  %v287_v13 = vadd.s32 56, %v16712_v51 }
  0x18   : > { %821 = vst.msk [vmem:[#allocation2 + $0x60] sm:$0xff] %vm20115_vm1, %v789_v17  ;;  %v792_v20 = vld [vmem:[%s16613_s15 + $0x60] sm:$0xff]  ;;  %14174 = vmatpush3.msk.msra.mxu1 %vm20112_vm0, %v972_v3  ;;  %822 = vst.msk [vmem:[#allocation2 + $0x68] sm:$0xff] %vm20115_vm1, %v790_v18  ;;  %v793_v21 = vld [vmem:[%s16613_s15 + $0x68] sm:$0xff]  ;;  %v337_v3 = vand.u32 15, %v283_v58  ;;  %v297_v58 = vadd.s32 136, %v16712_v51 }
  0x19   : > { %823 = vst.msk [vmem:[#allocation2 + $0x70] sm:$0xff] %vm20115_vm1, %v791_v19  ;;  %824 = vst.msk [vmem:[#allocation2 + $0x78] sm:$0xff] %vm20115_vm1, %v792_v20  ;;  %v794_v22 = vld [vmem:[%s16613_s15 + $0x70] sm:$0xff]  ;;  %v795_v23 = vld [vmem:[%s16613_s15 + $0x78] sm:$0xff]  ;;  %14223 = vmatprep.subr.msk.mxu1 %vm20112_vm0, %v16627_v11  ;;  %v20472_v20 = vmov 0 }
  0x1a   : > { %825 = vst.msk [vmem:[#allocation2 + $0x80] sm:$0xff] %vm20115_vm1, %v793_v21  ;;  %826 = vst.msk [vmem:[#allocation2 + $0x88] sm:$0xff] %vm20115_vm1, %v794_v22  ;;  %v796_v24 = vld [vmem:[%s16613_s15 + $0x80] sm:$0xff]  ;;  %v797_v25 = vld [vmem:[%s16613_s15 + $0x88] sm:$0xff]  ;;  %vm16751_vm3 = vcmp.ne.s32.totalorder %v337_v3, 15  ;;  %v365_v22 = vand.u32 15, %v287_v13 }
  0x1b   : > { %827 = vst.msk [vmem:[#allocation2 + $0x90] sm:$0xff] %vm20115_vm1, %v795_v23  ;;  %v798_v26 = vld [vmem:[%s16613_s15 + $0x90] sm:$0xff]  ;;  %828 = vst.msk [vmem:[#allocation2 + $0x98] sm:$0xff] %vm20115_vm1, %v796_v24  ;;  %v799_v27 = vld [vmem:[%s16613_s15 + $0x98] sm:$0xff]  ;;  %v20469_v9 = vsel %vm16751_vm3, 4294967295, %v20468_v9  ;;  %v289_v23 = vadd.s32 72, %v16712_v51 }
  0x1c   : > { %829 = vst.msk [vmem:[#allocation2 + $0xa0] sm:$0xff] %vm20115_vm1, %v797_v25  ;;  %830 = vst.msk [vmem:[#allocation2 + $0xa8] sm:$0xff] %vm20115_vm1, %v798_v26  ;;  %v800_v28 = vld [vmem:[%s16613_s15 + $0xa0] sm:$0xff]  ;;  %v801_v29 = vld [vmem:[%s16613_s15 + $0xa8] sm:$0xff]  ;;  %vm16807_vm5 = vcmp.ne.s32.totalorder %v365_v22, 15  ;;  %v284_v3 = vadd.s32 32, %v16712_v51 }
  0x1d   : > { %v975_v30 = vld [vmem:[#allocation2 + $0x18] sm:$0xff]  ;;  %v976_v31 = vld [vmem:[#allocation2 + $0x20] sm:$0xff]  ;;  %v977_v32 = vld [vmem:[#allocation2 + $0x28] sm:$0xff]  ;;  %831 = vst.msk [vmem:[#allocation2 + $0xb0] sm:$0xff] %vm20115_vm1, %v799_v27  ;;  %v299_v22 = vadd.s32 152, %v16712_v51 }
  0x1e   : > { %832 = vst.msk [vmem:[#allocation2 + $0xb8] sm:$0xff] %vm20115_vm1, %v800_v28  ;;  %833 = vst.msk [vmem:[#allocation2 + $0xc0] sm:$0xff] %vm20115_vm1, %v801_v29  ;;  %14128 = vmatprep.mubr.msk.f32.mxu1 %vm20115_vm1, %v975_v30  ;;  %14325 = vmatprep.mubr.msk.f32.mxu0 %vm20115_vm1, %v975_v30  ;;  %v978_v34 = vld [vmem:[#allocation2 + $0x30] sm:$0xff]  ;;  %v979_v35 = vld [vmem:[#allocation2 + $0x38] sm:$0xff]  ;;  %v20477_v28 = vmov 0  ;;  %v379_v30 = vand.u32 15, %v289_v23 }
  0x1f   : > { %14129 = vmatmul.mubr.msk.f32.gmra.mrb[2].mxu1 %vm20115_vm1, %v976_v31  ;;  %14326 = vmatmul.mubr.msk.f32.vlgmr.msra.gmra.mrb[0].mxu0 %vm20115_vm1, %v976_v31  ;;  %v980_v36 = vld [vmem:[#allocation2 + $0x40] sm:$0xff]  ;;  %v981_v37 = vld [vmem:[#allocation2 + $0x48] sm:$0xff]  ;;  %v802_v38 = vld [vmem:[%s16613_s15 + $0xb0] sm:$0xff]  ;;  %v20478_v28 = vsel %vm16807_vm5, 4294967295, %v20477_v28  ;;  %v291_v31 = vadd.s32 88, %v16712_v51  ;;  %v20502_v23 = vmov 0 }
  0x20   : > { %14374 = vmatpush3.msk.msra.mxu0 %vm20112_vm0, %v16593_v4  ;;  %14131 = vmatprep.mubr.msk.f32.mxu1 %vm20115_vm1, %v977_v32  ;;  %834 = vst.msk [vmem:[#allocation2 + $0xc8] sm:$0xff] %vm20115_vm1, %v802_v38  ;;  %v803_v39 = vld [vmem:[%s16613_s15 + $0xb8] sm:$0xff]  ;;  %v804_v40 = vld [vmem:[%s16613_s15 + $0xc0] sm:$0xff]  ;;  %v982_v41 = vld [vmem:[#allocation2 + $0x50] sm:$0xff]  ;;  %v285_v4 = vadd.s32 40, %v16712_v51  ;;  %vm16830_vm6 = vcmp.ne.s32.totalorder %v379_v30, 15 }
  0x21   : > { %14328 = vmatprep.mubr.msk.f32.mxu0 %vm20115_vm1, %v977_v32  ;;  %14423 = vmatprep.subr.msk.mxu0 %vm20112_vm0, %v16674_v33  ;;  %835 = vst.msk [vmem:[#allocation2 + $0xd0] sm:$0xff] %vm20115_vm1, %v803_v39  ;;  %836 = vst.msk [vmem:[#allocation2 + $0xd8] sm:$0xff] %vm20115_vm1, %v804_v40  ;;  %v805_v42 = vld [vmem:[%s16613_s15 + $0xc8] sm:$0xff]  ;;  %v983_v43 = vld [vmem:[#allocation2 + $0x58] sm:$0xff]  ;;  %v393_v38 = vand.u32 15, %v291_v31  ;;  %v293_v39 = vadd.s32 104, %v16712_v51 }
  0x22   : > { %837 = vst.msk [vmem:[#allocation2 + $0xe0] sm:$0xff] %vm20115_vm1, %v805_v42  ;;  %v806_v45 = vld [vmem:[%s16613_s15 + $0xd0] sm:$0xff]  ;;  %v807_v46 = vld [vmem:[%s16613_s15 + $0xd8] sm:$0xff]  ;;  %v808_v47 = vld [vmem:[%s16613_s15 + $0xe0] sm:$0xff]  ;;  %v351_v12 = vand.u32 15, %v285_v4  ;;  %v344_v30 = vand.u32 15, %v284_v3 }
  0x23   : > { %14132 = vmatmul.mubr.msk.f32.gmra.mrb[4].mxu1 %vm20115_vm1, %v978_v34  ;;  %14329 = vmatmul.mubr.msk.f32.gmra.mrb[2].mxu0 %vm20115_vm1, %v978_v34  ;;  %838 = vst.msk [vmem:[#allocation2 + $0xe8] sm:$0xff] %vm20115_vm1, %v806_v45  ;;  %839 = vst.msk [vmem:[#allocation2 + $0xf0] sm:$0xff] %vm20115_vm1, %v807_v46  ;;  %v809_v48 = vld [vmem:[%s16613_s15 + $0xe8] sm:$0xff]  ;;  %v984_v49 = vld [vmem:[#allocation2 + $0x60] sm:$0xff]  ;;  %vm16853_vm7 = vcmp.ne.s32.totalorder %v393_v38, 15  ;;  %v407_v46 = vand.u32 15, %v293_v39 }
  0x24   : > { %14134 = vmatprep.mubr.msk.f32.mxu1 %vm20115_vm1, %v979_v35  ;;  %14331 = vmatprep.mubr.msk.f32.mxu0 %vm20115_vm1, %v979_v35  ;;  %840 = vst.msk [vmem:[#allocation2 + $0xf8] sm:$0xff] %vm20115_vm1, %v808_v47  ;;  %841 = vst.msk [vmem:[#allocation2 + $0x100] sm:$0xff] %vm20115_vm1, %v809_v48  ;;  %v985_v50 = vld [vmem:[#allocation2 + $0x68] sm:$0xff]  ;;  %v986_v52 = vld [vmem:[#allocation2 + $0x70] sm:$0xff]  ;;  %vm16782_vm4 = vcmp.ne.s32.totalorder %v351_v12, 15  ;;  %v20488_v44 = vsel %vm16853_vm7, 4294967295, %v20487_v44 }
  0x25   : > { %v987_v53 = vld [vmem:[#allocation2 + $0x78] sm:$0xff]  ;;  %v988_v55 = vld [vmem:[#allocation2 + $0x80] sm:$0xff]  ;;  %v989_v56 = vld [vmem:[#allocation2 + $0x88] sm:$0xff]  ;;  %v20473_v20 = vsel %vm16782_vm4, 4294967295, %v20472_v20  ;;  %20479 = vst [vmem:[#allocation11_spill] sm:$0xff] %v20478_v28  ;;  %v295_v47 = vadd.s32 120, %v16712_v51 }
  0x26   : > { %v990_v59 = vld [vmem:[#allocation2 + $0x90] sm:$0xff]  ;;  %v16728_v60 = vld [vmem:[#allocation2 + $0x19] sm:$0xff]  ;;  %v16735_v0 = vld [vmem:[#allocation2 + $0x21] sm:$0xff]  ;;  %20474 = vst [vmem:[#allocation8_spill] sm:$0xff] %v20473_v20  ;;  %v316_v48 = vand.u32 15, %v16712_v51  ;;  %vm16878_vm8 = vcmp.ne.s32.totalorder %v407_v46, 15 }
  0x27   : > { %14135 = vmatmul.mubr.msk.f32.gmra.mrb[6].mxu1 %vm20115_vm1, %v980_v36  ;;  %14332 = vmatmul.mubr.msk.f32.gmra.mrb[4].mxu0 %vm20115_vm1, %v980_v36  ;;  %v810_v61 = vld [vmem:[%s16613_s15 + $0xf0] sm:$0xff]  ;;  %v991_v62 = vld [vmem:[#allocation2 + $0x98] sm:$0xff]  ;;  %v992_v6 = vld [vmem:[#allocation2 + $0xa0] sm:$0xff]  ;;  %v2987_v7 = vsel %vm16731_vm2, %v16735_v0, 0.0  ;;  %v20482_v36 = vmov 0  ;;  %20489 = vst [vmem:[#allocation17_spill] sm:$0xff] %v20488_v44 }
  0x28   : > { %14137 = vmatprep.mubr.msk.f32.mxu1 %vm20115_vm1, %v981_v37  ;;  %14334 = vmatprep.mubr.msk.f32.mxu0 %vm20115_vm1, %v981_v37  ;;  %842 = vst.msk [vmem:[#allocation2 + $0x108] sm:$0xff] %vm20115_vm1, %v810_v61  ;;  %v811_v5 = vld [vmem:[%s16613_s15 + $0xf8] sm:$0xff]  ;;  %v16749_v8 = vld [vmem:[#allocation2 + $0xa8] sm:$0xff]  ;;  %v16771_v16 = vld [vmem:[#allocation2 + $0xb0] sm:$0xff]  ;;  %v20483_v36 = vsel %vm16830_vm6, 4294967295, %v20482_v36  ;;  %v421_v57 = vand.u32 15, %v295_v47 }
  0x29   : > { %843 = vst.msk [vmem:[#allocation2 + $0x110] sm:$0xff] %vm20115_vm1, %v811_v5  ;;  %20467 = vst [vmem:[#allocation5_spill] sm:$0xff] %v16749_v8  ;;  %v16755_v10 = vld [vmem:[#allocation2 + $0x31] sm:$0xff]  ;;  %v16758_v14 = vld [vmem:[#allocation2 + $0x29] sm:$0xff]  ;;  %vm16885_vm9 = vcmp.ne.s32.totalorder %v316_v48, 0  ;;  %v20499_v12 = vmov 0 }
  0x2a   : > { %v16763_v15 = vld [vmem:[%s20103_s1 + $0x1c] sm:$0xf]  ;;  %20470 = vst [vmem:[#allocation6_spill] sm:$0xff] %v16771_v16  ;;  %v2989_v17 = vsel %vm16751_vm3, %v16755_v10, 0.0  ;;  %v16786_v21 = vld [vmem:[#allocation2 + $0x41] sm:$0xff]  ;;  %v16805_v27 = vld [vmem:[#allocation2 + $0x49] sm:$0xff] }
  0x2b   : > { %14138 = vmatmul.mubr.msk.f32.gmra.mrb[8].mxu1 %vm20115_vm1, %v982_v41  ;;  %14335 = vmatmul.mubr.msk.f32.gmra.mrb[6].mxu0 %vm20115_vm1, %v982_v41  ;;  %v16778_v18 = vld [vmem:[#allocation2 + $0xb8] sm:$0xff]  ;;  %v16798_v24 = vld [vmem:[#allocation2 + $0xc0] sm:$0xff]  ;;  %v2991_v25 = vsel %vm16782_vm4, %v16786_v21, 0.0  ;;  %v16803_v26 = vld [vmem:[#allocation2 + $0xc8] sm:$0xff]  ;;  %20484 = vst [vmem:[#allocation14_spill] sm:$0xff] %v20483_v36  ;;  %vm16906_vm10 = vcmp.ne.s32.totalorder %v421_v57, 15 }
  0x2c   : > { %14140 = vmatprep.mubr.msk.f32.mxu1 %vm20115_vm1, %v983_v43  ;;  %14337 = vmatprep.mubr.msk.f32.mxu0 %vm20115_vm1, %v983_v43  ;;  %20471 = vst [vmem:[#allocation7_spill] sm:$0xff] %v16778_v18  ;;  %v16780_v19 = vld [vmem:[#allocation2 + $0x39] sm:$0xff]  ;;  %20475 = vst [vmem:[#allocation9_spill] sm:$0xff] %v16798_v24  ;;  %v16811_v29 = vld [vmem:[#allocation2 + $0x51] sm:$0xff]  ;;  %v20500_v12 = vsel %vm16906_vm10, 4294967295, %v20499_v12  ;;  %v286_v31 = vadd.s32 48, %v16712_v51 }
  0x2d   : > { %20476 = vst [vmem:[#allocation10_spill] sm:$0xff] %v16803_v26  ;;  %v16821_v32 = vld [vmem:[#allocation2 + $0xd0] sm:$0xff]  ;;  %v16826_v34 = vld [vmem:[#allocation2 + $0xd8] sm:$0xff]  ;;  %v16834_v37 = vld [vmem:[#allocation2 + $0x61] sm:$0xff]  ;;  %v20507_v46 = vmov 0  ;;  %v449_v48 = vand.u32 15, %v299_v22 }
  0x2e   : > { %20480 = vst [vmem:[#allocation12_spill] sm:$0xff] %v16821_v32  ;;  %20481 = vst [vmem:[#allocation13_spill] sm:$0xff] %v16826_v34  ;;  %v16828_v35 = vld [vmem:[#allocation2 + $0x59] sm:$0xff]  ;;  %v2995_v41 = vsel %vm16830_vm6, %v16834_v37, 0.0  ;;  %v16849_v42 = vld [vmem:[#allocation2 + $0xe8] sm:$0xff]  ;;  %vm16941_vm13 = vcmp.ne.s32.totalorder %v344_v30, 0 }
  0x2f   : > { %14141 = vmatmul.mubr.msk.f32.gmra.mrb[10].mxu1 %vm20115_vm1, %v984_v49  ;;  %14338 = vmatmul.mubr.msk.f32.gmra.mrb[8].mxu0 %vm20115_vm1, %v984_v49  ;;  %v16844_v40 = vld [vmem:[#allocation2 + $0xe0] sm:$0xff]  ;;  %20486 = vst [vmem:[#allocation16_spill] sm:$0xff] %v16849_v42  ;;  %v16851_v43 = vld [vmem:[#allocation2 + $0x69] sm:$0xff]  ;;  %v16857_v45 = vld [vmem:[#allocation2 + $0x71] sm:$0xff]  ;;  %v282_v49 = vadd.s32 16, %v16712_v51  ;;  %vm16970_vm14 = vcmp.ne.s32.totalorder %v449_v48, 15 }
  0x30   : > { %14143 = vmatprep.mubr.msk.f32.mxu1 %vm20115_vm1, %v985_v50  ;;  %14340 = vmatprep.mubr.msk.f32.mxu0 %vm20115_vm1, %v985_v50  ;;  %20485 = vst [vmem:[#allocation15_spill] sm:$0xff] %v16844_v40  ;;  %v16869_v50 = vld [vmem:[#allocation2 + $0xf0] sm:$0xff]  ;;  %v16876_v54 = vld [vmem:[#allocation2 + $0x79] sm:$0xff]  ;;  %v844_v61 = vld [vmem:[#allocation2 + $0x7] sm:$0xff]  ;;  %v20517_v22 = vmov 0 }
  0x31   : > { %20490 = vst [vmem:[#allocation18_spill] sm:$0xff] %v16869_v50  ;;  %v16897_v4 = vld [vmem:[#allocation2 + $0x100] sm:$0xff]  ;;  %20501 = vst [vmem:[#allocation23_spill] sm:$0xff] %v20500_v12  ;;  %v16910_v13 = vld [vmem:[#allocation2 + $0x91] sm:$0xff]  ;;  %v20518_v22 = vsel %vm16970_vm14, 4294967295, %v20517_v22 }
  0x32   : > { %20498 = vst [vmem:[#allocation22_spill] sm:$0xff] %v16897_v4  ;;  %v3001_v38 = vsel %vm16906_vm10, %v16910_v13, 0.0  ;;  %v16938_v47 = vld [vmem:[#allocation2 + $0xa1] sm:$0xff]  ;;  %20519 = vst [vmem:[#allocation33_spill] sm:$0xff] %v20518_v22  ;;  %v16974_v30 = vld [vmem:[#allocation2 + $0xb1] sm:$0xff] }
  0x33   : > { %14144 = vmatmul.mubr.msk.f32.gmra.mrb[12].mxu1 %vm20115_vm1, %v986_v52  ;;  %14341 = vmatmul.mubr.msk.f32.gmra.mrb[10].mxu0 %vm20115_vm1, %v986_v52  ;;  %v2997_v52 = vsel %vm16853_vm7, %v16857_v45, 0.0  ;;  %20510 = vst [vmem:[#allocation28_spill] sm:$0xff] %v16938_v47  ;;  %v16945_v57 = vld [vmem:[#allocation2 + $0x27] sm:$0xff]  ;;  %v16958_v3 = vld [vmem:[#allocation2 + $0x1f] sm:$0xff]  ;;  %20520 = vst [vmem:[#allocation34_spill] sm:$0xff] %v16974_v30 }
  0x34   : > { %14146 = vmatprep.mubr.msk.f32.mxu1 %vm20115_vm1, %v987_v53  ;;  %14343 = vmatprep.mubr.msk.f32.mxu0 %vm20115_vm1, %v987_v53  ;;  %v16874_v53 = vld [vmem:[#allocation2 + $0xf8] sm:$0xff]  ;;  %20514 = vst [vmem:[#allocation30_spill] sm:$0xff] %v16945_v57  ;;  %20515 = vst [vmem:[#allocation31_spill] sm:$0xff] %v16958_v3  ;;  %v16992_v48 = vld [vmem:[#allocation2 + $0x2f] sm:$0xff] }
  0x35   : > { %20491 = vst [vmem:[#allocation19_spill] sm:$0xff] %v16874_v53  ;;  %20524 = vst [vmem:[#allocation36_spill] sm:$0xff] %v16992_v48  ;;  %v17132_v22 = vld [vmem:[#allocation2 + $0x87] sm:$0xff] }
  0x37   : > { %14147 = vmatmul.mubr.msk.f32.gmra.mrb[14].mxu1 %vm20115_vm1, %v988_v55  ;;  %14344 = vmatmul.mubr.msk.f32.gmra.mrb[12].mxu0 %vm20115_vm1, %v988_v55  ;;  %v20492_v55 = vmov 0 }
  0x38   : > { %14149 = vmatprep.mubr.msk.f32.mxu1 %vm20115_vm1, %v989_v56  ;;  %14346 = vmatprep.mubr.msk.f32.mxu0 %vm20115_vm1, %v989_v56  ;;  %v20493_v55 = vsel %vm16878_vm8, 4294967295, %v20492_v55  ;;  %v16882_v56 = vld [vmem:[#allocation2 + $0x81] sm:$0xff] }
  0x39   : > { %20494 = vst [vmem:[#allocation20_spill] sm:$0xff] %v20493_v55  ;;  %v2999_v5 = vsel %vm16878_vm8, %v16882_v56, 0.0 }
  0x3b   : > { %14150 = vmatmul.mubr.msk.f32.gmra.mrb[16].mxu1 %vm20115_vm1, %v990_v59  ;;  %14347 = vmatmul.mubr.msk.f32.gmra.mrb[14].mxu0 %vm20115_vm1, %v990_v59  ;;  %v20495_v59 = vmov 0 }
  0x3c   : > { %14152 = vmatprep.mubr.msk.f32.mxu1 %vm20115_vm1, %v991_v62  ;;  %14375 = vmatprep.mubr.msk.f32.mxu0 %vm20115_vm1, %v16728_v60  ;;  %v20496_v59 = vsel %vm16885_vm9, 4294967295, %v20495_v59  ;;  %v330_v62 = vand.u32 15, %v282_v49  ;;  %v301_v49 = vadd.s32 168, %v16712_v51 }
  0x3d   : > { %20497 = vst [vmem:[#allocation21_spill] sm:$0xff] %v20496_v59  ;;  %v17205_v59 = vld [vmem:[#allocation2 + $0xb7] sm:$0xff] }
  0x3e   : > { %vm16913_vm11 = vcmp.ne.s32.totalorder %v330_v62, 0  ;;  %v16953_v62 = vld [vmem:[%s20103_s1 + $0xc] sm:$0xf] }
  0x3f   : > { %14153 = vmatmul.mubr.msk.f32.gmra.mrb[18].mxu1 %vm20115_vm1, %v992_v6  ;;  %14376 = vmatmul.mubr.msk.f32.vlgmr.msra.gmra.mrb[0].mxu0 %vm20115_vm1, %v2987_v7  ;;  %v940_v6 = vsel %vm16885_vm9, %v844_v61, 0.0  ;;  %v16904_v7 = vld [vmem:[#allocation2 + $0x89] sm:$0xff]  ;;  %v20503_v23 = vsel %vm16913_vm11, 4294967295, %v20502_v23  ;;  %v288_v61 = vadd.s32 64, %v16712_v51 }
  0x40   : > { %14424 = vmatpush3.msk.msra.mxu0 %vm20112_vm0, %v16674_v33  ;;  %14155 = vmatprep.mubr.msk.f32.mxu1 %vm20115_vm1, %v16749_v8  ;;  %v2993_v33 = vsel %vm16807_vm5, %v16811_v29, 0.0  ;;  %20504 = vst [vmem:[#allocation24_spill] sm:$0xff] %v20503_v23  ;;  %v294_v8 = vadd.s32 112, %v16712_v51  ;;  %v17256_v23 = vld [vmem:[#allocation2 + $0xd7] sm:$0xff] }
  0x41   : > { %14378 = vmatprep.mubr.msk.f32.mxu0 %vm20115_vm1, %v16758_v14  ;;  %14473 = vmatprep.subr.msk.mxu0 %vm20112_vm0, %v16763_v15 }
  0x43   : > { %14156 = vmatmul.mubr.msk.f32.gmra.mrb[20].mxu1 %vm20115_vm1, %v16771_v16  ;;  %14379 = vmatmul.mubr.msk.f32.gmra.mrb[2].mxu0 %vm20115_vm1, %v2989_v17  ;;  %v435_v17 = vand.u32 15, %v297_v58  ;;  %v358_v58 = vand.u32 15, %v286_v31  ;;  %v463_v31 = vand.u32 15, %v301_v49  ;;  %v3005_v49 = vsel %vm16970_vm14, %v16974_v30, 0.0 }
  0x44   : > { %14158 = vmatprep.mubr.msk.f32.mxu1 %vm20115_vm1, %v16778_v18  ;;  %14381 = vmatprep.mubr.msk.f32.mxu0 %vm20115_vm1, %v16780_v19  ;;  %vm20533_vm14 = vcmask 31744   ;;  %v17043_v18 = vld [vmem:[#allocation2 + $0x57] sm:$0xff]  ;;  %v298_v30 = vadd.s32 144, %v16712_v51 }
  0x45   : > { %vm16934_vm12 = vcmp.ne.s32.totalorder %v435_v17, 15  ;;  %v16968_v17 = vld [vmem:[#allocation2 + $0xa9] sm:$0xff]  ;;  %vm16977_vm15 = vcmp.ne.s32.totalorder %v358_v58, 0  ;;  %20545 = vst [vmem:[#allocation45_spill] sm:$0xff] %v17043_v18 }
  0x46   : > { %v20508_v46 = vsel %vm16934_vm12, 4294967295, %v20507_v46  ;;  %20516 = vst [vmem:[#allocation32_spill] sm:$0xff] %v16968_v17 }
  0x47   : > { %14159 = vmatmul.mubr.msk.f32.gmra.mrb[22].mxu1 %vm20115_vm1, %v16798_v24  ;;  %14382 = vmatmul.mubr.msk.f32.gmra.mrb[4].mxu0 %vm20115_vm1, %v2991_v25  ;;  %v16917_v25 = vld [vmem:[#allocation2 + $0x17] sm:$0xff]  ;;  %20509 = vst [vmem:[#allocation27_spill] sm:$0xff] %v20508_v46  ;;  %v20543_v24 = vmov 0  ;;  %v304_v46 = vadd.s32 192, %v16712_v51 }
  0x48   : > { %14161 = vmatprep.mubr.msk.f32.mxu1 %vm20115_vm1, %v16803_v26  ;;  %14384 = vmatprep.mubr.msk.f32.mxu0 %vm20115_vm1, %v16805_v27  ;;  %20505 = vst [vmem:[#allocation25_spill] sm:$0xff] %v16917_v25  ;;  %v942_v39 = vsel %vm16913_vm11, %v16917_v25, 0.0  ;;  %v307_v26 = vadd.s32 216, %v16712_v51  ;;  %v309_v25 = vadd.s32 232, %v16712_v51 }
  0x4b   : > { %14162 = vmatmul.mubr.msk.f32.gmra.mrb[24].mxu1 %vm20115_vm1, %v16821_v32  ;;  %14385 = vmatmul.mubr.msk.f32.gmra.mrb[6].mxu0 %vm20115_vm1, %v2993_v33  ;;  %v845_v33 = vld [vmem:[#allocation2 + $0xf] sm:$0xff]  ;;  %v20539_v32 = vmov 0 }
  0x4c   : > { %14164 = vmatprep.mubr.msk.f32.mxu1 %vm20115_vm1, %v16826_v34  ;;  %14387 = vmatprep.mubr.msk.f32.mxu0 %vm20115_vm1, %v16828_v35  ;;  %v292_v34 = vadd.s32 96, %v16712_v51 }
  0x4e   : > { %v400_v16 = vand.u32 15, %v292_v34 }
  0x4f   : > { %14165 = vmatmul.mubr.msk.f32.gmra.mrb[26].mxu1 %vm20115_vm1, %v16844_v40  ;;  %14388 = vmatmul.mubr.msk.f32.gmra.mrb[8].mxu0 %vm20115_vm1, %v2995_v41  ;;  %v16932_v41 = vld [vmem:[#allocation2 + $0x99] sm:$0xff]  ;;  %v386_v40 = vand.u32 15, %v290_v1 }
  0x50   : > { %14167 = vmatprep.mubr.msk.f32.mxu1 %vm20115_vm1, %v16849_v42  ;;  %14390 = vmatprep.mubr.msk.f32.mxu0 %vm20115_vm1, %v16851_v43  ;;  %20506 = vst [vmem:[#allocation26_spill] sm:$0xff] %v16932_v41  ;;  %v17013_v42 = vld [vmem:[#allocation2 + $0x47] sm:$0xff] }
  0x51   : > { %20532 = vst [vmem:[#allocation40_spill] sm:$0xff] %v17013_v42 }
  0x53   : > { %14168 = vmatmul.mubr.msk.f32.gmra.mrb[28].mxu1 %vm20115_vm1, %v16869_v50  ;;  %14391 = vmatmul.mubr.msk.f32.gmra.mrb[10].mxu0 %vm20115_vm1, %v2997_v52  ;;  %v20511_v52 = vmov 0  ;;  %v20530_v50 = vmov 0 }
  0x54   : > { %14170 = vmatprep.mubr.msk.f32.mxu1 %vm20115_vm1, %v16874_v53  ;;  %14393 = vmatprep.mubr.msk.f32.mxu0 %vm20115_vm1, %v16876_v54  ;;  %v20512_v52 = vsel %vm16941_vm13, 4294967295, %v20511_v52  ;;  %v305_v53 = vadd.s32 200, %v16712_v51 }
  0x55   : > { %20513 = vst [vmem:[#allocation29_spill] sm:$0xff] %v20512_v52  ;;  %v20612_v52 = vmov 0 }
  0x57   : > { %14171 = vmatmul.mubr.msk.f32.gmra.mrb[30].mxu1 %vm20115_vm1, %v16897_v4  ;;  %14394 = vmatmul.mubr.msk.f32.gmra.mrb[12].mxu0 %vm20115_vm1, %v2999_v5  ;;  %v3003_v5 = vsel %vm16934_vm12, %v16938_v47, 0.0  ;;  %v20526_v4 = vmov 0  ;;  %vm20534_vm12 = vmmov %vm20533_vm14  ;;  %v20584_v47 = vmov 0 }
  0x58   : > { %14175 = vmatprep.mubr.msk.f32.mxu1 %vm20115_vm1, %v940_v6  ;;  %14396 = vmatprep.mubr.msk.f32.mxu0 %vm20115_vm1, %v16904_v7  ;;  %v944_v6 = vsel %vm16941_vm13, %v16945_v57, 0.0  ;;  %vm20535_vm10 = vmmov %vm20534_vm12 }
  0x59   : > { %vm20536_vm8 = vmmov %vm20535_vm10 }
  0x5b   : > { %14176 = vmatmul.mubr.msk.f32.vlgmr.msra.gmra.mrb[0].mxu1 %vm20115_vm1, %v845_v33  ;;  %14397 = vmatmul.mubr.msk.f32.gmra.mrb[14].mxu0 %vm20115_vm1, %v3001_v38  ;;  %v303_v33 = vadd.s32 184, %v16712_v51  ;;  %v20521_v38 = vmov 0 }
  0x5c   : > { %14178 = vmatprep.mubr.msk.f32.mxu1 %vm20115_vm1, %v942_v39  ;;  %14399 = vmatprep.mubr.msk.f32.mxu0 %vm20115_vm1, %v16932_v41  ;;  %v20522_v38 = vsel %vm16977_vm15, 4294967295, %v20521_v38  ;;  %v372_v39 = vand.u32 15, %v288_v61  ;;  %v17000_v61 = vld [vmem:[#allocation2 + $0xb9] sm:$0xff]  ;;  %v3408_v41 = vsel %vm16885_vm9, %v16945_v57, 0.0  ;;  %v20598_v57 = vmov 0 }
  0x5d   : > { %14224 = vmatpush3.msk.msra.mxu1 %vm20112_vm0, %v16627_v11  ;;  %v16981_v11 = vld [vmem:[#allocation2 + $0x37] sm:$0xff]  ;;  %20525 = vst [vmem:[#allocation37_spill] sm:$0xff] %v17000_v61 }
  0x5e   : > { %20523 = vst [vmem:[#allocation35_spill] sm:$0xff] %v16981_v11  ;;  %14273 = vmatprep.subr.msk.mxu1 %vm20112_vm0, %v16953_v62  ;;  %v946_v58 = vsel %vm16977_vm15, %v16981_v11, 0.0  ;;  %vm17002_vm0 = vcmp.ne.s32.totalorder %v463_v31, 15  ;;  %v17022_v31 = vld [vmem:[#allocation2 + $0x3f] sm:$0xff] }
  0x5f   : > { %14179 = vmatmul.mubr.msk.f32.gmra.mrb[2].mxu1 %vm20115_vm1, %v16958_v3  ;;  %14400 = vmatmul.mubr.msk.f32.gmra.mrb[16].mxu0 %vm20115_vm1, %v3003_v5  ;;  %v20527_v4 = vsel %vm17002_vm0, 4294967295, %v20526_v4  ;;  %v17006_v5 = vld [vmem:[#allocation2 + $0xc1] sm:$0xff]  ;;  %20537 = vst [vmem:[#allocation41_spill] sm:$0xff] %v17022_v31  ;;  %v20551_v3 = vmov 0 }
  0x60   : > { %14181 = vmatprep.mubr.msk.f32.mxu1 %vm20115_vm1, %v944_v6  ;;  %14402 = vmatprep.mubr.msk.f32.mxu0 %vm20115_vm1, %v16968_v17  ;;  %20528 = vst [vmem:[#allocation38_spill] sm:$0xff] %v20527_v4  ;;  %20529 = vst [vmem:[#allocation39_spill] sm:$0xff] %v17006_v5  ;;  %v477_v6 = vand.u32 15, %v303_v33  ;;  %vm17009_vm1 = vcmp.ne.s32.totalorder %v372_v39, 0  ;;  %v3007_v33 = vsel %vm17002_vm0, %v17006_v5, 0.0  ;;  %v17030_v39 = vld [vmem:[#allocation2 + $0xc9] sm:$0xff] }
  0x61   : > { %v20531_v50 = vsel %vm17009_vm1, 4294967295, %v20530_v50  ;;  %v948_v1 = vsel %vm17009_vm1, %v17013_v42, 0.0  ;;  %20538 = vst [vmem:[#allocation42_spill] sm:$0xff] %v17030_v39  ;;  %vm20547_vm0 = vmmov %vm20535_vm10  ;;  %v296_v5 = vadd.s32 128, %v16712_v51  ;;  %v20566_v4 = vmov 0 }
  0x62   : > { %vm20548_vm7 = vmmov %vm20547_vm0  ;;  %v20574_v17 = vmov 0 }
  0x63   : > { %14182 = vmatmul.mubr.msk.f32.gmra.mrb[4].mxu1 %vm20533_vm14, %v16992_v48  ;;  %14403 = vmatmul.mubr.msk.f32.gmra.mrb[18].mxu0 %vm20534_vm12, %v3005_v49  ;;  %vm17032_vm14 = vcmp.ne.s32.totalorder %v477_v6, 15  ;;  %v17036_v49 = vld [vmem:[#allocation2 + $0xd1] sm:$0xff]  ;;  %vm20546_vm12 = vmmov %vm20535_vm10  ;;  %v17060_v6 = vld [vmem:[#allocation2 + $0xd9] sm:$0xff] }
  0x64   : > { %14184 = vmatprep.mubr.msk.f32.mxu1 %vm20535_vm10, %v946_v58  ;;  %14405 = vmatprep.mubr.msk.f32.mxu0 %vm20536_vm8, %v17000_v61  ;;  %v20540_v32 = vsel %vm17032_vm14, 4294967295, %v20539_v32  ;;  %20542 = vst [vmem:[#allocation44_spill] sm:$0xff] %v17036_v49  ;;  %v491_v58 = vand.u32 15, %v305_v53  ;;  %vm17039_vm8 = vcmp.ne.s32.totalorder %v386_v40, 0  ;;  %v17052_v53 = vld [vmem:[#allocation2 + $0x4f] sm:$0xff]  ;;  %v3009_v40 = vsel %vm17032_vm14, %v17036_v49, 0.0  ;;  %vm20559_vm14 = vmmov %vm20548_vm7 }
  0x65   : > { %20541 = vst [vmem:[#allocation43_spill] sm:$0xff] %v20540_v32  ;;  %v20544_v24 = vsel %vm17039_vm8, 4294967295, %v20543_v24  ;;  %20549 = vst [vmem:[#allocation46_spill] sm:$0xff] %v17052_v53  ;;  %v950_v34 = vsel %vm17039_vm8, %v17043_v18, 0.0  ;;  %v17073_v49 = vld [vmem:[#allocation2 + $0x67] sm:$0xff]  ;;  %v414_v32 = vand.u32 15, %v294_v8 }
  0x66   : > { %20550 = vst [vmem:[#allocation47_spill] sm:$0xff] %v17060_v6  ;;  %20557 = vst [vmem:[#allocation50_spill] sm:$0xff] %v17073_v49  ;;  %v20562_v61 = vmov 0 }
  0x67   : > { %14185 = vmatmul.mubr.msk.f32.gmra.mrb[6].mxu1 %vm20535_vm10, %v17022_v31  ;;  %14406 = vmatmul.mubr.msk.f32.gmra.mrb[20].mxu0 %vm20546_vm12, %v3007_v33  ;;  %vm17062_vm10 = vcmp.ne.s32.totalorder %v491_v58, 15  ;;  %v17066_v33 = vld [vmem:[#allocation2 + $0xe1] sm:$0xff]  ;;  %vm20558_vm12 = vmmov %vm20548_vm7  ;;  %v17090_v58 = vld [vmem:[#allocation2 + $0xe9] sm:$0xff] }
  0x68   : > { %14187 = vmatprep.mubr.msk.f32.mxu1 %vm20547_vm0, %v948_v1  ;;  %14408 = vmatprep.mubr.msk.f32.mxu0 %vm20548_vm7, %v17030_v39  ;;  %v20552_v3 = vsel %vm17062_vm10, 4294967295, %v20551_v3  ;;  %20554 = vst [vmem:[#allocation49_spill] sm:$0xff] %v17066_v33  ;;  %v505_v1 = vand.u32 15, %v307_v26  ;;  %vm17069_vm0 = vcmp.ne.s32.totalorder %v400_v16, 0  ;;  %v20555_v39 = vmov 0  ;;  %vm20560_vm6 = vmmov %vm20548_vm7  ;;  %v17082_v26 = vld [vmem:[#allocation2 + $0x5f] sm:$0xff] }
  0x69   : > { %20553 = vst [vmem:[#allocation48_spill] sm:$0xff] %v20552_v3  ;;  %v20556_v39 = vsel %vm17069_vm0, 4294967295, %v20555_v39  ;;  %v3011_v16 = vsel %vm17062_vm10, %v17066_v33, 0.0  ;;  %v952_v8 = vsel %vm17069_vm0, %v17073_v49, 0.0  ;;  %20561 = vst [vmem:[#allocation51_spill] sm:$0xff] %v17090_v58  ;;  %v17103_v33 = vld [vmem:[#allocation2 + $0x77] sm:$0xff] }
  0x6a   : > { %20568 = vst [vmem:[#allocation54_spill] sm:$0xff] %v17103_v33  ;;  %v428_v3 = vand.u32 15, %v296_v5  ;;  %vm20570_vm10 = vmmov %vm20558_vm12 }
  0x6b   : > { %14188 = vmatmul.mubr.msk.f32.gmra.mrb[8].mxu1 %vm20548_vm7, %v17052_v53  ;;  %14409 = vmatmul.mubr.msk.f32.gmra.mrb[22].mxu0 %vm20558_vm12, %v3009_v40  ;;  %vm17092_vm7 = vcmp.ne.s32.totalorder %v505_v1, 15  ;;  %v17096_v40 = vld [vmem:[#allocation2 + $0xf1] sm:$0xff]  ;;  %vm20571_vm5 = vmmov %vm20570_vm10  ;;  %v17120_v1 = vld [vmem:[#allocation2 + $0xf9] sm:$0xff] }
  0x6c   : > { %14190 = vmatprep.mubr.msk.f32.mxu1 %vm20559_vm14, %v950_v34  ;;  %14411 = vmatprep.mubr.msk.f32.mxu0 %vm20560_vm6, %v17060_v6  ;;  %v20563_v61 = vsel %vm17092_vm7, 4294967295, %v20562_v61  ;;  %20565 = vst [vmem:[#allocation53_spill] sm:$0xff] %v17096_v40  ;;  %v519_v34 = vand.u32 15, %v309_v25  ;;  %v311_v6 = vadd.s32 248, %v16712_v51  ;;  %vm17099_vm6 = vcmp.ne.s32.totalorder %v414_v32, 0  ;;  %vm20569_vm14 = vmmov %vm20558_vm12  ;;  %v17112_v25 = vld [vmem:[#allocation2 + $0x6f] sm:$0xff] }
  0x6d   : > { %20564 = vst [vmem:[#allocation52_spill] sm:$0xff] %v20563_v61  ;;  %v20567_v4 = vsel %vm17099_vm6, 4294967295, %v20566_v4  ;;  %20572 = vst [vmem:[#allocation55_spill] sm:$0xff] %v17112_v25  ;;  %v3013_v32 = vsel %vm17092_vm7, %v17096_v40, 0.0  ;;  %v954_v5 = vsel %vm17099_vm6, %v17103_v33, 0.0  ;;  %v442_v40 = vand.u32 15, %v298_v30 }
  0x6e   : > { %20573 = vst [vmem:[#allocation56_spill] sm:$0xff] %v17120_v1  ;;  %v300_v61 = vadd.s32 160, %v16712_v51  ;;  %vm20581_vm7 = vmmov %vm20570_vm10 }
  0x6f   : > { %14191 = vmatmul.mubr.msk.f32.gmra.mrb[10].mxu1 %vm20569_vm14, %v17082_v26  ;;  %14412 = vmatmul.mubr.msk.f32.gmra.mrb[24].mxu0 %vm20558_vm12, %v3011_v16  ;;  %vm17122_vm14 = vcmp.ne.s32.totalorder %v519_v34, 15  ;;  %v17126_v16 = vld [vmem:[#allocation2 + $0x101] sm:$0xff]  ;;  %vm20580_vm12 = vmmov %vm20570_vm10  ;;  %v17149_v34 = vld [vmem:[#allocation2 + $0x109] sm:$0xff] }
  0x70   : > { %14193 = vmatprep.mubr.msk.f32.mxu1 %vm20570_vm10, %v952_v8  ;;  %14414 = vmatprep.mubr.msk.f32.mxu0 %vm20571_vm5, %v17090_v58  ;;  %v20575_v17 = vsel %vm17122_vm14, 4294967295, %v20574_v17  ;;  %20577 = vst [vmem:[#allocation58_spill] sm:$0xff] %v17126_v16  ;;  %v533_v8 = vand.u32 15, %v311_v6  ;;  %vm17128_vm5 = vcmp.ne.s32.totalorder %v428_v3, 0  ;;  %v20578_v58 = vmov 0  ;;  %vm20582_vm4 = vmmov %vm20581_vm7  ;;  %v17141_v6 = vld [vmem:[#allocation2 + $0x7f] sm:$0xff] }
  0x71   : > { %20576 = vst [vmem:[#allocation57_spill] sm:$0xff] %v20575_v17  ;;  %v20579_v58 = vsel %vm17128_vm5, 4294967295, %v20578_v58  ;;  %v3015_v3 = vsel %vm17122_vm14, %v17126_v16, 0.0  ;;  %v956_v30 = vsel %vm17128_vm5, %v17132_v22, 0.0  ;;  %20583 = vst [vmem:[#allocation59_spill] sm:$0xff] %v17149_v34  ;;  %v456_v17 = vand.u32 15, %v300_v61 }
  0x72   : > { %v302_v16 = vadd.s32 176, %v16712_v51  ;;  %vm20591_vm14 = vmmov %vm20582_vm4 }
  0x73   : > { %14194 = vmatmul.mubr.msk.f32.gmra.mrb[12].mxu1 %vm20570_vm10, %v17112_v25  ;;  %14415 = vmatmul.mubr.msk.f32.gmra.mrb[26].mxu0 %vm20580_vm12, %v3013_v32  ;;  %vm17151_vm10 = vcmp.ne.s32.totalorder %v533_v8, 15  ;;  %v17155_v32 = vld [vmem:[#allocation2 + $0x111] sm:$0xff]  ;;  %vm20590_vm12 = vmmov %vm20582_vm4 }
  0x74   : > { %14196 = vmatprep.mubr.msk.f32.mxu1 %vm20581_vm7, %v954_v5  ;;  %14417 = vmatprep.mubr.msk.f32.mxu0 %vm20582_vm4, %v17120_v1  ;;  %v20585_v47 = vsel %vm17151_vm10, 4294967295, %v20584_v47  ;;  %20587 = vst [vmem:[#allocation61_spill] sm:$0xff] %v17155_v32  ;;  %vm17157_vm7 = vcmp.ne.s32.totalorder %v442_v40, 0  ;;  %v20588_v5 = vmov 0  ;;  %v17161_v1 = vld [vmem:[#allocation2 + $0x97] sm:$0xff]  ;;  %vm20592_vm3 = vmmov %vm20582_vm4  ;;  %v17170_v8 = vld [vmem:[#allocation2 + $0x8f] sm:$0xff] }
  0x75   : > { %20586 = vst [vmem:[#allocation60_spill] sm:$0xff] %v20585_v47  ;;  %v20589_v5 = vsel %vm17157_vm7, 4294967295, %v20588_v5  ;;  %v3017_v40 = vsel %vm17151_vm10, %v17155_v32, 0.0  ;;  %v958_v61 = vsel %vm17157_vm7, %v17161_v1, 0.0  ;;  %vm20597_vm10 = vmmov %vm20592_vm3  ;;  %v17193_v32 = vld [vmem:[#allocation2 + $0x9f] sm:$0xff] }
  0x77   : > { %14197 = vmatmul.mubr.msk.f32.gmra.mrb[14].mxu1 %vm20582_vm4, %v17141_v6  ;;  %14418 = vmatmul.mubr.msk.f32.gmra.mrb[28].mxu0 %vm20590_vm12, %v3015_v3  ;;  %vm17181_vm4 = vcmp.ne.s32.totalorder %v456_v17, 0  ;;  %v20593_v3 = vmov 0  ;;  %vm20596_vm12 = vmmov %vm20592_vm3 }
  0x78   : > { %14199 = vmatprep.mubr.msk.f32.mxu1 %vm20591_vm14, %v956_v30  ;;  %14420 = vmatprep.mubr.msk.f32.mxu0 %vm20592_vm3, %v17149_v34  ;;  %v20594_v3 = vsel %vm17181_vm4, 4294967295, %v20593_v3  ;;  %v17185_v30 = vld [vmem:[#allocation2 + $0xa7] sm:$0xff]  ;;  %v470_v34 = vand.u32 15, %v302_v16  ;;  %vm20595_vm14 = vmmov %vm20592_vm3  ;;  %v3410_v16 = vsel %vm16913_vm11, %v16981_v11, 0.0  ;;  %v3412_v11 = vsel %vm16941_vm13, %v17013_v42, 0.0  ;;  %v17244_v42 = vld [vmem:[#allocation2 + $0xbf] sm:$0xff] }
  0x79   : > { %v960_v17 = vsel %vm17181_vm4, %v17185_v30, 0.0  ;;  %vm20604_vm11 = vmmov %vm20592_vm3 }
  0x7a   : > { %vm17201_vm9 = vcmp.ne.s32.totalorder %v470_v34, 0  ;;  %v17220_v34 = vld [vmem:[#allocation2 + $0xaf] sm:$0xff]  ;;  %vm20611_vm13 = vmmov %vm20604_vm11 }
  0x7b   : > { %14200 = vmatmul.mubr.msk.f32.gmra.mrb[16].mxu1 %vm20592_vm3, %v17170_v8  ;;  %14421 = vmatmul.mubr.msk.f32.gmra.mrb[30].mxu0 %vm20595_vm14, %v3017_v40  ;;  %v20599_v57 = vsel %vm17201_vm9, 4294967295, %v20598_v57  ;;  %v484_v40 = vand.u32 15, %v304_v46  ;;  %vm20602_vm14 = vcmask 1043456   ;;  %v962_v46 = vsel %vm17201_vm9, %v17205_v59, 0.0 }
  0x7c   : > { %14202 = vmatprep.mubr.msk.f32.mxu1 %vm20596_vm12, %v958_v61  ;;  %14425 = vmatprep.mubr.msk.f32.mxu0 %vm20597_vm10, %v3408_v41  ;;  %20600 = vst [vmem:[#allocation62_spill] sm:$0xff] %v20599_v57  ;;  %v306_v61 = vadd.s32 208, %v16712_v51  ;;  %v17211_v41 = vld [vmem:[%s20103_s1 + $0x20] sm:$0xf]  ;;  %vm20601_vm10 = vmmov %vm20592_vm3 }
  0x7d   : > { %vm20603_vm12 = vmmov %vm20592_vm3 }
  0x7f   : > { %14203 = vmatmul.mubr.msk.f32.gmra.mrb[18].mxu1 %vm20601_vm10, %v17193_v32  ;;  %14426 = vmatmul.mubr.msk.f32.vlgmr.msra.gmra.mrb[0].mxu0 %vm20592_vm3, %v16992_v48  ;;  %vm20605_vm10 = vmmov %vm20602_vm14  ;;  %vm17231_vm3 = vcmp.ne.s32.totalorder %v484_v40, 0  ;;  %v20606_v48 = vmov 0 }
  0x80   : > { %14474 = vmatpush3.msk.msra.mxu0 %vm20602_vm14, %v16763_v15  ;;  %14205 = vmatprep.mubr.msk.f32.mxu1 %vm20603_vm12, %v960_v17  ;;  %v20607_v48 = vsel %vm17231_vm3, 4294967295, %v20606_v48  ;;  %v17235_v15 = vld [vmem:[#allocation2 + $0xc7] sm:$0xff]  ;;  %v498_v17 = vand.u32 15, %v306_v61  ;;  %vm20609_vm14 = vmmov %vm20604_vm11  ;;  %v3414_v61 = vsel %vm16977_vm15, %v17043_v18, 0.0 }
  0x81   : > { %14428 = vmatprep.mubr.msk.f32.mxu0 %vm20604_vm11, %v3410_v16  ;;  %14523 = vmatprep.subr.msk.mxu0 %vm20605_vm10, %v17211_v41  ;;  %20608 = vst [vmem:[#allocation63_spill] sm:$0xff] %v20607_v48  ;;  %v308_v16 = vadd.s32 224, %v16712_v51  ;;  %vm20610_vm12 = vmmov %vm20604_vm11  ;;  %v964_v40 = vsel %vm17231_vm3, %v17235_v15, 0.0  ;;  %v17277_v18 = vld [vmem:[#allocation2 + $0xe7] sm:$0xff] }
  0x82   : > { %vm17252_vm10 = vcmp.ne.s32.totalorder %v498_v17, 0 }
  0x83   : > { %14206 = vmatmul.mubr.msk.f32.gmra.mrb[20].mxu1 %vm20604_vm11, %v17220_v34  ;;  %14429 = vmatmul.mubr.msk.f32.gmra.mrb[2].mxu0 %vm20609_vm14, %v17022_v31  ;;  %v20613_v52 = vsel %vm17252_vm10, 4294967295, %v20612_v52  ;;  %v512_v31 = vand.u32 15, %v308_v16  ;;  %vm20616_vm14 = vmmov %vm20604_vm11  ;;  %v966_v17 = vsel %vm17252_vm10, %v17256_v23, 0.0  ;;  %v20618_v16 = vmov 0 }
  0x84   : > { %14208 = vmatprep.mubr.msk.f32.mxu1 %vm20610_vm12, %v962_v46  ;;  %14431 = vmatprep.mubr.msk.f32.mxu0 %vm20611_vm13, %v3412_v11  ;;  %20614 = vst [vmem:[#allocation64_spill] sm:$0xff] %v20613_v52  ;;  %v310_v46 = vadd.s32 240, %v16712_v51  ;;  %vm20615_vm13 = vmmov %vm20604_vm11  ;;  %v17265_v11 = vld [vmem:[#allocation2 + $0xcf] sm:$0xff]  ;;  %v3416_v51 = vsel %vm17009_vm1, %v17073_v49, 0.0  ;;  %v17297_v49 = vld [vmem:[#allocation2 + $0xf7] sm:$0xff] }
  0x85   : > { %vm20617_vm12 = vmmov %vm20604_vm11  ;;  %vm17273_vm15 = vcmp.ne.s32.totalorder %v512_v31, 0 }
  0x86   : > { %v20619_v16 = vsel %vm17273_vm15, 4294967295, %v20618_v16  ;;  %v968_v31 = vsel %vm17273_vm15, %v17277_v18, 0.0 }
  0x87   : > { %14209 = vmatmul.mubr.msk.f32.gmra.mrb[22].mxu1 %vm20615_vm13, %v17244_v42  ;;  %14432 = vmatmul.mubr.msk.f32.gmra.mrb[4].mxu0 %vm20604_vm11, %v17052_v53  ;;  %20620 = vst [vmem:[#allocation65_spill] sm:$0xff] %v20619_v16  ;;  %v526_v53 = vand.u32 15, %v310_v46  ;;  %vm20621_vm13 = vmmov %vm20604_vm11  ;;  %v20624_v46 = vmov 0 }
  0x88   : > { %14211 = vmatprep.mubr.msk.f32.mxu1 %vm20616_vm14, %v964_v40  ;;  %14434 = vmatprep.mubr.msk.f32.mxu0 %vm20617_vm12, %v3414_v61  ;;  %vm20622_vm14 = vmmov %vm20604_vm11  ;;  %v17285_v40 = vld [vmem:[#allocation2 + $0xdf] sm:$0xff]  ;;  %v3418_v61 = vsel %vm17039_vm8, %v17103_v33, 0.0  ;;  %v1657_v33 = vld [vmem:[#allocation2 + $0x11] sm:$0xff] }
  0x89   : > { %vm20623_vm12 = vmmov %vm20604_vm11  ;;  %vm17293_vm1 = vcmp.ne.s32.totalorder %v526_v53, 0 }
  0x8a   : > { %v20625_v46 = vsel %vm17293_vm1, 4294967295, %v20624_v46  ;;  %v970_v53 = vsel %vm17293_vm1, %v17297_v49, 0.0  ;;  %vm20630_vm8 = vmmov %vm20604_vm11 }
  0x8b   : > { %14212 = vmatmul.mubr.msk.f32.gmra.mrb[24].mxu1 %vm20621_vm13, %v17265_v11  ;;  %14435 = vmatmul.mubr.msk.f32.gmra.mrb[6].mxu0 %vm20604_vm11, %v17082_v26  ;;  %20626 = vst [vmem:[#allocation66_spill] sm:$0xff] %v20625_v46  ;;  %vm20627_vm13 = vmmov %vm20604_vm11 }
  0x8c   : > { %14214 = vmatprep.mubr.msk.f32.mxu1 %vm20622_vm14, %v966_v17  ;;  %14437 = vmatprep.mubr.msk.f32.mxu0 %vm20623_vm12, %v3416_v51  ;;  %vm20628_vm14 = vmmov %vm20604_vm11  ;;  %v17305_v17 = vld [vmem:[#allocation2 + $0xef] sm:$0xff]  ;;  %v3420_v51 = vsel %vm17069_vm0, %v17132_v22, 0.0 }
  0x8d   : > { %vm20629_vm12 = vmmov %vm20604_vm11 }
  0x8e   : > { %vm20635_vm0 = vmmov %vm20630_vm8 }
  0x8f   : > { %14215 = vmatmul.mubr.msk.f32.gmra.mrb[26].mxu1 %vm20627_vm13, %v17285_v40  ;;  %14438 = vmatmul.mubr.msk.f32.gmra.mrb[8].mxu0 %vm20604_vm11, %v17112_v25  ;;  %vm20631_vm13 = vmmov %vm20630_vm8  ;;  %v3422_v25 = vsel %vm17099_vm6, %v17161_v1, 0.0 }
  0x90   : > { %14217 = vmatprep.mubr.msk.f32.mxu1 %vm20628_vm14, %v968_v31  ;;  %14440 = vmatprep.mubr.msk.f32.mxu0 %vm20629_vm12, %v3418_v61  ;;  %vm20632_vm11 = vmmov %vm20630_vm8  ;;  %v17319_v31 = vld [vmem:[#allocation2 + $0xff] sm:$0xff]  ;;  %v1656_v61 = vld [vmem:[#allocation2 + $0x9] sm:$0xff] }
  0x91   : > { %vm20633_vm14 = vmmov %vm20630_vm8 }
  0x92   : > { %vm20634_vm12 = vmmov %vm20630_vm8 }
  0x93   : > { %14218 = vmatmul.mubr.msk.f32.gmra.mrb[28].mxu1 %vm20630_vm8, %v17305_v17  ;;  %14441 = vmatmul.mubr.msk.f32.gmra.mrb[10].mxu0 %vm20631_vm13, %v17141_v6  ;;  %vm20636_vm13 = vmmov %vm20635_vm0 }
  0x94   : > { %14220 = vmatprep.mubr.msk.f32.mxu1 %vm20632_vm11, %v970_v53  ;;  %14443 = vmatprep.mubr.msk.f32.mxu0 %vm20633_vm14, %v3420_v51  ;;  %v1753_v53 = vsel %vm16731_vm2, %v1657_v33, 0.0  ;;  %v3424_v51 = vsel %vm17128_vm5, %v17185_v30, 0.0  ;;  %vm20637_vm11 = vmmov %vm20635_vm0  ;;  %v3426_v33 = vsel %vm17157_vm7, %v17205_v59, 0.0 }
  0x95   : > { %vm20638_vm14 = vmmov %vm20635_vm0 }
  0x97   : > { %14221 = vmatmul.mubr.msk.f32.gmra.mrb[30].mxu1 %vm20634_vm12, %v17319_v31  ;;  %14444 = vmatmul.mubr.msk.f32.gmra.mrb[12].mxu0 %vm20630_vm8, %v17170_v8  ;;  %vm20639_vm12 = vmmov %vm20635_vm0 }
  0x98   : > { %14225 = vmatprep.mubr.msk.f32.mxu1 %vm20635_vm0, %v1656_v61  ;;  %14446 = vmatprep.mubr.msk.f32.mxu0 %vm20636_vm13, %v3422_v25  ;;  %vm20640_vm8 = vmmov %vm20635_vm0  ;;  %vm20641_vm0 = vnez %v20469_v9  ;;  %vm20642_vm13 = vcmask 1043456  }
  0x99   : > { %v1755_v25 = vsel %vm20641_vm0, %v16735_v0, 0.0  ;;  %vm20646_vm2 = vmmov %vm20640_vm8  ;;  %v3428_v0 = vsel %vm17181_vm4, %v17235_v15, 0.0 }
  0x9a   : > { %vm20648_vm0 = vmmov %vm20646_vm2 }
  0x9b   : > { %14226 = vmatmul.mubr.msk.f32.vlgmr.msra.gmra.mrb[0].mxu1 %vm20637_vm11, %v1753_v53  ;;  %14447 = vmatmul.mubr.msk.f32.gmra.mrb[14].mxu0 %vm20638_vm14, %v17193_v32  ;;  %vm20643_vm11 = vmmov %vm20642_vm13 }
  0x9c   : > { %14228 = vmatprep.mubr.msk.f32.mxu1 %vm20639_vm12, %v16728_v60  ;;  %14449 = vmatprep.mubr.msk.f32.mxu0 %vm20640_vm8, %v3424_v51  ;;  %vm20644_vm14 = vmmov %vm20640_vm8  ;;  %v3798_v51 = vld [vmem:[#allocation2 + $0x28] sm:$0xff] }
  0x9d   : > { %14274 = vmatpush3.msk.msra.mxu1 %vm20642_vm13, %v16953_v62  ;;  %vm20645_vm12 = vmmov %vm20640_vm8  ;;  %vm20647_vm13 = vnez %v20473_v20  ;;  %v3406_v62 = vld [vmem:[#allocation2 + $0x117] sm:$0xff] }
  0x9e   : > { %15725 = vmatprep.subr.msk.mxu1 %vm20643_vm11, %v16585_v2  ;;  %v1757_v60 = vsel %vm20647_vm13, %v16755_v10, 0.0  ;;  %vm20649_vm11 = vmmov %vm20648_vm0  ;;  %v3430_v10 = vsel %vm17201_vm9, %v17256_v23, 0.0  ;;  %v3438_v61 = vsel %vm17293_vm1, %v3406_v62, 0.0 }
  0x9f   : > { %14229 = vmatmul.mubr.msk.f32.gmra.mrb[2].mxu1 %vm20644_vm14, %v1755_v25  ;;  %14450 = vmatmul.mubr.msk.f32.gmra.mrb[16].mxu0 %vm20645_vm12, %v17220_v34  ;;  %vm20650_vm14 = vmmov %vm20648_vm0  ;;  %v20678_v25 = vld [vmem:[#allocation26_spill] sm:$0xff] }
  0xa0   : > { %14231 = vmatprep.mubr.msk.f32.mxu1 %vm20640_vm8, %v16758_v14  ;;  %14452 = vmatprep.mubr.msk.f32.mxu0 %vm20646_vm2, %v3426_v33  ;;  %vm20651_vm12 = vmmov %vm20648_vm0  ;;  %vm20652_vm2 = vnez %v20478_v28  ;;  %v20681_v33 = vld [vmem:[#allocation28_spill] sm:$0xff] }
  0xa1   : > { %v1759_v2 = vsel %vm20652_vm2, %v16786_v21, 0.0  ;;  %vm20653_vm8 = vmmov %vm20648_vm0 }
  0xa2   : > { %vm20655_vm13 = vmmov %vm20648_vm0 }
  0xa3   : > { %14232 = vmatmul.mubr.msk.f32.gmra.mrb[4].mxu1 %vm20648_vm0, %v1757_v60  ;;  %14453 = vmatmul.mubr.msk.f32.gmra.mrb[18].mxu0 %vm20649_vm11, %v17244_v42  ;;  %vm20654_vm11 = vmmov %vm20648_vm0  ;;  %v20682_v60 = vld [vmem:[#allocation33_spill] sm:$0xff] }
  0xa4   : > { %14234 = vmatprep.mubr.msk.f32.mxu1 %vm20650_vm14, %v16780_v19  ;;  %14455 = vmatprep.mubr.msk.f32.mxu0 %vm20651_vm12, %v3428_v0  ;;  %vm20656_vm14 = vnez %v20483_v36  ;;  %v3432_v19 = vsel %vm17231_vm3, %v17277_v18, 0.0  ;;  %vm20657_vm12 = vmmov %vm20648_vm0  ;;  %v3799_v0 = vld [vmem:[#allocation2 + $0x30] sm:$0xff] }
  0xa5   : > { %v1761_v14 = vsel %vm20656_vm14, %v16811_v29, 0.0  ;;  %vm20659_vm2 = vmmov %vm20648_vm0  ;;  %v17399_v29 = vld [vmem:[#allocation2 + $0x107] sm:$0xff] }
  0xa7   : > { %14235 = vmatmul.mubr.msk.f32.gmra.mrb[6].mxu1 %vm20653_vm8, %v1759_v2  ;;  %14456 = vmatmul.mubr.msk.f32.gmra.mrb[20].mxu0 %vm20648_vm0, %v17265_v11  ;;  %vm20658_vm8 = vmmov %vm20648_vm0  ;;  %v3800_v2 = vld [vmem:[#allocation2 + $0x38] sm:$0xff] }
  0xa8   : > { %14237 = vmatprep.mubr.msk.f32.mxu1 %vm20654_vm11, %v16805_v27  ;;  %14458 = vmatprep.mubr.msk.f32.mxu0 %vm20655_vm13, %v3430_v10  ;;  %vm20660_vm13 = vnez %v20488_v44  ;;  %v3434_v27 = vsel %vm17252_vm10, %v17297_v49, 0.0  ;;  %vm20661_vm11 = vmmov %vm20648_vm0  ;;  %v20689_v10 = vld [vmem:[#allocation34_spill] sm:$0xff] }
  0xa9   : > { %v1763_v21 = vsel %vm20660_vm13, %v16834_v37, 0.0  ;;  %v3436_v37 = vsel %vm17273_vm15, %v17399_v29, 0.0  ;;  %vm20665_vm13 = vmmov %vm20648_vm0 }
  0xab   : > { %14238 = vmatmul.mubr.msk.f32.gmra.mrb[8].mxu1 %vm20657_vm12, %v1761_v14  ;;  %14459 = vmatmul.mubr.msk.f32.gmra.mrb[22].mxu0 %vm20658_vm8, %v17285_v40  ;;  %vm20662_vm12 = vmmov %vm20648_vm0  ;;  %v20690_v14 = vld [vmem:[#allocation38_spill] sm:$0xff] }
  0xac   : > { %14240 = vmatprep.mubr.msk.f32.mxu1 %vm20648_vm0, %v16828_v35  ;;  %14461 = vmatprep.mubr.msk.f32.mxu0 %vm20659_vm2, %v3432_v19  ;;  %vm20663_vm8 = vmmov %vm20648_vm0  ;;  %vm20664_vm2 = vnez %v20493_v55 }
  0xad   : > { %v1765_v35 = vsel %vm20664_vm2, %v16857_v45, 0.0  ;;  %v17422_v45 = vld [vmem:[#allocation2 + $0x10f] sm:$0xff] }
  0xaf   : > { %14241 = vmatmul.mubr.msk.f32.gmra.mrb[10].mxu1 %vm20661_vm11, %v1763_v21  ;;  %14462 = vmatmul.mubr.msk.f32.gmra.mrb[24].mxu0 %vm20662_vm12, %v17305_v17  ;;  %vm20666_vm11 = vmmov %vm20648_vm0  ;;  %v3801_v21 = vld [vmem:[#allocation2 + $0x40] sm:$0xff] }
  0xb0   : > { %14243 = vmatprep.mubr.msk.f32.mxu1 %vm20663_vm8, %v16851_v43  ;;  %14464 = vmatprep.mubr.msk.f32.mxu0 %vm20648_vm0, %v3434_v27  ;;  %vm20667_vm12 = vmmov %vm20648_vm0  ;;  %v3802_v27 = vld [vmem:[#allocation2 + $0x48] sm:$0xff] }
  0xb1   : > { %vm20668_vm8 = vmmov %vm20648_vm0  ;;  %vm20669_vm0 = vnez %v20500_v12 }
  0xb2   : > { %v1767_v43 = vsel %vm20669_vm0, %v16882_v56, 0.0  ;;  %vm20670_vm2 = vmmov %vm20668_vm8  ;;  %v3407_v56 = vld [vmem:[#allocation2 + $0x11f] sm:$0xff] }
  0xb3   : > { %14244 = vmatmul.mubr.msk.f32.gmra.mrb[12].mxu1 %vm20665_vm13, %v1765_v35  ;;  %14465 = vmatmul.mubr.msk.f32.gmra.mrb[26].mxu0 %vm20666_vm11, %v17319_v31  ;;  %vm20671_vm13 = vmmov %vm20670_vm2  ;;  %v20694_v35 = vld [vmem:[#allocation37_spill] sm:$0xff] }
  0xb4   : > { %14246 = vmatprep.mubr.msk.f32.mxu1 %vm20667_vm12, %v16876_v54  ;;  %14467 = vmatprep.mubr.msk.f32.mxu0 %vm20668_vm8, %v3436_v37  ;;  %vm20672_vm11 = vmmov %vm20670_vm2  ;;  %v20674_v54 = vld [vmem:[#allocation27_spill] sm:$0xff] }
  0xb5   : > { %vm20673_vm12 = vmmov %vm20670_vm2  ;;  %vm20675_vm8 = vnez %v20674_v54  ;;  %v20698_v37 = vld [vmem:[#allocation43_spill] sm:$0xff] }
  0xb6   : > { %v1769_v53 = vsel %vm20675_vm8, %v16910_v13, 0.0  ;;  %vm20676_vm0 = vmmov %vm20670_vm2  ;;  %vm20686_vm8 = vcmask 1043456   ;;  %v20687_v13 = vld [vmem:[#allocation32_spill] sm:$0xff] }
  0xb7   : > { %14247 = vmatmul.mubr.msk.f32.gmra.mrb[14].mxu1 %vm20670_vm2, %v1767_v43  ;;  %14468 = vmatmul.mubr.msk.f32.gmra.mrb[28].mxu0 %vm20671_vm13, %v17422_v45  ;;  %vm20677_vm15 = vmmov %vm20676_vm0  ;;  %vm20683_vm13 = vnez %v20682_v60  ;;  %v3803_v43 = vld [vmem:[#allocation2 + $0x50] sm:$0xff] }
  0xb8   : > { %14249 = vmatprep.mubr.msk.f32.mxu1 %vm20672_vm11, %v16904_v7  ;;  %14470 = vmatprep.mubr.msk.f32.mxu0 %vm20673_vm12, %v3438_v61  ;;  %vm20679_vm2 = vmmov %vm20676_vm0  ;;  %v1771_v7 = vsel %vm20683_vm13, %v20681_v33, 0.0  ;;  %v3804_v61 = vld [vmem:[#allocation2 + $0x58] sm:$0xff]  ;;  %v3805_v33 = vld [vmem:[#allocation2 + $0x60] sm:$0xff] }
  0xb9   : > { %vm20680_vm1 = vmmov %vm20676_vm0 }
  0xba   : > { %vm20684_vm11 = vmmov %vm20676_vm0 }
  0xbb   : > { %14250 = vmatmul.mubr.msk.f32.gmra.mrb[16].mxu1 %vm20676_vm0, %v1769_v53  ;;  %14471 = vmatmul.mubr.msk.f32.gmra.mrb[30].mxu0 %vm20677_vm15, %v3407_v56  ;;  %vm20685_vm12 = vmmov %vm20676_vm0  ;;  %v20702_v53 = vld [vmem:[#allocation42_spill] sm:$0xff]  ;;  %v20705_v56 = vld [vmem:[#allocation44_spill] sm:$0xff] }
  0xbc   : > { %14252 = vmatprep.mubr.msk.f32.mxu1 %vm20679_vm2, %v20678_v25  ;;  %14475 = vmatprep.mubr.msk.f32.mxu0 %vm20680_vm1, %v3798_v51  ;;  %vm20688_vm15 = vmmov %vm20676_vm0  ;;  %vm20691_vm0 = vnez %v20690_v14  ;;  %v20706_v51 = vld [vmem:[#allocation48_spill] sm:$0xff] }
  0xbd   : > { %v1773_v19 = vsel %vm20691_vm0, %v20689_v10, 0.0  ;;  %vm20692_vm2 = vmmov %vm20680_vm1 }
  0xbe   : > { %vm20693_vm13 = vmmov %vm20680_vm1 }
  0xbf   : > { %14253 = vmatmul.mubr.msk.f32.gmra.mrb[18].mxu1 %vm20684_vm11, %v1771_v7  ;;  %14476 = vmatmul.mubr.msk.f32.vlgmr.msra.gmra.mrb[0].mxu0 %vm20685_vm12, %v3799_v0  ;;  %vm20695_vm11 = vmmov %vm20680_vm1  ;;  %v3806_v7 = vld [vmem:[#allocation2 + $0x68] sm:$0xff]  ;;  %v20710_v0 = vld [vmem:[#allocation47_spill] sm:$0xff] }
  0xc0   : > { %14524 = vmatpush3.msk.msra.mxu0 %vm20686_vm8, %v17211_v41  ;;  %14255 = vmatprep.mubr.msk.f32.mxu1 %vm20688_vm15, %v20687_v13  ;;  %vm20696_vm12 = vmmov %vm20680_vm1  ;;  %v20697_v41 = vld [vmem:[#allocation39_spill] sm:$0xff]  ;;  %vm20699_vm8 = vnez %v20698_v37  ;;  %v20714_v13 = vld [vmem:[#allocation52_spill] sm:$0xff] }
  0xc1   : > { %14478 = vmatprep.mubr.msk.f32.mxu0 %vm20680_vm1, %v3800_v2  ;;  %v1775_v62 = vsel %vm20699_vm8, %v20697_v41, 0.0  ;;  %vm20700_vm15 = vmmov %vm20680_vm1  ;;  %v20713_v2 = vld [vmem:[#allocation49_spill] sm:$0xff] }
  0xc2   : > { %vm20701_vm0 = vmmov %vm20680_vm1  ;;  %v20721_v41 = vld [vmem:[#allocation57_spill] sm:$0xff] }
  0xc3   : > { %14256 = vmatmul.mubr.msk.f32.gmra.mrb[20].mxu1 %vm20692_vm2, %v1773_v19  ;;  %14479 = vmatmul.mubr.msk.f32.gmra.mrb[2].mxu0 %vm20693_vm13, %v3801_v21  ;;  %vm20703_vm1 = vmmov %vm20701_vm0  ;;  %vm20707_vm13 = vnez %v20706_v51  ;;  %v3807_v19 = vld [vmem:[#allocation2 + $0x70] sm:$0xff]  ;;  %v3808_v21 = vld [vmem:[#allocation2 + $0x78] sm:$0xff] }
  0xc4   : > { %14258 = vmatprep.mubr.msk.f32.mxu1 %vm20695_vm11, %v20694_v35  ;;  %14481 = vmatprep.mubr.msk.f32.mxu0 %vm20696_vm12, %v3802_v27  ;;  %vm20704_vm2 = vmmov %vm20701_vm0  ;;  %v1777_v25 = vsel %vm20707_vm13, %v20705_v56, 0.0  ;;  %v20717_v27 = vld [vmem:[#allocation51_spill] sm:$0xff]  ;;  %v20720_v35 = vld [vmem:[#allocation53_spill] sm:$0xff] }
  0xc5   : > { %vm20708_vm11 = vmmov %vm20701_vm0 }
  0xc6   : > { %vm20709_vm12 = vmmov %vm20701_vm0 }
  0xc7   : > { %14259 = vmatmul.mubr.msk.f32.gmra.mrb[22].mxu1 %vm20700_vm15, %v1775_v62  ;;  %14482 = vmatmul.mubr.msk.f32.gmra.mrb[4].mxu0 %vm20701_vm0, %v3803_v43  ;;  %vm20711_vm8 = vmmov %vm20701_vm0  ;;  %v3809_v43 = vld [vmem:[#allocation2 + $0x80] sm:$0xff] }
  0xc8   : > { %14261 = vmatprep.mubr.msk.f32.mxu1 %vm20703_vm1, %v20702_v53  ;;  %14484 = vmatprep.mubr.msk.f32.mxu0 %vm20704_vm2, %v3804_v61  ;;  %vm20712_vm15 = vmmov %vm20701_vm0  ;;  %vm20715_vm0 = vnez %v20714_v13  ;;  %v3810_v61 = vld [vmem:[#allocation2 + $0x88] sm:$0xff]  ;;  %v20739_v13 = vld [vmem:[#allocation31_spill] sm:$0xff] }
  0xc9   : > { %v1779_v10 = vsel %vm20715_vm0, %v20713_v2, 0.0  ;;  %vm20716_vm2 = vmmov %vm20703_vm1  ;;  %v20725_v53 = vld [vmem:[#allocation56_spill] sm:$0xff] }
  0xca   : > { %vm20718_vm13 = vmmov %vm20703_vm1 }
  0xcb   : > { %14262 = vmatmul.mubr.msk.f32.gmra.mrb[24].mxu1 %vm20708_vm11, %v1777_v25  ;;  %14485 = vmatmul.mubr.msk.f32.gmra.mrb[6].mxu0 %vm20709_vm12, %v3805_v33  ;;  %vm20719_vm11 = vmmov %vm20703_vm1  ;;  %v20728_v25 = vld [vmem:[#allocation58_spill] sm:$0xff] }
  0xcc   : > { %14264 = vmatprep.mubr.msk.f32.mxu1 %vm20711_vm8, %v20710_v0  ;;  %14487 = vmatprep.mubr.msk.f32.mxu0 %vm20712_vm15, %v3806_v7  ;;  %vm20722_vm8 = vnez %v20721_v41  ;;  %vm20723_vm12 = vmmov %vm20703_vm1  ;;  %v3811_v7 = vld [vmem:[#allocation2 + $0x90] sm:$0xff]  ;;  %v17496_v41 = vld [vmem:[#allocation2 + $0x98] sm:$0xff] }
  0xcd   : > { %v1781_v62 = vsel %vm20722_vm8, %v20720_v35, 0.0  ;;  %vm20724_vm15 = vmmov %vm20703_vm1 }
  0xce   : > { %vm20726_vm0 = vmmov %vm20703_vm1 }
  0xcf   : > { %14265 = vmatmul.mubr.msk.f32.gmra.mrb[26].mxu1 %vm20703_vm1, %v1779_v10  ;;  %14488 = vmatmul.mubr.msk.f32.gmra.mrb[8].mxu0 %vm20716_vm2, %v3807_v19  ;;  %vm20727_vm1 = vmmov %vm20726_vm0  ;;  %v20730_v10 = vld [vmem:[#allocation25_spill] sm:$0xff] }
  0xd0   : > { %14267 = vmatprep.mubr.msk.f32.mxu1 %vm20718_vm13, %v20717_v27  ;;  %14490 = vmatprep.mubr.msk.f32.mxu0 %vm20719_vm11, %v3808_v21  ;;  %vm20729_vm13 = vnez %v20585_v47  ;;  %v20731_v19 = vld [vmem:[#allocation21_spill] sm:$0xff]  ;;  %vm20733_vm11 = vmmov %vm20726_vm0 }
  0xd1   : > { %v1783_v33 = vsel %vm20729_vm13, %v20728_v25, 0.0  ;;  %vm20732_vm2 = vnez %v20731_v19  ;;  %vm20740_vm13 = vmmov %vm20726_vm0 }
  0xd2   : > { %v2174_v21 = vsel %vm20732_vm2, %v20730_v10, 0.0  ;;  %vm20741_vm2 = vmmov %vm20726_vm0  ;;  %v20746_v10 = vld [vmem:[#allocation35_spill] sm:$0xff] }
  0xd3   : > { %14268 = vmatmul.mubr.msk.f32.gmra.mrb[28].mxu1 %vm20723_vm12, %v1781_v62  ;;  %14491 = vmatmul.mubr.msk.f32.gmra.mrb[10].mxu0 %vm20724_vm15, %v3809_v43  ;;  %vm20734_vm12 = vmmov %vm20726_vm0  ;;  %v17503_v62 = vld [vmem:[#allocation2 + $0xa0] sm:$0xff]  ;;  %v20736_v43 = vld [vmem:[#allocation30_spill] sm:$0xff] }
  0xd4   : > { %14270 = vmatprep.mubr.msk.f32.mxu1 %vm20726_vm0, %v20725_v53  ;;  %14493 = vmatprep.mubr.msk.f32.mxu0 %vm20727_vm1, %v3810_v61  ;;  %vm20735_vm15 = vmmov %vm20726_vm0  ;;  %v20737_v61 = vld [vmem:[#allocation24_spill] sm:$0xff] }
  0xd5   : > { %vm20738_vm1 = vnez %v20737_v61  ;;  %v20749_v61 = vld [vmem:[#allocation36_spill] sm:$0xff] }
  0xd6   : > { %v2176_v47 = vsel %vm20738_vm1, %v20736_v43, 0.0  ;;  %vm20756_vm1 = vnez %v20522_v38 }
  0xd7   : > { %14271 = vmatmul.mubr.msk.f32.gmra.mrb[30].mxu1 %vm20733_vm11, %v1783_v33  ;;  %14494 = vmatmul.mubr.msk.f32.gmra.mrb[12].mxu0 %vm20734_vm12, %v3811_v7  ;;  %vm20742_vm11 = vmmov %vm20726_vm0  ;;  %v20743_v33 = vld [vmem:[#allocation5_spill] sm:$0xff] }
  0xd8   : > { %14275 = vmatprep.mubr.msk.f32.mxu1 %vm20735_vm15, %v2174_v21  ;;  %14496 = vmatprep.mubr.msk.f32.mxu0 %vm20726_vm0, %v17496_v41  ;;  %vm20744_vm12 = vmmov %vm20726_vm0  ;;  %v16504_v7 = vld [vmem:[%s20103_s1 + $0x10] sm:$0xf]  ;;  %vm20745_vm15 = vcmask 1043456  }
  0xd9   : > { %v20747_v21 = vld [vmem:[#allocation29_spill] sm:$0xff] }
  0xda   : > { %vm20748_vm0 = vnez %v20747_v21  ;;  %v20759_v21 = vld [vmem:[#allocation9_spill] sm:$0xff] }
  0xdb   : > { %14276 = vmatmul.mubr.msk.f32.vlgmr.msra.gmra.mrb[0].mxu1 %vm20740_vm13, %v20739_v13  ;;  %14497 = vmatmul.mubr.msk.f32.gmra.mrb[14].mxu0 %vm20741_vm2, %v17503_v62  ;;  %v2178_v43 = vsel %vm20748_vm0, %v20746_v10, 0.0  ;;  %vm20750_vm13 = vmmov %vm20741_vm2  ;;  %v20751_v13 = vld [vmem:[#allocation6_spill] sm:$0xff]  ;;  %v20764_v10 = vld [vmem:[#allocation45_spill] sm:$0xff] }
  0xdc   : > { %14278 = vmatprep.mubr.msk.f32.mxu1 %vm20742_vm11, %v2176_v47  ;;  %14499 = vmatprep.mubr.msk.f32.mxu0 %vm20744_vm12, %v20743_v33  ;;  %vm20752_vm11 = vmmov %vm20741_vm2  ;;  %v20753_v47 = vld [vmem:[#allocation7_spill] sm:$0xff]  ;;  %v20755_v33 = vld [vmem:[#allocation40_spill] sm:$0xff] }
  0xdd   : > { %15726 = vmatpush3.msk.msra.mxu1 %vm20745_vm15, %v16504_v7  ;;  %vm20754_vm12 = vmmov %vm20741_vm2  ;;  %v2180_v19 = vsel %vm20756_vm1, %v20755_v33, 0.0  ;;  %v20757_v7 = vld [vmem:[#allocation41_spill] sm:$0xff] }
  0xde   : > { %vm20758_vm15 = vmmov %vm20741_vm2  ;;  %v20771_v33 = vld [vmem:[#allocation13_spill] sm:$0xff] }
  0xdf   : > { %14279 = vmatmul.mubr.msk.f32.gmra.mrb[2].mxu1 %vm20750_vm13, %v20749_v61  ;;  %14500 = vmatmul.mubr.msk.f32.gmra.mrb[16].mxu0 %vm20741_vm2, %v20751_v13  ;;  %vm20760_vm0 = vmmov %vm20741_vm2  ;;  %v20762_v61 = vld [vmem:[#allocation10_spill] sm:$0xff]  ;;  %vm20765_vm2 = vnez %v20531_v50 }
  0xe0   : > { %14281 = vmatprep.mubr.msk.f32.mxu1 %vm20752_vm11, %v2178_v43  ;;  %14502 = vmatprep.mubr.msk.f32.mxu0 %vm20754_vm12, %v20753_v47  ;;  %vm20761_vm8 = vmmov %vm20760_vm0  ;;  %v2182_v43 = vsel %vm20765_vm2, %v20764_v10, 0.0  ;;  %v20766_v13 = vld [vmem:[#allocation46_spill] sm:$0xff]  ;;  %v20768_v47 = vld [vmem:[#allocation12_spill] sm:$0xff] }
  0xe1   : > { %vm20763_vm13 = vmmov %vm20760_vm0  ;;  %v20780_v10 = vld [vmem:[#allocation54_spill] sm:$0xff] }
  0xe2   : > { %vm20767_vm11 = vmmov %vm20760_vm0 }
  0xe3   : > { %14282 = vmatmul.mubr.msk.f32.gmra.mrb[4].mxu1 %vm20758_vm15, %v20757_v7  ;;  %14503 = vmatmul.mubr.msk.f32.gmra.mrb[18].mxu0 %vm20760_vm0, %v20759_v21  ;;  %vm20769_vm12 = vmmov %vm20760_vm0  ;;  %v20773_v21 = vld [vmem:[#allocation50_spill] sm:$0xff]  ;;  %v20775_v7 = vld [vmem:[#allocation15_spill] sm:$0xff] }
  0xe4   : > { %14284 = vmatprep.mubr.msk.f32.mxu1 %vm20761_vm8, %v2180_v19  ;;  %14505 = vmatprep.mubr.msk.f32.mxu0 %vm20763_vm13, %v20762_v61  ;;  %vm20770_vm1 = vmmov %vm20760_vm0  ;;  %vm20774_vm8 = vnez %v20544_v24  ;;  %v20778_v61 = vld [vmem:[#allocation16_spill] sm:$0xff] }
  0xe5   : > { %vm20772_vm15 = vmmov %vm20760_vm0  ;;  %v2184_v19 = vsel %vm20774_vm8, %v20773_v21, 0.0  ;;  %v17572_v21 = vld [vmem:[#allocation2 + $0x108] sm:$0xff] }
  0xe6   : > { %vm20776_vm13 = vmmov %vm20760_vm0 }
  0xe7   : > { %14285 = vmatmul.mubr.msk.f32.gmra.mrb[6].mxu1 %vm20767_vm11, %v20766_v13  ;;  %14506 = vmatmul.mubr.msk.f32.gmra.mrb[20].mxu0 %vm20769_vm12, %v20768_v47  ;;  %vm20777_vm2 = vmmov %vm20760_vm0  ;;  %v20782_v13 = vld [vmem:[#allocation55_spill] sm:$0xff]  ;;  %v20784_v47 = vld [vmem:[#allocation18_spill] sm:$0xff] }
  0xe8   : > { %14287 = vmatprep.mubr.msk.f32.mxu1 %vm20770_vm1, %v2182_v43  ;;  %14508 = vmatprep.mubr.msk.f32.mxu0 %vm20772_vm15, %v20771_v33  ;;  %vm20779_vm11 = vmmov %vm20760_vm0  ;;  %vm20781_vm1 = vnez %v20556_v39  ;;  %v2188_v33 = vsel %vm17099_vm6, %v17132_v22, 0.0  ;;  %v3828_v22 = vld [vmem:[#allocation2 + $0x118] sm:$0xff] }
  0xe9   : > { %v2186_v43 = vsel %vm20781_vm1, %v20780_v10, 0.0  ;;  %vm20783_vm12 = vmmov %vm20760_vm0  ;;  %v2192_v10 = vsel %vm17157_vm7, %v17185_v30, 0.0  ;;  %v4191_v30 = vld [vmem:[#allocation2 + $0x41] sm:$0xff] }
  0xea   : > { %vm20785_vm15 = vmmov %vm20760_vm0 }
  0xeb   : > { %14288 = vmatmul.mubr.msk.f32.gmra.mrb[8].mxu1 %vm20760_vm0, %v17082_v26  ;;  %14509 = vmatmul.mubr.msk.f32.gmra.mrb[22].mxu0 %vm20776_vm13, %v20775_v7  ;;  %vm20786_vm8 = vmmov %vm20760_vm0  ;;  %v20787_v26 = vld [vmem:[#allocation19_spill] sm:$0xff]  ;;  %v17581_v7 = vld [vmem:[#allocation2 + $0x110] sm:$0xff] }
  0xec   : > { %14290 = vmatprep.mubr.msk.f32.mxu1 %vm20777_vm2, %v2184_v19  ;;  %14511 = vmatprep.mubr.msk.f32.mxu0 %vm20779_vm11, %v20778_v61  ;;  %vm20788_vm2 = vmmov %vm20760_vm0  ;;  %v20789_v19 = vld [vmem:[#allocation22_spill] sm:$0xff]  ;;  %v2190_v61 = vsel %vm17128_vm5, %v17161_v1, 0.0 }
  0xed   : > { %vm20790_vm13 = vmmov %vm20760_vm0 }
  0xee   : > { %vm20791_vm11 = vmmov %vm20760_vm0 }
  0xef   : > { %14291 = vmatmul.mubr.msk.f32.gmra.mrb[10].mxu1 %vm20783_vm12, %v20782_v13  ;;  %14512 = vmatmul.mubr.msk.f32.gmra.mrb[24].mxu0 %vm20785_vm15, %v20784_v47  ;;  %vm20792_vm12 = vmmov %vm20760_vm0  ;;  %v4189_v13 = vld [vmem:[#allocation2 + $0x31] sm:$0xff]  ;;  %v4190_v47 = vld [vmem:[#allocation2 + $0x39] sm:$0xff] }
  0xf0   : > { %14293 = vmatprep.mubr.msk.f32.mxu1 %vm20786_vm8, %v2186_v43  ;;  %14514 = vmatprep.mubr.msk.f32.mxu0 %vm20760_vm0, %v20787_v26  ;;  %vm20793_vm8 = vmmov %vm20760_vm0  ;;  %v4188_v43 = vld [vmem:[#allocation2 + $0x29] sm:$0xff]  ;;  %v2196_v26 = vsel %vm17201_vm9, %v17235_v15, 0.0  ;;  %v4195_v15 = vld [vmem:[#allocation2 + $0x61] sm:$0xff] }
  0xf1   : > { %vm20794_vm15 = vmmov %vm20760_vm0 }
  0xf3   : > { %14294 = vmatmul.mubr.msk.f32.gmra.mrb[12].mxu1 %vm20788_vm2, %v17141_v6  ;;  %14515 = vmatmul.mubr.msk.f32.gmra.mrb[26].mxu0 %vm20790_vm13, %v20789_v19  ;;  %vm20795_vm2 = vmmov %vm20760_vm0  ;;  %v3829_v6 = vld [vmem:[#allocation2 + $0x120] sm:$0xff]  ;;  %v2198_v19 = vsel %vm17231_vm3, %v17256_v23, 0.0  ;;  %v4197_v23 = vld [vmem:[#allocation2 + $0x71] sm:$0xff] }
  0xf4   : > { %14296 = vmatprep.mubr.msk.f32.mxu1 %vm20791_vm11, %v2188_v33  ;;  %14517 = vmatprep.mubr.msk.f32.mxu0 %vm20792_vm12, %v17572_v21  ;;  %vm20796_vm13 = vmmov %vm20760_vm0  ;;  %v4192_v33 = vld [vmem:[#allocation2 + $0x49] sm:$0xff] }
  0xf5   : > { %vm20797_vm11 = vmmov %vm20760_vm0 }
  0xf6   : > { %vm20798_vm12 = vmmov %vm20760_vm0 }
  0xf7   : > { %14297 = vmatmul.mubr.msk.f32.gmra.mrb[14].mxu1 %vm20793_vm8, %v17170_v8  ;;  %14518 = vmatmul.mubr.msk.f32.gmra.mrb[28].mxu0 %vm20794_vm15, %v17581_v7  ;;  %vm20799_vm8 = vmmov %vm20760_vm0  ;;  %vm20800_vm15 = vnez %v20466_v63  ;;  %v2194_v8 = vsel %vm17181_vm4, %v17205_v59, 0.0  ;;  %v4193_v59 = vld [vmem:[#allocation2 + $0x51] sm:$0xff] }
  0xf8   : > { %14299 = vmatprep.mubr.msk.f32.mxu1 %vm20760_vm0, %v2190_v61  ;;  %14520 = vmatprep.mubr.msk.f32.mxu0 %vm20795_vm2, %v3828_v22  ;;  %v4221_v1 = vsel %vm20800_vm15, %v4189_v13, 0.0  ;;  %vm20801_vm2 = vmmov %vm20760_vm0  ;;  %v4194_v61 = vld [vmem:[#allocation2 + $0x59] sm:$0xff]  ;;  %v2200_v22 = vsel %vm17252_vm10, %v17277_v18, 0.0  ;;  %v4199_v18 = vld [vmem:[#allocation2 + $0x81] sm:$0xff] }
  0xf9   : > { %vm20806_vm15 = vmmov %vm20760_vm0 }
  0xfb   : > { %14300 = vmatmul.mubr.msk.f32.gmra.mrb[16].mxu1 %vm20796_vm13, %v17193_v32  ;;  %14521 = vmatmul.mubr.msk.f32.gmra.mrb[30].mxu0 %vm20797_vm11, %v3829_v6  ;;  %vm20802_vm13 = vmmov %vm20760_vm0  ;;  %v4196_v6 = vld [vmem:[#allocation2 + $0x69] sm:$0xff] }
  0xfc   : > { %14302 = vmatprep.mubr.msk.f32.mxu1 %vm20798_vm12, %v2192_v10  ;;  %14525 = vmatprep.mubr.msk.f32.mxu0 %vm20799_vm8, %v4188_v43  ;;  %vm20803_vm11 = vmmov %vm20760_vm0  ;;  %vm20804_vm12 = vnez %v20469_v9  ;;  %v4198_v43 = vld [vmem:[#allocation2 + $0x79] sm:$0xff] }
  0xfd   : > { %v4223_v32 = vsel %vm20804_vm12, %v4191_v30, 0.0  ;;  %vm20805_vm8 = vmmov %vm20760_vm0  ;;  %v4204_v30 = vld [vmem:[#allocation2 + $0xa9] sm:$0xff] }
  0xfe   : > { %vm20810_vm12 = vmmov %vm20760_vm0 }
  0xff   : > { %14303 = vmatmul.mubr.msk.f32.gmra.mrb[18].mxu1 %vm20760_vm0, %v17220_v34  ;;  %14526 = vmatmul.mubr.msk.f32.vlgmr.msra.gmra.mrb[0].mxu0 %vm20801_vm2, %v4221_v1  ;;  %vm20807_vm2 = vmmov %vm20760_vm0  ;;  %v4200_v1 = vld [vmem:[#allocation2 + $0x89] sm:$0xff] }
 0x100   : > { %14305 = vmatprep.mubr.msk.f32.mxu1 %vm20802_vm13, %v2194_v8  ;;  %14528 = vmatprep.mubr.msk.f32.mxu0 %vm20803_vm11, %v4190_v47  ;;  %vm20808_vm13 = vnez %v20473_v20  ;;  %vm20809_vm11 = vmmov %vm20760_vm0  ;;  %v4202_v8 = vld [vmem:[#allocation2 + $0x99] sm:$0xff]  ;;  %v4203_v47 = vld [vmem:[#allocation2 + $0xa1] sm:$0xff] }
 0x101   : > { %v4225_v34 = vsel %vm20808_vm13, %v4193_v59, 0.0  ;;  %vm20814_vm13 = vmmov %vm20807_vm2  ;;  %v4207_v59 = vld [vmem:[#allocation2 + $0xc1] sm:$0xff] }
 0x103   : > { %14306 = vmatmul.mubr.msk.f32.gmra.mrb[20].mxu1 %vm20805_vm8, %v17244_v42  ;;  %14529 = vmatmul.mubr.msk.f32.gmra.mrb[2].mxu0 %vm20806_vm15, %v4223_v32  ;;  %vm20811_vm8 = vmmov %vm20760_vm0  ;;  %v4205_v32 = vld [vmem:[#allocation2 + $0xb1] sm:$0xff] }
 0x104   : > { %14308 = vmatprep.mubr.msk.f32.mxu1 %vm20760_vm0, %v2196_v26  ;;  %14531 = vmatprep.mubr.msk.f32.mxu0 %vm20807_vm2, %v4192_v33  ;;  %vm20812_vm15 = vmmov %vm20760_vm0  ;;  %vm20813_vm0 = vnez %v20478_v28  ;;  %v2584_v26 = vld [vmem:[#allocation2 + $0xb8] sm:$0xff] }
 0x105   : > { %v4227_v42 = vsel %vm20813_vm0, %v4195_v15, 0.0  ;;  %vm20819_vm0 = vmmov %vm20807_vm2  ;;  %v4206_v33 = vld [vmem:[#allocation2 + $0xb9] sm:$0xff]  ;;  %v2587_v15 = vld [vmem:[#allocation2 + $0xd0] sm:$0xff] }
 0x106   : > { %vm20844_vm10 = vmmov %vm20819_vm0 }
 0x107   : > { %14309 = vmatmul.mubr.msk.f32.gmra.mrb[22].mxu1 %vm20809_vm11, %v17265_v11  ;;  %14532 = vmatmul.mubr.msk.f32.gmra.mrb[4].mxu0 %vm20810_vm12, %v4225_v34  ;;  %vm20815_vm11 = vmmov %vm20807_vm2  ;;  %v4229_v11 = vsel %vm20656_vm14, %v4197_v23, 0.0 }
 0x108   : > { %14311 = vmatprep.mubr.msk.f32.mxu1 %vm20811_vm8, %v2198_v19  ;;  %14534 = vmatprep.mubr.msk.f32.mxu0 %vm20812_vm15, %v4194_v61  ;;  %vm20816_vm12 = vmmov %vm20807_vm2  ;;  %vm20817_vm8 = vnez %v20619_v16  ;;  %v2586_v19 = vld [vmem:[#allocation2 + $0xc8] sm:$0xff] }
 0x109   : > { %v2202_v10 = vsel %vm20817_vm8, %v17297_v49, 0.0  ;;  %vm20818_vm15 = vmmov %vm20807_vm2  ;;  %v4201_v49 = vld [vmem:[#allocation2 + $0x91] sm:$0xff]  ;;  %v4208_v61 = vld [vmem:[#allocation2 + $0xc9] sm:$0xff] }
 0x10a   : > { %vm20824_vm14 = vmmov %vm20819_vm0 }
 0x10b   : > { %14312 = vmatmul.mubr.msk.f32.gmra.mrb[24].mxu1 %vm20807_vm2, %v17285_v40  ;;  %14535 = vmatmul.mubr.msk.f32.gmra.mrb[6].mxu0 %vm20814_vm13, %v4227_v42  ;;  %vm20820_vm2 = vmmov %vm20819_vm0 }
 0x10c   : > { %14314 = vmatprep.mubr.msk.f32.mxu1 %vm20815_vm11, %v2200_v22  ;;  %14537 = vmatprep.mubr.msk.f32.mxu0 %vm20816_vm12, %v4196_v6  ;;  %vm20821_vm13 = vmmov %vm20819_vm0  ;;  %vm20822_vm11 = vnez %v20488_v44  ;;  %vm20823_vm12 = vnez %v20625_v46  ;;  %v2588_v22 = vld [vmem:[#allocation2 + $0xd8] sm:$0xff]  ;;  %v2589_v6 = vld [vmem:[#allocation2 + $0xe0] sm:$0xff] }
 0x10d   : > { %v4231_v40 = vsel %vm20822_vm11, %v4199_v18, 0.0  ;;  %v2204_v13 = vsel %vm20823_vm12, %v17399_v29, 0.0  ;;  %vm20825_vm8 = vmmov %vm20819_vm0  ;;  %v2582_v29 = vld [vmem:[#allocation2 + $0xa8] sm:$0xff]  ;;  %v20865_v18 = vld [vmem:[#allocation61_spill] sm:$0xff] }
 0x10e   : > { %vm20829_vm11 = vmmov %vm20819_vm0 }
 0x10f   : > { %14315 = vmatmul.mubr.msk.f32.gmra.mrb[26].mxu1 %vm20818_vm15, %v17305_v17  ;;  %14538 = vmatmul.mubr.msk.f32.gmra.mrb[8].mxu0 %vm20819_vm0, %v4229_v11  ;;  %vm20826_vm15 = vmmov %vm20819_vm0  ;;  %v2590_v11 = vld [vmem:[#allocation2 + $0xe8] sm:$0xff] }
 0x110   : > { %14317 = vmatprep.mubr.msk.f32.mxu1 %vm20820_vm2, %v2202_v10  ;;  %14540 = vmatprep.mubr.msk.f32.mxu0 %vm20821_vm13, %v4198_v43  ;;  %vm20827_vm2 = vnez %v20493_v55  ;;  %vm20828_vm13 = vmmov %vm20819_vm0  ;;  %v2592_v10 = vld [vmem:[#allocation2 + $0xf8] sm:$0xff]  ;;  %v20858_v43 = vld [vmem:[#allocation52_spill] sm:$0xff] }
 0x111   : > { %v4233_v17 = vsel %vm20827_vm2, %v4201_v49, 0.0  ;;  %vm20830_vm12 = vmmov %vm20819_vm0 }
 0x112   : > { %vm20834_vm2 = vmmov %vm20819_vm0 }
 0x113   : > { %14318 = vmatmul.mubr.msk.f32.gmra.mrb[28].mxu1 %vm20824_vm14, %v17319_v31  ;;  %14541 = vmatmul.mubr.msk.f32.gmra.mrb[10].mxu0 %vm20825_vm8, %v4231_v40  ;;  %vm20831_vm14 = vmmov %vm20819_vm0  ;;  %vm20832_vm8 = vnez %v20500_v12  ;;  %v20866_v40 = vld [vmem:[#allocation57_spill] sm:$0xff] }
 0x114   : > { %14320 = vmatprep.mubr.msk.f32.mxu1 %vm20826_vm15, %v2204_v13  ;;  %14543 = vmatprep.mubr.msk.f32.mxu0 %vm20819_vm0, %v4200_v1  ;;  %v4235_v31 = vsel %vm20832_vm8, %v4203_v47, 0.0  ;;  %vm20833_vm15 = vmmov %vm20819_vm0  ;;  %v4219_v1 = vld [vmem:[#allocation2 + $0x121] sm:$0xff]  ;;  %v12535_v47 = vld [vmem:[%s20105_s3 + $0x38] sm:$0xff] }
 0x115   : > { %vm20839_vm8 = vmmov %vm20819_vm0 }
 0x117   : > { %14321 = vmatmul.mubr.msk.f32.gmra.mrb[30].mxu1 %vm20828_vm13, %v17422_v45  ;;  %14544 = vmatmul.mubr.msk.f32.gmra.mrb[12].mxu0 %vm20829_vm11, %v4233_v17  ;;  %vm20835_vm13 = vmmov %vm20819_vm0  ;;  %v2583_v45 = vld [vmem:[#allocation2 + $0xb0] sm:$0xff]  ;;  %vm20836_vm11 = vnez %v20674_v54  ;;  %v12533_v17 = vld [vmem:[%s20105_s3 + $0x28] sm:$0xff] }
 0x118   : > { %14349 = vmatprep.mubr.msk.f32.mxu1 %vm20830_vm12, %v17496_v41  ;;  %14546 = vmatprep.mubr.msk.f32.mxu0 %vm20831_vm14, %v4202_v8  ;;  %v4237_v41 = vsel %vm20836_vm11, %v4205_v32, 0.0  ;;  %vm20837_vm12 = vmmov %vm20819_vm0 }
 0x119   : > { %vm20838_vm14 = vmmov %vm20819_vm0 }
 0x11a   : > { %vm20843_vm11 = vmmov %vm20819_vm0 }
 0x11b   : > { %14350 = vmatmul.mubr.msk.f32.vlgmr.msra.gmra.mrb[16].mxu1 %vm20833_vm15, %v17503_v62  ;;  %14547 = vmatmul.mubr.msk.f32.gmra.mrb[14].mxu0 %vm20819_vm0, %v4235_v31  ;;  %vm20840_vm15 = vmmov %vm20819_vm0  ;;  %v2585_v62 = vld [vmem:[#allocation2 + $0xc0] sm:$0xff] }
 0x11c   : > { %14352 = vmatprep.mubr.msk.f32.mxu1 %vm20834_vm2, %v2582_v29  ;;  %14549 = vmatprep.mubr.msk.f32.mxu0 %vm20835_vm13, %v4204_v30  ;;  %vm20841_vm2 = vnez %v20682_v60  ;;  %vm20842_vm13 = vmmov %vm20819_vm0  ;;  %v20873_v29 = vmov 0.0  }
 0x11d   : > { %v4239_v34 = vsel %vm20841_vm2, %v4207_v59, 0.0  ;;  %v4780_v59 = vld [vmem:[%s20105_s3 + $0x18] sm:$0xff] }
 0x11f   : > { %14353 = vmatmul.mubr.msk.f32.gmra.mrb[18].mxu1 %vm20837_vm12, %v2583_v45  ;;  %14550 = vmatmul.mubr.msk.f32.gmra.mrb[16].mxu0 %vm20838_vm14, %v4237_v41  ;;  %vm20846_vm12 = vmmov %vm20819_vm0  ;;  %v4777_v45 = vld [vmem:[%s20105_s3] sm:$0xff]  ;;  %v4778_v41 = vld [vmem:[%s20105_s3 + $0x8] sm:$0xff] }
 0x120   : > { %14355 = vmatprep.mubr.msk.f32.mxu1 %vm20839_vm8, %v2584_v26  ;;  %14552 = vmatprep.mubr.msk.f32.mxu0 %vm20840_vm15, %v4206_v33  ;;  %vm20845_vm8 = vnez %v20690_v14  ;;  %vm20847_vm14 = vmmov %vm20819_vm0  ;;  %v15589_v26 = vpack.c.bf16 %v4778_v41, %v4777_v45  ;;  %v4779_v33 = vld [vmem:[%s20105_s3 + $0x10] sm:$0xff] }
 0x121   : > { %v4241_v42 = vsel %vm20845_vm8, %v20705_v56, 0.0  ;;  %vm20848_vm15 = vmmov %vm20819_vm0  ;;  %v2591_v56 = vld [vmem:[#allocation2 + $0xf0] sm:$0xff] }
 0x122   : > { %vm20852_vm8 = vmmov %vm20819_vm0 }
 0x123   : > { %14356 = vmatmul.mubr.msk.f32.gmra.mrb[20].mxu1 %vm20819_vm0, %v2585_v62  ;;  %14553 = vmatmul.mubr.msk.f32.gmra.mrb[18].mxu0 %vm20842_vm13, %v4239_v34  ;;  %vm20851_vm13 = vmmov %vm20819_vm0  ;;  %v15593_v62 = vpack.c.bf16 %v4780_v59, %v4779_v33  ;;  %v12600_v34 = vld [vmem:[%s20105_s3 + $0x40] sm:$0xff] }
 0x124   : > { %14358 = vmatprep.mubr.msk.f32.mxu1 %vm20843_vm11, %v2586_v19  ;;  %14555 = vmatprep.mubr.msk.f32.mxu0 %vm20844_vm10, %v4208_v61  ;;  %vm20849_vm11 = vnez %v20698_v37  ;;  %vm20850_vm10 = vmmov %vm20819_vm0  ;;  %v12601_v19 = vld [vmem:[%s20105_s3 + $0x48] sm:$0xff] }
 0x125   : > { %v4243_v23 = vsel %vm20849_vm11, %v20713_v2, 0.0  ;;  %vm20856_vm11 = vmmov %vm20819_vm0  ;;  %v2593_v2 = vld [vmem:[#allocation2 + $0x100] sm:$0xff]  ;;  %v17786_v61 = vpack.c.bf16 %v12601_v19, %v12600_v34 }
 0x127   : > { %14359 = vmatmul.mubr.msk.f32.gmra.mrb[22].mxu1 %vm20846_vm12, %v2587_v15  ;;  %14556 = vmatmul.mubr.msk.f32.gmra.mrb[20].mxu0 %vm20847_vm14, %v4241_v42  ;;  %vm20853_vm12 = vmmov %vm20819_vm0  ;;  %vm20854_vm14 = vnez %v20706_v51 }
 0x128   : > { %14361 = vmatprep.mubr.msk.f32.mxu1 %vm20848_vm15, %v2588_v22  ;;  %14558 = vmatprep.mubr.msk.f32.mxu0 %vm20819_vm0, %v20710_v0  ;;  %v4245_v0 = vsel %vm20854_vm14, %v20720_v35, 0.0  ;;  %vm20855_vm15 = vmmov %vm20819_vm0  ;;  %v20863_v35 = vld [vmem:[#allocation59_spill] sm:$0xff] }
 0x129   : > { %vm20862_vm14 = vmmov %vm20819_vm0 }
 0x12b   : > { %14362 = vmatmul.mubr.msk.f32.gmra.mrb[24].mxu1 %vm20850_vm10, %v2589_v6  ;;  %14559 = vmatmul.mubr.msk.f32.gmra.mrb[22].mxu0 %vm20851_vm13, %v4243_v23  ;;  %vm20857_vm10 = vmmov %vm20819_vm0 }
 0x12c   : > { %14364 = vmatprep.mubr.msk.f32.mxu1 %vm20852_vm8, %v2590_v11  ;;  %14561 = vmatprep.mubr.msk.f32.mxu0 %vm20853_vm12, %v20717_v27  ;;  %vm20859_vm8 = vnez %v20858_v43  ;;  %vm20860_vm13 = vmmov %vm20819_vm0  ;;  %v12674_v43 = vld [vmem:[%s20105_s3 + $0x90] sm:$0xff] }
 0x12d   : > { %v4247_v27 = vsel %vm20859_vm8, %v20728_v25, 0.0  ;;  %vm20861_vm12 = vmmov %vm20819_vm0  ;;  %v20870_v25 = vld [vmem:[#allocation60_spill] sm:$0xff] }
 0x12f   : > { %14365 = vmatmul.mubr.msk.f32.gmra.mrb[26].mxu1 %vm20855_vm15, %v2591_v56  ;;  %14562 = vmatmul.mubr.msk.f32.gmra.mrb[24].mxu0 %vm20819_vm0, %v4245_v0  ;;  %vm20864_vm15 = vmmov %vm20819_vm0 }
 0x130   : > { %14367 = vmatprep.mubr.msk.f32.mxu1 %vm20856_vm11, %v2592_v10  ;;  %14564 = vmatprep.mubr.msk.f32.mxu0 %vm20857_vm10, %v20725_v53  ;;  %vm20867_vm11 = vnez %v20866_v40  ;;  %v4218_v53 = vld [vmem:[#allocation2 + $0x119] sm:$0xff]  ;;  %vm20868_vm10 = vmmov %vm20819_vm0 }
 0x131   : > { %v4249_v13 = vsel %vm20867_vm11, %v20865_v18, 0.0  ;;  %v12675_v40 = vld [vmem:[%s20105_s3 + $0x98] sm:$0xff] }
 0x133   : > { %14368 = vmatmul.mubr.msk.f32.gmra.mrb[28].mxu1 %vm20860_vm13, %v2593_v2  ;;  %14565 = vmatmul.mubr.msk.f32.gmra.mrb[26].mxu0 %vm20861_vm12, %v4247_v27  ;;  %vm20869_vm13 = vmmov %vm20819_vm0  ;;  %vm20871_vm12 = vnez %v20870_v25  ;;  %v12708_v25 = vld [vmem:[%s20105_s3 + $0xa0] sm:$0xff] }
 0x134   : > { %14370 = vmatprep.mubr.msk.f32.mxu1 %vm20862_vm14, %v17572_v21  ;;  %14567 = vmatprep.mubr.msk.f32.mxu0 %vm20864_vm15, %v20863_v35  ;;  %v4251_v49 = vsel %vm20871_vm12, %v4219_v1, 0.0  ;;  %vm20872_vm14 = vmmov %vm20819_vm0  ;;  %v12532_v21 = vld [vmem:[%s20105_s3 + $0x20] sm:$0xff]  ;;  %vm767_vm15 = vcmask 261120  }
 0x135   : > { %v15581_v8 = vpack.c.bf16 %v12533_v17, %v12532_v21  ;;  %768 = vst.msk [vmem:[#allocation3] sm:$0xff] %vm767_vm15, %v20873_v29  ;;  %769 = vst.msk [vmem:[#allocation3 + $0x8] sm:$0xff] %vm767_vm15, %v20873_v29  ;;  %v17802_v21 = vld [vmem:[%s20104_s2] ss:$0 sm:$0xff] }
 0x136   : > { %770 = vst.msk [vmem:[#allocation3 + $0x10] sm:$0xff] %vm767_vm15, %v20873_v29  ;;  %771 = vst.msk [vmem:[#allocation3 + $0x118] sm:$0xff] %vm767_vm15, %v20873_v29 }
 0x137   : > { %14371 = vmatmul.mubr.msk.f32.gmra.mrb[30].mxu1 %vm20819_vm0, %v17581_v7  ;;  %14568 = vmatmul.mubr.msk.f32.gmra.mrb[28].mxu0 %vm20868_vm10, %v4249_v13  ;;  %v12534_v7 = vld [vmem:[%s20105_s3 + $0x30] sm:$0xff]  ;;  %772 = vst.msk [vmem:[#allocation3 + $0x120] sm:$0xff] %vm767_vm15, %v20873_v29  ;;  %773 = vst.msk [vmem:[#allocation3 + $0x128] sm:$0xff] %vm767_vm15, %v20873_v29 }
 0x138   : > { %14570 = vmatprep.mubr.msk.f32.mxu0 %vm20869_vm13, %v4218_v53  ;;  %15582 = vmatprep.subr.bf16.mxu1 %v15581_v8  ;;  %v15585_v31 = vpack.c.bf16 %v12535_v47, %v12534_v7  ;;  %774 = vst.msk [vmem:[#allocation4] sm:$0xff] %vm767_vm15, %v20873_v29  ;;  %775 = vst.msk [vmem:[#allocation4 + $0x8] sm:$0xff] %vm767_vm15, %v20873_v29 }
 0x139   : > { %15584 = vmatpush3.bf16.msra.mxu1 %v15581_v8  ;;  %776 = vst.msk [vmem:[#allocation4 + $0x10] sm:$0xff] %vm767_vm15, %v20873_v29  ;;  %777 = vst.msk [vmem:[#allocation4 + $0x118] sm:$0xff] %vm767_vm15, %v20873_v29 }
 0x13a   : > { %778 = vst.msk [vmem:[#allocation4 + $0x120] sm:$0xff] %vm767_vm15, %v20873_v29  ;;  %779 = vst.msk [vmem:[#allocation4 + $0x128] sm:$0xff] %vm767_vm15, %v20873_v29  ;;  %15586 = vmatprep.subr.bf16.mxu1 %v15585_v31 }
 0x13b   : > { %14571 = vmatmul.mubr.msk.f32.gmra.mrb[30].mxu0 %vm20872_vm14, %v4251_v49  ;;  %vm20910_vm14 = vnez %v20522_v38 }
 0x13c   : > { %v4781_v30 = vld [vmem:[#allocation3 + $0x8] sm:$0xff] }
 0x13d   : > { %15588 = vmatpush3.bf16.msra.mxu1 %v15585_v31  ;;  %14581 = vmatprep.mubr.msk.f32.mxu1 %vm767_vm15, %v4781_v30  ;;  %v4782_v32 = vld [vmem:[#allocation3 + $0x10] sm:$0xff] }
 0x13e   : > { %15590 = vmatprep.subr.bf16.mxu1 %v15589_v26 }
 0x140   : > { %14582 = vmatmul.mubr.msk.f32.vlgmr.msra.gmra.mrb[32].mxu1 %vm767_vm15, %v4782_v32 }
 0x141   : > { %15592 = vmatpush3.bf16.msra.mxu1 %v15589_v26 }
 0x142   : > { %15594 = vmatprep.subr.bf16.mxu1 %v15593_v62 }
 0x145   : > { %15596 = vmatpush3.bf16.msra.mxu1 %v15593_v62 }
 0x146   : > { %15598 = vmatprep.subr.bf16.mxu1 %v17786_v61 }
 0x1ae   : > { %v14277_v15 = vpop.f32.mrb[0].mxu1 }
 0x1af   : > { %v2373_v42 = vpop.f32.mrb[1].mxu1 }
 0x1b2   : > { %v14280_v22 = vpop.f32.mrb[2].mxu1 }
 0x1b3   : > { %v2383_v6 = vpop.f32.mrb[3].mxu1 }
 0x1b6   : > { %v14283_v23 = vpop.f32.mrb[4].mxu1 }
 0x1b7   : > { %v2393_v11 = vpop.f32.mrb[5].mxu1 }
 0x1ba   : > { %v14286_v56 = vpop.f32.mrb[6].mxu1 }
 0x1bb   : > { %v2403_v0 = vpop.f32.mrb[7].mxu1 }
 0x1be   : > { %v14289_v10 = vpop.f32.mrb[8].mxu1 }
 0x1bf   : > { %v2413_v2 = vpop.f32.mrb[9].mxu1 }
 0x1c2   : > { %v14292_v27 = vpop.f32.mrb[10].mxu1 }
 0x1c3   : > { %v17789_v35 = vpop.f32.mrb[11].mxu1 }
 0x1c6   : > { %v17791_v18 = vpop.f32.mrb[12].mxu1 }
 0x1c7   : > { %v17793_v13 = vpop.f32.mrb[13].mxu1 }
 0x1ca   : > { %v17795_v53 = vpop.f32.mrb[14].mxu1 }
 0x1cb   : > { %v17797_v1 = vpop.f32.mrb[15].mxu1 }
 0x1d2   : > { %v14527_v49 = vpop.f32.mrb[0].mxu0 }
 0x1d3   : > { %v15727_v17 = vadd.f32 %v14527_v49, %v14277_v15  ;;  %v4419_v8 = vpop.f32.mrb[1].mxu0 }
 0x1d4   : > { %v15728_v7 = vadd.f32 %v4419_v8, %v2373_v42 }
 0x1d5   : > { %v4618_v47 = vadd.f32 %v15727_v17, %v17802_v21 }
 0x1d6   : > { %v4617_v31 = vadd.f32 %v15728_v7, %v17802_v21  ;;  %v14530_v29 = vpop.f32.mrb[2].mxu0 }
 0x1d7   : > { %v4650_v30 = vmax.f32 %v4618_v47, 0.0  ;;  %v15729_v32 = vadd.f32 %v14530_v29, %v14280_v22  ;;  %v4429_v45 = vpop.f32.mrb[3].mxu0 }
 0x1d8   : > { %v4649_v41 = vmax.f32 %v4617_v31, 0.0  ;;  %v15730_v26 = vadd.f32 %v4429_v45, %v2383_v6 }
 0x1d9   : > { %4682 = vst.msk [vmem:[#allocation3 + $0x20] sm:$0xff] %vm767_vm15, %v4650_v30  ;;  %v4620_v33 = vadd.f32 %v15729_v32, %v17802_v21 }
 0x1da   : > { %4681 = vst.msk [vmem:[#allocation3 + $0x18] sm:$0xff] %vm767_vm15, %v4649_v41  ;;  %v4619_v59 = vadd.f32 %v15730_v26, %v17802_v21  ;;  %v14533_v62 = vpop.f32.mrb[4].mxu0 }
 0x1db   : > { %v4652_v34 = vmax.f32 %v4620_v33, 0.0  ;;  %v15731_v19 = vadd.f32 %v14533_v62, %v14283_v23  ;;  %v4439_v15 = vpop.f32.mrb[5].mxu0 }
 0x1dc   : > { %v4651_v42 = vmax.f32 %v4619_v59, 0.0  ;;  %v15732_v49 = vadd.f32 %v4439_v15, %v2393_v11 }
 0x1dd   : > { %4684 = vst.msk [vmem:[#allocation3 + $0x30] sm:$0xff] %vm767_vm15, %v4652_v34  ;;  %v4622_v22 = vadd.f32 %v15731_v19, %v17802_v21 }
 0x1de   : > { %4683 = vst.msk [vmem:[#allocation3 + $0x28] sm:$0xff] %vm767_vm15, %v4651_v42  ;;  %v4621_v6 = vadd.f32 %v15732_v49, %v17802_v21  ;;  %v14536_v17 = vpop.f32.mrb[6].mxu0 }
 0x1df   : > { %v4654_v8 = vmax.f32 %v4622_v22, 0.0  ;;  %v15733_v7 = vadd.f32 %v14536_v17, %v14286_v56  ;;  %v4449_v47 = vpop.f32.mrb[7].mxu0 }
 0x1e0   : > { %v4653_v31 = vmax.f32 %v4621_v6, 0.0  ;;  %v15734_v29 = vadd.f32 %v4449_v47, %v2403_v0  ;;  %v17822_v45 = vld [vmem:[#allocation3 + $0x20] sm:$0xff] }
 0x1e1   : > { %4686 = vst.msk [vmem:[#allocation3 + $0x40] sm:$0xff] %vm767_vm15, %v4654_v8  ;;  %v4624_v23 = vadd.f32 %v15733_v7, %v17802_v21  ;;  %v17816_v30 = vld [vmem:[#allocation3 + $0x18] sm:$0xff]  ;;  %20875 = vst [vmem:[#allocation28_spill] sm:$0xff] %v17822_v45 }
 0x1e2   : > { %20874 = vst [vmem:[#allocation26_spill] sm:$0xff] %v17816_v30  ;;  %4685 = vst.msk [vmem:[#allocation3 + $0x38] sm:$0xff] %vm767_vm15, %v4653_v31  ;;  %v4623_v11 = vadd.f32 %v15734_v29, %v17802_v21  ;;  %v14539_v32 = vpop.f32.mrb[8].mxu0  ;;  %14584 = vmatprep.mubr.msk.f32.mxu1 %vm767_vm15, %v17816_v30  ;;  %v18179_v48 = vld [vmem:[#allocation3 + $0x19] sm:$0xff] }
 0x1e3   : > { %v4656_v56 = vmax.f32 %v4624_v23, 0.0  ;;  %v15735_v41 = vadd.f32 %v14539_v32, %v14289_v10  ;;  %v4459_v26 = vpop.f32.mrb[9].mxu0  ;;  %14585 = vmatmul.mubr.msk.f32.gmra.mrb[34].mxu1 %vm767_vm15, %v17822_v45 }
 0x1e4   : > { %v4655_v0 = vmax.f32 %v4623_v11, 0.0  ;;  %v15736_v33 = vadd.f32 %v4459_v26, %v2413_v2  ;;  %v17834_v10 = vld [vmem:[#allocation3 + $0x30] sm:$0xff] }
 0x1e5   : > { %4688 = vst.msk [vmem:[#allocation3 + $0x50] sm:$0xff] %vm767_vm15, %v4656_v56  ;;  %v4626_v59 = vadd.f32 %v15735_v41, %v17802_v21  ;;  %v17828_v62 = vld [vmem:[#allocation3 + $0x28] sm:$0xff]  ;;  %20877 = vst [vmem:[#allocation34_spill] sm:$0xff] %v17834_v10 }
 0x1e6   : > { %20876 = vst [vmem:[#allocation32_spill] sm:$0xff] %v17828_v62  ;;  %4687 = vst.msk [vmem:[#allocation3 + $0x48] sm:$0xff] %vm767_vm15, %v4655_v0  ;;  %v4625_v34 = vadd.f32 %v15736_v33, %v17802_v21  ;;  %v14542_v19 = vpop.f32.mrb[10].mxu0  ;;  %14587 = vmatprep.mubr.msk.f32.mxu1 %vm767_vm15, %v17828_v62 }
 0x1e7   : > { %v4658_v15 = vmax.f32 %v4626_v59, 0.0  ;;  %v15737_v42 = vadd.f32 %v14542_v19, %v14292_v27  ;;  %v4469_v49 = vpop.f32.mrb[11].mxu0  ;;  %14588 = vmatmul.mubr.msk.f32.gmra.mrb[36].mxu1 %vm767_vm15, %v17834_v10 }
 0x1e8   : > { %v4657_v2 = vmax.f32 %v4625_v34, 0.0  ;;  %v15738_v22 = vadd.f32 %v4469_v49, %v17789_v35  ;;  %v17847_v27 = vld [vmem:[#allocation3 + $0x40] sm:$0xff] }
 0x1e9   : > { %4690 = vst.msk [vmem:[#allocation3 + $0x60] sm:$0xff] %vm767_vm15, %v4658_v15  ;;  %v4628_v6 = vadd.f32 %v15737_v42, %v17802_v21  ;;  %v17841_v17 = vld [vmem:[#allocation3 + $0x38] sm:$0xff]  ;;  %20879 = vst [vmem:[#allocation39_spill] sm:$0xff] %v17847_v27 }
 0x1ea   : > { %20878 = vst [vmem:[#allocation37_spill] sm:$0xff] %v17841_v17  ;;  %4689 = vst.msk [vmem:[#allocation3 + $0x58] sm:$0xff] %vm767_vm15, %v4657_v2  ;;  %v4627_v8 = vadd.f32 %v15738_v22, %v17802_v21  ;;  %v14545_v7 = vpop.f32.mrb[12].mxu0  ;;  %14590 = vmatprep.mubr.msk.f32.mxu1 %vm767_vm15, %v17841_v17 }
 0x1eb   : > { %v4660_v47 = vmax.f32 %v4628_v6, 0.0  ;;  %v15739_v31 = vadd.f32 %v14545_v7, %v17791_v18  ;;  %v4479_v35 = vpop.f32.mrb[13].mxu0  ;;  %14591 = vmatmul.mubr.msk.f32.gmra.mrb[38].mxu1 %vm767_vm15, %v17847_v27 }
 0x1ec   : > { %v4659_v29 = vmax.f32 %v4627_v8, 0.0  ;;  %v15740_v23 = vadd.f32 %v4479_v35, %v17793_v13  ;;  %v17861_v18 = vld [vmem:[#allocation3 + $0x50] sm:$0xff] }
 0x1ed   : > { %4692 = vst.msk [vmem:[#allocation3 + $0x70] sm:$0xff] %vm767_vm15, %v4660_v47  ;;  %v4630_v11 = vadd.f32 %v15739_v31, %v17802_v21  ;;  %v17855_v32 = vld [vmem:[#allocation3 + $0x48] sm:$0xff]  ;;  %20881 = vst [vmem:[#allocation44_spill] sm:$0xff] %v17861_v18 }
 0x1ee   : > { %20880 = vst [vmem:[#allocation42_spill] sm:$0xff] %v17855_v32  ;;  %4691 = vst.msk [vmem:[#allocation3 + $0x68] sm:$0xff] %vm767_vm15, %v4659_v29  ;;  %v4629_v56 = vadd.f32 %v15740_v23, %v17802_v21  ;;  %v14351_v41 = vpop.f32.mrb[16].mxu1  ;;  %v14548_v26 = vpop.f32.mrb[14].mxu0  ;;  %14593 = vmatprep.mubr.msk.f32.mxu1 %vm767_vm15, %v17855_v32 }
 0x1ef   : > { %v4662_v0 = vmax.f32 %v4630_v11, 0.0  ;;  %v15741_v13 = vadd.f32 %v14548_v26, %v17795_v53  ;;  %v2843_v33 = vpop.f32.mrb[17].mxu1  ;;  %v4489_v59 = vpop.f32.mrb[15].mxu0  ;;  %14594 = vmatmul.mubr.msk.f32.gmra.mrb[40].mxu1 %vm767_vm15, %v17861_v18 }
 0x1f0   : > { %v4661_v34 = vmax.f32 %v4629_v56, 0.0  ;;  %v15742_v19 = vadd.f32 %v4489_v59, %v17797_v1  ;;  %v17875_v22 = vld [vmem:[#allocation3 + $0x60] sm:$0xff] }
 0x1f1   : > { %4694 = vst.msk [vmem:[#allocation3 + $0x80] sm:$0xff] %vm767_vm15, %v4662_v0  ;;  %v4632_v15 = vadd.f32 %v15741_v13, %v17802_v21  ;;  %v17869_v42 = vld [vmem:[#allocation3 + $0x58] sm:$0xff]  ;;  %20883 = vst [vmem:[#allocation49_spill] sm:$0xff] %v17875_v22 }
 0x1f2   : > { %20882 = vst [vmem:[#allocation47_spill] sm:$0xff] %v17869_v42  ;;  %4693 = vst.msk [vmem:[#allocation3 + $0x78] sm:$0xff] %vm767_vm15, %v4661_v34  ;;  %v4631_v49 = vadd.f32 %v15742_v19, %v17802_v21  ;;  %v14354_v2 = vpop.f32.mrb[18].mxu1  ;;  %v14551_v53 = vpop.f32.mrb[16].mxu0  ;;  %14596 = vmatprep.mubr.msk.f32.mxu1 %vm767_vm15, %v17869_v42 }
 0x1f3   : > { %v4664_v6 = vmax.f32 %v4632_v15, 0.0  ;;  %v15743_v8 = vadd.f32 %v14551_v53, %v14351_v41  ;;  %v2853_v1 = vpop.f32.mrb[19].mxu1  ;;  %v4499_v7 = vpop.f32.mrb[17].mxu0  ;;  %14597 = vmatmul.mubr.msk.f32.gmra.mrb[42].mxu1 %vm767_vm15, %v17875_v22 }
 0x1f4   : > { %v4663_v47 = vmax.f32 %v4631_v49, 0.0  ;;  %v15744_v31 = vadd.f32 %v4499_v7, %v2843_v33  ;;  %v17887_v41 = vld [vmem:[#allocation3 + $0x70] sm:$0xff] }
 0x1f5   : > { %4696 = vst.msk [vmem:[#allocation3 + $0x90] sm:$0xff] %vm767_vm15, %v4664_v6  ;;  %v4634_v35 = vadd.f32 %v15743_v8, %v17802_v21  ;;  %v17881_v29 = vld [vmem:[#allocation3 + $0x68] sm:$0xff]  ;;  %20885 = vst [vmem:[#allocation53_spill] sm:$0xff] %v17887_v41 }
 0x1f6   : > { %20884 = vst [vmem:[#allocation51_spill] sm:$0xff] %v17881_v29  ;;  %4695 = vst.msk [vmem:[#allocation3 + $0x88] sm:$0xff] %vm767_vm15, %v4663_v47  ;;  %v4633_v23 = vadd.f32 %v15744_v31, %v17802_v21  ;;  %v14357_v11 = vpop.f32.mrb[20].mxu1  ;;  %v14554_v56 = vpop.f32.mrb[18].mxu0  ;;  %14599 = vmatprep.mubr.msk.f32.mxu1 %vm767_vm15, %v17881_v29 }
 0x1f7   : > { %v4666_v26 = vmax.f32 %v4634_v35, 0.0  ;;  %v15745_v0 = vadd.f32 %v14554_v56, %v14354_v2  ;;  %v2863_v13 = vpop.f32.mrb[21].mxu1  ;;  %v4509_v33 = vpop.f32.mrb[19].mxu0  ;;  %14600 = vmatmul.mubr.msk.f32.gmra.mrb[44].mxu1 %vm767_vm15, %v17887_v41 }
 0x1f8   : > { %v4665_v59 = vmax.f32 %v4633_v23, 0.0  ;;  %v15746_v34 = vadd.f32 %v4509_v33, %v2853_v1  ;;  %v17899_v2 = vld [vmem:[#allocation3 + $0x80] sm:$0xff] }
 0x1f9   : > { %4698 = vst.msk [vmem:[#allocation3 + $0xa0] sm:$0xff] %vm767_vm15, %v4666_v26  ;;  %v4636_v19 = vadd.f32 %v15745_v0, %v17802_v21  ;;  %v17893_v15 = vld [vmem:[#allocation3 + $0x78] sm:$0xff]  ;;  %20887 = vst [vmem:[#allocation58_spill] sm:$0xff] %v17899_v2 }
 0x1fa   : > { %20886 = vst [vmem:[#allocation56_spill] sm:$0xff] %v17893_v15  ;;  %4697 = vst.msk [vmem:[#allocation3 + $0x98] sm:$0xff] %vm767_vm15, %v4665_v59  ;;  %v4635_v49 = vadd.f32 %v15746_v34, %v17802_v21  ;;  %v14360_v53 = vpop.f32.mrb[22].mxu1  ;;  %v14557_v6 = vpop.f32.mrb[20].mxu0  ;;  %14602 = vmatprep.mubr.msk.f32.mxu1 %vm767_vm15, %v17893_v15 }
 0x1fb   : > { %v4668_v8 = vmax.f32 %v4636_v19, 0.0  ;;  %v15747_v7 = vadd.f32 %v14557_v6, %v14357_v11  ;;  %v2873_v1 = vpop.f32.mrb[23].mxu1  ;;  %v4519_v47 = vpop.f32.mrb[21].mxu0  ;;  %14603 = vmatmul.mubr.msk.f32.gmra.mrb[46].mxu1 %vm767_vm15, %v17899_v2 }
 0x1fc   : > { %v4667_v31 = vmax.f32 %v4635_v49, 0.0  ;;  %v15748_v35 = vadd.f32 %v4519_v47, %v2863_v13  ;;  %v17911_v11 = vld [vmem:[#allocation3 + $0x90] sm:$0xff] }
 0x1fd   : > { %4700 = vst.msk [vmem:[#allocation3 + $0xb0] sm:$0xff] %vm767_vm15, %v4668_v8  ;;  %v4638_v23 = vadd.f32 %v15747_v7, %v17802_v21  ;;  %v17905_v56 = vld [vmem:[#allocation3 + $0x88] sm:$0xff]  ;;  %20889 = vst [vmem:[#allocation30_spill] sm:$0xff] %v17911_v11 }
 0x1fe   : > { %20888 = vst [vmem:[#allocation25_spill] sm:$0xff] %v17905_v56  ;;  %4699 = vst.msk [vmem:[#allocation3 + $0xa8] sm:$0xff] %vm767_vm15, %v4667_v31  ;;  %v4637_v26 = vadd.f32 %v15748_v35, %v17802_v21  ;;  %v14363_v0 = vpop.f32.mrb[24].mxu1  ;;  %v14560_v33 = vpop.f32.mrb[22].mxu0  ;;  %14605 = vmatprep.mubr.msk.f32.mxu1 %vm767_vm15, %v17905_v56  ;;  %v18081_v56 = vld [vmem:[#allocation3 + $0x7f] sm:$0xff]  ;;  %v18091_v15 = vld [vmem:[#allocation3 + $0x8f] sm:$0xff] }
 0x1ff   : > { %v4670_v59 = vmax.f32 %v4638_v23, 0.0  ;;  %v15749_v34 = vadd.f32 %v14560_v33, %v14360_v53  ;;  %v2883_v13 = vpop.f32.mrb[25].mxu1  ;;  %v4529_v19 = vpop.f32.mrb[23].mxu0  ;;  %14606 = vmatmul.mubr.msk.f32.gmra.mrb[48].mxu1 %vm767_vm15, %v17911_v11  ;;  %v18079_v11 = vld [vmem:[#allocation3 + $0x87] sm:$0xff] }
 0x200   : > { %v4669_v49 = vmax.f32 %v4637_v26, 0.0  ;;  %v15750_v6 = vadd.f32 %v4529_v19, %v2873_v1  ;;  %v17923_v53 = vld [vmem:[#allocation3 + $0xa0] sm:$0xff] }
 0x201   : > { %4702 = vst.msk [vmem:[#allocation3 + $0xc0] sm:$0xff] %vm767_vm15, %v4670_v59  ;;  %v4640_v8 = vadd.f32 %v15749_v34, %v17802_v21  ;;  %v17917_v7 = vld [vmem:[#allocation3 + $0x98] sm:$0xff]  ;;  %20891 = vst [vmem:[#allocation5_spill] sm:$0xff] %v17923_v53 }
 0x202   : > { %20890 = vst [vmem:[#allocation31_spill] sm:$0xff] %v17917_v7  ;;  %4701 = vst.msk [vmem:[#allocation3 + $0xb8] sm:$0xff] %vm767_vm15, %v4669_v49  ;;  %v4639_v47 = vadd.f32 %v15750_v6, %v17802_v21  ;;  %v14366_v31 = vpop.f32.mrb[26].mxu1  ;;  %v14563_v35 = vpop.f32.mrb[24].mxu0  ;;  %14608 = vmatprep.mubr.msk.f32.mxu1 %vm767_vm15, %v17917_v7  ;;  %v18089_v2 = vld [vmem:[#allocation3 + $0x97] sm:$0xff]  ;;  %v18101_v29 = vld [vmem:[#allocation3 + $0x9f] sm:$0xff] }
 0x203   : > { %v4672_v23 = vmax.f32 %v4640_v8, 0.0  ;;  %v15751_v26 = vadd.f32 %v14563_v35, %v14363_v0  ;;  %v2893_v1 = vpop.f32.mrb[27].mxu1  ;;  %v4539_v33 = vpop.f32.mrb[25].mxu0  ;;  %14609 = vmatmul.mubr.msk.f32.gmra.mrb[50].mxu1 %vm767_vm15, %v17923_v53 }
 0x204   : > { %v4671_v59 = vmax.f32 %v4639_v47, 0.0  ;;  %v15752_v34 = vadd.f32 %v4539_v33, %v2883_v13  ;;  %v17935_v0 = vld [vmem:[#allocation3 + $0xb0] sm:$0xff] }
 0x205   : > { %4704 = vst.msk [vmem:[#allocation3 + $0xd0] sm:$0xff] %vm767_vm15, %v4672_v23  ;;  %v4642_v19 = vadd.f32 %v15751_v26, %v17802_v21  ;;  %v17929_v49 = vld [vmem:[#allocation3 + $0xa8] sm:$0xff]  ;;  %20893 = vst [vmem:[#allocation36_spill] sm:$0xff] %v17935_v0 }
 0x206   : > { %20892 = vst [vmem:[#allocation35_spill] sm:$0xff] %v17929_v49  ;;  %4703 = vst.msk [vmem:[#allocation3 + $0xc8] sm:$0xff] %vm767_vm15, %v4671_v59  ;;  %v4641_v6 = vadd.f32 %v15752_v34, %v17802_v21  ;;  %v14369_v7 = vpop.f32.mrb[28].mxu1  ;;  %v14566_v8 = vpop.f32.mrb[26].mxu0  ;;  %14611 = vmatprep.mubr.msk.f32.mxu1 %vm767_vm15, %v17929_v49  ;;  %v18099_v41 = vld [vmem:[#allocation3 + $0xa7] sm:$0xff]  ;;  %v18111_v42 = vld [vmem:[#allocation3 + $0xaf] sm:$0xff] }
 0x207   : > { %v4674_v35 = vmax.f32 %v4642_v19, 0.0  ;;  %v15753_v47 = vadd.f32 %v14566_v8, %v14366_v31  ;;  %v2903_v13 = vpop.f32.mrb[29].mxu1  ;;  %v4549_v33 = vpop.f32.mrb[27].mxu0  ;;  %14612 = vmatmul.mubr.msk.f32.gmra.mrb[52].mxu1 %vm767_vm15, %v17935_v0 }
 0x208   : > { %v4673_v23 = vmax.f32 %v4641_v6, 0.0  ;;  %v15754_v26 = vadd.f32 %v4549_v33, %v2893_v1  ;;  %v17947_v31 = vld [vmem:[#allocation3 + $0xc0] sm:$0xff] }
 0x209   : > { %4706 = vst.msk [vmem:[#allocation3 + $0xe0] sm:$0xff] %vm767_vm15, %v4674_v35  ;;  %v4644_v59 = vadd.f32 %v15753_v47, %v17802_v21  ;;  %v17941_v34 = vld [vmem:[#allocation3 + $0xb8] sm:$0xff]  ;;  %20895 = vst [vmem:[#allocation7_spill] sm:$0xff] %v17947_v31 }
 0x20a   : > { %20894 = vst [vmem:[#allocation6_spill] sm:$0xff] %v17941_v34  ;;  %4705 = vst.msk [vmem:[#allocation3 + $0xd8] sm:$0xff] %vm767_vm15, %v4673_v23  ;;  %v4643_v49 = vadd.f32 %v15754_v26, %v17802_v21  ;;  %v14372_v53 = vpop.f32.mrb[30].mxu1  ;;  %v14569_v19 = vpop.f32.mrb[28].mxu0  ;;  %14614 = vmatprep.mubr.msk.f32.mxu1 %vm767_vm15, %v17941_v34  ;;  %v18109_v22 = vld [vmem:[#allocation3 + $0xb7] sm:$0xff]  ;;  %v18121_v32 = vld [vmem:[#allocation3 + $0xbf] sm:$0xff] }
 0x20b   : > { %v4676_v8 = vmax.f32 %v4644_v59, 0.0  ;;  %v15755_v6 = vadd.f32 %v14569_v19, %v14369_v7  ;;  %v2913_v1 = vpop.f32.mrb[31].mxu1  ;;  %v4559_v33 = vpop.f32.mrb[29].mxu0  ;;  %14615 = vmatmul.mubr.msk.f32.gmra.mrb[54].mxu1 %vm767_vm15, %v17947_v31  ;;  %v18071_v31 = vld [vmem:[#allocation3 + $0x6f] sm:$0xff] }
 0x20c   : > { %v4675_v35 = vmax.f32 %v4643_v49, 0.0  ;;  %v15756_v47 = vadd.f32 %v4559_v33, %v2903_v13  ;;  %v17959_v7 = vld [vmem:[#allocation3 + $0xd0] sm:$0xff] }
 0x20d   : > { %4708 = vst.msk [vmem:[#allocation3 + $0xf0] sm:$0xff] %vm767_vm15, %v4676_v8  ;;  %v4646_v23 = vadd.f32 %v15755_v6, %v17802_v21  ;;  %v17953_v26 = vld [vmem:[#allocation3 + $0xc8] sm:$0xff]  ;;  %20897 = vst [vmem:[#allocation41_spill] sm:$0xff] %v17959_v7 }
 0x20e   : > { %20896 = vst [vmem:[#allocation40_spill] sm:$0xff] %v17953_v26  ;;  %4707 = vst.msk [vmem:[#allocation3 + $0xe8] sm:$0xff] %vm767_vm15, %v4675_v35  ;;  %v4645_v34 = vadd.f32 %v15756_v47, %v17802_v21  ;;  %v14572_v0 = vpop.f32.mrb[30].mxu0  ;;  %14617 = vmatprep.mubr.msk.f32.mxu1 %vm767_vm15, %v17953_v26  ;;  %v4713_v47 = vld [vmem:[#allocation3 + $0x7] sm:$0xff]  ;;  %v18069_v26 = vld [vmem:[#allocation3 + $0x77] sm:$0xff] }
 0x20f   : > { %v4678_v59 = vmax.f32 %v4646_v23, 0.0  ;;  %v15757_v19 = vadd.f32 %v14572_v0, %v14372_v53  ;;  %v4569_v49 = vpop.f32.mrb[31].mxu0  ;;  %14618 = vmatmul.mubr.msk.f32.gmra.mrb[56].mxu1 %vm767_vm15, %v17959_v7  ;;  %v18061_v7 = vld [vmem:[#allocation3 + $0x5f] sm:$0xff]  ;;  %v18119_v18 = vld [vmem:[#allocation3 + $0xc7] sm:$0xff]  ;;  %v18131_v17 = vld [vmem:[#allocation3 + $0xcf] sm:$0xff] }
 0x210   : > { %v4677_v13 = vmax.f32 %v4645_v34, 0.0  ;;  %v15758_v8 = vadd.f32 %v4569_v49, %v2913_v1  ;;  %v17971_v53 = vld [vmem:[#allocation3 + $0xe0] sm:$0xff]  ;;  %v18293_v60 = vld [vmem:[#allocation3 + $0xc9] sm:$0xff] }
 0x211   : > { %4710 = vst.msk [vmem:[#allocation3 + $0x100] sm:$0xff] %vm767_vm15, %v4678_v59  ;;  %v4648_v6 = vadd.f32 %v15757_v19, %v17802_v21  ;;  %v17965_v33 = vld [vmem:[#allocation3 + $0xd8] sm:$0xff]  ;;  %20899 = vst [vmem:[#allocation10_spill] sm:$0xff] %v17971_v53  ;;  %v20903_v59 = vld [vmem:[#allocation21_spill] sm:$0xff] }
 0x212   : > { %20898 = vst [vmem:[#allocation9_spill] sm:$0xff] %v17965_v33  ;;  %4709 = vst.msk [vmem:[#allocation3 + $0xf8] sm:$0xff] %vm767_vm15, %v4677_v13  ;;  %v4647_v35 = vadd.f32 %v15758_v8, %v17802_v21  ;;  %14620 = vmatprep.mubr.msk.f32.mxu1 %vm767_vm15, %v17965_v33  ;;  %vm20904_vm0 = vnez %v20903_v59  ;;  %v12602_v13 = vld [vmem:[%s20105_s3 + $0x50] sm:$0xff]  ;;  %v12603_v8 = vld [vmem:[%s20105_s3 + $0x58] sm:$0xff] }
 0x213   : > { %v4680_v0 = vmax.f32 %v4648_v6, 0.0  ;;  %14621 = vmatmul.mubr.msk.f32.gmra.mrb[58].mxu1 %vm767_vm15, %v17971_v53  ;;  %v4745_v19 = vsel %vm20904_vm0, %v4713_v47, 0.0  ;;  %v4714_v6 = vld [vmem:[#allocation3 + $0xf] sm:$0xff]  ;;  %v12637_v47 = vld [vmem:[%s20105_s3 + $0x68] sm:$0xff]  ;;  %v18059_v33 = vld [vmem:[#allocation3 + $0x67] sm:$0xff]  ;;  %20941 = vst [vmem:[#allocation68_spill] sm:$0xff] %v18293_v60 }
 0x214   : > { %v4679_v34 = vmax.f32 %v4647_v35, 0.0  ;;  %v17981_v21 = vld [vmem:[#allocation3 + $0xf0] sm:$0xff]  ;;  %v18141_v62 = vld [vmem:[#allocation3 + $0xdf] sm:$0xff] }
 0x215   : > { %4712 = vst.msk [vmem:[#allocation3 + $0x110] sm:$0xff] %vm767_vm15, %v4680_v0  ;;  %v17976_v1 = vld [vmem:[#allocation3 + $0xe8] sm:$0xff]  ;;  %20901 = vst [vmem:[#allocation46_spill] sm:$0xff] %v17981_v21  ;;  %v18002_v35 = vld [vmem:[#allocation3 + $0x17] sm:$0xff]  ;;  %v15601_v0 = vpack.c.bf16 %v12603_v8, %v12602_v13 }
 0x216   : > { %20900 = vst [vmem:[#allocation45_spill] sm:$0xff] %v17976_v1  ;;  %4711 = vst.msk [vmem:[#allocation3 + $0x108] sm:$0xff] %vm767_vm15, %v4679_v34  ;;  %14623 = vmatprep.mubr.msk.f32.mxu1 %vm767_vm15, %v17976_v1  ;;  %v12636_v34 = vld [vmem:[%s20105_s3 + $0x60] sm:$0xff]  ;;  %v18020_v8 = vld [vmem:[#allocation3 + $0x1f] sm:$0xff] }
 0x217   : > { %14624 = vmatmul.mubr.msk.f32.gmra.mrb[60].mxu1 %vm767_vm15, %v17981_v21  ;;  %v18018_v13 = vpack.c.bf16 %v12637_v47, %v12636_v34  ;;  %v18028_v1 = vld [vmem:[#allocation3 + $0x37] sm:$0xff]  ;;  %v18039_v34 = vld [vmem:[#allocation3 + $0x47] sm:$0xff]  ;;  %v18041_v47 = vld [vmem:[#allocation3 + $0x3f] sm:$0xff]  ;;  %20915 = vst [vmem:[#allocation15_spill] sm:$0xff] %v18141_v62 }
 0x218   : > { %v17991_v49 = vld [vmem:[#allocation3 + $0x100] sm:$0xff]  ;;  %v18051_v53 = vld [vmem:[#allocation3 + $0x4f] sm:$0xff]  ;;  %v18129_v27 = vld [vmem:[#allocation3 + $0xd7] sm:$0xff] }
 0x219   : > { %v17985_v23 = vld [vmem:[#allocation3 + $0xf8] sm:$0xff]  ;;  %20905 = vst [vmem:[#allocation13_spill] sm:$0xff] %v17991_v49  ;;  %v18139_v10 = vld [vmem:[#allocation3 + $0xe7] sm:$0xff]  ;;  %v18151_v30 = vld [vmem:[#allocation3 + $0xef] sm:$0xff] }
 0x21a   : > { %20902 = vst [vmem:[#allocation12_spill] sm:$0xff] %v17985_v23  ;;  %14626 = vmatprep.mubr.msk.f32.mxu1 %vm767_vm15, %v17985_v23  ;;  %v20906_v23 = vld [vmem:[#allocation24_spill] sm:$0xff]  ;;  %20914 = vst [vmem:[#allocation50_spill] sm:$0xff] %v18139_v10 }
 0x21b   : > { %14627 = vmatmul.mubr.msk.f32.gmra.mrb[62].mxu1 %vm767_vm15, %v17991_v49  ;;  %vm20907_vm10 = vnez %v20906_v23  ;;  %v18149_v45 = vld [vmem:[#allocation3 + $0xf7] sm:$0xff]  ;;  %20918 = vst [vmem:[#allocation54_spill] sm:$0xff] %v18151_v30 }
 0x21c   : > { %14637 = vmatprep.mubr.msk.f32.mxu1 %vm767_vm15, %v4745_v19  ;;  %v4747_v49 = vsel %vm20907_vm10, %v18002_v35, 0.0  ;;  %v18016_v19 = vld [vmem:[#allocation3 + $0x27] sm:$0xff]  ;;  %20917 = vst [vmem:[#allocation16_spill] sm:$0xff] %v18149_v45 }
 0x21f   : > { %14638 = vmatmul.mubr.msk.f32.vlgmr.msra.gmra.mrb[32].mxu1 %vm767_vm15, %v4714_v6  ;;  %v20908_v6 = vld [vmem:[#allocation29_spill] sm:$0xff] }
 0x220   : > { %15600 = vmatpush3.bf16.msra.mxu1 %v17786_v61  ;;  %14640 = vmatprep.mubr.msk.f32.mxu1 %vm767_vm15, %v4747_v49  ;;  %vm20909_vm13 = vnez %v20908_v6  ;;  %v18031_v61 = vld [vmem:[#allocation3 + $0x2f] sm:$0xff]  ;;  %v4751_v49 = vsel %vm20910_vm14, %v18028_v1, 0.0  ;;  %vm20912_vm14 = vnez %v20544_v24 }
 0x221   : > { %15602 = vmatprep.subr.bf16.mxu1 %v15601_v0  ;;  %v4749_v21 = vsel %vm20909_vm13, %v18016_v19, 0.0  ;;  %vm20911_vm13 = vnez %v20531_v50 }
 0x223   : > { %14641 = vmatmul.mubr.msk.f32.gmra.mrb[34].mxu1 %vm767_vm15, %v18020_v8 }
 0x224   : > { %14643 = vmatprep.mubr.msk.f32.mxu1 %vm767_vm15, %v4749_v21  ;;  %15604 = vmatpush3.bf16.msra.mxu1 %v15601_v0  ;;  %v4753_v21 = vsel %vm20911_vm13, %v18039_v34, 0.0  ;;  %v18049_v0 = vld [vmem:[#allocation3 + $0x57] sm:$0xff] }
 0x225   : > { %15606 = vmatprep.subr.bf16.mxu1 %v18018_v13 }
 0x227   : > { %14644 = vmatmul.mubr.msk.f32.gmra.mrb[36].mxu1 %vm767_vm15, %v18031_v61 }
 0x228   : > { %14646 = vmatprep.mubr.msk.f32.mxu1 %vm767_vm15, %v4751_v49  ;;  %v4755_v49 = vsel %vm20912_vm14, %v18049_v0, 0.0 }
 0x22b   : > { %14647 = vmatmul.mubr.msk.f32.gmra.mrb[38].mxu1 %vm767_vm15, %v18041_v47 }
 0x22c   : > { %14649 = vmatprep.mubr.msk.f32.mxu1 %vm767_vm15, %v4753_v21  ;;  %v4757_v21 = vsel %vm20781_vm1, %v18059_v33, 0.0 }
 0x22f   : > { %14650 = vmatmul.mubr.msk.f32.gmra.mrb[40].mxu1 %vm767_vm15, %v18051_v53 }
 0x230   : > { %14652 = vmatprep.mubr.msk.f32.mxu1 %vm767_vm15, %v4755_v49  ;;  %v4759_v49 = vsel %vm17099_vm6, %v18069_v26, 0.0 }
 0x233   : > { %14653 = vmatmul.mubr.msk.f32.gmra.mrb[42].mxu1 %vm767_vm15, %v18061_v7 }
 0x234   : > { %14655 = vmatprep.mubr.msk.f32.mxu1 %vm767_vm15, %v4757_v21  ;;  %v4761_v21 = vsel %vm17128_vm5, %v18079_v11, 0.0 }
 0x237   : > { %14656 = vmatmul.mubr.msk.f32.gmra.mrb[44].mxu1 %vm767_vm15, %v18071_v31 }
 0x238   : > { %14658 = vmatprep.mubr.msk.f32.mxu1 %vm767_vm15, %v4759_v49  ;;  %v4763_v49 = vsel %vm17157_vm7, %v18089_v2, 0.0 }
 0x23b   : > { %14659 = vmatmul.mubr.msk.f32.gmra.mrb[46].mxu1 %vm767_vm15, %v18081_v56 }
 0x23c   : > { %14661 = vmatprep.mubr.msk.f32.mxu1 %vm767_vm15, %v4761_v21  ;;  %v4765_v21 = vsel %vm17181_vm4, %v18099_v41, 0.0 }
 0x23f   : > { %14662 = vmatmul.mubr.msk.f32.gmra.mrb[48].mxu1 %vm767_vm15, %v18091_v15 }
 0x240   : > { %14664 = vmatprep.mubr.msk.f32.mxu1 %vm767_vm15, %v4763_v49  ;;  %v4767_v49 = vsel %vm17201_vm9, %v18109_v22, 0.0  ;;  %vm20913_vm9 = vnez %v20613_v52  ;;  %v5460_v52 = vld [vmem:[#allocation3 + $0x9] sm:$0xff] }
 0x243   : > { %14665 = vmatmul.mubr.msk.f32.gmra.mrb[50].mxu1 %vm767_vm15, %v18101_v29 }
 0x244   : > { %14667 = vmatprep.mubr.msk.f32.mxu1 %vm767_vm15, %v4765_v21  ;;  %v4769_v21 = vsel %vm17231_vm3, %v18119_v18, 0.0  ;;  %vm20916_vm3 = vnez %v20619_v16  ;;  %v12639_v16 = vld [vmem:[%s20105_s3 + $0x78] sm:$0xff] }
 0x247   : > { %14668 = vmatmul.mubr.msk.f32.gmra.mrb[52].mxu1 %vm767_vm15, %v18111_v42 }
 0x248   : > { %14670 = vmatprep.mubr.msk.f32.mxu1 %vm767_vm15, %v4767_v49  ;;  %v4771_v49 = vsel %vm20913_vm9, %v18129_v27, 0.0  ;;  %vm20919_vm9 = vnez %v20625_v46 }
 0x24b   : > { %14671 = vmatmul.mubr.msk.f32.gmra.mrb[54].mxu1 %vm767_vm15, %v18121_v32 }
 0x24c   : > { %14673 = vmatprep.mubr.msk.f32.mxu1 %vm767_vm15, %v4769_v21  ;;  %v4773_v21 = vsel %vm20916_vm3, %v18139_v10, 0.0  ;;  %v12673_v10 = vld [vmem:[%s20105_s3 + $0x88] sm:$0xff]  ;;  %vm20923_vm3 = vnez %v20473_v20 }
 0x24d   : > { %v18223_v20 = vld [vmem:[#allocation3 + $0x59] sm:$0xff] }
 0x24e   : > { %20928 = vst [vmem:[#allocation22_spill] sm:$0xff] %v18223_v20 }
 0x24f   : > { %14674 = vmatmul.mubr.msk.f32.gmra.mrb[56].mxu1 %vm767_vm15, %v18131_v17 }
 0x250   : > { %14676 = vmatprep.mubr.msk.f32.mxu1 %vm767_vm15, %v4771_v49  ;;  %v4775_v49 = vsel %vm20919_vm9, %v18149_v45, 0.0  ;;  %vm20921_vm9 = vnez %v20466_v63  ;;  %v12672_v45 = vld [vmem:[%s20105_s3 + $0x80] sm:$0xff] }
 0x253   : > { %14677 = vmatmul.mubr.msk.f32.gmra.mrb[58].mxu1 %vm767_vm15, %v18141_v62  ;;  %v18159_v62 = vld [vmem:[#allocation3 + $0xff] sm:$0xff] }
 0x254   : > { %14679 = vmatprep.mubr.msk.f32.mxu1 %vm767_vm15, %v4773_v21  ;;  %20920 = vst [vmem:[#allocation55_spill] sm:$0xff] %v18159_v62  ;;  %v12638_v21 = vld [vmem:[%s20105_s3 + $0x70] sm:$0xff] }
 0x255   : > { %v15609_v46 = vpack.c.bf16 %v12639_v16, %v12638_v21  ;;  %v18194_v21 = vld [vmem:[#allocation3 + $0x31] sm:$0xff] }
 0x257   : > { %14680 = vmatmul.mubr.msk.f32.gmra.mrb[60].mxu1 %vm767_vm15, %v18151_v30  ;;  %v5461_v30 = vld [vmem:[#allocation3 + $0x11] sm:$0xff] }
 0x258   : > { %14682 = vmatprep.mubr.msk.f32.mxu1 %vm767_vm15, %v4775_v49  ;;  %v5493_v49 = vsel %vm20921_vm9, %v5461_v30, 0.0  ;;  %vm20922_vm9 = vnez %v20469_v9  ;;  %v18192_v30 = vld [vmem:[#allocation3 + $0x29] sm:$0xff] }
 0x25b   : > { %14683 = vmatmul.mubr.msk.f32.gmra.mrb[62].mxu1 %vm767_vm15, %v18159_v62  ;;  %v18181_v62 = vld [vmem:[#allocation3 + $0x21] sm:$0xff] }
 0x25c   : > { %14693 = vmatprep.mubr.msk.f32.mxu1 %vm767_vm15, %v5460_v52  ;;  %v18186_v52 = vpack.c.bf16 %v12673_v10, %v12672_v45  ;;  %v5495_v16 = vsel %vm20922_vm9, %v18181_v62, 0.0  ;;  %v5497_v45 = vsel %vm20923_vm3, %v18194_v21, 0.0  ;;  %v18203_v10 = vld [vmem:[#allocation3 + $0x39] sm:$0xff]  ;;  %vm20925_vm9 = vnez %v20478_v28  ;;  %v18233_v28 = vld [vmem:[#allocation3 + $0x69] sm:$0xff] }
 0x25d   : > { %20924 = vst [vmem:[#allocation18_spill] sm:$0xff] %v18203_v10  ;;  %vm20927_vm3 = vnez %v20483_v36  ;;  %20930 = vst [vmem:[#allocation59_spill] sm:$0xff] %v18233_v28  ;;  %v18243_v36 = vld [vmem:[#allocation3 + $0x79] sm:$0xff] }
 0x25e   : > { %20932 = vst [vmem:[#allocation61_spill] sm:$0xff] %v18243_v36 }
 0x25f   : > { %14694 = vmatmul.mubr.msk.f32.vlgmr.msra.gmra.mrb[32].mxu1 %vm767_vm15, %v5493_v49 }
 0x260   : > { %15608 = vmatpush3.bf16.msra.mxu1 %v18018_v13  ;;  %14696 = vmatprep.mubr.msk.f32.mxu1 %vm767_vm15, %v18179_v48  ;;  %v18205_v13 = vld [vmem:[#allocation3 + $0x41] sm:$0xff] }
 0x261   : > { %15610 = vmatprep.subr.bf16.mxu1 %v15609_v46  ;;  %v5499_v49 = vsel %vm20925_vm9, %v18205_v13, 0.0  ;;  %vm20929_vm9 = vnez %v20488_v44  ;;  %v18253_v44 = vld [vmem:[#allocation3 + $0x89] sm:$0xff] }
 0x262   : > { %20934 = vst [vmem:[#allocation21_spill] sm:$0xff] %v18253_v44 }
 0x263   : > { %14697 = vmatmul.mubr.msk.f32.gmra.mrb[34].mxu1 %vm767_vm15, %v5495_v16  ;;  %v18215_v16 = vld [vmem:[#allocation3 + $0x51] sm:$0xff] }
 0x264   : > { %14699 = vmatprep.mubr.msk.f32.mxu1 %vm767_vm15, %v18192_v30  ;;  %15612 = vmatpush3.bf16.msra.mxu1 %v15609_v46  ;;  %v18213_v46 = vld [vmem:[#allocation3 + $0x49] sm:$0xff] }
 0x265   : > { %15614 = vmatprep.subr.bf16.mxu1 %v18186_v52  ;;  %20926 = vst [vmem:[#allocation19_spill] sm:$0xff] %v18213_v46 }
 0x267   : > { %14700 = vmatmul.mubr.msk.f32.gmra.mrb[36].mxu1 %vm767_vm15, %v5497_v45  ;;  %v5501_v45 = vsel %vm20927_vm3, %v18215_v16, 0.0  ;;  %vm20931_vm3 = vnez %v20493_v55  ;;  %v18263_v55 = vld [vmem:[#allocation3 + $0x99] sm:$0xff] }
 0x268   : > { %14702 = vmatprep.mubr.msk.f32.mxu1 %vm767_vm15, %v18203_v10  ;;  %v18225_v10 = vld [vmem:[#allocation3 + $0x61] sm:$0xff]  ;;  %20936 = vst [vmem:[#allocation24_spill] sm:$0xff] %v18263_v55 }
 0x26b   : > { %14703 = vmatmul.mubr.msk.f32.gmra.mrb[38].mxu1 %vm767_vm15, %v5499_v49  ;;  %v5503_v49 = vsel %vm20929_vm9, %v18225_v10, 0.0  ;;  %vm20933_vm9 = vnez %v20500_v12  ;;  %v18273_v12 = vld [vmem:[#allocation3 + $0xa9] sm:$0xff] }
 0x26c   : > { %14705 = vmatprep.mubr.msk.f32.mxu1 %vm767_vm15, %v18213_v46  ;;  %v18235_v46 = vld [vmem:[#allocation3 + $0x71] sm:$0xff]  ;;  %20937 = vst [vmem:[#allocation29_spill] sm:$0xff] %v18273_v12 }
 0x26f   : > { %14706 = vmatmul.mubr.msk.f32.gmra.mrb[40].mxu1 %vm767_vm15, %v5501_v45  ;;  %v5505_v45 = vsel %vm20931_vm3, %v18235_v46, 0.0  ;;  %vm20935_vm3 = vnez %v20674_v54  ;;  %v18283_v54 = vld [vmem:[#allocation3 + $0xb9] sm:$0xff] }
 0x270   : > { %14708 = vmatprep.mubr.msk.f32.mxu1 %vm767_vm15, %v18223_v20  ;;  %v18245_v20 = vld [vmem:[#allocation3 + $0x81] sm:$0xff]  ;;  %20939 = vst [vmem:[#allocation67_spill] sm:$0xff] %v18283_v54 }
 0x273   : > { %14709 = vmatmul.mubr.msk.f32.gmra.mrb[42].mxu1 %vm767_vm15, %v5503_v49  ;;  %v5507_v49 = vsel %vm20933_vm9, %v18245_v20, 0.0 }
 0x274   : > { %14711 = vmatprep.mubr.msk.f32.mxu1 %vm767_vm15, %v18233_v28  ;;  %v18255_v28 = vld [vmem:[#allocation3 + $0x91] sm:$0xff] }
 0x277   : > { %14712 = vmatmul.mubr.msk.f32.gmra.mrb[44].mxu1 %vm767_vm15, %v5505_v45  ;;  %v5509_v45 = vsel %vm20935_vm3, %v18255_v28, 0.0  ;;  %vm20938_vm3 = vnez %v20690_v14  ;;  %v18303_v14 = vld [vmem:[#allocation3 + $0xd9] sm:$0xff] }
 0x278   : > { %14714 = vmatprep.mubr.msk.f32.mxu1 %vm767_vm15, %v18243_v36  ;;  %v18265_v36 = vld [vmem:[#allocation3 + $0xa1] sm:$0xff]  ;;  %20944 = vst [vmem:[#allocation70_spill] sm:$0xff] %v18303_v14 }
 0x27b   : > { %14715 = vmatmul.mubr.msk.f32.gmra.mrb[46].mxu1 %vm767_vm15, %v5507_v49  ;;  %v5511_v49 = vsel %vm20841_vm2, %v18265_v36, 0.0  ;;  %vm20940_vm2 = vnez %v20698_v37  ;;  %v18313_v37 = vld [vmem:[#allocation3 + $0xe9] sm:$0xff] }
 0x27c   : > { %14717 = vmatprep.mubr.msk.f32.mxu1 %vm767_vm15, %v18253_v44  ;;  %v18275_v44 = vld [vmem:[#allocation3 + $0xb1] sm:$0xff] }
 0x27f   : > { %14718 = vmatmul.mubr.msk.f32.gmra.mrb[48].mxu1 %vm767_vm15, %v5509_v45  ;;  %v5513_v45 = vsel %vm20938_vm3, %v18275_v44, 0.0  ;;  %vm20943_vm3 = vnez %v20706_v51  ;;  %v18323_v51 = vld [vmem:[#allocation3 + $0xf9] sm:$0xff] }
 0x280   : > { %14720 = vmatprep.mubr.msk.f32.mxu1 %vm767_vm15, %v18263_v55  ;;  %v18285_v55 = vld [vmem:[#allocation3 + $0xc1] sm:$0xff]  ;;  %20945 = vst [vmem:[#allocation71_spill] sm:$0xff] %v18323_v51 }
 0x283   : > { %14721 = vmatmul.mubr.msk.f32.gmra.mrb[50].mxu1 %vm767_vm15, %v5511_v49  ;;  %v5515_v49 = vsel %vm20940_vm2, %v18285_v55, 0.0 }
 0x284   : > { %14723 = vmatprep.mubr.msk.f32.mxu1 %vm767_vm15, %v18273_v12  ;;  %v18295_v12 = vld [vmem:[#allocation3 + $0xd1] sm:$0xff] }
 0x285   : > { %20942 = vst [vmem:[#allocation69_spill] sm:$0xff] %v18295_v12 }
 0x287   : > { %14724 = vmatmul.mubr.msk.f32.gmra.mrb[52].mxu1 %vm767_vm15, %v5513_v45  ;;  %v5517_v45 = vsel %vm20943_vm3, %v18295_v12, 0.0 }
 0x288   : > { %14726 = vmatprep.mubr.msk.f32.mxu1 %vm767_vm15, %v18283_v54  ;;  %v18305_v54 = vld [vmem:[#allocation3 + $0xe1] sm:$0xff] }
 0x28b   : > { %14727 = vmatmul.mubr.msk.f32.gmra.mrb[54].mxu1 %vm767_vm15, %v5515_v49  ;;  %v5519_v49 = vsel %vm20859_vm8, %v18305_v54, 0.0 }
 0x28c   : > { %14729 = vmatprep.mubr.msk.f32.mxu1 %vm767_vm15, %v18293_v60  ;;  %v18315_v60 = vld [vmem:[#allocation3 + $0xf1] sm:$0xff] }
 0x28f   : > { %14730 = vmatmul.mubr.msk.f32.gmra.mrb[56].mxu1 %vm767_vm15, %v5517_v45  ;;  %v5521_v45 = vsel %vm20867_vm11, %v18315_v60, 0.0 }
 0x290   : > { %14732 = vmatprep.mubr.msk.f32.mxu1 %vm767_vm15, %v18303_v14  ;;  %v18325_v14 = vld [vmem:[#allocation3 + $0x101] sm:$0xff] }
 0x291   : > { %20946 = vst [vmem:[#allocation72_spill] sm:$0xff] %v18325_v14 }
 0x293   : > { %14733 = vmatmul.mubr.msk.f32.gmra.mrb[58].mxu1 %vm767_vm15, %v5519_v49  ;;  %v5523_v49 = vsel %vm20871_vm12, %v18325_v14, 0.0  ;;  %v12709_v14 = vld [vmem:[%s20105_s3 + $0xa8] sm:$0xff] }
 0x294   : > { %14735 = vmatprep.mubr.msk.f32.mxu1 %vm767_vm15, %v18313_v37 }
 0x297   : > { %14736 = vmatmul.mubr.msk.f32.gmra.mrb[60].mxu1 %vm767_vm15, %v5521_v45  ;;  %v5914_v45 = vsel %vm20904_vm0, %v18002_v35, 0.0  ;;  %vm20947_vm0 = vnez %v20908_v6 }
 0x298   : > { %14738 = vmatprep.mubr.msk.f32.mxu1 %vm767_vm15, %v18323_v51  ;;  %v15617_v51 = vpack.c.bf16 %v12675_v40, %v12674_v43  ;;  %v15621_v43 = vpack.c.bf16 %v12709_v14, %v12708_v25  ;;  %v5918_v40 = vsel %vm20947_vm0, %v18028_v1, 0.0  ;;  %v5922_v14 = vsel %vm20911_vm13, %v18049_v0, 0.0 }
 0x299   : > { %v5926_v25 = vsel %vm20781_vm1, %v18069_v26, 0.0 }
 0x29b   : > { %14739 = vmatmul.mubr.msk.f32.gmra.mrb[62].mxu1 %vm767_vm15, %v5523_v49  ;;  %v5916_v49 = vsel %vm20907_vm10, %v18016_v19, 0.0  ;;  %vm20948_vm10 = vnez %v20522_v38 }
 0x29c   : > { %14749 = vmatprep.mubr.msk.f32.mxu1 %vm767_vm15, %v5914_v45  ;;  %v5920_v35 = vsel %vm20948_vm10, %v18039_v34, 0.0  ;;  %v5932_v45 = vsel %vm17157_vm7, %v18099_v41, 0.0 }
 0x29f   : > { %14750 = vmatmul.mubr.msk.f32.vlgmr.msra.gmra.mrb[32].mxu1 %vm767_vm15, %v18020_v8  ;;  %v5928_v8 = vsel %vm17099_vm6, %v18079_v11, 0.0 }
 0x2a0   : > { %15616 = vmatpush3.bf16.msra.mxu1 %v18186_v52  ;;  %14752 = vmatprep.mubr.msk.f32.mxu1 %vm767_vm15, %v5916_v49  ;;  %v5930_v52 = vsel %vm17128_vm5, %v18089_v2, 0.0  ;;  %v5934_v49 = vsel %vm17181_vm4, %v18109_v22, 0.0  ;;  %vm20949_vm5 = vnez %v20599_v57 }
 0x2a1   : > { %15618 = vmatprep.subr.bf16.mxu1 %v15617_v51 }
 0x2a3   : > { %14753 = vmatmul.mubr.msk.f32.gmra.mrb[34].mxu1 %vm767_vm15, %v18031_v61 }
 0x2a4   : > { %14755 = vmatprep.mubr.msk.f32.mxu1 %vm767_vm15, %v5918_v40  ;;  %15620 = vmatpush3.bf16.msra.mxu1 %v15617_v51  ;;  %v5924_v51 = vsel %vm20912_vm14, %v18059_v33, 0.0  ;;  %v5936_v40 = vsel %vm20949_vm5, %v18119_v18, 0.0 }
 0x2a5   : > { %15622 = vmatprep.subr.bf16.mxu1 %v15621_v43 }
 0x2a7   : > { %14756 = vmatmul.mubr.msk.f32.gmra.mrb[36].mxu1 %vm767_vm15, %v18041_v47 }
 0x2a8   : > { %14758 = vmatprep.mubr.msk.f32.mxu1 %vm767_vm15, %v5920_v35  ;;  %v20950_v35 = vld [vmem:[#allocation63_spill] sm:$0xff] }
 0x2a9   : > { %vm20951_vm7 = vnez %v20950_v35  ;;  %v18434_v35 = vld [vmem:[#allocation3 + $0x107] sm:$0xff] }
 0x2aa   : > { %20960 = vst [vmem:[#allocation73_spill] sm:$0xff] %v18434_v35 }
 0x2ab   : > { %14759 = vmatmul.mubr.msk.f32.gmra.mrb[38].mxu1 %vm767_vm15, %v18051_v53 }
 0x2ac   : > { %14761 = vmatprep.mubr.msk.f32.mxu1 %vm767_vm15, %v5922_v14  ;;  %v5938_v14 = vsel %vm20951_vm7, %v18129_v27, 0.0 }
 0x2af   : > { %14762 = vmatmul.mubr.msk.f32.gmra.mrb[40].mxu1 %vm767_vm15, %v18061_v7 }
 0x2b0   : > { %14764 = vmatprep.mubr.msk.f32.mxu1 %vm767_vm15, %v5924_v51  ;;  %v20952_v51 = vld [vmem:[#allocation15_spill] sm:$0xff] }
 0x2b3   : > { %14765 = vmatmul.mubr.msk.f32.gmra.mrb[42].mxu1 %vm767_vm15, %v18071_v31 }
 0x2b4   : > { %14767 = vmatprep.mubr.msk.f32.mxu1 %vm767_vm15, %v5926_v25  ;;  %v20953_v25 = vld [vmem:[#allocation50_spill] sm:$0xff] }
 0x2b7   : > { %14768 = vmatmul.mubr.msk.f32.gmra.mrb[44].mxu1 %vm767_vm15, %v18081_v56 }
 0x2b8   : > { %14770 = vmatprep.mubr.msk.f32.mxu1 %vm767_vm15, %v5928_v8  ;;  %v20954_v8 = vld [vmem:[#allocation64_spill] sm:$0xff] }
 0x2b9   : > { %vm20955_vm4 = vnez %v20954_v8 }
 0x2bb   : > { %14771 = vmatmul.mubr.msk.f32.gmra.mrb[46].mxu1 %vm767_vm15, %v18091_v15 }
 0x2bc   : > { %14773 = vmatprep.mubr.msk.f32.mxu1 %vm767_vm15, %v5930_v52  ;;  %v5940_v52 = vsel %vm20955_vm4, %v20953_v25, 0.0  ;;  %v20968_v25 = vld [vmem:[#allocation34_spill] sm:$0xff] }
 0x2bf   : > { %14774 = vmatmul.mubr.msk.f32.gmra.mrb[48].mxu1 %vm767_vm15, %v18101_v29 }
 0x2c0   : > { %14776 = vmatprep.mubr.msk.f32.mxu1 %vm767_vm15, %v5932_v45  ;;  %v20956_v45 = vld [vmem:[#allocation54_spill] sm:$0xff] }
 0x2c3   : > { %14777 = vmatmul.mubr.msk.f32.gmra.mrb[50].mxu1 %vm767_vm15, %v18111_v42 }
 0x2c4   : > { %14779 = vmatprep.mubr.msk.f32.mxu1 %vm767_vm15, %v5934_v49  ;;  %v20957_v49 = vld [vmem:[#allocation16_spill] sm:$0xff] }
 0x2c7   : > { %14780 = vmatmul.mubr.msk.f32.gmra.mrb[52].mxu1 %vm767_vm15, %v18121_v32 }
 0x2c8   : > { %14782 = vmatprep.mubr.msk.f32.mxu1 %vm767_vm15, %v5936_v40  ;;  %v20958_v40 = vld [vmem:[#allocation65_spill] sm:$0xff] }
 0x2c9   : > { %vm20959_vm5 = vnez %v20958_v40  ;;  %v12710_v40 = vld [vmem:[%s20105_s3 + $0xb0] sm:$0xff] }
 0x2ca   : > { %v5942_v57 = vsel %vm20959_vm5, %v20957_v49, 0.0  ;;  %v20966_v49 = vld [vmem:[#allocation28_spill] sm:$0xff]  ;;  %vm20996_vm5 = vnez %v20469_v9 }
 0x2cb   : > { %14783 = vmatmul.mubr.msk.f32.gmra.mrb[54].mxu1 %vm767_vm15, %v18131_v17 }
 0x2cc   : > { %14785 = vmatprep.mubr.msk.f32.mxu1 %vm767_vm15, %v5938_v14  ;;  %v20961_v14 = vld [vmem:[#allocation55_spill] sm:$0xff] }
 0x2cf   : > { %14786 = vmatmul.mubr.msk.f32.gmra.mrb[56].mxu1 %vm767_vm15, %v20952_v51  ;;  %v20962_v51 = vld [vmem:[#allocation66_spill] sm:$0xff] }
 0x2d0   : > { %14788 = vmatprep.mubr.msk.f32.mxu1 %vm767_vm15, %v5940_v52  ;;  %vm20963_vm7 = vnez %v20962_v51  ;;  %v18442_v52 = vld [vmem:[#allocation3 + $0x10f] sm:$0xff] }
 0x2d1   : > { %v5944_v8 = vsel %vm20963_vm7, %v18434_v35, 0.0  ;;  %20964 = vst [vmem:[#allocation74_spill] sm:$0xff] %v18442_v52  ;;  %v12745_v35 = vld [vmem:[%s20105_s3 + $0xc8] sm:$0xff]  ;;  %vm20995_vm7 = vnez %v20466_v63 }
 0x2d3   : > { %14789 = vmatmul.mubr.msk.f32.gmra.mrb[58].mxu1 %vm767_vm15, %v20956_v45  ;;  %v20967_v45 = vld [vmem:[#allocation32_spill] sm:$0xff] }
 0x2d4   : > { %14791 = vmatprep.mubr.msk.f32.mxu1 %vm767_vm15, %v5942_v57  ;;  %v12711_v57 = vld [vmem:[%s20105_s3 + $0xb8] sm:$0xff] }
 0x2d5   : > { %v15625_v51 = vpack.c.bf16 %v12711_v57, %v12710_v40  ;;  %v20969_v40 = vld [vmem:[#allocation37_spill] sm:$0xff]  ;;  %v20971_v57 = vld [vmem:[#allocation42_spill] sm:$0xff] }
 0x2d7   : > { %14792 = vmatmul.mubr.msk.f32.gmra.mrb[60].mxu1 %vm767_vm15, %v20961_v14  ;;  %v20965_v14 = vld [vmem:[#allocation26_spill] sm:$0xff] }
 0x2d8   : > { %14794 = vmatprep.mubr.msk.f32.mxu1 %vm767_vm15, %v5944_v8  ;;  %v12744_v8 = vld [vmem:[%s20105_s3 + $0xc0] sm:$0xff] }
 0x2db   : > { %14795 = vmatmul.mubr.msk.f32.gmra.mrb[62].mxu1 %vm767_vm15, %v18442_v52  ;;  %v15629_v52 = vpack.c.bf16 %v12745_v35, %v12744_v8  ;;  %v20974_v35 = vld [vmem:[#allocation49_spill] sm:$0xff]  ;;  %v20978_v8 = vld [vmem:[#allocation58_spill] sm:$0xff] }
 0x2dc   : > { %14805 = vmatprep.mubr.msk.f32.mxu1 %vm767_vm15, %v20965_v14  ;;  %v20970_v14 = vld [vmem:[#allocation39_spill] sm:$0xff] }
 0x2df   : > { %14806 = vmatmul.mubr.msk.f32.vlgmr.msra.gmra.mrb[32].mxu1 %vm767_vm15, %v20966_v49  ;;  %v20977_v49 = vld [vmem:[#allocation56_spill] sm:$0xff] }
 0x2e0   : > { %15624 = vmatpush3.bf16.msra.mxu1 %v15621_v43  ;;  %14808 = vmatprep.mubr.msk.f32.mxu1 %vm767_vm15, %v20967_v45  ;;  %v20972_v43 = vld [vmem:[#allocation44_spill] sm:$0xff]  ;;  %v20973_v45 = vld [vmem:[#allocation47_spill] sm:$0xff] }
 0x2e1   : > { %15626 = vmatprep.subr.bf16.mxu1 %v15625_v51 }
 0x2e3   : > { %14809 = vmatmul.mubr.msk.f32.gmra.mrb[34].mxu1 %vm767_vm15, %v20968_v25  ;;  %v20975_v25 = vld [vmem:[#allocation51_spill] sm:$0xff] }
 0x2e4   : > { %14811 = vmatprep.mubr.msk.f32.mxu1 %vm767_vm15, %v20969_v40  ;;  %15628 = vmatpush3.bf16.msra.mxu1 %v15625_v51  ;;  %v20976_v51 = vld [vmem:[#allocation53_spill] sm:$0xff] }
 0x2e5   : > { %15630 = vmatprep.subr.bf16.mxu1 %v15629_v52  ;;  %v20979_v40 = vld [vmem:[#allocation25_spill] sm:$0xff] }
 0x2e7   : > { %14812 = vmatmul.mubr.msk.f32.gmra.mrb[36].mxu1 %vm767_vm15, %v20970_v14  ;;  %v20980_v14 = vld [vmem:[#allocation30_spill] sm:$0xff] }
 0x2e8   : > { %14814 = vmatprep.mubr.msk.f32.mxu1 %vm767_vm15, %v20971_v57  ;;  %v20981_v57 = vld [vmem:[#allocation31_spill] sm:$0xff] }
 0x2eb   : > { %14815 = vmatmul.mubr.msk.f32.gmra.mrb[38].mxu1 %vm767_vm15, %v20972_v43  ;;  %v20982_v43 = vld [vmem:[#allocation5_spill] sm:$0xff] }
 0x2ec   : > { %14817 = vmatprep.mubr.msk.f32.mxu1 %vm767_vm15, %v20973_v45  ;;  %v20983_v45 = vld [vmem:[#allocation35_spill] sm:$0xff] }
 0x2ef   : > { %14818 = vmatmul.mubr.msk.f32.gmra.mrb[40].mxu1 %vm767_vm15, %v20974_v35  ;;  %v20984_v35 = vld [vmem:[#allocation36_spill] sm:$0xff] }
 0x2f0   : > { %14820 = vmatprep.mubr.msk.f32.mxu1 %vm767_vm15, %v20975_v25  ;;  %v20985_v25 = vld [vmem:[#allocation6_spill] sm:$0xff] }
 0x2f3   : > { %14821 = vmatmul.mubr.msk.f32.gmra.mrb[42].mxu1 %vm767_vm15, %v20976_v51  ;;  %v20986_v51 = vld [vmem:[#allocation7_spill] sm:$0xff] }
 0x2f4   : > { %14823 = vmatprep.mubr.msk.f32.mxu1 %vm767_vm15, %v20977_v49  ;;  %v20987_v49 = vld [vmem:[#allocation40_spill] sm:$0xff] }
 0x2f7   : > { %14824 = vmatmul.mubr.msk.f32.gmra.mrb[44].mxu1 %vm767_vm15, %v20978_v8  ;;  %v20988_v8 = vld [vmem:[#allocation41_spill] sm:$0xff] }
 0x2f8   : > { %14826 = vmatprep.mubr.msk.f32.mxu1 %vm767_vm15, %v20979_v40  ;;  %v20989_v40 = vld [vmem:[#allocation9_spill] sm:$0xff] }
 0x2fb   : > { %14827 = vmatmul.mubr.msk.f32.gmra.mrb[46].mxu1 %vm767_vm15, %v20980_v14  ;;  %v20990_v14 = vld [vmem:[#allocation10_spill] sm:$0xff] }
 0x2fc   : > { %14829 = vmatprep.mubr.msk.f32.mxu1 %vm767_vm15, %v20981_v57  ;;  %v20991_v57 = vld [vmem:[#allocation45_spill] sm:$0xff] }
 0x2ff   : > { %14830 = vmatmul.mubr.msk.f32.gmra.mrb[48].mxu1 %vm767_vm15, %v20982_v43  ;;  %v20992_v43 = vld [vmem:[#allocation46_spill] sm:$0xff] }
 0x300   : > { %14832 = vmatprep.mubr.msk.f32.mxu1 %vm767_vm15, %v20983_v45  ;;  %v20993_v45 = vld [vmem:[#allocation12_spill] sm:$0xff] }
 0x303   : > { %14833 = vmatmul.mubr.msk.f32.gmra.mrb[50].mxu1 %vm767_vm15, %v20984_v35  ;;  %v20994_v35 = vld [vmem:[#allocation13_spill] sm:$0xff] }
 0x304   : > { %14835 = vmatprep.mubr.msk.f32.mxu1 %vm767_vm15, %v20985_v25  ;;  %v18518_v25 = vld [vmem:[#allocation3 + $0x108] sm:$0xff] }
 0x307   : > { %14836 = vmatmul.mubr.msk.f32.gmra.mrb[52].mxu1 %vm767_vm15, %v20986_v51  ;;  %v18522_v51 = vld [vmem:[#allocation3 + $0x110] sm:$0xff] }
 0x308   : > { %14838 = vmatprep.mubr.msk.f32.mxu1 %vm767_vm15, %v20987_v49  ;;  %v12746_v49 = vld [vmem:[%s20105_s3 + $0xd0] sm:$0xff] }
 0x30b   : > { %14839 = vmatmul.mubr.msk.f32.gmra.mrb[54].mxu1 %vm767_vm15, %v20988_v8  ;;  %v12747_v8 = vld [vmem:[%s20105_s3 + $0xd8] sm:$0xff] }
 0x30c   : > { %14841 = vmatprep.mubr.msk.f32.mxu1 %vm767_vm15, %v20989_v40  ;;  %v15633_v40 = vpack.c.bf16 %v12747_v8, %v12746_v49  ;;  %v21000_v49 = vld [vmem:[#allocation19_spill] sm:$0xff] }
 0x30d   : > { %v21001_v8 = vld [vmem:[#allocation11_spill] sm:$0xff] }
 0x30e   : > { %vm21002_vm4 = vnez %v21001_v8  ;;  %v21009_v8 = vld [vmem:[#allocation61_spill] sm:$0xff] }
 0x30f   : > { %14842 = vmatmul.mubr.msk.f32.gmra.mrb[56].mxu1 %vm767_vm15, %v20990_v14  ;;  %v6727_v14 = vsel %vm20995_vm7, %v18181_v62, 0.0  ;;  %v6729_v62 = vsel %vm20996_vm5, %v18194_v21, 0.0 }
 0x310   : > { %14844 = vmatprep.mubr.msk.f32.mxu1 %vm767_vm15, %v20991_v57  ;;  %v12780_v57 = vld [vmem:[%s20105_s3 + $0xe0] sm:$0xff] }
 0x313   : > { %14845 = vmatmul.mubr.msk.f32.gmra.mrb[58].mxu1 %vm767_vm15, %v20992_v43  ;;  %v12781_v43 = vld [vmem:[%s20105_s3 + $0xe8] sm:$0xff] }
 0x314   : > { %14847 = vmatprep.mubr.msk.f32.mxu1 %vm767_vm15, %v20993_v45  ;;  %v20997_v45 = vld [vmem:[#allocation18_spill] sm:$0xff] }
 0x317   : > { %14848 = vmatmul.mubr.msk.f32.gmra.mrb[60].mxu1 %vm767_vm15, %v20994_v35  ;;  %v20998_v35 = vld [vmem:[#allocation8_spill] sm:$0xff] }
 0x318   : > { %14850 = vmatprep.mubr.msk.f32.mxu1 %vm767_vm15, %v18518_v25  ;;  %vm20999_vm7 = vnez %v20998_v35 }
 0x31b   : > { %14851 = vmatmul.mubr.msk.f32.gmra.mrb[62].mxu1 %vm767_vm15, %v18522_v51 }
 0x31c   : > { %14861 = vmatprep.mubr.msk.f32.mxu1 %vm767_vm15, %v18179_v48  ;;  %v15637_v48 = vpack.c.bf16 %v12781_v43, %v12780_v57  ;;  %v21003_v57 = vld [vmem:[#allocation22_spill] sm:$0xff] }
 0x31f   : > { %14862 = vmatmul.mubr.msk.f32.vlgmr.msra.gmra.mrb[32].mxu1 %vm767_vm15, %v6727_v14  ;;  %v6733_v14 = vsel %vm21002_vm4, %v18215_v16, 0.0 }
 0x320   : > { %15632 = vmatpush3.bf16.msra.mxu1 %v15629_v52  ;;  %14864 = vmatprep.mubr.msk.f32.mxu1 %vm767_vm15, %v18192_v30  ;;  %v6731_v52 = vsel %vm20999_vm7, %v18205_v13, 0.0 }
 0x321   : > { %15634 = vmatprep.subr.bf16.mxu1 %v15633_v40 }
 0x323   : > { %14865 = vmatmul.mubr.msk.f32.gmra.mrb[34].mxu1 %vm767_vm15, %v6729_v62  ;;  %v21006_v62 = vld [vmem:[#allocation59_spill] sm:$0xff] }
 0x324   : > { %14867 = vmatprep.mubr.msk.f32.mxu1 %vm767_vm15, %v20997_v45  ;;  %15636 = vmatpush3.bf16.msra.mxu1 %v15633_v40  ;;  %v21004_v40 = vld [vmem:[#allocation14_spill] sm:$0xff] }
 0x325   : > { %15638 = vmatprep.subr.bf16.mxu1 %v15637_v48  ;;  %vm21005_vm5 = vnez %v21004_v40  ;;  %v21012_v40 = vld [vmem:[#allocation21_spill] sm:$0xff] }
 0x326   : > { %v6735_v43 = vsel %vm21005_vm5, %v18225_v10, 0.0 }
 0x327   : > { %14868 = vmatmul.mubr.msk.f32.gmra.mrb[36].mxu1 %vm767_vm15, %v6731_v52  ;;  %v21007_v52 = vld [vmem:[#allocation17_spill] sm:$0xff] }
 0x328   : > { %14870 = vmatprep.mubr.msk.f32.mxu1 %vm767_vm15, %v21000_v49  ;;  %vm21008_vm7 = vnez %v21007_v52  ;;  %v21014_v52 = vld [vmem:[#allocation24_spill] sm:$0xff] }
 0x329   : > { %v6737_v35 = vsel %vm21008_vm7, %v18235_v46, 0.0 }
 0x32b   : > { %14871 = vmatmul.mubr.msk.f32.gmra.mrb[38].mxu1 %vm767_vm15, %v6733_v14  ;;  %v21010_v14 = vld [vmem:[#allocation20_spill] sm:$0xff] }
 0x32c   : > { %14873 = vmatprep.mubr.msk.f32.mxu1 %vm767_vm15, %v21003_v57  ;;  %vm21011_vm4 = vnez %v21010_v14  ;;  %v21017_v14 = vld [vmem:[#allocation29_spill] sm:$0xff] }
 0x32d   : > { %v6739_v57 = vsel %vm21011_vm4, %v18245_v20, 0.0 }
 0x32f   : > { %14874 = vmatmul.mubr.msk.f32.gmra.mrb[40].mxu1 %vm767_vm15, %v6735_v43  ;;  %v21020_v43 = vld [vmem:[#allocation67_spill] sm:$0xff] }
 0x330   : > { %14876 = vmatprep.mubr.msk.f32.mxu1 %vm767_vm15, %v21006_v62  ;;  %v6741_v62 = vsel %vm20933_vm9, %v18255_v28, 0.0 }
 0x333   : > { %14877 = vmatmul.mubr.msk.f32.gmra.mrb[42].mxu1 %vm767_vm15, %v6737_v35  ;;  %v21015_v35 = vld [vmem:[#allocation27_spill] sm:$0xff] }
 0x334   : > { %14879 = vmatprep.mubr.msk.f32.mxu1 %vm767_vm15, %v21009_v8  ;;  %vm21016_vm7 = vnez %v21015_v35  ;;  %v21023_v35 = vld [vmem:[#allocation68_spill] sm:$0xff] }
 0x335   : > { %v6743_v8 = vsel %vm21016_vm7, %v18265_v36, 0.0 }
 0x337   : > { %14880 = vmatmul.mubr.msk.f32.gmra.mrb[44].mxu1 %vm767_vm15, %v6739_v57  ;;  %v21018_v57 = vld [vmem:[#allocation33_spill] sm:$0xff] }
 0x338   : > { %14882 = vmatprep.mubr.msk.f32.mxu1 %vm767_vm15, %v21012_v40  ;;  %vm21019_vm4 = vnez %v21018_v57  ;;  %v21025_v57 = vld [vmem:[#allocation70_spill] sm:$0xff] }
 0x339   : > { %v6745_v40 = vsel %vm21019_vm4, %v18275_v44, 0.0 }
 0x33b   : > { %14883 = vmatmul.mubr.msk.f32.gmra.mrb[46].mxu1 %vm767_vm15, %v6741_v62  ;;  %v21021_v62 = vld [vmem:[#allocation38_spill] sm:$0xff] }
 0x33c   : > { %14885 = vmatprep.mubr.msk.f32.mxu1 %vm767_vm15, %v21014_v52  ;;  %vm21022_vm9 = vnez %v21021_v62  ;;  %v6753_v62 = vsel %vm20859_vm8, %v18315_v60, 0.0 }
 0x33d   : > { %v6747_v52 = vsel %vm21022_vm9, %v18285_v55, 0.0 }
 0x33f   : > { %14886 = vmatmul.mubr.msk.f32.gmra.mrb[48].mxu1 %vm767_vm15, %v6743_v8  ;;  %v21028_v8 = vld [vmem:[#allocation71_spill] sm:$0xff] }
 0x340   : > { %14888 = vmatprep.mubr.msk.f32.mxu1 %vm767_vm15, %v21017_v14  ;;  %v6749_v14 = vsel %vm20940_vm2, %v18295_v12, 0.0 }
 0x343   : > { %14889 = vmatmul.mubr.msk.f32.gmra.mrb[50].mxu1 %vm767_vm15, %v6745_v40  ;;  %v18628_v40 = vld [vmem:[#allocation3 + $0x109] sm:$0xff] }
 0x344   : > { %14891 = vmatprep.mubr.msk.f32.mxu1 %vm767_vm15, %v21020_v43  ;;  %v6751_v43 = vsel %vm20943_vm3, %v18305_v54, 0.0  ;;  %21031 = vst [vmem:[#allocation26_spill] sm:$0xff] %v18628_v40 }
 0x347   : > { %14892 = vmatmul.mubr.msk.f32.gmra.mrb[52].mxu1 %vm767_vm15, %v6747_v52  ;;  %v12816_v52 = vld [vmem:[%s20105_s3 + $0x100] sm:$0xff] }
 0x348   : > { %14894 = vmatprep.mubr.msk.f32.mxu1 %vm767_vm15, %v21023_v35 }
 0x34b   : > { %14895 = vmatmul.mubr.msk.f32.gmra.mrb[54].mxu1 %vm767_vm15, %v6749_v14  ;;  %v21029_v14 = vld [vmem:[#allocation72_spill] sm:$0xff] }
 0x34c   : > { %14897 = vmatprep.mubr.msk.f32.mxu1 %vm767_vm15, %v21025_v57  ;;  %v6755_v12 = vsel %vm20867_vm11, %v21029_v14, 0.0  ;;  %v12783_v57 = vld [vmem:[%s20105_s3 + $0xf8] sm:$0xff]  ;;  %vm21034_vm11 = vnez %v20903_v59 }
 0x34f   : > { %14898 = vmatmul.mubr.msk.f32.gmra.mrb[56].mxu1 %vm767_vm15, %v6751_v43  ;;  %v18630_v43 = vld [vmem:[#allocation3 + $0x111] sm:$0xff] }
 0x350   : > { %14900 = vmatprep.mubr.msk.f32.mxu1 %vm767_vm15, %v18313_v37  ;;  %21032 = vst [vmem:[#allocation28_spill] sm:$0xff] %v18630_v43 }
 0x353   : > { %14901 = vmatmul.mubr.msk.f32.gmra.mrb[58].mxu1 %vm767_vm15, %v6753_v62  ;;  %v6757_v62 = vsel %vm20871_vm12, %v18630_v43, 0.0  ;;  %v12817_v43 = vld [vmem:[%s20105_s3 + $0x108] sm:$0xff]  ;;  %vm21035_vm12 = vnez %v20906_v23 }
 0x354   : > { %14903 = vmatprep.mubr.msk.f32.mxu1 %vm767_vm15, %v21028_v8  ;;  %v12782_v8 = vld [vmem:[%s20105_s3 + $0xf0] sm:$0xff] }
 0x357   : > { %14904 = vmatmul.mubr.msk.f32.gmra.mrb[60].mxu1 %vm767_vm15, %v6755_v12  ;;  %v7148_v12 = vsel %vm21034_vm11, %v18016_v19, 0.0  ;;  %v18660_v19 = vpack.c.bf16 %v12817_v43, %v12816_v52  ;;  %v7147_v43 = vld [vmem:[#allocation3 + $0x11f] sm:$0xff] }
 0x358   : > { %14906 = vmatprep.mubr.msk.f32.mxu1 %vm767_vm15, %v18628_v40  ;;  %v15641_v40 = vpack.c.bf16 %v12783_v57, %v12782_v8  ;;  %v7152_v57 = vsel %vm20947_vm0, %v18039_v34, 0.0  ;;  %v21050_v34 = vld [vmem:[#allocation73_spill] sm:$0xff]  ;;  %v21053_v8 = vld [vmem:[#allocation74_spill] sm:$0xff] }
 0x35b   : > { %14907 = vmatmul.mubr.msk.f32.gmra.mrb[62].mxu1 %vm767_vm15, %v6757_v62  ;;  %v7150_v62 = vsel %vm21035_vm12, %v18028_v1, 0.0  ;;  %v7154_v1 = vsel %vm20948_vm10, %v18049_v0, 0.0 }
 0x35c   : > { %14917 = vmatprep.mubr.msk.f32.mxu1 %vm767_vm15, %v7148_v12  ;;  %v7538_v12 = vld [vmem:[#allocation3 + $0x28] sm:$0xff] }
 0x35f   : > { %14918 = vmatmul.mubr.msk.f32.vlgmr.msra.gmra.mrb[32].mxu1 %vm767_vm15, %v18031_v61  ;;  %v7156_v61 = vsel %vm20911_vm13, %v18059_v33, 0.0 }
 0x360   : > { %15640 = vmatpush3.bf16.msra.mxu1 %v15637_v48  ;;  %14920 = vmatprep.mubr.msk.f32.mxu1 %vm767_vm15, %v7150_v62  ;;  %v7146_v48 = vld [vmem:[#allocation3 + $0x117] sm:$0xff]  ;;  %v12818_v62 = vld [vmem:[%s20105_s3 + $0x110] sm:$0xff] }
 0x361   : > { %15642 = vmatprep.subr.bf16.mxu1 %v15641_v40 }
 0x363   : > { %14921 = vmatmul.mubr.msk.f32.gmra.mrb[34].mxu1 %vm767_vm15, %v18041_v47  ;;  %v21051_v47 = vld [vmem:[#allocation65_spill] sm:$0xff] }
 0x364   : > { %14923 = vmatprep.mubr.msk.f32.mxu1 %vm767_vm15, %v7152_v57  ;;  %15644 = vmatpush3.bf16.msra.mxu1 %v15641_v40  ;;  %v21054_v40 = vld [vmem:[#allocation66_spill] sm:$0xff] }
 0x365   : > { %15646 = vmatprep.subr.bf16.mxu1 %v18660_v19  ;;  %v12819_v57 = vld [vmem:[%s20105_s3 + $0x118] sm:$0xff] }
 0x367   : > { %14924 = vmatmul.mubr.msk.f32.gmra.mrb[36].mxu1 %vm767_vm15, %v18051_v53  ;;  %v7158_v53 = vsel %vm20912_vm14, %v18069_v26, 0.0  ;;  %vm21036_vm14 = vnez %v20579_v58  ;;  %v21046_v26 = vld [vmem:[#allocation16_spill] sm:$0xff] }
 0x368   : > { %14926 = vmatprep.mubr.msk.f32.mxu1 %vm767_vm15, %v7154_v1  ;;  %v12853_v1 = vld [vmem:[%s20107_s5 + $0x20] sm:$0xff] }
 0x36b   : > { %14927 = vmatmul.mubr.msk.f32.gmra.mrb[38].mxu1 %vm767_vm15, %v18061_v7  ;;  %v7160_v7 = vsel %vm20781_vm1, %v18079_v11, 0.0  ;;  %vm21037_vm1 = vnez %v20589_v5 }
 0x36c   : > { %14929 = vmatprep.mubr.msk.f32.mxu1 %vm767_vm15, %v7156_v61  ;;  %v12854_v61 = vld [vmem:[%s20107_s5 + $0x28] sm:$0xff] }
 0x36f   : > { %14930 = vmatmul.mubr.msk.f32.gmra.mrb[40].mxu1 %vm767_vm15, %v18071_v31  ;;  %v7162_v31 = vsel %vm17099_vm6, %v18089_v2, 0.0  ;;  %vm21038_vm6 = vnez %v20594_v3  ;;  %v21042_v2 = vld [vmem:[#allocation50_spill] sm:$0xff] }
 0x370   : > { %14932 = vmatprep.mubr.msk.f32.mxu1 %vm767_vm15, %v7158_v53  ;;  %v12855_v53 = vld [vmem:[%s20107_s5 + $0x30] sm:$0xff] }
 0x373   : > { %14933 = vmatmul.mubr.msk.f32.gmra.mrb[42].mxu1 %vm767_vm15, %v18081_v56  ;;  %v7164_v56 = vsel %vm21036_vm14, %v18099_v41, 0.0 }
 0x374   : > { %14935 = vmatprep.mubr.msk.f32.mxu1 %vm767_vm15, %v7160_v7  ;;  %v15653_v7 = vpack.c.bf16 %v12854_v61, %v12853_v1  ;;  %v7558_v1 = vld [vmem:[#allocation3 + $0xc8] sm:$0xff]  ;;  %v7559_v61 = vld [vmem:[#allocation3 + $0xd0] sm:$0xff] }
 0x376   : > { %15654 = vmatprep.subr.bf16.mxu0 %v15653_v7 }
 0x377   : > { %14936 = vmatmul.mubr.msk.f32.gmra.mrb[44].mxu1 %vm767_vm15, %v18091_v15  ;;  %v7166_v15 = vsel %vm21037_vm1, %v18109_v22, 0.0  ;;  %v21041_v22 = vld [vmem:[#allocation15_spill] sm:$0xff]  ;;  %15656 = vmatpush3.bf16.msra.mxu0 %v15653_v7  ;;  %v7561_v7 = vld [vmem:[#allocation3 + $0xe0] sm:$0xff] }
 0x378   : > { %14938 = vmatprep.mubr.msk.f32.mxu1 %vm767_vm15, %v7162_v31  ;;  %v12856_v31 = vld [vmem:[%s20107_s5 + $0x38] sm:$0xff] }
 0x37b   : > { %14939 = vmatmul.mubr.msk.f32.gmra.mrb[46].mxu1 %vm767_vm15, %v18101_v29  ;;  %v7168_v29 = vsel %vm21038_vm6, %v18119_v18, 0.0  ;;  %v21045_v18 = vld [vmem:[#allocation54_spill] sm:$0xff] }
 0x37c   : > { %14941 = vmatprep.mubr.msk.f32.mxu1 %vm767_vm15, %v7164_v56  ;;  %v15649_v56 = vpack.c.bf16 %v12819_v57, %v12818_v62  ;;  %v7556_v62 = vld [vmem:[#allocation3 + $0xb8] sm:$0xff]  ;;  %v7557_v57 = vld [vmem:[#allocation3 + $0xc0] sm:$0xff] }
 0x37f   : > { %14942 = vmatmul.mubr.msk.f32.gmra.mrb[48].mxu1 %vm767_vm15, %v18111_v42  ;;  %v21039_v42 = vld [vmem:[#allocation62_spill] sm:$0xff] }
 0x380   : > { %14944 = vmatprep.mubr.msk.f32.mxu1 %vm767_vm15, %v7166_v15  ;;  %vm21040_vm14 = vnez %v21039_v42  ;;  %v15657_v15 = vpack.c.bf16 %v12856_v31, %v12855_v53  ;;  %v7560_v53 = vld [vmem:[#allocation3 + $0xd8] sm:$0xff]  ;;  %v7562_v31 = vld [vmem:[#allocation3 + $0xe8] sm:$0xff] }
 0x381   : > { %v7170_v41 = vsel %vm21040_vm14, %v18129_v27, 0.0  ;;  %v21049_v27 = vld [vmem:[#allocation55_spill] sm:$0xff]  ;;  %vm21052_vm14 = vnez %v21051_v47 }
 0x382   : > { %v7176_v0 = vsel %vm21052_vm14, %v21050_v34, 0.0  ;;  %15658 = vmatprep.subr.bf16.mxu0 %v15657_v15  ;;  %v7549_v34 = vld [vmem:[#allocation3 + $0x80] sm:$0xff]  ;;  %vm21057_vm14 = vnez %v20469_v9 }
 0x383   : > { %14945 = vmatmul.mubr.msk.f32.gmra.mrb[50].mxu1 %vm767_vm15, %v18121_v32  ;;  %v21043_v32 = vld [vmem:[#allocation63_spill] sm:$0xff]  ;;  %15660 = vmatpush3.bf16.msra.mxu0 %v15657_v15  ;;  %v7564_v15 = vld [vmem:[#allocation3 + $0xf8] sm:$0xff] }
 0x384   : > { %14947 = vmatprep.mubr.msk.f32.mxu1 %vm767_vm15, %v7168_v29  ;;  %vm21044_vm1 = vnez %v21043_v32  ;;  %v7539_v29 = vld [vmem:[#allocation3 + $0x30] sm:$0xff] }
 0x385   : > { %v7172_v11 = vsel %vm21044_vm1, %v21042_v2, 0.0  ;;  %vm21055_vm1 = vnez %v21054_v40  ;;  %v7542_v2 = vld [vmem:[#allocation3 + $0x48] sm:$0xff] }
 0x386   : > { %v7178_v52 = vsel %vm21055_vm1, %v7146_v48, 0.0  ;;  %v7551_v48 = vld [vmem:[#allocation3 + $0x90] sm:$0xff]  ;;  %vm21056_vm1 = vnez %v20466_v63 }
 0x387   : > { %14948 = vmatmul.mubr.msk.f32.gmra.mrb[52].mxu1 %vm767_vm15, %v18131_v17  ;;  %v21047_v17 = vld [vmem:[#allocation64_spill] sm:$0xff] }
 0x388   : > { %14950 = vmatprep.mubr.msk.f32.mxu1 %vm767_vm15, %v7170_v41  ;;  %vm21048_vm6 = vnez %v21047_v17  ;;  %v7540_v41 = vld [vmem:[#allocation3 + $0x38] sm:$0xff] }
 0x389   : > { %v7174_v33 = vsel %vm21048_vm6, %v21046_v26, 0.0  ;;  %v7545_v26 = vld [vmem:[#allocation3 + $0x60] sm:$0xff] }
 0x38b   : > { %14951 = vmatmul.mubr.msk.f32.gmra.mrb[54].mxu1 %vm767_vm15, %v21041_v22  ;;  %v7541_v22 = vld [vmem:[#allocation3 + $0x40] sm:$0xff] }
 0x38c   : > { %14953 = vmatprep.mubr.msk.f32.mxu1 %vm767_vm15, %v7172_v11  ;;  %v7543_v11 = vld [vmem:[#allocation3 + $0x50] sm:$0xff] }
 0x38f   : > { %14954 = vmatmul.mubr.msk.f32.gmra.mrb[56].mxu1 %vm767_vm15, %v21045_v18  ;;  %v7544_v18 = vld [vmem:[#allocation3 + $0x58] sm:$0xff] }
 0x390   : > { %14956 = vmatprep.mubr.msk.f32.mxu1 %vm767_vm15, %v7174_v33  ;;  %v7547_v33 = vld [vmem:[#allocation3 + $0x70] sm:$0xff] }
 0x393   : > { %14957 = vmatmul.mubr.msk.f32.gmra.mrb[58].mxu1 %vm767_vm15, %v21049_v27  ;;  %v7548_v27 = vld [vmem:[#allocation3 + $0x78] sm:$0xff] }
 0x394   : > { %14959 = vmatprep.mubr.msk.f32.mxu1 %vm767_vm15, %v7176_v0  ;;  %v7550_v0 = vld [vmem:[#allocation3 + $0x88] sm:$0xff] }
 0x397   : > { %14960 = vmatmul.mubr.msk.f32.gmra.mrb[60].mxu1 %vm767_vm15, %v21053_v8  ;;  %v7552_v8 = vld [vmem:[#allocation3 + $0x98] sm:$0xff] }
 0x398   : > { %14962 = vmatprep.mubr.msk.f32.mxu1 %vm767_vm15, %v7178_v52  ;;  %v7553_v52 = vld [vmem:[#allocation3 + $0xa0] sm:$0xff] }
 0x39b   : > { %14963 = vmatmul.mubr.msk.f32.gmra.mrb[62].mxu1 %vm767_vm15, %v7147_v43  ;;  %v7554_v43 = vld [vmem:[#allocation3 + $0xa8] sm:$0xff] }
 0x39c   : > { %14973 = vmatprep.mubr.msk.f32.mxu1 %vm767_vm15, %v7538_v12  ;;  %v7555_v12 = vld [vmem:[#allocation3 + $0xb0] sm:$0xff] }
 0x39f   : > { %14974 = vmatmul.mubr.msk.f32.vlgmr.msra.gmra.mrb[32].mxu1 %vm767_vm15, %v7539_v29  ;;  %v7565_v29 = vld [vmem:[#allocation3 + $0x100] sm:$0xff] }
 0x3a0   : > { %15648 = vmatpush3.bf16.msra.mxu1 %v18660_v19  ;;  %14976 = vmatprep.mubr.msk.f32.mxu1 %vm767_vm15, %v7540_v41  ;;  %v7546_v19 = vld [vmem:[#allocation3 + $0x68] sm:$0xff]  ;;  %v7568_v41 = vld [vmem:[#allocation3 + $0x118] sm:$0xff] }
 0x3a1   : > { %15650 = vmatprep.subr.bf16.mxu1 %v15649_v56 }
 0x3a3   : > { %14977 = vmatmul.mubr.msk.f32.gmra.mrb[34].mxu1 %vm767_vm15, %v7541_v22  ;;  %v7569_v22 = vld [vmem:[#allocation3 + $0x120] sm:$0xff] }
 0x3a4   : > { %14979 = vmatprep.mubr.msk.f32.mxu1 %vm767_vm15, %v7542_v2  ;;  %15652 = vmatpush3.bf16.msra.mxu1 %v15649_v56  ;;  %v7563_v56 = vld [vmem:[#allocation3 + $0xf0] sm:$0xff]  ;;  %v7961_v2 = vsel %vm21056_vm1, %v18194_v21, 0.0  ;;  %v21060_v21 = vld [vmem:[#allocation22_spill] sm:$0xff] }
 0x3a7   : > { %14980 = vmatmul.mubr.msk.f32.gmra.mrb[36].mxu1 %vm767_vm15, %v7543_v11 }
 0x3a8   : > { %14982 = vmatprep.mubr.msk.f32.mxu1 %vm767_vm15, %v7544_v18  ;;  %v7969_v18 = vsel %vm21005_vm5, %v18235_v46, 0.0  ;;  %v21071_v46 = vld [vmem:[#allocation24_spill] sm:$0xff] }
 0x3ab   : > { %14983 = vmatmul.mubr.msk.f32.gmra.mrb[38].mxu1 %vm767_vm15, %v7545_v26  ;;  %v21066_v26 = vld [vmem:[#allocation17_spill] sm:$0xff] }
 0x3ac   : > { %14985 = vmatprep.mubr.msk.f32.mxu1 %vm767_vm15, %v7546_v19 }
 0x3af   : > { %14986 = vmatmul.mubr.msk.f32.gmra.mrb[40].mxu1 %vm767_vm15, %v7547_v33  ;;  %v21069_v33 = vld [vmem:[#allocation20_spill] sm:$0xff] }
 0x3b0   : > { %14988 = vmatprep.mubr.msk.f32.mxu1 %vm767_vm15, %v7548_v27 }
 0x3b3   : > { %14989 = vmatmul.mubr.msk.f32.gmra.mrb[42].mxu1 %vm767_vm15, %v7549_v34  ;;  %v21072_v34 = vld [vmem:[#allocation23_spill] sm:$0xff] }
 0x3b4   : > { %14991 = vmatprep.mubr.msk.f32.mxu1 %vm767_vm15, %v7550_v0  ;;  %vm21073_vm5 = vnez %v21072_v34 }
 0x3b5   : > { %v7975_v0 = vsel %vm21073_vm5, %v18265_v36, 0.0  ;;  %v21078_v36 = vld [vmem:[#allocation69_spill] sm:$0xff] }
 0x3b7   : > { %14992 = vmatmul.mubr.msk.f32.gmra.mrb[44].mxu1 %vm767_vm15, %v7551_v48 }
 0x3b8   : > { %14994 = vmatprep.mubr.msk.f32.mxu1 %vm767_vm15, %v7552_v8  ;;  %v7977_v8 = vsel %vm21016_vm7, %v18275_v44, 0.0  ;;  %v21080_v44 = vld [vmem:[#allocation70_spill] sm:$0xff] }
 0x3bb   : > { %14995 = vmatmul.mubr.msk.f32.gmra.mrb[46].mxu1 %vm767_vm15, %v7553_v52 }
 0x3bc   : > { %14997 = vmatprep.mubr.msk.f32.mxu1 %vm767_vm15, %v7554_v43  ;;  %v7979_v43 = vsel %vm21019_vm4, %v18285_v55, 0.0  ;;  %v21082_v55 = vld [vmem:[#allocation48_spill] sm:$0xff] }
 0x3bf   : > { %14998 = vmatmul.mubr.msk.f32.gmra.mrb[48].mxu1 %vm767_vm15, %v7555_v12 }
 0x3c0   : > { %15000 = vmatprep.mubr.msk.f32.mxu1 %vm767_vm15, %v7556_v62  ;;  %v7981_v62 = vsel %vm21022_vm9, %v21078_v36, 0.0 }
 0x3c3   : > { %15001 = vmatmul.mubr.msk.f32.gmra.mrb[50].mxu1 %vm767_vm15, %v7557_v57  ;;  %v21081_v57 = vld [vmem:[#allocation43_spill] sm:$0xff] }
 0x3c4   : > { %15003 = vmatprep.mubr.msk.f32.mxu1 %vm767_vm15, %v7558_v1  ;;  %v7983_v1 = vsel %vm20940_vm2, %v18305_v54, 0.0  ;;  %v21085_v54 = vld [vmem:[#allocation26_spill] sm:$0xff] }
 0x3c7   : > { %15004 = vmatmul.mubr.msk.f32.gmra.mrb[52].mxu1 %vm767_vm15, %v7559_v61  ;;  %v21083_v61 = vld [vmem:[#allocation71_spill] sm:$0xff] }
 0x3c8   : > { %15006 = vmatprep.mubr.msk.f32.mxu1 %vm767_vm15, %v7560_v53  ;;  %v12995_v53 = vld [vmem:[%s20107_s5 + $0x90] sm:$0xff] }
 0x3cb   : > { %15007 = vmatmul.mubr.msk.f32.gmra.mrb[54].mxu1 %vm767_vm15, %v7561_v7  ;;  %v7987_v7 = vsel %vm20859_vm8, %v21029_v14, 0.0  ;;  %v8521_v14 = vld [vmem:[#allocation4 + $0x8] sm:$0xff] }
 0x3cc   : > { %15009 = vmatprep.mubr.msk.f32.mxu1 %vm767_vm15, %v7562_v31  ;;  %v7958_v31 = vld [vmem:[#allocation3 + $0x119] sm:$0xff]  ;;  %15085 = vmatprep.mubr.msk.f32.mxu0 %vm767_vm15, %v8521_v14 }
 0x3cf   : > { %15010 = vmatmul.mubr.msk.f32.gmra.mrb[56].mxu1 %vm767_vm15, %v7563_v56  ;;  %v21086_v56 = vld [vmem:[#allocation28_spill] sm:$0xff] }
 0x3d0   : > { %15012 = vmatprep.mubr.msk.f32.mxu1 %vm767_vm15, %v7564_v15  ;;  %v21087_v15 = vld [vmem:[#allocation57_spill] sm:$0xff] }
 0x3d1   : > { %vm21088_vm2 = vnez %v21087_v15  ;;  %v12996_v15 = vld [vmem:[%s20107_s5 + $0x98] sm:$0xff] }
 0x3d3   : > { %15013 = vmatmul.mubr.msk.f32.gmra.mrb[58].mxu1 %vm767_vm15, %v7565_v29  ;;  %v21089_v29 = vld [vmem:[#allocation60_spill] sm:$0xff] }
 0x3d4   : > { %15015 = vmatprep.mubr.msk.f32.mxu1 %vm767_vm15, %v18518_v25  ;;  %v7963_v25 = vsel %vm21057_vm14, %v18205_v13, 0.0  ;;  %v21063_v13 = vld [vmem:[#allocation59_spill] sm:$0xff] }
 0x3d7   : > { %15016 = vmatmul.mubr.msk.f32.gmra.mrb[60].mxu1 %vm767_vm15, %v18522_v51 }
 0x3d8   : > { %15018 = vmatprep.mubr.msk.f32.mxu1 %vm767_vm15, %v7568_v41 }
 0x3db   : > { %15019 = vmatmul.mubr.msk.f32.gmra.mrb[62].mxu1 %vm767_vm15, %v7569_v22  ;;  %v8517_v22 = vld [vmem:[%s20107_s5] sm:$0xff] }
 0x3dc   : > { %15029 = vmatprep.mubr.msk.f32.mxu1 %vm767_vm15, %v18192_v30  ;;  %v21058_v30 = vld [vmem:[#allocation8_spill] sm:$0xff] }
 0x3dd   : > { %vm21059_vm6 = vnez %v21058_v30 }
 0x3de   : > { %v7965_v51 = vsel %vm21059_vm6, %v18215_v16, 0.0  ;;  %v21065_v16 = vld [vmem:[#allocation61_spill] sm:$0xff]  ;;  %vm21067_vm6 = vnez %v21066_v26 }
 0x3df   : > { %15030 = vmatmul.mubr.msk.f32.vlgmr.msra.gmra.mrb[32].mxu1 %vm767_vm15, %v7961_v2  ;;  %v7971_v19 = vsel %vm21067_vm6, %v18245_v20, 0.0  ;;  %v21074_v20 = vld [vmem:[#allocation29_spill] sm:$0xff]  ;;  %v8518_v2 = vld [vmem:[%s20107_s5 + $0x8] sm:$0xff] }
 0x3e0   : > { %15032 = vmatprep.mubr.msk.f32.mxu1 %vm767_vm15, %v20997_v45  ;;  %v21061_v45 = vld [vmem:[#allocation11_spill] sm:$0xff] }
 0x3e1   : > { %vm21062_vm1 = vnez %v21061_v45 }
 0x3e2   : > { %v7967_v11 = vsel %vm21062_vm1, %v18225_v10, 0.0  ;;  %v21068_v10 = vld [vmem:[#allocation21_spill] sm:$0xff]  ;;  %vm21070_vm1 = vnez %v21069_v33 }
 0x3e3   : > { %15033 = vmatmul.mubr.msk.f32.gmra.mrb[34].mxu1 %vm767_vm15, %v7963_v25  ;;  %v7973_v27 = vsel %vm21070_vm1, %v18255_v28, 0.0  ;;  %v21076_v28 = vld [vmem:[#allocation67_spill] sm:$0xff]  ;;  %v8522_v25 = vld [vmem:[#allocation4 + $0x10] sm:$0xff] }
 0x3e4   : > { %15035 = vmatprep.mubr.msk.f32.mxu1 %vm767_vm15, %v21000_v49  ;;  %v21064_v49 = vld [vmem:[#allocation14_spill] sm:$0xff]  ;;  %15086 = vmatmul.mubr.msk.f32.vlgmr.msra.gmra.mrb[32].mxu0 %vm767_vm15, %v8522_v25 }
 0x3e7   : > { %15036 = vmatmul.mubr.msk.f32.gmra.mrb[36].mxu1 %vm767_vm15, %v7965_v51  ;;  %v15661_v51 = vpack.c.bf16 %v8518_v2, %v8517_v22 }
 0x3e8   : > { %15038 = vmatprep.mubr.msk.f32.mxu1 %vm767_vm15, %v21060_v21  ;;  %v8519_v21 = vld [vmem:[%s20107_s5 + $0x10] sm:$0xff] }
 0x3e9   : > { %15662 = vmatprep.subr.bf16.mxu0 %v15661_v51 }
 0x3ea   : > { %15664 = vmatpush3.bf16.msra.mxu0 %v15661_v51 }
 0x3eb   : > { %15039 = vmatmul.mubr.msk.f32.gmra.mrb[38].mxu1 %vm767_vm15, %v7967_v11  ;;  %v8520_v11 = vld [vmem:[%s20107_s5 + $0x18] sm:$0xff] }
 0x3ec   : > { %15041 = vmatprep.mubr.msk.f32.mxu1 %vm767_vm15, %v21063_v13  ;;  %v15665_v13 = vpack.c.bf16 %v8520_v11, %v8519_v21 }
 0x3ee   : > { %15666 = vmatprep.subr.bf16.mxu0 %v15665_v13 }
 0x3ef   : > { %15042 = vmatmul.mubr.msk.f32.gmra.mrb[40].mxu1 %vm767_vm15, %v7969_v18  ;;  %15668 = vmatpush3.bf16.msra.mxu0 %v15665_v13  ;;  %v12921_v18 = vld [vmem:[%s20107_s5 + $0x40] sm:$0xff] }
 0x3f0   : > { %15044 = vmatprep.mubr.msk.f32.mxu1 %vm767_vm15, %v21065_v16  ;;  %v12922_v16 = vld [vmem:[%s20107_s5 + $0x48] sm:$0xff] }
 0x3f3   : > { %15045 = vmatmul.mubr.msk.f32.gmra.mrb[42].mxu1 %vm767_vm15, %v7971_v19  ;;  %v18914_v19 = vpack.c.bf16 %v12922_v16, %v12921_v18 }
 0x3f4   : > { %15047 = vmatprep.mubr.msk.f32.mxu1 %vm767_vm15, %v21068_v10  ;;  %v18920_v10 = vld [vmem:[%s20106_s4] ss:$0 sm:$0xff] }
 0x3f5   : > { %15670 = vmatprep.subr.bf16.mxu0 %v18914_v19 }
 0x3f7   : > { %15048 = vmatmul.mubr.msk.f32.gmra.mrb[44].mxu1 %vm767_vm15, %v7973_v27 }
 0x3f8   : > { %15050 = vmatprep.mubr.msk.f32.mxu1 %vm767_vm15, %v21071_v46 }
 0x3fb   : > { %15051 = vmatmul.mubr.msk.f32.gmra.mrb[46].mxu1 %vm767_vm15, %v7975_v0 }
 0x3fc   : > { %15053 = vmatprep.mubr.msk.f32.mxu1 %vm767_vm15, %v21074_v20 }
 0x3ff   : > { %15054 = vmatmul.mubr.msk.f32.gmra.mrb[48].mxu1 %vm767_vm15, %v7977_v8 }
 0x400   : > { %15056 = vmatprep.mubr.msk.f32.mxu1 %vm767_vm15, %v21076_v28 }
 0x403   : > { %15057 = vmatmul.mubr.msk.f32.gmra.mrb[50].mxu1 %vm767_vm15, %v7979_v43 }
 0x404   : > { %15059 = vmatprep.mubr.msk.f32.mxu1 %vm767_vm15, %v21023_v35  ;;  %v7985_v35 = vsel %vm20943_vm3, %v18315_v60, 0.0  ;;  %v7989_v60 = vsel %vm21088_vm2, %v21086_v56, 0.0  ;;  %vm21090_vm3 = vnez %v21089_v29  ;;  %v13029_v29 = vld [vmem:[%s20107_s5 + $0xa0] sm:$0xff] }
 0x407   : > { %15060 = vmatmul.mubr.msk.f32.gmra.mrb[52].mxu1 %vm767_vm15, %v7981_v62 }
 0x408   : > { %15062 = vmatprep.mubr.msk.f32.mxu1 %vm767_vm15, %v21080_v44 }
 0x40b   : > { %15063 = vmatmul.mubr.msk.f32.gmra.mrb[54].mxu1 %vm767_vm15, %v7983_v1 }
 0x40c   : > { %15065 = vmatprep.mubr.msk.f32.mxu1 %vm767_vm15, %v18313_v37  ;;  %v7959_v37 = vld [vmem:[#allocation3 + $0x121] sm:$0xff] }
 0x40d   : > { %v7991_v41 = vsel %vm21090_vm3, %v7959_v37, 0.0 }
 0x40f   : > { %15066 = vmatmul.mubr.msk.f32.gmra.mrb[56].mxu1 %vm767_vm15, %v7985_v35 }
 0x410   : > { %15068 = vmatprep.mubr.msk.f32.mxu1 %vm767_vm15, %v21083_v61 }
 0x413   : > { %15069 = vmatmul.mubr.msk.f32.gmra.mrb[58].mxu1 %vm767_vm15, %v7987_v7 }
 0x414   : > { %15071 = vmatprep.mubr.msk.f32.mxu1 %vm767_vm15, %v21085_v54 }
 0x417   : > { %15072 = vmatmul.mubr.msk.f32.gmra.mrb[60].mxu1 %vm767_vm15, %v7989_v60 }
 0x418   : > { %15074 = vmatprep.mubr.msk.f32.mxu1 %vm767_vm15, %v7958_v31 }
 0x41b   : > { %15075 = vmatmul.mubr.msk.f32.gmra.mrb[62].mxu1 %vm767_vm15, %v7991_v41 }
 0x4b2   : > { %v15031_v27 = vpop.f32.mrb[32].mxu1 }
 0x4b3   : > { %v8358_v46 = vadd.f32 %v15031_v27, %v18920_v10  ;;  %v8159_v0 = vpop.f32.mrb[33].mxu1 }
 0x4b4   : > { %v8357_v20 = vadd.f32 %v18920_v10, %v8159_v0 }
 0x4b5   : > { %v8390_v8 = vmax.f32 %v8358_v46, 0.0 }
 0x4b6   : > { %v8389_v28 = vmax.f32 %v8357_v20, 0.0  ;;  %v15034_v43 = vpop.f32.mrb[34].mxu1 }
 0x4b7   : > { %8422 = vst.msk [vmem:[#allocation4 + $0x20] sm:$0xff] %vm767_vm15, %v8390_v8  ;;  %v8360_v36 = vadd.f32 %v15034_v43, %v18920_v10  ;;  %v8169_v62 = vpop.f32.mrb[35].mxu1 }
 0x4b8   : > { %8421 = vst.msk [vmem:[#allocation4 + $0x18] sm:$0xff] %vm767_vm15, %v8389_v28  ;;  %v8359_v44 = vadd.f32 %v18920_v10, %v8169_v62 }
 0x4b9   : > { %v8392_v1 = vmax.f32 %v8360_v36, 0.0 }
 0x4ba   : > { %v8391_v35 = vmax.f32 %v8359_v44, 0.0  ;;  %v15037_v61 = vpop.f32.mrb[36].mxu1 }
 0x4bb   : > { %8424 = vst.msk [vmem:[#allocation4 + $0x30] sm:$0xff] %vm767_vm15, %v8392_v1  ;;  %v8362_v7 = vadd.f32 %v15037_v61, %v18920_v10  ;;  %v8179_v54 = vpop.f32.mrb[37].mxu1 }
 0x4bc   : > { %8423 = vst.msk [vmem:[#allocation4 + $0x28] sm:$0xff] %vm767_vm15, %v8391_v35  ;;  %v8361_v31 = vadd.f32 %v18920_v10, %v8179_v54 }
 0x4bd   : > { %v8394_v37 = vmax.f32 %v8362_v7, 0.0 }
 0x4be   : > { %v8393_v56 = vmax.f32 %v8361_v31, 0.0  ;;  %v15040_v60 = vpop.f32.mrb[38].mxu1  ;;  %v18940_v25 = vld [vmem:[#allocation4 + $0x20] sm:$0xff] }
 0x4bf   : > { %8426 = vst.msk [vmem:[#allocation4 + $0x40] sm:$0xff] %vm767_vm15, %v8394_v37  ;;  %v8364_v41 = vadd.f32 %v15040_v60, %v18920_v10  ;;  %v8189_v14 = vpop.f32.mrb[39].mxu1  ;;  %v18934_v22 = vld [vmem:[#allocation4 + $0x18] sm:$0xff]  ;;  %21092 = vst [vmem:[#allocation34_spill] sm:$0xff] %v18940_v25 }
 0x4c0   : > { %21091 = vst [vmem:[#allocation32_spill] sm:$0xff] %v18934_v22  ;;  %8425 = vst.msk [vmem:[#allocation4 + $0x38] sm:$0xff] %vm767_vm15, %v8393_v56  ;;  %v8363_v2 = vadd.f32 %v18920_v10, %v8189_v14  ;;  %15088 = vmatprep.mubr.msk.f32.mxu0 %vm767_vm15, %v18934_v22 }
 0x4c1   : > { %v8396_v51 = vmax.f32 %v8364_v41, 0.0  ;;  %15089 = vmatmul.mubr.msk.f32.gmra.mrb[34].mxu0 %vm767_vm15, %v18940_v25 }
 0x4c2   : > { %v8395_v21 = vmax.f32 %v8363_v2, 0.0  ;;  %v15043_v11 = vpop.f32.mrb[40].mxu1  ;;  %v18952_v46 = vld [vmem:[#allocation4 + $0x30] sm:$0xff] }
 0x4c3   : > { %8428 = vst.msk [vmem:[#allocation4 + $0x50] sm:$0xff] %vm767_vm15, %v8396_v51  ;;  %v8366_v13 = vadd.f32 %v15043_v11, %v18920_v10  ;;  %v8199_v18 = vpop.f32.mrb[41].mxu1  ;;  %v18946_v16 = vld [vmem:[#allocation4 + $0x28] sm:$0xff]  ;;  %21094 = vst [vmem:[#allocation39_spill] sm:$0xff] %v18952_v46 }
 0x4c4   : > { %21093 = vst [vmem:[#allocation37_spill] sm:$0xff] %v18946_v16  ;;  %8427 = vst.msk [vmem:[#allocation4 + $0x48] sm:$0xff] %vm767_vm15, %v8395_v21  ;;  %v8365_v27 = vadd.f32 %v18920_v10, %v8199_v18  ;;  %15091 = vmatprep.mubr.msk.f32.mxu0 %vm767_vm15, %v18946_v16 }
 0x4c5   : > { %v8398_v0 = vmax.f32 %v8366_v13, 0.0  ;;  %15092 = vmatmul.mubr.msk.f32.gmra.mrb[36].mxu0 %vm767_vm15, %v18952_v46 }
 0x4c6   : > { %v8397_v20 = vmax.f32 %v8365_v27, 0.0  ;;  %v15046_v8 = vpop.f32.mrb[42].mxu1  ;;  %v18964_v44 = vld [vmem:[#allocation4 + $0x40] sm:$0xff] }
 0x4c7   : > { %8430 = vst.msk [vmem:[#allocation4 + $0x60] sm:$0xff] %vm767_vm15, %v8398_v0  ;;  %v8368_v28 = vadd.f32 %v15046_v8, %v18920_v10  ;;  %v8209_v43 = vpop.f32.mrb[43].mxu1  ;;  %v18958_v36 = vld [vmem:[#allocation4 + $0x38] sm:$0xff]  ;;  %21096 = vst [vmem:[#allocation44_spill] sm:$0xff] %v18964_v44 }
 0x4c8   : > { %21095 = vst [vmem:[#allocation42_spill] sm:$0xff] %v18958_v36  ;;  %8429 = vst.msk [vmem:[#allocation4 + $0x58] sm:$0xff] %vm767_vm15, %v8397_v20  ;;  %v8367_v62 = vadd.f32 %v18920_v10, %v8209_v43  ;;  %15094 = vmatprep.mubr.msk.f32.mxu0 %vm767_vm15, %v18958_v36 }
 0x4c9   : > { %v8400_v1 = vmax.f32 %v8368_v28, 0.0  ;;  %15095 = vmatmul.mubr.msk.f32.gmra.mrb[38].mxu0 %vm767_vm15, %v18964_v44 }
 0x4ca   : > { %v8399_v35 = vmax.f32 %v8367_v62, 0.0  ;;  %v15049_v61 = vpop.f32.mrb[44].mxu1  ;;  %v18976_v56 = vld [vmem:[#allocation4 + $0x50] sm:$0xff] }
 0x4cb   : > { %8432 = vst.msk [vmem:[#allocation4 + $0x70] sm:$0xff] %vm767_vm15, %v8400_v1  ;;  %v8370_v7 = vadd.f32 %v15049_v61, %v18920_v10  ;;  %v8219_v54 = vpop.f32.mrb[45].mxu1  ;;  %v18970_v31 = vld [vmem:[#allocation4 + $0x48] sm:$0xff]  ;;  %21098 = vst [vmem:[#allocation49_spill] sm:$0xff] %v18976_v56 }
 0x4cc   : > { %21097 = vst [vmem:[#allocation47_spill] sm:$0xff] %v18970_v31  ;;  %8431 = vst.msk [vmem:[#allocation4 + $0x68] sm:$0xff] %vm767_vm15, %v8399_v35  ;;  %v8369_v37 = vadd.f32 %v18920_v10, %v8219_v54  ;;  %15097 = vmatprep.mubr.msk.f32.mxu0 %vm767_vm15, %v18970_v31 }
 0x4cd   : > { %v8402_v60 = vmax.f32 %v8370_v7, 0.0  ;;  %15098 = vmatmul.mubr.msk.f32.gmra.mrb[40].mxu0 %vm767_vm15, %v18976_v56 }
 0x4ce   : > { %v8401_v41 = vmax.f32 %v8369_v37, 0.0  ;;  %v15052_v14 = vpop.f32.mrb[46].mxu1  ;;  %v18988_v13 = vld [vmem:[#allocation4 + $0x60] sm:$0xff] }
 0x4cf   : > { %8434 = vst.msk [vmem:[#allocation4 + $0x80] sm:$0xff] %vm767_vm15, %v8402_v60  ;;  %v8372_v2 = vadd.f32 %v15052_v14, %v18920_v10  ;;  %v8229_v51 = vpop.f32.mrb[47].mxu1  ;;  %v18982_v21 = vld [vmem:[#allocation4 + $0x58] sm:$0xff]  ;;  %21100 = vst [vmem:[#allocation53_spill] sm:$0xff] %v18988_v13 }
 0x4d0   : > { %21099 = vst [vmem:[#allocation51_spill] sm:$0xff] %v18982_v21  ;;  %8433 = vst.msk [vmem:[#allocation4 + $0x78] sm:$0xff] %vm767_vm15, %v8401_v41  ;;  %v8371_v11 = vadd.f32 %v18920_v10, %v8229_v51  ;;  %15100 = vmatprep.mubr.msk.f32.mxu0 %vm767_vm15, %v18982_v21 }
 0x4d1   : > { %v8404_v18 = vmax.f32 %v8372_v2, 0.0  ;;  %15101 = vmatmul.mubr.msk.f32.gmra.mrb[42].mxu0 %vm767_vm15, %v18988_v13 }
 0x4d2   : > { %v8403_v27 = vmax.f32 %v8371_v11, 0.0  ;;  %v15055_v0 = vpop.f32.mrb[48].mxu1  ;;  %v19000_v62 = vld [vmem:[#allocation4 + $0x70] sm:$0xff] }
 0x4d3   : > { %8436 = vst.msk [vmem:[#allocation4 + $0x90] sm:$0xff] %vm767_vm15, %v8404_v18  ;;  %v8374_v20 = vadd.f32 %v15055_v0, %v18920_v10  ;;  %v8239_v8 = vpop.f32.mrb[49].mxu1  ;;  %v18994_v28 = vld [vmem:[#allocation4 + $0x68] sm:$0xff]  ;;  %21102 = vst [vmem:[#allocation58_spill] sm:$0xff] %v19000_v62 }
 0x4d4   : > { %21101 = vst [vmem:[#allocation56_spill] sm:$0xff] %v18994_v28  ;;  %8435 = vst.msk [vmem:[#allocation4 + $0x88] sm:$0xff] %vm767_vm15, %v8403_v27  ;;  %v8373_v43 = vadd.f32 %v18920_v10, %v8239_v8  ;;  %15103 = vmatprep.mubr.msk.f32.mxu0 %vm767_vm15, %v18994_v28 }
 0x4d5   : > { %v8406_v1 = vmax.f32 %v8374_v20, 0.0  ;;  %15104 = vmatmul.mubr.msk.f32.gmra.mrb[44].mxu0 %vm767_vm15, %v19000_v62 }
 0x4d6   : > { %v8405_v35 = vmax.f32 %v8373_v43, 0.0  ;;  %v15058_v61 = vpop.f32.mrb[50].mxu1  ;;  %v19012_v41 = vld [vmem:[#allocation4 + $0x80] sm:$0xff] }
 0x4d7   : > { %8438 = vst.msk [vmem:[#allocation4 + $0xa0] sm:$0xff] %vm767_vm15, %v8406_v1  ;;  %v8376_v7 = vadd.f32 %v15058_v61, %v18920_v10  ;;  %v8249_v54 = vpop.f32.mrb[51].mxu1  ;;  %v19006_v37 = vld [vmem:[#allocation4 + $0x78] sm:$0xff]  ;;  %21104 = vst [vmem:[#allocation30_spill] sm:$0xff] %v19012_v41 }
 0x4d8   : > { %21103 = vst [vmem:[#allocation25_spill] sm:$0xff] %v19006_v37  ;;  %8437 = vst.msk [vmem:[#allocation4 + $0x98] sm:$0xff] %vm767_vm15, %v8405_v35  ;;  %v8375_v60 = vadd.f32 %v18920_v10, %v8249_v54  ;;  %15106 = vmatprep.mubr.msk.f32.mxu0 %vm767_vm15, %v19006_v37 }
 0x4d9   : > { %v8408_v14 = vmax.f32 %v8376_v7, 0.0  ;;  %15107 = vmatmul.mubr.msk.f32.gmra.mrb[46].mxu0 %vm767_vm15, %v19012_v41 }
 0x4da   : > { %v8407_v2 = vmax.f32 %v8375_v60, 0.0  ;;  %v15061_v51 = vpop.f32.mrb[52].mxu1  ;;  %v19024_v20 = vld [vmem:[#allocation4 + $0x90] sm:$0xff] }
 0x4db   : > { %8440 = vst.msk [vmem:[#allocation4 + $0xb0] sm:$0xff] %vm767_vm15, %v8408_v14  ;;  %v8378_v11 = vadd.f32 %v15061_v51, %v18920_v10  ;;  %v8259_v18 = vpop.f32.mrb[53].mxu1  ;;  %v19018_v27 = vld [vmem:[#allocation4 + $0x88] sm:$0xff]  ;;  %21106 = vst [vmem:[#allocation5_spill] sm:$0xff] %v19024_v20 }
 0x4dc   : > { %21105 = vst [vmem:[#allocation31_spill] sm:$0xff] %v19018_v27  ;;  %8439 = vst.msk [vmem:[#allocation4 + $0xa8] sm:$0xff] %vm767_vm15, %v8407_v2  ;;  %v8377_v0 = vadd.f32 %v18920_v10, %v8259_v18  ;;  %15109 = vmatprep.mubr.msk.f32.mxu0 %vm767_vm15, %v19018_v27  ;;  %v19194_v27 = vld [vmem:[#allocation4 + $0x7f] sm:$0xff]  ;;  %v19204_v37 = vld [vmem:[#allocation4 + $0x8f] sm:$0xff] }
 0x4dd   : > { %v8410_v8 = vmax.f32 %v8378_v11, 0.0  ;;  %15110 = vmatmul.mubr.msk.f32.gmra.mrb[48].mxu0 %vm767_vm15, %v19024_v20  ;;  %v19192_v20 = vld [vmem:[#allocation4 + $0x87] sm:$0xff] }
 0x4de   : > { %v8409_v43 = vmax.f32 %v8377_v0, 0.0  ;;  %v15064_v1 = vpop.f32.mrb[54].mxu1  ;;  %v19036_v60 = vld [vmem:[#allocation4 + $0xa0] sm:$0xff]  ;;  %v19366_v26 = vld [vmem:[#allocation4 + $0x89] sm:$0xff] }
 0x4df   : > { %8442 = vst.msk [vmem:[#allocation4 + $0xc0] sm:$0xff] %vm767_vm15, %v8410_v8  ;;  %v8380_v35 = vadd.f32 %v15064_v1, %v18920_v10  ;;  %v8269_v61 = vpop.f32.mrb[55].mxu1  ;;  %v19030_v7 = vld [vmem:[#allocation4 + $0x98] sm:$0xff]  ;;  %21108 = vst [vmem:[#allocation36_spill] sm:$0xff] %v19036_v60 }
 0x4e0   : > { %21107 = vst [vmem:[#allocation35_spill] sm:$0xff] %v19030_v7  ;;  %8441 = vst.msk [vmem:[#allocation4 + $0xb8] sm:$0xff] %vm767_vm15, %v8409_v43  ;;  %v8379_v54 = vadd.f32 %v18920_v10, %v8269_v61  ;;  %15112 = vmatprep.mubr.msk.f32.mxu0 %vm767_vm15, %v19030_v7  ;;  %v19184_v7 = vld [vmem:[#allocation4 + $0x6f] sm:$0xff]  ;;  %v19202_v41 = vld [vmem:[#allocation4 + $0x97] sm:$0xff] }
 0x4e1   : > { %v8412_v14 = vmax.f32 %v8380_v35, 0.0  ;;  %15113 = vmatmul.mubr.msk.f32.gmra.mrb[50].mxu0 %vm767_vm15, %v19036_v60  ;;  %v19182_v60 = vld [vmem:[#allocation4 + $0x77] sm:$0xff]  ;;  %v19214_v28 = vld [vmem:[#allocation4 + $0x9f] sm:$0xff]  ;;  %21146 = vst [vmem:[#allocation59_spill] sm:$0xff] %v19366_v26 }
 0x4e2   : > { %v8411_v2 = vmax.f32 %v8379_v54, 0.0  ;;  %v15067_v51 = vpop.f32.mrb[56].mxu1  ;;  %v19048_v43 = vld [vmem:[#allocation4 + $0xb0] sm:$0xff]  ;;  %v19376_v33 = vld [vmem:[#allocation4 + $0x99] sm:$0xff] }
 0x4e3   : > { %8444 = vst.msk [vmem:[#allocation4 + $0xd0] sm:$0xff] %vm767_vm15, %v8412_v14  ;;  %v8382_v11 = vadd.f32 %v15067_v51, %v18920_v10  ;;  %v8279_v18 = vpop.f32.mrb[57].mxu1  ;;  %v19042_v0 = vld [vmem:[#allocation4 + $0xa8] sm:$0xff]  ;;  %21110 = vst [vmem:[#allocation7_spill] sm:$0xff] %v19048_v43 }
 0x4e4   : > { %21109 = vst [vmem:[#allocation6_spill] sm:$0xff] %v19042_v0  ;;  %8443 = vst.msk [vmem:[#allocation4 + $0xc8] sm:$0xff] %vm767_vm15, %v8411_v2  ;;  %v8381_v8 = vadd.f32 %v18920_v10, %v8279_v18  ;;  %15115 = vmatprep.mubr.msk.f32.mxu0 %vm767_vm15, %v19042_v0  ;;  %v19212_v62 = vld [vmem:[#allocation4 + $0xa7] sm:$0xff]  ;;  %v19224_v21 = vld [vmem:[#allocation4 + $0xaf] sm:$0xff] }
 0x4e5   : > { %v8414_v1 = vmax.f32 %v8382_v11, 0.0  ;;  %15116 = vmatmul.mubr.msk.f32.gmra.mrb[52].mxu0 %vm767_vm15, %v19048_v43  ;;  %21147 = vst [vmem:[#allocation61_spill] sm:$0xff] %v19376_v33  ;;  %v19386_v34 = vld [vmem:[#allocation4 + $0xa9] sm:$0xff] }
 0x4e6   : > { %v8413_v35 = vmax.f32 %v8381_v8, 0.0  ;;  %v15070_v61 = vpop.f32.mrb[58].mxu1  ;;  %v19060_v11 = vld [vmem:[#allocation4 + $0xc0] sm:$0xff]  ;;  %21148 = vst [vmem:[#allocation21_spill] sm:$0xff] %v19386_v34 }
 0x4e7   : > { %8446 = vst.msk [vmem:[#allocation4 + $0xe0] sm:$0xff] %vm767_vm15, %v8414_v1  ;;  %v8384_v54 = vadd.f32 %v15070_v61, %v18920_v10  ;;  %v8289_v14 = vpop.f32.mrb[59].mxu1  ;;  %v19054_v51 = vld [vmem:[#allocation4 + $0xb8] sm:$0xff]  ;;  %21112 = vst [vmem:[#allocation41_spill] sm:$0xff] %v19060_v11 }
 0x4e8   : > { %21111 = vst [vmem:[#allocation40_spill] sm:$0xff] %v19054_v51  ;;  %8445 = vst.msk [vmem:[#allocation4 + $0xd8] sm:$0xff] %vm767_vm15, %v8413_v35  ;;  %v8383_v2 = vadd.f32 %v18920_v10, %v8289_v14  ;;  %15118 = vmatprep.mubr.msk.f32.mxu0 %vm767_vm15, %v19054_v51  ;;  %v19222_v13 = vld [vmem:[#allocation4 + $0xb7] sm:$0xff]  ;;  %v19234_v31 = vld [vmem:[#allocation4 + $0xbf] sm:$0xff] }
 0x4e9   : > { %v8416_v18 = vmax.f32 %v8384_v54, 0.0  ;;  %15119 = vmatmul.mubr.msk.f32.gmra.mrb[54].mxu0 %vm767_vm15, %v19060_v11  ;;  %v19396_v48 = vld [vmem:[#allocation4 + $0xb9] sm:$0xff] }
 0x4ea   : > { %v8415_v8 = vmax.f32 %v8383_v2, 0.0  ;;  %v15073_v1 = vpop.f32.mrb[60].mxu1  ;;  %v19072_v54 = vld [vmem:[#allocation4 + $0xd0] sm:$0xff]  ;;  %21149 = vst [vmem:[#allocation24_spill] sm:$0xff] %v19396_v48 }
 0x4eb   : > { %8448 = vst.msk [vmem:[#allocation4 + $0xf0] sm:$0xff] %vm767_vm15, %v8416_v18  ;;  %v8386_v61 = vadd.f32 %v15073_v1, %v18920_v10  ;;  %v8299_v43 = vpop.f32.mrb[61].mxu1  ;;  %v19066_v0 = vld [vmem:[#allocation4 + $0xc8] sm:$0xff]  ;;  %21114 = vst [vmem:[#allocation10_spill] sm:$0xff] %v19072_v54 }
 0x4ec   : > { %21113 = vst [vmem:[#allocation9_spill] sm:$0xff] %v19066_v0  ;;  %8447 = vst.msk [vmem:[#allocation4 + $0xe8] sm:$0xff] %vm767_vm15, %v8415_v8  ;;  %v8385_v35 = vadd.f32 %v18920_v10, %v8299_v43  ;;  %15121 = vmatprep.mubr.msk.f32.mxu0 %vm767_vm15, %v19066_v0  ;;  %v19174_v0 = vld [vmem:[#allocation4 + $0x5f] sm:$0xff]  ;;  %v19232_v56 = vld [vmem:[#allocation4 + $0xc7] sm:$0xff] }
 0x4ed   : > { %v8418_v14 = vmax.f32 %v8386_v61, 0.0  ;;  %15122 = vmatmul.mubr.msk.f32.gmra.mrb[56].mxu0 %vm767_vm15, %v19072_v54  ;;  %v19172_v54 = vld [vmem:[#allocation4 + $0x67] sm:$0xff]  ;;  %v19244_v36 = vld [vmem:[#allocation4 + $0xcf] sm:$0xff] }
 0x4ee   : > { %v8417_v2 = vmax.f32 %v8385_v35, 0.0  ;;  %v15076_v18 = vpop.f32.mrb[62].mxu1  ;;  %v19084_v8 = vld [vmem:[#allocation4 + $0xe0] sm:$0xff]  ;;  %v19406_v52 = vld [vmem:[#allocation4 + $0xc9] sm:$0xff] }
 0x4ef   : > { %8450 = vst.msk [vmem:[#allocation4 + $0x100] sm:$0xff] %vm767_vm15, %v8418_v14  ;;  %v8388_v1 = vadd.f32 %v15076_v18, %v18920_v10  ;;  %v8309_v11 = vpop.f32.mrb[63].mxu1  ;;  %v19078_v51 = vld [vmem:[#allocation4 + $0xd8] sm:$0xff]  ;;  %21116 = vst [vmem:[#allocation46_spill] sm:$0xff] %v19084_v8 }
 0x4f0   : > { %21115 = vst [vmem:[#allocation45_spill] sm:$0xff] %v19078_v51  ;;  %8449 = vst.msk [vmem:[#allocation4 + $0xf8] sm:$0xff] %vm767_vm15, %v8417_v2  ;;  %v8387_v43 = vadd.f32 %v18920_v10, %v8309_v11  ;;  %15124 = vmatprep.mubr.msk.f32.mxu0 %vm767_vm15, %v19078_v51  ;;  %v8453_v11 = vld [vmem:[#allocation4 + $0x7] sm:$0xff]  ;;  %v19164_v51 = vld [vmem:[#allocation4 + $0x4f] sm:$0xff] }
 0x4f1   : > { %v8420_v61 = vmax.f32 %v8388_v1, 0.0  ;;  %15125 = vmatmul.mubr.msk.f32.gmra.mrb[58].mxu0 %vm767_vm15, %v19084_v8  ;;  %v8485_v18 = vsel %vm21034_vm11, %v8453_v11, 0.0  ;;  %v19115_v11 = vld [vmem:[#allocation4 + $0x17] sm:$0xff]  ;;  %v19254_v16 = vld [vmem:[#allocation4 + $0xdf] sm:$0xff]  ;;  %21151 = vst [vmem:[#allocation29_spill] sm:$0xff] %v19406_v52 }
 0x4f2   : > { %v8419_v35 = vmax.f32 %v8387_v43, 0.0  ;;  %v19094_v10 = vld [vmem:[#allocation4 + $0xf0] sm:$0xff]  ;;  %21131 = vst [vmem:[#allocation72_spill] sm:$0xff] %v19254_v16  ;;  %v19416_v12 = vld [vmem:[#allocation4 + $0xd9] sm:$0xff] }
 0x4f3   : > { %8452 = vst.msk [vmem:[#allocation4 + $0x110] sm:$0xff] %vm767_vm15, %v8420_v61  ;;  %v19089_v14 = vld [vmem:[#allocation4 + $0xe8] sm:$0xff]  ;;  %21118 = vst [vmem:[#allocation13_spill] sm:$0xff] %v19094_v10  ;;  %v12923_v43 = vld [vmem:[%s20107_s5 + $0x50] sm:$0xff] }
 0x4f4   : > { %21117 = vst [vmem:[#allocation12_spill] sm:$0xff] %v19089_v14  ;;  %8451 = vst.msk [vmem:[#allocation4 + $0x108] sm:$0xff] %vm767_vm15, %v8419_v35  ;;  %15127 = vmatprep.mubr.msk.f32.mxu0 %vm767_vm15, %v19089_v14  ;;  %v12924_v61 = vld [vmem:[%s20107_s5 + $0x58] sm:$0xff]  ;;  %v8454_v35 = vld [vmem:[#allocation4 + $0xf] sm:$0xff] }
 0x4f5   : > { %15128 = vmatmul.mubr.msk.f32.gmra.mrb[60].mxu0 %vm767_vm15, %v19094_v10  ;;  %v15673_v10 = vpack.c.bf16 %v12924_v61, %v12923_v43  ;;  %v12958_v14 = vld [vmem:[%s20107_s5 + $0x68] sm:$0xff]  ;;  %v19133_v61 = vld [vmem:[#allocation4 + $0x1f] sm:$0xff]  ;;  %v19141_v8 = vld [vmem:[#allocation4 + $0x37] sm:$0xff]  ;;  %21154 = vst [vmem:[#allocation69_spill] sm:$0xff] %v19416_v12 }
 0x4f6   : > { %v19104_v1 = vld [vmem:[#allocation4 + $0x100] sm:$0xff]  ;;  %v19242_v44 = vld [vmem:[#allocation4 + $0xd7] sm:$0xff]  ;;  %v19264_v22 = vld [vmem:[#allocation4 + $0xef] sm:$0xff] }
 0x4f7   : > { %v19098_v2 = vld [vmem:[#allocation4 + $0xf8] sm:$0xff]  ;;  %21120 = vst [vmem:[#allocation19_spill] sm:$0xff] %v19104_v1  ;;  %v19252_v46 = vld [vmem:[#allocation4 + $0xe7] sm:$0xff]  ;;  %21134 = vst [vmem:[#allocation50_spill] sm:$0xff] %v19264_v22 }
 0x4f8   : > { %21119 = vst [vmem:[#allocation18_spill] sm:$0xff] %v19098_v2  ;;  %15130 = vmatprep.mubr.msk.f32.mxu0 %vm767_vm15, %v19098_v2  ;;  %v12957_v2 = vld [vmem:[%s20107_s5 + $0x60] sm:$0xff]  ;;  %21130 = vst [vmem:[#allocation68_spill] sm:$0xff] %v19252_v46  ;;  %v19262_v25 = vld [vmem:[#allocation4 + $0xf7] sm:$0xff] }
 0x4f9   : > { %15131 = vmatmul.mubr.msk.f32.gmra.mrb[62].mxu0 %vm767_vm15, %v19104_v1  ;;  %v8487_v1 = vsel %vm21035_vm12, %v19115_v11, 0.0  ;;  %v19131_v43 = vpack.c.bf16 %v12958_v14, %v12957_v2  ;;  %v8491_v14 = vsel %vm20948_vm10, %v19141_v8, 0.0  ;;  %v19152_v2 = vld [vmem:[#allocation4 + $0x47] sm:$0xff]  ;;  %vm21121_vm10 = vnez %v20544_v24  ;;  %21133 = vst [vmem:[#allocation15_spill] sm:$0xff] %v19262_v25 }
 0x4fa   : > { %15141 = vmatprep.mubr.msk.f32.mxu0 %vm767_vm15, %v8485_v18  ;;  %v19129_v18 = vld [vmem:[#allocation4 + $0x27] sm:$0xff] }
 0x4fd   : > { %15142 = vmatmul.mubr.msk.f32.vlgmr.msra.gmra.mrb[32].mxu0 %vm767_vm15, %v8454_v35  ;;  %v8489_v35 = vsel %vm20947_vm0, %v19129_v18, 0.0 }
 0x4fe   : > { %15672 = vmatpush3.bf16.msra.mxu0 %v18914_v19  ;;  %15144 = vmatprep.mubr.msk.f32.mxu0 %vm767_vm15, %v8487_v1  ;;  %v19144_v19 = vld [vmem:[#allocation4 + $0x2f] sm:$0xff]  ;;  %v19154_v1 = vld [vmem:[#allocation4 + $0x3f] sm:$0xff] }
 0x4ff   : > { %15674 = vmatprep.subr.bf16.mxu0 %v15673_v10 }
 0x501   : > { %15145 = vmatmul.mubr.msk.f32.gmra.mrb[34].mxu0 %vm767_vm15, %v19133_v61 }
 0x502   : > { %15147 = vmatprep.mubr.msk.f32.mxu0 %vm767_vm15, %v8489_v35  ;;  %15676 = vmatpush3.bf16.msra.mxu0 %v15673_v10  ;;  %v8493_v10 = vsel %vm20911_vm13, %v19152_v2, 0.0  ;;  %v19162_v35 = vld [vmem:[#allocation4 + $0x57] sm:$0xff]  ;;  %vm21122_vm13 = vnez %v20556_v39 }
 0x503   : > { %15678 = vmatprep.subr.bf16.mxu0 %v19131_v43 }
 0x505   : > { %15148 = vmatmul.mubr.msk.f32.gmra.mrb[36].mxu0 %vm767_vm15, %v19144_v19 }
 0x506   : > { %15150 = vmatprep.mubr.msk.f32.mxu0 %vm767_vm15, %v8491_v14  ;;  %v8495_v14 = vsel %vm21121_vm10, %v19162_v35, 0.0  ;;  %vm21123_vm10 = vnez %v20567_v4 }
 0x509   : > { %15151 = vmatmul.mubr.msk.f32.gmra.mrb[38].mxu0 %vm767_vm15, %v19154_v1 }
 0x50a   : > { %15153 = vmatprep.mubr.msk.f32.mxu0 %vm767_vm15, %v8493_v10  ;;  %v8497_v10 = vsel %vm21122_vm13, %v19172_v54, 0.0  ;;  %vm21124_vm13 = vnez %v20579_v58 }
 0x50d   : > { %15154 = vmatmul.mubr.msk.f32.gmra.mrb[40].mxu0 %vm767_vm15, %v19164_v51 }
 0x50e   : > { %15156 = vmatprep.mubr.msk.f32.mxu0 %vm767_vm15, %v8495_v14  ;;  %v8499_v14 = vsel %vm21123_vm10, %v19182_v60, 0.0  ;;  %vm21125_vm10 = vnez %v20589_v5 }
 0x511   : > { %15157 = vmatmul.mubr.msk.f32.gmra.mrb[42].mxu0 %vm767_vm15, %v19174_v0 }
 0x512   : > { %15159 = vmatprep.mubr.msk.f32.mxu0 %vm767_vm15, %v8497_v10  ;;  %v8501_v10 = vsel %vm21124_vm13, %v19192_v20, 0.0  ;;  %vm21126_vm13 = vnez %v20594_v3 }
 0x515   : > { %15160 = vmatmul.mubr.msk.f32.gmra.mrb[44].mxu0 %vm767_vm15, %v19184_v7 }
 0x516   : > { %15162 = vmatprep.mubr.msk.f32.mxu0 %vm767_vm15, %v8499_v14  ;;  %v8503_v14 = vsel %vm21125_vm10, %v19202_v41, 0.0  ;;  %vm21127_vm10 = vnez %v21039_v42 }
 0x519   : > { %15163 = vmatmul.mubr.msk.f32.gmra.mrb[46].mxu0 %vm767_vm15, %v19194_v27 }
 0x51a   : > { %15165 = vmatprep.mubr.msk.f32.mxu0 %vm767_vm15, %v8501_v10  ;;  %v8505_v10 = vsel %vm21126_vm13, %v19212_v62, 0.0  ;;  %vm21128_vm13 = vnez %v21043_v32  ;;  %v19292_v32 = vld [vmem:[#allocation4 + $0x19] sm:$0xff] }
 0x51d   : > { %15166 = vmatmul.mubr.msk.f32.gmra.mrb[48].mxu0 %vm767_vm15, %v19204_v37 }
 0x51e   : > { %15168 = vmatprep.mubr.msk.f32.mxu0 %vm767_vm15, %v8503_v14  ;;  %v8507_v14 = vsel %vm21127_vm10, %v19222_v13, 0.0  ;;  %vm21129_vm10 = vnez %v21047_v17  ;;  %v9200_v17 = vld [vmem:[#allocation4 + $0x9] sm:$0xff] }
 0x521   : > { %15169 = vmatmul.mubr.msk.f32.gmra.mrb[50].mxu0 %vm767_vm15, %v19214_v28 }
 0x522   : > { %15171 = vmatprep.mubr.msk.f32.mxu0 %vm767_vm15, %v8505_v10  ;;  %v8509_v10 = vsel %vm21128_vm13, %v19232_v56, 0.0  ;;  %vm21132_vm13 = vnez %v21051_v47  ;;  %v12960_v47 = vld [vmem:[%s20107_s5 + $0x78] sm:$0xff] }
 0x525   : > { %15172 = vmatmul.mubr.msk.f32.gmra.mrb[52].mxu0 %vm767_vm15, %v19224_v21 }
 0x526   : > { %15174 = vmatprep.mubr.msk.f32.mxu0 %vm767_vm15, %v8507_v14  ;;  %v8511_v14 = vsel %vm21129_vm10, %v19242_v44, 0.0  ;;  %vm21135_vm10 = vnez %v21054_v40 }
 0x529   : > { %15175 = vmatmul.mubr.msk.f32.gmra.mrb[54].mxu0 %vm767_vm15, %v19234_v31 }
 0x52a   : > { %15177 = vmatprep.mubr.msk.f32.mxu0 %vm767_vm15, %v8509_v10  ;;  %v8513_v10 = vsel %vm21132_vm13, %v19252_v46, 0.0  ;;  %v12994_v46 = vld [vmem:[%s20107_s5 + $0x88] sm:$0xff] }
 0x52d   : > { %15178 = vmatmul.mubr.msk.f32.gmra.mrb[56].mxu0 %vm767_vm15, %v19244_v36 }
 0x52e   : > { %15180 = vmatprep.mubr.msk.f32.mxu0 %vm767_vm15, %v8511_v14  ;;  %v8515_v14 = vsel %vm21135_vm10, %v19262_v25, 0.0  ;;  %vm21137_vm10 = vnez %v20466_v63  ;;  %v12993_v25 = vld [vmem:[%s20107_s5 + $0x80] sm:$0xff] }
 0x531   : > { %15181 = vmatmul.mubr.msk.f32.gmra.mrb[58].mxu0 %vm767_vm15, %v19254_v16  ;;  %v19272_v16 = vld [vmem:[#allocation4 + $0xff] sm:$0xff] }
 0x532   : > { %15183 = vmatprep.mubr.msk.f32.mxu0 %vm767_vm15, %v8513_v10  ;;  %21136 = vst [vmem:[#allocation54_spill] sm:$0xff] %v19272_v16  ;;  %v12959_v10 = vld [vmem:[%s20107_s5 + $0x70] sm:$0xff] }
 0x533   : > { %v15681_v40 = vpack.c.bf16 %v12960_v47, %v12959_v10  ;;  %v19307_v10 = vld [vmem:[#allocation4 + $0x31] sm:$0xff] }
 0x535   : > { %15184 = vmatmul.mubr.msk.f32.gmra.mrb[60].mxu0 %vm767_vm15, %v19264_v22  ;;  %v9201_v22 = vld [vmem:[#allocation4 + $0x11] sm:$0xff] }
 0x536   : > { %15186 = vmatprep.mubr.msk.f32.mxu0 %vm767_vm15, %v8515_v14  ;;  %v9233_v14 = vsel %vm21137_vm10, %v9201_v22, 0.0  ;;  %v19305_v22 = vld [vmem:[#allocation4 + $0x29] sm:$0xff]  ;;  %vm21138_vm10 = vnez %v21058_v30  ;;  %v19336_v30 = vld [vmem:[#allocation4 + $0x59] sm:$0xff] }
 0x537   : > { %21143 = vst [vmem:[#allocation73_spill] sm:$0xff] %v19336_v30 }
 0x539   : > { %15187 = vmatmul.mubr.msk.f32.gmra.mrb[62].mxu0 %vm767_vm15, %v19272_v16  ;;  %v19294_v16 = vld [vmem:[#allocation4 + $0x21] sm:$0xff] }
 0x53a   : > { %15197 = vmatprep.mubr.msk.f32.mxu0 %vm767_vm15, %v9200_v17  ;;  %v19299_v17 = vpack.c.bf16 %v12994_v46, %v12993_v25  ;;  %v9235_v47 = vsel %vm21057_vm14, %v19294_v16, 0.0  ;;  %v9237_v25 = vsel %vm21138_vm10, %v19307_v10, 0.0  ;;  %v19316_v46 = vld [vmem:[#allocation4 + $0x39] sm:$0xff]  ;;  %vm21140_vm14 = vnez %v21061_v45  ;;  %v19346_v45 = vld [vmem:[#allocation4 + $0x69] sm:$0xff] }
 0x53b   : > { %21139 = vst [vmem:[#allocation16_spill] sm:$0xff] %v19316_v46  ;;  %vm21142_vm10 = vnez %v21064_v49  ;;  %21144 = vst [vmem:[#allocation74_spill] sm:$0xff] %v19346_v45  ;;  %v19356_v49 = vld [vmem:[#allocation4 + $0x79] sm:$0xff] }
 0x53c   : > { %21145 = vst [vmem:[#allocation22_spill] sm:$0xff] %v19356_v49 }
 0x53d   : > { %15198 = vmatmul.mubr.msk.f32.vlgmr.msra.gmra.mrb[32].mxu0 %vm767_vm15, %v9233_v14 }
 0x53e   : > { %15680 = vmatpush3.bf16.msra.mxu0 %v19131_v43  ;;  %15200 = vmatprep.mubr.msk.f32.mxu0 %vm767_vm15, %v19292_v32  ;;  %v19318_v43 = vld [vmem:[#allocation4 + $0x41] sm:$0xff] }
 0x53f   : > { %15682 = vmatprep.subr.bf16.mxu0 %v15681_v40  ;;  %v9239_v14 = vsel %vm21140_vm14, %v19318_v43, 0.0 }
 0x541   : > { %15201 = vmatmul.mubr.msk.f32.gmra.mrb[34].mxu0 %vm767_vm15, %v9235_v47  ;;  %v19328_v47 = vld [vmem:[#allocation4 + $0x51] sm:$0xff] }
 0x542   : > { %15203 = vmatprep.mubr.msk.f32.mxu0 %vm767_vm15, %v19305_v22  ;;  %15684 = vmatpush3.bf16.msra.mxu0 %v15681_v40  ;;  %v19326_v40 = vld [vmem:[#allocation4 + $0x49] sm:$0xff] }
 0x543   : > { %15686 = vmatprep.subr.bf16.mxu0 %v19299_v17  ;;  %21141 = vst [vmem:[#allocation55_spill] sm:$0xff] %v19326_v40 }
 0x545   : > { %15204 = vmatmul.mubr.msk.f32.gmra.mrb[36].mxu0 %vm767_vm15, %v9237_v25  ;;  %v9241_v25 = vsel %vm21142_vm10, %v19328_v47, 0.0 }
 0x546   : > { %15206 = vmatprep.mubr.msk.f32.mxu0 %vm767_vm15, %v19316_v46  ;;  %v19338_v46 = vld [vmem:[#allocation4 + $0x61] sm:$0xff] }
 0x549   : > { %15207 = vmatmul.mubr.msk.f32.gmra.mrb[38].mxu0 %vm767_vm15, %v9239_v14  ;;  %v9243_v14 = vsel %vm21067_vm6, %v19338_v46, 0.0 }
 0x54a   : > { %15209 = vmatprep.mubr.msk.f32.mxu0 %vm767_vm15, %v19326_v40  ;;  %v19348_v40 = vld [vmem:[#allocation4 + $0x71] sm:$0xff] }
 0x54d   : > { %15210 = vmatmul.mubr.msk.f32.gmra.mrb[40].mxu0 %vm767_vm15, %v9241_v25  ;;  %v9245_v25 = vsel %vm21070_vm1, %v19348_v40, 0.0 }
 0x54e   : > { %15212 = vmatprep.mubr.msk.f32.mxu0 %vm767_vm15, %v19336_v30  ;;  %v19358_v30 = vld [vmem:[#allocation4 + $0x81] sm:$0xff] }
 0x551   : > { %15213 = vmatmul.mubr.msk.f32.gmra.mrb[42].mxu0 %vm767_vm15, %v9243_v14  ;;  %v9247_v14 = vsel %vm21073_vm5, %v19358_v30, 0.0 }
 0x552   : > { %15215 = vmatprep.mubr.msk.f32.mxu0 %vm767_vm15, %v19346_v45  ;;  %v19368_v45 = vld [vmem:[#allocation4 + $0x91] sm:$0xff] }
 0x555   : > { %15216 = vmatmul.mubr.msk.f32.gmra.mrb[44].mxu0 %vm767_vm15, %v9245_v25  ;;  %v9249_v25 = vsel %vm21016_vm7, %v19368_v45, 0.0 }
 0x556   : > { %15218 = vmatprep.mubr.msk.f32.mxu0 %vm767_vm15, %v19356_v49  ;;  %v19378_v49 = vld [vmem:[#allocation4 + $0xa1] sm:$0xff] }
 0x559   : > { %15219 = vmatmul.mubr.msk.f32.gmra.mrb[46].mxu0 %vm767_vm15, %v9247_v14  ;;  %v9251_v14 = vsel %vm21019_vm4, %v19378_v49, 0.0  ;;  %vm21150_vm4 = vnez %v21081_v57  ;;  %v19426_v57 = vld [vmem:[#allocation4 + $0xe9] sm:$0xff] }
 0x55a   : > { %15221 = vmatprep.mubr.msk.f32.mxu0 %vm767_vm15, %v19366_v26  ;;  %v19388_v26 = vld [vmem:[#allocation4 + $0xb1] sm:$0xff] }
 0x55d   : > { %15222 = vmatmul.mubr.msk.f32.gmra.mrb[48].mxu0 %vm767_vm15, %v9249_v25  ;;  %v9253_v25 = vsel %vm21022_vm9, %v19388_v26, 0.0  ;;  %vm21153_vm9 = vnez %v21082_v55  ;;  %v19436_v55 = vld [vmem:[#allocation4 + $0xf9] sm:$0xff] }
 0x55e   : > { %15224 = vmatprep.mubr.msk.f32.mxu0 %vm767_vm15, %v19376_v33  ;;  %v19398_v33 = vld [vmem:[#allocation4 + $0xc1] sm:$0xff]  ;;  %21155 = vst [vmem:[#allocation70_spill] sm:$0xff] %v19436_v55 }
 0x561   : > { %15225 = vmatmul.mubr.msk.f32.gmra.mrb[50].mxu0 %vm767_vm15, %v9251_v14  ;;  %v9255_v14 = vsel %vm21150_vm4, %v19398_v33, 0.0 }
 0x562   : > { %15227 = vmatprep.mubr.msk.f32.mxu0 %vm767_vm15, %v19386_v34  ;;  %v19408_v34 = vld [vmem:[#allocation4 + $0xd1] sm:$0xff] }
 0x563   : > { %21152 = vst [vmem:[#allocation67_spill] sm:$0xff] %v19408_v34 }
 0x565   : > { %15228 = vmatmul.mubr.msk.f32.gmra.mrb[52].mxu0 %vm767_vm15, %v9253_v25  ;;  %v9257_v25 = vsel %vm21153_vm9, %v19408_v34, 0.0 }
 0x566   : > { %15230 = vmatprep.mubr.msk.f32.mxu0 %vm767_vm15, %v19396_v48  ;;  %v19418_v48 = vld [vmem:[#allocation4 + $0xe1] sm:$0xff] }
 0x569   : > { %15231 = vmatmul.mubr.msk.f32.gmra.mrb[54].mxu0 %vm767_vm15, %v9255_v14  ;;  %v9259_v14 = vsel %vm20859_vm8, %v19418_v48, 0.0 }
 0x56a   : > { %15233 = vmatprep.mubr.msk.f32.mxu0 %vm767_vm15, %v19406_v52  ;;  %v19428_v52 = vld [vmem:[#allocation4 + $0xf1] sm:$0xff] }
 0x56d   : > { %15234 = vmatmul.mubr.msk.f32.gmra.mrb[56].mxu0 %vm767_vm15, %v9257_v25  ;;  %v9261_v25 = vsel %vm21088_vm2, %v19428_v52, 0.0 }
 0x56e   : > { %15236 = vmatprep.mubr.msk.f32.mxu0 %vm767_vm15, %v19416_v12  ;;  %v19438_v12 = vld [vmem:[#allocation4 + $0x101] sm:$0xff] }
 0x56f   : > { %21156 = vst [vmem:[#allocation71_spill] sm:$0xff] %v19438_v12 }
 0x571   : > { %15237 = vmatmul.mubr.msk.f32.gmra.mrb[58].mxu0 %vm767_vm15, %v9259_v14  ;;  %v9263_v14 = vsel %vm21090_vm3, %v19438_v12, 0.0  ;;  %v13030_v12 = vld [vmem:[%s20107_s5 + $0xa8] sm:$0xff] }
 0x572   : > { %15239 = vmatprep.mubr.msk.f32.mxu0 %vm767_vm15, %v19426_v57 }
 0x575   : > { %15240 = vmatmul.mubr.msk.f32.gmra.mrb[60].mxu0 %vm767_vm15, %v9261_v25  ;;  %v9654_v25 = vsel %vm21034_vm11, %v19115_v11, 0.0  ;;  %vm21158_vm11 = vnez %v20531_v50 }
 0x576   : > { %15242 = vmatprep.mubr.msk.f32.mxu0 %vm767_vm15, %v19436_v55  ;;  %v15689_v55 = vpack.c.bf16 %v12996_v15, %v12995_v53  ;;  %v15693_v53 = vpack.c.bf16 %v13030_v12, %v13029_v29  ;;  %v9658_v15 = vsel %vm20947_vm0, %v19141_v8, 0.0  ;;  %v9662_v12 = vsel %vm21158_vm11, %v19162_v35, 0.0 }
 0x577   : > { %vm21159_vm0 = vnez %v20544_v24  ;;  %vm21161_vm11 = vnez %v20567_v4 }
 0x579   : > { %15243 = vmatmul.mubr.msk.f32.gmra.mrb[62].mxu0 %vm767_vm15, %v9263_v14  ;;  %v9656_v14 = vsel %vm21035_vm12, %v19129_v18, 0.0  ;;  %vm21157_vm12 = vnez %v20522_v38 }
 0x57a   : > { %15253 = vmatprep.mubr.msk.f32.mxu0 %vm767_vm15, %v9654_v25  ;;  %v9660_v11 = vsel %vm21157_vm12, %v19152_v2, 0.0  ;;  %vm21160_vm12 = vnez %v20556_v39 }
 0x57b   : > { %v9666_v29 = vsel %vm21160_vm12, %v19182_v60, 0.0  ;;  %vm21163_vm12 = vnez %v20589_v5 }
 0x57c   : > { %v9672_v25 = vsel %vm21163_vm12, %v19212_v62, 0.0 }
 0x57d   : > { %15254 = vmatmul.mubr.msk.f32.vlgmr.msra.gmra.mrb[32].mxu0 %vm767_vm15, %v19133_v61  ;;  %v9668_v61 = vsel %vm21161_vm11, %v19192_v20, 0.0  ;;  %vm21164_vm11 = vnez %v20594_v3 }
 0x57e   : > { %15688 = vmatpush3.bf16.msra.mxu0 %v19299_v17  ;;  %15256 = vmatprep.mubr.msk.f32.mxu0 %vm767_vm15, %v9656_v14  ;;  %v9674_v14 = vsel %vm21164_vm11, %v19222_v13, 0.0 }
 0x57f   : > { %15690 = vmatprep.subr.bf16.mxu0 %v15689_v55 }
 0x581   : > { %15257 = vmatmul.mubr.msk.f32.gmra.mrb[34].mxu0 %vm767_vm15, %v19144_v19 }
 0x582   : > { %15259 = vmatprep.mubr.msk.f32.mxu0 %vm767_vm15, %v9658_v15  ;;  %15692 = vmatpush3.bf16.msra.mxu0 %v15689_v55  ;;  %v9664_v55 = vsel %vm21159_vm0, %v19172_v54, 0.0  ;;  %vm21162_vm0 = vnez %v20579_v58 }
 0x583   : > { %15694 = vmatprep.subr.bf16.mxu0 %v15693_v53  ;;  %v9670_v17 = vsel %vm21162_vm0, %v19202_v41, 0.0  ;;  %vm21165_vm0 = vnez %v21039_v42 }
 0x584   : > { %v9676_v15 = vsel %vm21165_vm0, %v19232_v56, 0.0 }
 0x585   : > { %15260 = vmatmul.mubr.msk.f32.gmra.mrb[36].mxu0 %vm767_vm15, %v19154_v1 }
 0x586   : > { %15262 = vmatprep.mubr.msk.f32.mxu0 %vm767_vm15, %v9660_v11  ;;  %v21166_v11 = vld [vmem:[#allocation63_spill] sm:$0xff] }
 0x587   : > { %vm21167_vm12 = vnez %v21166_v11  ;;  %v19547_v11 = vld [vmem:[#allocation4 + $0x107] sm:$0xff] }
 0x588   : > { %21175 = vst [vmem:[#allocation26_spill] sm:$0xff] %v19547_v11 }
 0x589   : > { %15263 = vmatmul.mubr.msk.f32.gmra.mrb[38].mxu0 %vm767_vm15, %v19164_v51 }
 0x58a   : > { %15265 = vmatprep.mubr.msk.f32.mxu0 %vm767_vm15, %v9662_v12  ;;  %v9678_v12 = vsel %vm21167_vm12, %v19242_v44, 0.0 }
 0x58d   : > { %15266 = vmatmul.mubr.msk.f32.gmra.mrb[40].mxu0 %vm767_vm15, %v19174_v0 }
 0x58e   : > { %15268 = vmatprep.mubr.msk.f32.mxu0 %vm767_vm15, %v9664_v55  ;;  %v21168_v55 = vld [vmem:[#allocation72_spill] sm:$0xff] }
 0x591   : > { %15269 = vmatmul.mubr.msk.f32.gmra.mrb[42].mxu0 %vm767_vm15, %v19184_v7 }
 0x592   : > { %15271 = vmatprep.mubr.msk.f32.mxu0 %vm767_vm15, %v9666_v29  ;;  %v21169_v29 = vld [vmem:[#allocation68_spill] sm:$0xff] }
 0x595   : > { %15272 = vmatmul.mubr.msk.f32.gmra.mrb[44].mxu0 %vm767_vm15, %v19194_v27 }
 0x596   : > { %15274 = vmatprep.mubr.msk.f32.mxu0 %vm767_vm15, %v9668_v61  ;;  %v21170_v61 = vld [vmem:[#allocation64_spill] sm:$0xff] }
 0x597   : > { %vm21171_vm11 = vnez %v21170_v61 }
 0x599   : > { %15275 = vmatmul.mubr.msk.f32.gmra.mrb[46].mxu0 %vm767_vm15, %v19204_v37 }
 0x59a   : > { %15277 = vmatprep.mubr.msk.f32.mxu0 %vm767_vm15, %v9670_v17  ;;  %v9680_v17 = vsel %vm21171_vm11, %v21169_v29, 0.0  ;;  %v21183_v29 = vld [vmem:[#allocation39_spill] sm:$0xff] }
 0x59d   : > { %15278 = vmatmul.mubr.msk.f32.gmra.mrb[48].mxu0 %vm767_vm15, %v19214_v28 }
 0x59e   : > { %15280 = vmatprep.mubr.msk.f32.mxu0 %vm767_vm15, %v9672_v25  ;;  %v21172_v25 = vld [vmem:[#allocation50_spill] sm:$0xff] }
 0x5a1   : > { %15281 = vmatmul.mubr.msk.f32.gmra.mrb[50].mxu0 %vm767_vm15, %v19224_v21 }
 0x5a2   : > { %15283 = vmatprep.mubr.msk.f32.mxu0 %vm767_vm15, %v9674_v14  ;;  %v21173_v14 = vld [vmem:[#allocation15_spill] sm:$0xff] }
 0x5a3   : > { %v9682_v42 = vsel %vm21132_vm13, %v21173_v14, 0.0  ;;  %v21181_v14 = vld [vmem:[#allocation34_spill] sm:$0xff]  ;;  %vm21211_vm13 = vnez %v20469_v9 }
 0x5a4   : > { %v21274_v9 = vld [vmem:[#allocation74_spill] sm:$0xff] }
 0x5a5   : > { %15284 = vmatmul.mubr.msk.f32.gmra.mrb[52].mxu0 %vm767_vm15, %v19234_v31 }
 0x5a6   : > { %15286 = vmatprep.mubr.msk.f32.mxu0 %vm767_vm15, %v9676_v15  ;;  %v13031_v15 = vld [vmem:[%s20107_s5 + $0xb0] sm:$0xff] }
 0x5a9   : > { %15287 = vmatmul.mubr.msk.f32.gmra.mrb[54].mxu0 %vm767_vm15, %v19244_v36 }
 0x5aa   : > { %15289 = vmatprep.mubr.msk.f32.mxu0 %vm767_vm15, %v9678_v12  ;;  %v21176_v12 = vld [vmem:[#allocation54_spill] sm:$0xff] }
 0x5ad   : > { %15290 = vmatmul.mubr.msk.f32.gmra.mrb[56].mxu0 %vm767_vm15, %v21168_v55  ;;  %v21177_v55 = vld [vmem:[#allocation66_spill] sm:$0xff] }
 0x5ae   : > { %15292 = vmatprep.mubr.msk.f32.mxu0 %vm767_vm15, %v9680_v17  ;;  %vm21178_vm12 = vnez %v21177_v55  ;;  %v19555_v17 = vld [vmem:[#allocation4 + $0x10f] sm:$0xff] }
 0x5af   : > { %v9684_v61 = vsel %vm21178_vm12, %v19547_v11, 0.0  ;;  %21179 = vst [vmem:[#allocation28_spill] sm:$0xff] %v19555_v17  ;;  %v13066_v11 = vld [vmem:[%s20107_s5 + $0xc8] sm:$0xff]  ;;  %vm21210_vm12 = vnez %v20466_v63 }
 0x5b1   : > { %15293 = vmatmul.mubr.msk.f32.gmra.mrb[58].mxu0 %vm767_vm15, %v21172_v25  ;;  %v21182_v25 = vld [vmem:[#allocation37_spill] sm:$0xff] }
 0x5b2   : > { %15295 = vmatprep.mubr.msk.f32.mxu0 %vm767_vm15, %v9682_v42  ;;  %v13032_v42 = vld [vmem:[%s20107_s5 + $0xb8] sm:$0xff] }
 0x5b3   : > { %v15697_v55 = vpack.c.bf16 %v13032_v42, %v13031_v15  ;;  %v21184_v15 = vld [vmem:[#allocation42_spill] sm:$0xff]  ;;  %v21186_v42 = vld [vmem:[#allocation47_spill] sm:$0xff] }
 0x5b5   : > { %15296 = vmatmul.mubr.msk.f32.gmra.mrb[60].mxu0 %vm767_vm15, %v21176_v12  ;;  %v21180_v12 = vld [vmem:[#allocation32_spill] sm:$0xff] }
 0x5b6   : > { %15298 = vmatprep.mubr.msk.f32.mxu0 %vm767_vm15, %v9684_v61  ;;  %v13065_v61 = vld [vmem:[%s20107_s5 + $0xc0] sm:$0xff] }
 0x5b9   : > { %15299 = vmatmul.mubr.msk.f32.gmra.mrb[62].mxu0 %vm767_vm15, %v19555_v17  ;;  %v15701_v17 = vpack.c.bf16 %v13066_v11, %v13065_v61  ;;  %v21189_v11 = vld [vmem:[#allocation53_spill] sm:$0xff]  ;;  %v21193_v61 = vld [vmem:[#allocation30_spill] sm:$0xff] }
 0x5ba   : > { %15309 = vmatprep.mubr.msk.f32.mxu0 %vm767_vm15, %v21180_v12  ;;  %v21185_v12 = vld [vmem:[#allocation44_spill] sm:$0xff] }
 0x5bd   : > { %15310 = vmatmul.mubr.msk.f32.vlgmr.msra.gmra.mrb[32].mxu0 %vm767_vm15, %v21181_v14  ;;  %v21192_v14 = vld [vmem:[#allocation25_spill] sm:$0xff] }
 0x5be   : > { %15696 = vmatpush3.bf16.msra.mxu0 %v15693_v53  ;;  %15312 = vmatprep.mubr.msk.f32.mxu0 %vm767_vm15, %v21182_v25  ;;  %v21187_v53 = vld [vmem:[#allocation49_spill] sm:$0xff]  ;;  %v21188_v25 = vld [vmem:[#allocation51_spill] sm:$0xff] }
 0x5bf   : > { %15698 = vmatprep.subr.bf16.mxu0 %v15697_v55 }
 0x5c1   : > { %15313 = vmatmul.mubr.msk.f32.gmra.mrb[34].mxu0 %vm767_vm15, %v21183_v29  ;;  %v21190_v29 = vld [vmem:[#allocation56_spill] sm:$0xff] }
 0x5c2   : > { %15315 = vmatprep.mubr.msk.f32.mxu0 %vm767_vm15, %v21184_v15  ;;  %15700 = vmatpush3.bf16.msra.mxu0 %v15697_v55  ;;  %v21191_v55 = vld [vmem:[#allocation58_spill] sm:$0xff]  ;;  %v21194_v15 = vld [vmem:[#allocation31_spill] sm:$0xff] }
 0x5c3   : > { %15702 = vmatprep.subr.bf16.mxu0 %v15701_v17 }
 0x5c5   : > { %15316 = vmatmul.mubr.msk.f32.gmra.mrb[36].mxu0 %vm767_vm15, %v21185_v12  ;;  %v21195_v12 = vld [vmem:[#allocation5_spill] sm:$0xff] }
 0x5c6   : > { %15318 = vmatprep.mubr.msk.f32.mxu0 %vm767_vm15, %v21186_v42  ;;  %v21196_v42 = vld [vmem:[#allocation35_spill] sm:$0xff] }
 0x5c9   : > { %15319 = vmatmul.mubr.msk.f32.gmra.mrb[38].mxu0 %vm767_vm15, %v21187_v53  ;;  %v21197_v53 = vld [vmem:[#allocation36_spill] sm:$0xff] }
 0x5ca   : > { %15321 = vmatprep.mubr.msk.f32.mxu0 %vm767_vm15, %v21188_v25  ;;  %v21198_v25 = vld [vmem:[#allocation6_spill] sm:$0xff] }
 0x5cd   : > { %15322 = vmatmul.mubr.msk.f32.gmra.mrb[40].mxu0 %vm767_vm15, %v21189_v11  ;;  %v21199_v11 = vld [vmem:[#allocation7_spill] sm:$0xff] }
 0x5ce   : > { %15324 = vmatprep.mubr.msk.f32.mxu0 %vm767_vm15, %v21190_v29  ;;  %v21200_v29 = vld [vmem:[#allocation40_spill] sm:$0xff] }
 0x5d1   : > { %15325 = vmatmul.mubr.msk.f32.gmra.mrb[42].mxu0 %vm767_vm15, %v21191_v55  ;;  %v21201_v55 = vld [vmem:[#allocation41_spill] sm:$0xff] }
 0x5d2   : > { %15327 = vmatprep.mubr.msk.f32.mxu0 %vm767_vm15, %v21192_v14  ;;  %v21202_v14 = vld [vmem:[#allocation9_spill] sm:$0xff] }
 0x5d5   : > { %15328 = vmatmul.mubr.msk.f32.gmra.mrb[44].mxu0 %vm767_vm15, %v21193_v61  ;;  %v21203_v61 = vld [vmem:[#allocation10_spill] sm:$0xff] }
 0x5d6   : > { %15330 = vmatprep.mubr.msk.f32.mxu0 %vm767_vm15, %v21194_v15  ;;  %v21204_v15 = vld [vmem:[#allocation45_spill] sm:$0xff] }
 0x5d9   : > { %15331 = vmatmul.mubr.msk.f32.gmra.mrb[46].mxu0 %vm767_vm15, %v21195_v12  ;;  %v21205_v12 = vld [vmem:[#allocation46_spill] sm:$0xff] }
 0x5da   : > { %15333 = vmatprep.mubr.msk.f32.mxu0 %vm767_vm15, %v21196_v42  ;;  %v21206_v42 = vld [vmem:[#allocation12_spill] sm:$0xff] }
 0x5dd   : > { %15334 = vmatmul.mubr.msk.f32.gmra.mrb[48].mxu0 %vm767_vm15, %v21197_v53  ;;  %v21207_v53 = vld [vmem:[#allocation13_spill] sm:$0xff] }
 0x5de   : > { %15336 = vmatprep.mubr.msk.f32.mxu0 %vm767_vm15, %v21198_v25  ;;  %v21208_v25 = vld [vmem:[#allocation18_spill] sm:$0xff] }
 0x5e1   : > { %15337 = vmatmul.mubr.msk.f32.gmra.mrb[50].mxu0 %vm767_vm15, %v21199_v11  ;;  %v21209_v11 = vld [vmem:[#allocation19_spill] sm:$0xff] }
 0x5e2   : > { %15339 = vmatprep.mubr.msk.f32.mxu0 %vm767_vm15, %v21200_v29  ;;  %v19631_v29 = vld [vmem:[#allocation4 + $0x108] sm:$0xff] }
 0x5e5   : > { %15340 = vmatmul.mubr.msk.f32.gmra.mrb[52].mxu0 %vm767_vm15, %v21201_v55  ;;  %v19635_v55 = vld [vmem:[#allocation4 + $0x110] sm:$0xff] }
 0x5e6   : > { %15342 = vmatprep.mubr.msk.f32.mxu0 %vm767_vm15, %v21202_v14  ;;  %v13067_v14 = vld [vmem:[%s20107_s5 + $0xd0] sm:$0xff] }
 0x5e9   : > { %15343 = vmatmul.mubr.msk.f32.gmra.mrb[54].mxu0 %vm767_vm15, %v21203_v61  ;;  %v13068_v61 = vld [vmem:[%s20107_s5 + $0xd8] sm:$0xff] }
 0x5ea   : > { %15345 = vmatprep.mubr.msk.f32.mxu0 %vm767_vm15, %v21204_v15  ;;  %v15705_v15 = vpack.c.bf16 %v13068_v61, %v13067_v14  ;;  %v21215_v14 = vld [vmem:[#allocation55_spill] sm:$0xff]  ;;  %v21221_v61 = vld [vmem:[#allocation22_spill] sm:$0xff] }
 0x5ed   : > { %15346 = vmatmul.mubr.msk.f32.gmra.mrb[56].mxu0 %vm767_vm15, %v21205_v12  ;;  %v10467_v12 = vsel %vm21210_vm12, %v19294_v16, 0.0  ;;  %v10469_v16 = vsel %vm21211_vm13, %v19307_v10, 0.0 }
 0x5ee   : > { %15348 = vmatprep.mubr.msk.f32.mxu0 %vm767_vm15, %v21206_v42  ;;  %v13101_v42 = vld [vmem:[%s20107_s5 + $0xe0] sm:$0xff] }
 0x5f1   : > { %15349 = vmatmul.mubr.msk.f32.gmra.mrb[58].mxu0 %vm767_vm15, %v21207_v53  ;;  %v13102_v53 = vld [vmem:[%s20107_s5 + $0xe8] sm:$0xff] }
 0x5f2   : > { %15351 = vmatprep.mubr.msk.f32.mxu0 %vm767_vm15, %v21208_v25  ;;  %v21212_v25 = vld [vmem:[#allocation16_spill] sm:$0xff] }
 0x5f5   : > { %15352 = vmatmul.mubr.msk.f32.gmra.mrb[60].mxu0 %vm767_vm15, %v21209_v11  ;;  %v21213_v11 = vld [vmem:[#allocation8_spill] sm:$0xff] }
 0x5f6   : > { %15354 = vmatprep.mubr.msk.f32.mxu0 %vm767_vm15, %v19631_v29  ;;  %vm21214_vm12 = vnez %v21213_v11  ;;  %v10477_v11 = vsel %vm21067_vm6, %v19348_v40, 0.0 }
 0x5f9   : > { %15355 = vmatmul.mubr.msk.f32.gmra.mrb[62].mxu0 %vm767_vm15, %v19635_v55 }
 0x5fa   : > { %15365 = vmatprep.mubr.msk.f32.mxu0 %vm767_vm15, %v19292_v32  ;;  %v15709_v32 = vpack.c.bf16 %v13102_v53, %v13101_v42  ;;  %v21217_v42 = vld [vmem:[#allocation73_spill] sm:$0xff]  ;;  %v10475_v53 = vsel %vm21142_vm10, %v19338_v46, 0.0 }
 0x5fd   : > { %15366 = vmatmul.mubr.msk.f32.vlgmr.msra.gmra.mrb[32].mxu0 %vm767_vm15, %v10467_v12  ;;  %v10473_v12 = vsel %vm21140_vm14, %v19328_v47, 0.0 }
 0x5fe   : > { %15704 = vmatpush3.bf16.msra.mxu0 %v15701_v17  ;;  %15368 = vmatprep.mubr.msk.f32.mxu0 %vm767_vm15, %v19305_v22  ;;  %v10471_v17 = vsel %vm21214_vm12, %v19318_v43, 0.0 }
 0x5ff   : > { %15706 = vmatprep.subr.bf16.mxu0 %v15705_v15 }
 0x601   : > { %15369 = vmatmul.mubr.msk.f32.gmra.mrb[34].mxu0 %vm767_vm15, %v10469_v16  ;;  %v21219_v16 = vld [vmem:[#allocation74_spill] sm:$0xff] }
 0x602   : > { %15371 = vmatprep.mubr.msk.f32.mxu0 %vm767_vm15, %v21212_v25  ;;  %15708 = vmatpush3.bf16.msra.mxu0 %v15705_v15  ;;  %v21223_v15 = vld [vmem:[#allocation59_spill] sm:$0xff] }
 0x603   : > { %15710 = vmatprep.subr.bf16.mxu0 %v15709_v32 }
 0x605   : > { %15372 = vmatmul.mubr.msk.f32.gmra.mrb[36].mxu0 %vm767_vm15, %v10471_v17  ;;  %v21225_v17 = vld [vmem:[#allocation61_spill] sm:$0xff] }
 0x606   : > { %15374 = vmatprep.mubr.msk.f32.mxu0 %vm767_vm15, %v21215_v14 }
 0x609   : > { %15375 = vmatmul.mubr.msk.f32.gmra.mrb[38].mxu0 %vm767_vm15, %v10473_v12  ;;  %v21227_v12 = vld [vmem:[#allocation21_spill] sm:$0xff] }
 0x60a   : > { %15377 = vmatprep.mubr.msk.f32.mxu0 %vm767_vm15, %v21217_v42  ;;  %v10479_v42 = vsel %vm21070_vm1, %v19358_v30, 0.0 }
 0x60d   : > { %15378 = vmatmul.mubr.msk.f32.gmra.mrb[40].mxu0 %vm767_vm15, %v10475_v53  ;;  %v21230_v53 = vld [vmem:[#allocation24_spill] sm:$0xff] }
 0x60e   : > { %15380 = vmatprep.mubr.msk.f32.mxu0 %vm767_vm15, %v21219_v16  ;;  %v10481_v16 = vsel %vm21073_vm5, %v19368_v45, 0.0 }
 0x611   : > { %15381 = vmatmul.mubr.msk.f32.gmra.mrb[42].mxu0 %vm767_vm15, %v10477_v11  ;;  %v21233_v11 = vld [vmem:[#allocation29_spill] sm:$0xff] }
 0x612   : > { %15383 = vmatprep.mubr.msk.f32.mxu0 %vm767_vm15, %v21221_v61  ;;  %v10483_v61 = vsel %vm21016_vm7, %v19378_v49, 0.0 }
 0x615   : > { %15384 = vmatmul.mubr.msk.f32.gmra.mrb[44].mxu0 %vm767_vm15, %v10479_v42  ;;  %v21228_v42 = vld [vmem:[#allocation33_spill] sm:$0xff] }
 0x616   : > { %15386 = vmatprep.mubr.msk.f32.mxu0 %vm767_vm15, %v21223_v15  ;;  %vm21229_vm1 = vnez %v21228_v42  ;;  %v21235_v42 = vld [vmem:[#allocation69_spill] sm:$0xff] }
 0x617   : > { %v10485_v15 = vsel %vm21229_vm1, %v19388_v26, 0.0 }
 0x619   : > { %15387 = vmatmul.mubr.msk.f32.gmra.mrb[46].mxu0 %vm767_vm15, %v10481_v16  ;;  %v21231_v16 = vld [vmem:[#allocation38_spill] sm:$0xff] }
 0x61a   : > { %15389 = vmatprep.mubr.msk.f32.mxu0 %vm767_vm15, %v21225_v17  ;;  %vm21232_vm5 = vnez %v21231_v16  ;;  %v10493_v16 = vsel %vm20859_vm8, %v19428_v52, 0.0  ;;  %vm21248_vm8 = vnez %v20531_v50 }
 0x61b   : > { %v10487_v17 = vsel %vm21232_vm5, %v19398_v33, 0.0 }
 0x61d   : > { %15390 = vmatmul.mubr.msk.f32.gmra.mrb[48].mxu0 %vm767_vm15, %v10483_v61  ;;  %v21238_v61 = vld [vmem:[#allocation70_spill] sm:$0xff] }
 0x61e   : > { %15392 = vmatprep.mubr.msk.f32.mxu0 %vm767_vm15, %v21227_v12  ;;  %v10489_v12 = vsel %vm21150_vm4, %v19408_v34, 0.0 }
 0x621   : > { %15393 = vmatmul.mubr.msk.f32.gmra.mrb[50].mxu0 %vm767_vm15, %v10485_v15  ;;  %v19741_v15 = vld [vmem:[#allocation4 + $0x109] sm:$0xff] }
 0x622   : > { %15395 = vmatprep.mubr.msk.f32.mxu0 %vm767_vm15, %v21230_v53  ;;  %v10491_v53 = vsel %vm21153_vm9, %v19418_v48, 0.0  ;;  %21241 = vst [vmem:[#allocation32_spill] sm:$0xff] %v19741_v15 }
 0x625   : > { %15396 = vmatmul.mubr.msk.f32.gmra.mrb[52].mxu0 %vm767_vm15, %v10487_v17  ;;  %v13137_v17 = vld [vmem:[%s20107_s5 + $0x100] sm:$0xff] }
 0x626   : > { %15398 = vmatprep.mubr.msk.f32.mxu0 %vm767_vm15, %v21233_v11 }
 0x629   : > { %15399 = vmatmul.mubr.msk.f32.gmra.mrb[54].mxu0 %vm767_vm15, %v10489_v12  ;;  %v21239_v12 = vld [vmem:[#allocation71_spill] sm:$0xff] }
 0x62a   : > { %15401 = vmatprep.mubr.msk.f32.mxu0 %vm767_vm15, %v21235_v42  ;;  %v10495_v34 = vsel %vm21088_vm2, %v21239_v12, 0.0  ;;  %v13104_v42 = vld [vmem:[%s20107_s5 + $0xf8] sm:$0xff]  ;;  %vm21244_vm2 = vnez %v20903_v59 }
 0x62d   : > { %15402 = vmatmul.mubr.msk.f32.gmra.mrb[56].mxu0 %vm767_vm15, %v10491_v53  ;;  %v19743_v53 = vld [vmem:[#allocation4 + $0x111] sm:$0xff] }
 0x62e   : > { %15404 = vmatprep.mubr.msk.f32.mxu0 %vm767_vm15, %v19426_v57  ;;  %21242 = vst [vmem:[#allocation34_spill] sm:$0xff] %v19743_v53 }
 0x631   : > { %15405 = vmatmul.mubr.msk.f32.gmra.mrb[58].mxu0 %vm767_vm15, %v10493_v16  ;;  %v10497_v16 = vsel %vm21090_vm3, %v19743_v53, 0.0  ;;  %v13138_v53 = vld [vmem:[%s20107_s5 + $0x108] sm:$0xff]  ;;  %vm21245_vm3 = vnez %v20906_v23 }
 0x632   : > { %15407 = vmatprep.mubr.msk.f32.mxu0 %vm767_vm15, %v21238_v61  ;;  %v13103_v61 = vld [vmem:[%s20107_s5 + $0xf0] sm:$0xff]  ;;  %v15717_v59 = vpack.c.bf16 %v13138_v53, %v13137_v17  ;;  %v11284_v17 = vld [vmem:[#allocation4 + $0x58] sm:$0xff]  ;;  %v11285_v53 = vld [vmem:[#allocation4 + $0x60] sm:$0xff] }
 0x635   : > { %15408 = vmatmul.mubr.msk.f32.gmra.mrb[60].mxu0 %vm767_vm15, %v10495_v34  ;;  %v10888_v34 = vsel %vm21244_vm2, %v19129_v18, 0.0  ;;  %vm21246_vm2 = vnez %v20908_v6  ;;  %v10896_v6 = vsel %vm21248_vm8, %v19172_v54, 0.0  ;;  %vm21251_vm8 = vnez %v20567_v4  ;;  %v10887_v54 = vld [vmem:[#allocation4 + $0x11f] sm:$0xff] }
 0x636   : > { %15410 = vmatprep.mubr.msk.f32.mxu0 %vm767_vm15, %v19741_v15  ;;  %v15713_v15 = vpack.c.bf16 %v13104_v42, %v13103_v61  ;;  %v10892_v18 = vsel %vm21246_vm2, %v19152_v2, 0.0  ;;  %vm21249_vm2 = vnez %v20544_v24  ;;  %v10902_v50 = vsel %vm21251_vm8, %v19202_v41, 0.0  ;;  %v21265_v41 = vld [vmem:[#allocation65_spill] sm:$0xff]  ;;  %v11278_v2 = vld [vmem:[#allocation4 + $0x28] sm:$0xff]  ;;  %v11281_v42 = vld [vmem:[#allocation4 + $0x40] sm:$0xff] }
 0x637   : > { %vm21254_vm8 = vnez %v20594_v3  ;;  %v21260_v3 = vld [vmem:[#allocation50_spill] sm:$0xff]  ;;  %v11282_v61 = vld [vmem:[#allocation4 + $0x48] sm:$0xff] }
 0x638   : > { %v10908_v4 = vsel %vm21254_vm8, %v19232_v56, 0.0  ;;  %v21261_v56 = vld [vmem:[#allocation15_spill] sm:$0xff] }
 0x639   : > { %15411 = vmatmul.mubr.msk.f32.gmra.mrb[62].mxu0 %vm767_vm15, %v10497_v16  ;;  %v10890_v16 = vsel %vm21245_vm3, %v19141_v8, 0.0  ;;  %vm21247_vm3 = vnez %v20522_v38  ;;  %v13139_v8 = vld [vmem:[%s20107_s5 + $0x110] sm:$0xff] }
 0x63a   : > { %15421 = vmatprep.mubr.msk.f32.mxu0 %vm767_vm15, %v10888_v34  ;;  %v10894_v23 = vsel %vm21247_vm3, %v19162_v35, 0.0  ;;  %vm21250_vm3 = vnez %v20556_v39  ;;  %v11279_v35 = vld [vmem:[#allocation4 + $0x30] sm:$0xff]  ;;  %v11286_v34 = vld [vmem:[#allocation4 + $0x68] sm:$0xff] }
 0x63b   : > { %v10900_v38 = vsel %vm21250_vm3, %v19192_v20, 0.0  ;;  %vm21253_vm3 = vnez %v20589_v5  ;;  %v21256_v5 = vld [vmem:[#allocation72_spill] sm:$0xff]  ;;  %v10886_v20 = vld [vmem:[#allocation4 + $0x117] sm:$0xff] }
 0x63c   : > { %v10906_v39 = vsel %vm21253_vm3, %v19222_v13, 0.0  ;;  %v21257_v13 = vld [vmem:[#allocation68_spill] sm:$0xff] }
 0x63d   : > { %15422 = vmatmul.mubr.msk.f32.vlgmr.msra.gmra.mrb[32].mxu0 %vm767_vm15, %v19144_v19  ;;  %v13140_v19 = vld [vmem:[%s20107_s5 + $0x118] sm:$0xff] }
 0x63e   : > { %15712 = vmatpush3.bf16.msra.mxu0 %v15709_v32  ;;  %15424 = vmatprep.mubr.msk.f32.mxu0 %vm767_vm15, %v10890_v16  ;;  %v11280_v32 = vld [vmem:[#allocation4 + $0x38] sm:$0xff]  ;;  %v11287_v16 = vld [vmem:[#allocation4 + $0x70] sm:$0xff] }
 0x63f   : > { %15714 = vmatprep.subr.bf16.mxu0 %v15713_v15 }
 0x641   : > { %15425 = vmatmul.mubr.msk.f32.gmra.mrb[34].mxu0 %vm767_vm15, %v19154_v1  ;;  %v15721_v1 = vpack.c.bf16 %v13140_v19, %v13139_v8  ;;  %v11719_v19 = vsel %vm21229_vm1, %v19398_v33, 0.0 }
 0x642   : > { %15427 = vmatprep.mubr.msk.f32.mxu0 %vm767_vm15, %v10892_v18  ;;  %15716 = vmatpush3.bf16.msra.mxu0 %v15713_v15  ;;  %v11283_v15 = vld [vmem:[#allocation4 + $0x50] sm:$0xff]  ;;  %v11289_v18 = vld [vmem:[#allocation4 + $0x80] sm:$0xff] }
 0x643   : > { %15718 = vmatprep.subr.bf16.mxu0 %v15717_v59 }
 0x645   : > { %15428 = vmatmul.mubr.msk.f32.gmra.mrb[36].mxu0 %vm767_vm15, %v19164_v51  ;;  %v10898_v51 = vsel %vm21249_vm2, %v19182_v60, 0.0  ;;  %vm21252_vm2 = vnez %v20579_v58  ;;  %v21268_v60 = vld [vmem:[#allocation66_spill] sm:$0xff]  ;;  %v11298_v58 = vld [vmem:[#allocation4 + $0xc8] sm:$0xff] }
 0x646   : > { %15430 = vmatprep.mubr.msk.f32.mxu0 %vm767_vm15, %v10894_v23  ;;  %v10904_v24 = vsel %vm21252_vm2, %v19212_v62, 0.0  ;;  %v10914_v62 = vsel %vm21171_vm11, %v21261_v56, 0.0  ;;  %vm21269_vm3 = vnez %v21268_v60  ;;  %v11290_v23 = vld [vmem:[#allocation4 + $0x88] sm:$0xff]  ;;  %v11305_v56 = vld [vmem:[#allocation4 + $0x100] sm:$0xff]  ;;  %vm21270_vm11 = vnez %v20466_v63  ;;  %v21272_v63 = vld [vmem:[#allocation73_spill] sm:$0xff] }
 0x649   : > { %15431 = vmatmul.mubr.msk.f32.gmra.mrb[38].mxu0 %vm767_vm15, %v19174_v0  ;;  %v10918_v0 = vsel %vm21269_vm3, %v10886_v20, 0.0 }
 0x64a   : > { %15433 = vmatprep.mubr.msk.f32.mxu0 %vm767_vm15, %v10896_v6  ;;  %v11291_v6 = vld [vmem:[#allocation4 + $0x90] sm:$0xff] }
 0x64d   : > { %15434 = vmatmul.mubr.msk.f32.gmra.mrb[40].mxu0 %vm767_vm15, %v19184_v7  ;;  %v21267_v7 = vld [vmem:[#allocation28_spill] sm:$0xff] }
 0x64e   : > { %15436 = vmatprep.mubr.msk.f32.mxu0 %vm767_vm15, %v10898_v51  ;;  %v11292_v51 = vld [vmem:[#allocation4 + $0x98] sm:$0xff] }
 0x651   : > { %15437 = vmatmul.mubr.msk.f32.gmra.mrb[42].mxu0 %vm767_vm15, %v19194_v27 }
 0x652   : > { %15439 = vmatprep.mubr.msk.f32.mxu0 %vm767_vm15, %v10900_v38  ;;  %v11293_v38 = vld [vmem:[#allocation4 + $0xa0] sm:$0xff] }
 0x655   : > { %15440 = vmatmul.mubr.msk.f32.gmra.mrb[44].mxu0 %vm767_vm15, %v19204_v37  ;;  %v21264_v37 = vld [vmem:[#allocation26_spill] sm:$0xff] }
 0x656   : > { %15442 = vmatprep.mubr.msk.f32.mxu0 %vm767_vm15, %v10902_v50  ;;  %v11294_v50 = vld [vmem:[#allocation4 + $0xa8] sm:$0xff] }
 0x659   : > { %15443 = vmatmul.mubr.msk.f32.gmra.mrb[46].mxu0 %vm767_vm15, %v19214_v28 }
 0x65a   : > { %15445 = vmatprep.mubr.msk.f32.mxu0 %vm767_vm15, %v10904_v24  ;;  %v11295_v24 = vld [vmem:[#allocation4 + $0xb0] sm:$0xff] }
 0x65d   : > { %15446 = vmatmul.mubr.msk.f32.gmra.mrb[48].mxu0 %vm767_vm15, %v19224_v21  ;;  %v10910_v21 = vsel %vm21165_vm0, %v19242_v44, 0.0  ;;  %v21263_v44 = vld [vmem:[#allocation54_spill] sm:$0xff]  ;;  %vm21266_vm0 = vnez %v21265_v41  ;;  %v11711_v41 = vsel %vm21067_vm6, %v19358_v30, 0.0  ;;  %v21284_v30 = vld [vmem:[#allocation21_spill] sm:$0xff] }
 0x65e   : > { %15448 = vmatprep.mubr.msk.f32.mxu0 %vm767_vm15, %v10906_v39  ;;  %v10916_v27 = vsel %vm21266_vm0, %v21264_v37, 0.0  ;;  %v11296_v39 = vld [vmem:[#allocation4 + $0xb8] sm:$0xff] }
 0x661   : > { %15449 = vmatmul.mubr.msk.f32.gmra.mrb[50].mxu0 %vm767_vm15, %v19234_v31  ;;  %v21258_v31 = vld [vmem:[#allocation63_spill] sm:$0xff] }
 0x662   : > { %15451 = vmatprep.mubr.msk.f32.mxu0 %vm767_vm15, %v10908_v4  ;;  %vm21259_vm2 = vnez %v21258_v31  ;;  %v11297_v4 = vld [vmem:[#allocation4 + $0xc0] sm:$0xff]  ;;  %v11302_v31 = vld [vmem:[#allocation4 + $0xe8] sm:$0xff] }
 0x663   : > { %v10912_v28 = vsel %vm21259_vm2, %v21257_v13, 0.0  ;;  %v11301_v13 = vld [vmem:[#allocation4 + $0xe0] sm:$0xff] }
 0x665   : > { %15452 = vmatmul.mubr.msk.f32.gmra.mrb[52].mxu0 %vm767_vm15, %v19244_v36  ;;  %v11308_v36 = vld [vmem:[#allocation4 + $0x118] sm:$0xff] }
 0x666   : > { %15454 = vmatprep.mubr.msk.f32.mxu0 %vm767_vm15, %v10910_v21  ;;  %v11299_v21 = vld [vmem:[#allocation4 + $0xd0] sm:$0xff] }
 0x669   : > { %15455 = vmatmul.mubr.msk.f32.gmra.mrb[54].mxu0 %vm767_vm15, %v21256_v5  ;;  %v11300_v5 = vld [vmem:[#allocation4 + $0xd8] sm:$0xff] }
 0x66a   : > { %15457 = vmatprep.mubr.msk.f32.mxu0 %vm767_vm15, %v10912_v28  ;;  %v11303_v28 = vld [vmem:[#allocation4 + $0xf0] sm:$0xff] }
 0x66d   : > { %15458 = vmatmul.mubr.msk.f32.gmra.mrb[56].mxu0 %vm767_vm15, %v21260_v3  ;;  %v11304_v3 = vld [vmem:[#allocation4 + $0xf8] sm:$0xff] }
 0x66e   : > { %15460 = vmatprep.mubr.msk.f32.mxu0 %vm767_vm15, %v10914_v62  ;;  %v11309_v62 = vld [vmem:[#allocation4 + $0x120] sm:$0xff] }
 0x671   : > { %15461 = vmatmul.mubr.msk.f32.gmra.mrb[58].mxu0 %vm767_vm15, %v21263_v44  ;;  %v11701_v44 = vsel %vm21270_vm11, %v19307_v10, 0.0 }
 0x672   : > { %15463 = vmatprep.mubr.msk.f32.mxu0 %vm767_vm15, %v10916_v27  ;;  %v21279_v27 = vld [vmem:[#allocation20_spill] sm:$0xff] }
 0x675   : > { %15464 = vmatmul.mubr.msk.f32.gmra.mrb[60].mxu0 %vm767_vm15, %v21267_v7  ;;  %v21282_v7 = vld [vmem:[#allocation23_spill] sm:$0xff] }
 0x676   : > { %15466 = vmatprep.mubr.msk.f32.mxu0 %vm767_vm15, %v10918_v0 }
 0x679   : > { %15467 = vmatmul.mubr.msk.f32.gmra.mrb[62].mxu0 %vm767_vm15, %v10887_v54  ;;  %v11717_v54 = vsel %vm21016_vm7, %v19388_v26, 0.0  ;;  %v21290_v26 = vld [vmem:[#allocation69_spill] sm:$0xff]  ;;  %vm12129_vm7 = vcmask 64512  }
 0x67a   : > { %15477 = vmatprep.mubr.msk.f32.mxu0 %vm767_vm15, %v11278_v2 }
 0x67d   : > { %15478 = vmatmul.mubr.msk.f32.vlgmr.msra.gmra.mrb[32].mxu0 %vm767_vm15, %v11279_v35 }
 0x67e   : > { %15720 = vmatpush3.bf16.msra.mxu0 %v15717_v59  ;;  %15480 = vmatprep.mubr.msk.f32.mxu0 %vm767_vm15, %v11280_v32  ;;  %v11288_v59 = vld [vmem:[#allocation4 + $0x78] sm:$0xff]  ;;  %v11723_v32 = vsel %vm21150_vm4, %v19418_v48, 0.0  ;;  %v21296_v48 = vld [vmem:[#allocation32_spill] sm:$0xff] }
 0x67f   : > { %15722 = vmatprep.subr.bf16.mxu0 %v15721_v1 }
 0x681   : > { %15481 = vmatmul.mubr.msk.f32.gmra.mrb[34].mxu0 %vm767_vm15, %v11281_v42  ;;  %v21293_v42 = vld [vmem:[#allocation70_spill] sm:$0xff] }
 0x682   : > { %15483 = vmatprep.mubr.msk.f32.mxu0 %vm767_vm15, %v11282_v61  ;;  %15724 = vmatpush3.bf16.msra.mxu0 %v15721_v1  ;;  %v21294_v61 = vld [vmem:[#allocation52_spill] sm:$0xff] }
 0x683   : > { %vm21295_vm6 = vnez %v21294_v61 }
 0x685   : > { %15484 = vmatmul.mubr.msk.f32.gmra.mrb[36].mxu0 %vm767_vm15, %v11283_v15  ;;  %v11727_v15 = vsel %vm21295_vm6, %v21239_v12, 0.0  ;;  %v19994_v12 = vld [vmem:[%s20108_s6] ss:$0 sm:$0xff] }
 0x686   : > { %15486 = vmatprep.mubr.msk.f32.mxu0 %vm767_vm15, %v11284_v17  ;;  %v11698_v17 = vld [vmem:[#allocation4 + $0x119] sm:$0xff] }
 0x689   : > { %15487 = vmatmul.mubr.msk.f32.gmra.mrb[38].mxu0 %vm767_vm15, %v11285_v53  ;;  %v21297_v53 = vld [vmem:[#allocation34_spill] sm:$0xff] }
 0x68a   : > { %15489 = vmatprep.mubr.msk.f32.mxu0 %vm767_vm15, %v11286_v34  ;;  %v21298_v34 = vld [vmem:[#allocation57_spill] sm:$0xff] }
 0x68d   : > { %15490 = vmatmul.mubr.msk.f32.gmra.mrb[40].mxu0 %vm767_vm15, %v11287_v16  ;;  %v21300_v16 = vld [vmem:[#allocation60_spill] sm:$0xff] }
 0x68e   : > { %15492 = vmatprep.mubr.msk.f32.mxu0 %vm767_vm15, %v11288_v59 }
 0x691   : > { %15493 = vmatmul.mubr.msk.f32.gmra.mrb[42].mxu0 %vm767_vm15, %v11289_v18 }
 0x692   : > { %15495 = vmatprep.mubr.msk.f32.mxu0 %vm767_vm15, %v11290_v23 }
 0x695   : > { %15496 = vmatmul.mubr.msk.f32.gmra.mrb[44].mxu0 %vm767_vm15, %v11291_v6 }
 0x696   : > { %15498 = vmatprep.mubr.msk.f32.mxu0 %vm767_vm15, %v11292_v51 }
 0x699   : > { %15499 = vmatmul.mubr.msk.f32.gmra.mrb[46].mxu0 %vm767_vm15, %v11293_v38 }
 0x69a   : > { %15501 = vmatprep.mubr.msk.f32.mxu0 %vm767_vm15, %v11294_v50 }
 0x69d   : > { %15502 = vmatmul.mubr.msk.f32.gmra.mrb[48].mxu0 %vm767_vm15, %v11295_v24 }
 0x69e   : > { %15504 = vmatprep.mubr.msk.f32.mxu0 %vm767_vm15, %v11296_v39 }
 0x6a1   : > { %15505 = vmatmul.mubr.msk.f32.gmra.mrb[50].mxu0 %vm767_vm15, %v11297_v4 }
 0x6a2   : > { %15507 = vmatprep.mubr.msk.f32.mxu0 %vm767_vm15, %v11298_v58 }
 0x6a5   : > { %15508 = vmatmul.mubr.msk.f32.gmra.mrb[52].mxu0 %vm767_vm15, %v11299_v21 }
 0x6a6   : > { %15510 = vmatprep.mubr.msk.f32.mxu0 %vm767_vm15, %v11300_v5 }
 0x6a9   : > { %15511 = vmatmul.mubr.msk.f32.gmra.mrb[54].mxu0 %vm767_vm15, %v11301_v13 }
 0x6aa   : > { %15513 = vmatprep.mubr.msk.f32.mxu0 %vm767_vm15, %v11302_v31 }
 0x6ad   : > { %15514 = vmatmul.mubr.msk.f32.gmra.mrb[56].mxu0 %vm767_vm15, %v11303_v28 }
 0x6ae   : > { %15516 = vmatprep.mubr.msk.f32.mxu0 %vm767_vm15, %v11304_v3 }
 0x6b1   : > { %15517 = vmatmul.mubr.msk.f32.gmra.mrb[58].mxu0 %vm767_vm15, %v11305_v56 }
 0x6b2   : > { %15519 = vmatprep.mubr.msk.f32.mxu0 %vm767_vm15, %v19631_v29  ;;  %v11703_v29 = vsel %vm21211_vm13, %v19318_v43, 0.0 }
 0x6b5   : > { %15520 = vmatmul.mubr.msk.f32.gmra.mrb[60].mxu0 %vm767_vm15, %v19635_v55  ;;  %v11705_v55 = vsel %vm21214_vm12, %v19328_v47, 0.0  ;;  %v21276_v47 = vld [vmem:[#allocation22_spill] sm:$0xff]  ;;  %vm21280_vm12 = vnez %v21279_v27 }
 0x6b6   : > { %15522 = vmatprep.mubr.msk.f32.mxu0 %vm767_vm15, %v11308_v36  ;;  %v11713_v20 = vsel %vm21280_vm12, %v19368_v45, 0.0  ;;  %v21286_v45 = vld [vmem:[#allocation24_spill] sm:$0xff] }
 0x6b9   : > { %15523 = vmatmul.mubr.msk.f32.gmra.mrb[62].mxu0 %vm767_vm15, %v11309_v62 }
 0x6ba   : > { %15533 = vmatprep.mubr.msk.f32.mxu0 %vm767_vm15, %v19305_v22 }
 0x6bd   : > { %15534 = vmatmul.mubr.msk.f32.vlgmr.msra.gmra.mrb[32].mxu0 %vm767_vm15, %v11701_v44 }
 0x6be   : > { %15536 = vmatprep.mubr.msk.f32.mxu0 %vm767_vm15, %v21212_v25  ;;  %v11707_v25 = vsel %vm21140_vm14, %v19338_v46, 0.0  ;;  %v21278_v46 = vld [vmem:[#allocation59_spill] sm:$0xff] }
 0x6c1   : > { %15537 = vmatmul.mubr.msk.f32.gmra.mrb[34].mxu0 %vm767_vm15, %v11703_v29 }
 0x6c2   : > { %15539 = vmatprep.mubr.msk.f32.mxu0 %vm767_vm15, %v21215_v14  ;;  %v11709_v14 = vsel %vm21142_vm10, %v19348_v40, 0.0  ;;  %v21281_v40 = vld [vmem:[#allocation61_spill] sm:$0xff]  ;;  %vm21283_vm10 = vnez %v21282_v7 }
 0x6c3   : > { %v11715_v60 = vsel %vm21283_vm10, %v19378_v49, 0.0  ;;  %v21288_v49 = vld [vmem:[#allocation67_spill] sm:$0xff] }
 0x6c4   : > { %v11721_v1 = vsel %vm21232_vm5, %v21288_v49, 0.0  ;;  %vm21299_vm5 = vnez %v21298_v34 }
 0x6c5   : > { %15540 = vmatmul.mubr.msk.f32.gmra.mrb[36].mxu0 %vm767_vm15, %v11705_v55 }
 0x6c6   : > { %15542 = vmatprep.mubr.msk.f32.mxu0 %vm767_vm15, %v21272_v63 }
 0x6c9   : > { %15543 = vmatmul.mubr.msk.f32.gmra.mrb[38].mxu0 %vm767_vm15, %v11707_v25 }
 0x6ca   : > { %15545 = vmatprep.mubr.msk.f32.mxu0 %vm767_vm15, %v21274_v9 }
 0x6cd   : > { %15546 = vmatmul.mubr.msk.f32.gmra.mrb[40].mxu0 %vm767_vm15, %v11709_v14 }
 0x6ce   : > { %15548 = vmatprep.mubr.msk.f32.mxu0 %vm767_vm15, %v21276_v47 }
 0x6d1   : > { %15549 = vmatmul.mubr.msk.f32.gmra.mrb[42].mxu0 %vm767_vm15, %v11711_v41 }
 0x6d2   : > { %15551 = vmatprep.mubr.msk.f32.mxu0 %vm767_vm15, %v21278_v46 }
 0x6d5   : > { %15552 = vmatmul.mubr.msk.f32.gmra.mrb[44].mxu0 %vm767_vm15, %v11713_v20 }
 0x6d6   : > { %15554 = vmatprep.mubr.msk.f32.mxu0 %vm767_vm15, %v21281_v40 }
 0x6d9   : > { %15555 = vmatmul.mubr.msk.f32.gmra.mrb[46].mxu0 %vm767_vm15, %v11715_v60 }
 0x6da   : > { %15557 = vmatprep.mubr.msk.f32.mxu0 %vm767_vm15, %v21284_v30 }
 0x6dd   : > { %15558 = vmatmul.mubr.msk.f32.gmra.mrb[48].mxu0 %vm767_vm15, %v11717_v54 }
 0x6de   : > { %15560 = vmatprep.mubr.msk.f32.mxu0 %vm767_vm15, %v21286_v45 }
 0x6e1   : > { %15561 = vmatmul.mubr.msk.f32.gmra.mrb[50].mxu0 %vm767_vm15, %v11719_v19 }
 0x6e2   : > { %15563 = vmatprep.mubr.msk.f32.mxu0 %vm767_vm15, %v21233_v11  ;;  %v11725_v11 = vsel %vm21153_vm9, %v19428_v52, 0.0  ;;  %v11729_v52 = vsel %vm21299_vm5, %v21297_v53, 0.0  ;;  %vm21301_vm9 = vnez %v21300_v16 }
 0x6e5   : > { %15564 = vmatmul.mubr.msk.f32.gmra.mrb[52].mxu0 %vm767_vm15, %v11721_v1 }
 0x6e6   : > { %15566 = vmatprep.mubr.msk.f32.mxu0 %vm767_vm15, %v21290_v26 }
 0x6e9   : > { %15567 = vmatmul.mubr.msk.f32.gmra.mrb[54].mxu0 %vm767_vm15, %v11723_v32 }
 0x6ea   : > { %15569 = vmatprep.mubr.msk.f32.mxu0 %vm767_vm15, %v19426_v57  ;;  %v11699_v57 = vld [vmem:[#allocation4 + $0x121] sm:$0xff] }
 0x6eb   : > { %v11731_v59 = vsel %vm21301_vm9, %v11699_v57, 0.0 }
 0x6ed   : > { %15570 = vmatmul.mubr.msk.f32.gmra.mrb[56].mxu0 %vm767_vm15, %v11725_v11 }
 0x6ee   : > { %15572 = vmatprep.mubr.msk.f32.mxu0 %vm767_vm15, %v21293_v42 }
 0x6f1   : > { %15573 = vmatmul.mubr.msk.f32.gmra.mrb[58].mxu0 %vm767_vm15, %v11727_v15 }
 0x6f2   : > { %15575 = vmatprep.mubr.msk.f32.mxu0 %vm767_vm15, %v21296_v48 }
 0x6f5   : > { %15576 = vmatmul.mubr.msk.f32.gmra.mrb[60].mxu0 %vm767_vm15, %v11729_v52 }
 0x6f6   : > { %15578 = vmatprep.mubr.msk.f32.mxu0 %vm767_vm15, %v11698_v17 }
 0x6f9   : > { %15579 = vmatmul.mubr.msk.f32.gmra.mrb[62].mxu0 %vm767_vm15, %v11731_v59 }
 0x790   : > { %v15535_v18 = vpop.f32.mrb[32].mxu0 }
 0x791   : > { %v12098_v23 = vadd.f32 %v15535_v18, %v19994_v12  ;;  %v11899_v6 = vpop.f32.mrb[33].mxu0 }
 0x792   : > { %v12097_v51 = vadd.f32 %v19994_v12, %v11899_v6 }
 0x793   : > { %12131 = vst.msk [vmem:[%s20001_s20 + $0x8] sm:$0xff] %vm12129_vm7, %v12098_v23 }
 0x794   : > { %12130 = vst.msk [vmem:[%s20001_s20] sm:$0xff] %vm12129_vm7, %v12097_v51  ;;  %v15538_v38 = vpop.f32.mrb[34].mxu0 }
 0x795   : > { %v12100_v50 = vadd.f32 %v15538_v38, %v19994_v12  ;;  %v11909_v24 = vpop.f32.mrb[35].mxu0 }
 0x796   : > { %v12099_v39 = vadd.f32 %v19994_v12, %v11909_v24 }
 0x797   : > { %12133 = vst.msk [vmem:[%s20001_s20 + $0x18] sm:$0xff] %vm12129_vm7, %v12100_v50 }
 0x798   : > { %12132 = vst.msk [vmem:[%s20001_s20 + $0x10] sm:$0xff] %vm12129_vm7, %v12099_v39  ;;  %v15541_v4 = vpop.f32.mrb[36].mxu0 }
 0x799   : > { %v12102_v58 = vadd.f32 %v15541_v4, %v19994_v12  ;;  %v11919_v21 = vpop.f32.mrb[37].mxu0 }
 0x79a   : > { %v12101_v5 = vadd.f32 %v19994_v12, %v11919_v21 }
 0x79b   : > { %12135 = vst.msk [vmem:[%s20001_s20 + $0x28] sm:$0xff] %vm12129_vm7, %v12102_v58 }
 0x79c   : > { %12134 = vst.msk [vmem:[%s20001_s20 + $0x20] sm:$0xff] %vm12129_vm7, %v12101_v5  ;;  %v15544_v13 = vpop.f32.mrb[38].mxu0 }
 0x79d   : > { %v12104_v31 = vadd.f32 %v15544_v13, %v19994_v12  ;;  %v11929_v28 = vpop.f32.mrb[39].mxu0 }
 0x79e   : > { %v12103_v3 = vadd.f32 %v19994_v12, %v11929_v28 }
 0x79f   : > { %12137 = vst.msk [vmem:[%s20001_s20 + $0x38] sm:$0xff] %vm12129_vm7, %v12104_v31 }
 0x7a0   : > { %12136 = vst.msk [vmem:[%s20001_s20 + $0x30] sm:$0xff] %vm12129_vm7, %v12103_v3  ;;  %v15547_v56 = vpop.f32.mrb[40].mxu0 }
 0x7a1   : > { %v12106_v36 = vadd.f32 %v15547_v56, %v19994_v12  ;;  %v11939_v62 = vpop.f32.mrb[41].mxu0 }
 0x7a2   : > { %v12105_v44 = vadd.f32 %v19994_v12, %v11939_v62 }
 0x7a3   : > { %12139 = vst.msk [vmem:[%s20001_s20 + $0x48] sm:$0xff] %vm12129_vm7, %v12106_v36 }
 0x7a4   : > { %12138 = vst.msk [vmem:[%s20001_s20 + $0x40] sm:$0xff] %vm12129_vm7, %v12105_v44  ;;  %v15550_v29 = vpop.f32.mrb[42].mxu0 }
 0x7a5   : > { %v12108_v22 = vadd.f32 %v15550_v29, %v19994_v12  ;;  %v11949_v55 = vpop.f32.mrb[43].mxu0 }
 0x7a6   : > { %v12107_v63 = vadd.f32 %v19994_v12, %v11949_v55 }
 0x7a7   : > { %12141 = vst.msk [vmem:[%s20001_s20 + $0x58] sm:$0xff] %vm12129_vm7, %v12108_v22 }
 0x7a8   : > { %12140 = vst.msk [vmem:[%s20001_s20 + $0x50] sm:$0xff] %vm12129_vm7, %v12107_v63  ;;  %v15553_v10 = vpop.f32.mrb[44].mxu0 }
 0x7a9   : > { %v12110_v25 = vadd.f32 %v15553_v10, %v19994_v12  ;;  %v11959_v9 = vpop.f32.mrb[45].mxu0 }
 0x7aa   : > { %v12109_v43 = vadd.f32 %v19994_v12, %v11959_v9 }
 0x7ab   : > { %12143 = vst.msk [vmem:[%s20001_s20 + $0x68] sm:$0xff] %vm12129_vm7, %v12110_v25 }
 0x7ac   : > { %12142 = vst.msk [vmem:[%s20001_s20 + $0x60] sm:$0xff] %vm12129_vm7, %v12109_v43  ;;  %v15556_v14 = vpop.f32.mrb[46].mxu0 }
 0x7ad   : > { %v12112_v47 = vadd.f32 %v15556_v14, %v19994_v12  ;;  %v11969_v37 = vpop.f32.mrb[47].mxu0 }
 0x7ae   : > { %v12111_v41 = vadd.f32 %v19994_v12, %v11969_v37 }
 0x7af   : > { %12145 = vst.msk [vmem:[%s20001_s20 + $0x78] sm:$0xff] %vm12129_vm7, %v12112_v47 }
 0x7b0   : > { %12144 = vst.msk [vmem:[%s20001_s20 + $0x70] sm:$0xff] %vm12129_vm7, %v12111_v41  ;;  %v15559_v46 = vpop.f32.mrb[48].mxu0 }
 0x7b1   : > { %v12114_v27 = vadd.f32 %v15559_v46, %v19994_v12  ;;  %v11979_v20 = vpop.f32.mrb[49].mxu0 }
 0x7b2   : > { %v12113_v40 = vadd.f32 %v19994_v12, %v11979_v20 }
 0x7b3   : > { %12147 = vst.msk [vmem:[%s20001_s20 + $0x88] sm:$0xff] %vm12129_vm7, %v12114_v27 }
 0x7b4   : > { %12146 = vst.msk [vmem:[%s20001_s20 + $0x80] sm:$0xff] %vm12129_vm7, %v12113_v40  ;;  %v15562_v7 = vpop.f32.mrb[50].mxu0 }
 0x7b5   : > { %v12116_v60 = vadd.f32 %v15562_v7, %v19994_v12  ;;  %v11989_v30 = vpop.f32.mrb[51].mxu0 }
 0x7b6   : > { %v12115_v0 = vadd.f32 %v19994_v12, %v11989_v30 }
 0x7b7   : > { %12149 = vst.msk [vmem:[%s20001_s20 + $0x98] sm:$0xff] %vm12129_vm7, %v12116_v60 }
 0x7b8   : > { %12148 = vst.msk [vmem:[%s20001_s20 + $0x90] sm:$0xff] %vm12129_vm7, %v12115_v0  ;;  %v15565_v54 = vpop.f32.mrb[52].mxu0 }
 0x7b9   : > { %v12118_v45 = vadd.f32 %v15565_v54, %v19994_v12  ;;  %v11999_v8 = vpop.f32.mrb[53].mxu0 }
 0x7ba   : > { %v12117_v19 = vadd.f32 %v19994_v12, %v11999_v8 }
 0x7bb   : > { %12151 = vst.msk [vmem:[%s20001_s20 + $0xa8] sm:$0xff] %vm12129_vm7, %v12118_v45 }
 0x7bc   : > { %12150 = vst.msk [vmem:[%s20001_s20 + $0xa0] sm:$0xff] %vm12129_vm7, %v12117_v19  ;;  %v15568_v49 = vpop.f32.mrb[54].mxu0 }
 0x7bd   : > { %v12120_v2 = vadd.f32 %v15568_v49, %v19994_v12  ;;  %v12009_v1 = vpop.f32.mrb[55].mxu0 }
 0x7be   : > { %v12119_v26 = vadd.f32 %v19994_v12, %v12009_v1 }
 0x7bf   : > { %12153 = vst.msk [vmem:[%s20001_s20 + $0xb8] sm:$0xff] %vm12129_vm7, %v12120_v2 }
 0x7c0   : > { %12152 = vst.msk [vmem:[%s20001_s20 + $0xb0] sm:$0xff] %vm12129_vm7, %v12119_v26  ;;  %v15571_v35 = vpop.f32.mrb[56].mxu0 }
 0x7c1   : > { %v12122_v32 = vadd.f32 %v15571_v35, %v19994_v12  ;;  %v12019_v33 = vpop.f32.mrb[57].mxu0 }
 0x7c2   : > { %v12121_v11 = vadd.f32 %v19994_v12, %v12019_v33 }
 0x7c3   : > { %12155 = vst.msk [vmem:[%s20001_s20 + $0xc8] sm:$0xff] %vm12129_vm7, %v12122_v32 }
 0x7c4   : > { %12154 = vst.msk [vmem:[%s20001_s20 + $0xc0] sm:$0xff] %vm12129_vm7, %v12121_v11  ;;  %v15574_v42 = vpop.f32.mrb[58].mxu0 }
 0x7c5   : > { %v12124_v61 = vadd.f32 %v15574_v42, %v19994_v12  ;;  %v12029_v15 = vpop.f32.mrb[59].mxu0 }
 0x7c6   : > { %v12123_v48 = vadd.f32 %v19994_v12, %v12029_v15 }
 0x7c7   : > { %12157 = vst.msk [vmem:[%s20001_s20 + $0xd8] sm:$0xff] %vm12129_vm7, %v12124_v61 }
 0x7c8   : > { %12156 = vst.msk [vmem:[%s20001_s20 + $0xd0] sm:$0xff] %vm12129_vm7, %v12123_v48  ;;  %v15577_v17 = vpop.f32.mrb[60].mxu0 }
 0x7c9   : > { %v12126_v57 = vadd.f32 %v15577_v17, %v19994_v12  ;;  %v12039_v53 = vpop.f32.mrb[61].mxu0 }
 0x7ca   : > { %v12125_v34 = vadd.f32 %v19994_v12, %v12039_v53 }
 0x7cb   : > { %12159 = vst.msk [vmem:[%s20001_s20 + $0xe8] sm:$0xff] %vm12129_vm7, %v12126_v57 }
 0x7cc   : > { %12158 = vst.msk [vmem:[%s20001_s20 + $0xe0] sm:$0xff] %vm12129_vm7, %v12125_v34  ;;  %v15580_v52 = vpop.f32.mrb[62].mxu0 }
 0x7cd   : > { %v12128_v16 = vadd.f32 %v15580_v52, %v19994_v12  ;;  %v12049_v59 = vpop.f32.mrb[63].mxu0 }
 0x7ce   : > { %v12127_v18 = vadd.f32 %v19994_v12, %v12049_v59 }
 0x7cf   : > { %12161 = vst.msk [vmem:[%s20001_s20 + $0xf8] sm:$0xff] %vm12129_vm7, %v12128_v16 }
 0x7d0   : > { %12160 = vst.msk [vmem:[%s20001_s20 + $0xf0] sm:$0xff] %vm12129_vm7, %v12127_v18 }
 0x7d1 PF: > { %s17_s24 = sadd.s32 1, %s16511_s24  }
 0x7d2   : > { %p14_p4 = scmp.ge.s32.totalorder %s17_s24, 4  }
 0x7d4   :  { %16 = sbr.rel (!%p14_p4) target bundleno = 1 (0x1), region = 102 }

</bundles_post_ra>
